<compile_context>
chip_gen: v7x
topology: tpu7x:2x2x1
jax: 0.10.0
libtpu: 0.0.40
codegen_flags: <defaults>
</compile_context>

<pallas_src>
import functools

import numpy as np

import jax
import jax.numpy as jnp
from jax.experimental import pallas as pl
from jax.experimental.pallas import tpu as pltpu


# Samples per grid step (lane batch).  32 fills the 256-wide MXU of v6e/v7x;
# use 16 on v5e.  prepare_params() and lenet_forward() stay consistent because
# the forward pass re-derives BT from the prepared selector shapes.
BT = 32


# --------------------------------------------------------------------------- #
# Pallas kernel
# --------------------------------------------------------------------------- #

def _maxpool_2x2(y, rp, cp):
    """2x2 / stride-2 max pool of a (C*H, W*BT) lane-interleaved slab.

    `rp` (R, R): rp @ y stacks even rows on top of odd rows (rows pair within a
    channel because every per-channel row block has even height).  `cp`
    (C_in, C_in) = kron(pair_select, I_BT): y @ cp stacks even-ow lane blocks
    left of odd-ow lane blocks.  Selection-by-0/1-matmul keeps everything on
    the (otherwise idle) MXU; the follow-up slices are 8-sublane / 128-lane
    aligned.  Both selector matmuls run in exact f32.
    """
    r, c = y.shape
    z = jnp.dot(rp, y, preferred_element_type=jnp.float32)        # (r, c)
    z = jnp.maximum(z[: r // 2, :], z[r // 2:, :])                 # (r/2, c)
    z = jnp.dot(z, cp, preferred_element_type=jnp.float32)        # (r/2, c)
    return jnp.maximum(z[:, : c // 2], z[:, c // 2:])              # (r/2, c/2)


def _lenet_kernel(x_ref,
                  m1_ref, b1_ref, rp1_ref, cp1_ref,
                  m2_ref, b2_ref, rp2_ref, cp2_ref,
                  gfc1_ref, bfc1_ref, wfc2_ref, bfc2_ref, wfc3_ref, bfc3_ref,
                  out_ref, *, bt):
    f32, bf16 = jnp.float32, jnp.bfloat16
    img = x_ref[0]                                   # (32, 28*bt); rows 28..31 are zero pad

    # ---- conv1 (1 -> 6, 5x5) + ReLU --------------------------------------- #
    # One lane slice per kw (5 total), sublane-aligned concat (32-row blocks),
    # then a single MXU matmul with the host-built band matrix m1:
    #   m1[c*24+oh, kw*32+ih] = w1[c, ih-oh, kw]   (0 <= ih-oh <= 4)
    # bf16 operands, f32 accumulation.
    t1 = jnp.concatenate([img[:, kw * bt:(kw + 24) * bt] for kw in range(5)],
                         axis=0)                                   # (160, 24*bt)
    y1 = jnp.dot(m1_ref[...], t1.astype(bf16),
                 preferred_element_type=f32) + b1_ref[...]
    y1 = jnp.maximum(y1, 0.0)                                      # (144, 24*bt)

    # ---- maxpool 2x2 ------------------------------------------------------ #
    p1 = _maxpool_2x2(y1, rp1_ref[...], cp1_ref[...])              # (72, 12*bt)

    # ---- conv2 (6 -> 16, 5x5) + ReLU -------------------------------------- #
    #   m2[co*8+oh, kw*72 + ci*12 + ih] = w2[co, ci, ih-oh, kw]
    t2 = jnp.concatenate([p1[:, kw * bt:(kw + 8) * bt] for kw in range(5)],
                         axis=0)                                   # (360, 8*bt)
    y2 = jnp.dot(m2_ref[...], t2.astype(bf16),
                 preferred_element_type=f32) + b2_ref[...]
    y2 = jnp.maximum(y2, 0.0)                                      # (128, 8*bt)

    # ---- maxpool 2x2 ------------------------------------------------------ #
    p2 = _maxpool_2x2(y2, rp2_ref[...], cp2_ref[...])              # (64, 4*bt)

    # ---- flatten (torch NCHW order folded into gfc1) + fc stack ----------- #
    feat = jnp.concatenate([p2[:, w * bt:(w + 1) * bt] for w in range(4)],
                           axis=0)                                 # (256, bt)
    h = jnp.dot(gfc1_ref[...], feat.astype(bf16),
                preferred_element_type=f32) + bfc1_ref[...]
    h = jnp.maximum(h, 0.0)                                        # (120, bt)
    h = jnp.dot(wfc2_ref[...], h.astype(bf16),
                preferred_element_type=f32) + bfc2_ref[...]
    h = jnp.maximum(h, 0.0)                                        # (84, bt)
    out_ref[0] = jnp.dot(wfc3_ref[...], h.astype(bf16),
                         preferred_element_type=f32) + bfc3_ref[...]   # (10, bt)


# --------------------------------------------------------------------------- #
# One-time host-side parameter preparation (all reshapes/transposes/expansions)
# --------------------------------------------------------------------------- #

def _pair_select(n):
    """(n, n) 0/1 matrix: x @ m -> first n/2 cols = even cols of x, rest = odd."""
    m = np.zeros((n, n), np.float32)
    h = n // 2
    m[2 * np.arange(h), np.arange(h)] = 1.0
    m[2 * np.arange(h) + 1, h + np.arange(h)] = 1.0
    return m


def _conv1_matrix(conv1_w):
    """(144, 160) band matrix: y1 = m1 @ concat_kw(img_pad[:, kw-shifted])."""
    w = np.asarray(conv1_w, np.float32).reshape(6, 5, 5)           # [c, kh, kw]
    m = np.zeros((6 * 24, 5 * 32), np.float32)
    for c in range(6):
        for oh in range(24):
            for kh in range(5):
                for kw in range(5):
                    m[c * 24 + oh, kw * 32 + oh + kh] = w[c, kh, kw]
    return m


def _conv2_matrix(conv2_w):
    """(128, 360) band matrix: y2 = m2 @ concat_kw(p1[:, kw-shifted])."""
    w = np.asarray(conv2_w, np.float32)                            # [co, ci, kh, kw]
    m = np.zeros((16 * 8, 5 * 72), np.float32)
    for co in range(16):
        for oh in range(8):
            for ci in range(6):
                for kh in range(5):
                    for kw in range(5):
                        m[co * 8 + oh, kw * 72 + ci * 12 + oh + kh] = w[co, ci, kh, kw]
    return m


def prepare_params(params, bt=BT):
    eye_bt = np.eye(bt, dtype=np.float32)

    m1 = _conv1_matrix(params["conv1_w"])
    m2 = _conv2_matrix(params["conv2_w"])

    # fc1 consumes torch.flatten of (16,4,4): feature = co*16 + h*4 + w.  The
    # kernel builds features as concat_w(p2 lane block w) with p2 rows = co*4+h,
    # so regroup fc1's weight columns to w*64 + co*4 + h.
    wf1 = np.asarray(params["fc1_w"], np.float32).reshape(120, 16, 4, 4)
    gfc1 = np.concatenate([wf1[:, :, :, w].reshape(120, 64) for w in range(4)],
                          axis=1)                                  # (120, 256)

    return {
        # bf16 MXU operands (f32 accumulation happens in-kernel).
        "m1":   jnp.asarray(m1, jnp.bfloat16),
        "m2":   jnp.asarray(m2, jnp.bfloat16),
        "gfc1": jnp.asarray(gfc1, jnp.bfloat16),
        "wfc2": jnp.asarray(params["fc2_w"], jnp.bfloat16),
        "wfc3": jnp.asarray(params["fc3_w"], jnp.bfloat16),
        # Exact f32 0/1 pooling selectors (row pair-select; lane-block pair-
        # select = kron(pair_select, I_bt) because samples interleave lanes).
        "rp1": jnp.asarray(_pair_select(144).T),
        "cp1": jnp.asarray(np.kron(_pair_select(24), eye_bt)),     # (24*bt, 24*bt)
        "rp2": jnp.asarray(_pair_select(128).T),
        "cp2": jnp.asarray(np.kron(_pair_select(8), eye_bt)),      # (8*bt, 8*bt)
        # Biases stay f32.
        "b1":   jnp.asarray(np.repeat(np.asarray(params["conv1_b"], np.float32), 24)
                            .reshape(144, 1)),
        "b2":   jnp.asarray(np.repeat(np.asarray(params["conv2_b"], np.float32), 8)
                            .reshape(128, 1)),
        "bfc1": jnp.asarray(params["fc1_b"], jnp.float32).reshape(120, 1),
        "bfc2": jnp.asarray(params["fc2_b"], jnp.float32).reshape(84, 1),
        "bfc3": jnp.asarray(params["fc3_b"], jnp.float32).reshape(10, 1),
    }


# --------------------------------------------------------------------------- #
# Forward wrapper: single fused pallas_call, grid over groups of BT samples
# --------------------------------------------------------------------------- #

def lenet_forward(prep, x):
    """x: (B, 1, 28, 28) f32 -> logits (B, 10) f32."""
    bt = prep["cp2"].shape[0] // 8          # lane batch used when prep was built
    B = x.shape[0]
    G = -(-B // bt)
    Bpad = G * bt

    # Layout plumbing (wrapper-side, XLA): interleave samples along lanes
    # (col = iw*bt + b) and zero-pad rows 28 -> 32 so in-kernel concats are
    # sublane-aligned.
    x2 = x.reshape(B, 28, 28)
    if Bpad != B:
        x2 = jnp.pad(x2, ((0, Bpad - B), (0, 0), (0, 0)))
    xs = x2.reshape(G, bt, 28, 28).transpose(0, 2, 3, 1).reshape(G, 28, 28 * bt)
    xs = jnp.pad(xs, ((0, 0), (0, 4), (0, 0)))                     # (G, 32, 28*bt)

    consts = (prep["m1"], prep["b1"], prep["rp1"], prep["cp1"],
              prep["m2"], prep["b2"], prep["rp2"], prep["cp2"],
              prep["gfc1"], prep["bfc1"], prep["wfc2"], prep["bfc2"],
              prep["wfc3"], prep["bfc3"])

    in_specs = [pl.BlockSpec((1, 32, 28 * bt), lambda g: (g, 0, 0))]
    # Constant index maps -> fetched once, stay VMEM-resident across the grid.
    in_specs += [pl.BlockSpec(c.shape, lambda g: (0, 0)) for c in consts]

    out = pl.pallas_call(
        functools.partial(_lenet_kernel, bt=bt),
        out_shape=jax.ShapeDtypeStruct((G, 10, bt), jnp.float32),
        grid=(G,),
        in_specs=in_specs,
        out_specs=pl.BlockSpec((1, 10, bt), lambda g: (g, 0, 0)),
        compiler_params=pltpu.CompilerParams(
            dimension_semantics=("parallel",)),    # batch groups split across cores
    )(xs, *consts)

    # (G, 10, bt) -> (Bpad, 10) -> (B, 10): wrapper-side layout plumbing.
    return out.transpose(0, 2, 1).reshape(Bpad, 10)[:B]


# --------------------------------------------------------------------------- #
# Pure-JAX reference of the PyTorch module (self-check) and param init
# --------------------------------------------------------------------------- #

def init_params(key):
    ks = jax.random.split(key, 10)
    n = lambda k, shape, s: jax.random.normal(k, shape, jnp.float32) * s
    return {
        "conv1_w": n(ks[0], (6, 1, 5, 5), 0.20),   # nn.Conv2d(1, 6, 5)
        "conv1_b": n(ks[1], (6,), 0.10),
        "conv2_w": n(ks[2], (16, 6, 5, 5), 0.08),  # nn.Conv2d(6, 16, 5)
        "conv2_b": n(ks[3], (16,), 0.10),
        "fc1_w":   n(ks[4], (120, 256), 0.06),     # nn.Linear(4*4*16, 120)
        "fc1_b":   n(ks[5], (120,), 0.10),
        "fc2_w":   n(ks[6], (84, 120), 0.09),      # nn.Linear(120, 84)
        "fc2_b":   n(ks[7], (84,), 0.10),
        "fc3_w":   n(ks[8], (10, 84), 0.10),       # nn.Linear(84, 10)
        "fc3_b":   n(ks[9], (10,), 0.10),
    }


def forward_reference(params, x):
    dn = ("NCHW", "OIHW", "NCHW")
    hi = jax.lax.Precision.HIGHEST
    y = jax.lax.conv_general_dilated(x, params["conv1_w"], (1, 1), "VALID",
                                     dimension_numbers=dn, precision=hi)
    y = jax.nn.relu(y + params["conv1_b"][None, :, None, None])
    y = jax.lax.reduce_window(y, -jnp.inf, jax.lax.max,
                              (1, 1, 2, 2), (1, 1, 2, 2), "VALID")
    y = jax.lax.conv_general_dilated(y, params["conv2_w"], (1, 1), "VALID",
                                     dimension_numbers=dn, precision=hi)
    y = jax.nn.relu(y + params["conv2_b"][None, :, None, None])
    y = jax.lax.reduce_window(y, -jnp.inf, jax.lax.max,
                              (1, 1, 2, 2), (1, 1, 2, 2), "VALID")
    f = y.reshape(y.shape[0], -1)                              # torch.flatten(x, 1)
    f = jax.nn.relu(jnp.dot(f, params["fc1_w"].T, precision=hi) + params["fc1_b"])
    f = jax.nn.relu(jnp.dot(f, params["fc2_w"].T, precision=hi) + params["fc2_b"])
    return jnp.dot(f, params["fc3_w"].T, precision=hi) + params["fc3_b"]


if __name__ == "__main__":
    key = jax.random.PRNGKey(0)
    kx, kp = jax.random.split(key)
    # 28x28 spatial size is required by fc1's 4*4*16 input.  Batch 40 is small
    # but exercises batch padding (-> 64) and a 2-step grid.
    B = 40
    x = jax.random.normal(kx, (B, 1, 28, 28), jnp.float32)
    params = init_params(kp)

    prep = prepare_params(params)                  # one-time weight preparation
    logits = jax.jit(lenet_forward)(prep, x)
    jax.block_until_ready(logits)
    assert logits.shape == (B, 10) and logits.dtype == jnp.float32

    # Numerical check against the pure-XLA (f32, HIGHEST-precision) replica of
    # the PyTorch module.  The bf16 conv/fc MXU operands bound the error to a
    # ~1-2% of max|logit| (the pooling/selection path is exact f32); an all-f32
    # operand variant of this kernel matches to ~1e-5.
    ref = jax.jit(forward_reference)(params, x)
    err = float(jnp.max(jnp.abs(logits - ref)) / (jnp.max(jnp.abs(ref)) + 1e-6))
    assert err < 5e-2, f"kernel/reference mismatch: rel err {err}"

    print("KERNEL_OK")
</pallas_src>

<mosaic_0001>
module attributes {stable_mosaic.version = 11 : i64} {
  func.func @_lenet_kernel(%arg0: i32, %arg1: memref<1x32x896xf32, #tpu.memory_space<vmem>>, %arg2: memref<144x160xbf16, #tpu.memory_space<vmem>>, %arg3: memref<144x1xf32, #tpu.memory_space<vmem>>, %arg4: memref<144x144xf32, #tpu.memory_space<vmem>>, %arg5: memref<768x768xf32, #tpu.memory_space<vmem>>, %arg6: memref<128x360xbf16, #tpu.memory_space<vmem>>, %arg7: memref<128x1xf32, #tpu.memory_space<vmem>>, %arg8: memref<128x128xf32, #tpu.memory_space<vmem>>, %arg9: memref<256x256xf32, #tpu.memory_space<vmem>>, %arg10: memref<120x256xbf16, #tpu.memory_space<vmem>>, %arg11: memref<120x1xf32, #tpu.memory_space<vmem>>, %arg12: memref<84x120xbf16, #tpu.memory_space<vmem>>, %arg13: memref<84x1xf32, #tpu.memory_space<vmem>>, %arg14: memref<10x84xbf16, #tpu.memory_space<vmem>>, %arg15: memref<10x1xf32, #tpu.memory_space<vmem>>, %arg16: memref<1x10x32xf32, #tpu.memory_space<vmem>>) attributes {dimension_semantics = [#tpu.dimension_semantics<parallel>], iteration_bounds = array<i64: 2>, scalar_prefetch = 0 : i64, scratch_operands = 0 : i64, tpu.core_type = #tpu.core_type<tc>, window_params = [{transform_indices = @transform_0, window_bounds = array<i64: 1, 32, 896>}, {pipeline_mode = #tpu.pipeline_mode<synchronous>, transform_indices = @transform_1, window_bounds = array<i64: 144, 160>}, {pipeline_mode = #tpu.pipeline_mode<synchronous>, transform_indices = @transform_2, window_bounds = array<i64: 144, 1>}, {pipeline_mode = #tpu.pipeline_mode<synchronous>, transform_indices = @transform_3, window_bounds = array<i64: 144, 144>}, {pipeline_mode = #tpu.pipeline_mode<synchronous>, transform_indices = @transform_4, window_bounds = array<i64: 768, 768>}, {pipeline_mode = #tpu.pipeline_mode<synchronous>, transform_indices = @transform_5, window_bounds = array<i64: 128, 360>}, {pipeline_mode = #tpu.pipeline_mode<synchronous>, transform_indices = @transform_6, window_bounds = array<i64: 128, 1>}, {pipeline_mode = #tpu.pipeline_mode<synchronous>, transform_indices = @transform_7, window_bounds = array<i64: 128, 128>}, {pipeline_mode = #tpu.pipeline_mode<synchronous>, transform_indices = @transform_8, window_bounds = array<i64: 256, 256>}, {pipeline_mode = #tpu.pipeline_mode<synchronous>, transform_indices = @transform_9, window_bounds = array<i64: 120, 256>}, {pipeline_mode = #tpu.pipeline_mode<synchronous>, transform_indices = @transform_10, window_bounds = array<i64: 120, 1>}, {pipeline_mode = #tpu.pipeline_mode<synchronous>, transform_indices = @transform_11, window_bounds = array<i64: 84, 120>}, {pipeline_mode = #tpu.pipeline_mode<synchronous>, transform_indices = @transform_12, window_bounds = array<i64: 84, 1>}, {pipeline_mode = #tpu.pipeline_mode<synchronous>, transform_indices = @transform_13, window_bounds = array<i64: 10, 84>}, {pipeline_mode = #tpu.pipeline_mode<synchronous>, transform_indices = @transform_14, window_bounds = array<i64: 10, 1>}, {transform_indices = @transform_15, window_bounds = array<i64: 1, 10, 32>}]} {
    %c0 = arith.constant 0 : index
    %c0_0 = arith.constant 0 : index
    %c0_1 = arith.constant 0 : index
    %0 = vector.load %arg1[%c0, %c0_0, %c0_1] : memref<1x32x896xf32, #tpu.memory_space<vmem>>, vector<1x32x896xf32>
    %1 = vector.shape_cast %0 : vector<1x32x896xf32> to vector<32x896xf32>
    %2 = vector.extract_strided_slice %1 {offsets = [0, 0], sizes = [32, 768], strides = [1, 1]} : vector<32x896xf32> to vector<32x768xf32>
    %3 = vector.extract_strided_slice %1 {offsets = [0, 32], sizes = [32, 768], strides = [1, 1]} : vector<32x896xf32> to vector<32x768xf32>
    %4 = vector.extract_strided_slice %1 {offsets = [0, 64], sizes = [32, 768], strides = [1, 1]} : vector<32x896xf32> to vector<32x768xf32>
    %5 = vector.extract_strided_slice %1 {offsets = [0, 96], sizes = [32, 768], strides = [1, 1]} : vector<32x896xf32> to vector<32x768xf32>
    %6 = vector.extract_strided_slice %1 {offsets = [0, 128], sizes = [32, 768], strides = [1, 1]} : vector<32x896xf32> to vector<32x768xf32>
    %7 = tpu.concatenate %2, %3, %4, %5, %6 in 0 : vector<32x768xf32>, vector<32x768xf32>, vector<32x768xf32>, vector<32x768xf32>, vector<32x768xf32> -> vector<160x768xf32>
    %c0_2 = arith.constant 0 : index
    %c0_3 = arith.constant 0 : index
    %8 = vector.load %arg2[%c0_2, %c0_3] : memref<144x160xbf16, #tpu.memory_space<vmem>>, vector<144x160xbf16>
    %9 = arith.truncf %7 : vector<160x768xf32> to vector<160x768xbf16>
    %cst = arith.constant dense<0.000000e+00> : vector<144x768xf32>
    %10 = tpu.matmul %8, %9, %cst {dimension_numbers = #tpu.dot_dimension_numbers<[1], [0], [0], [1], [0, 0, 1, 1], [], []>} : vector<144x160xbf16>, vector<160x768xbf16>, vector<144x768xf32> -> vector<144x768xf32>
    %c0_4 = arith.constant 0 : index
    %c0_5 = arith.constant 0 : index
    %11 = vector.load %arg3[%c0_4, %c0_5] : memref<144x1xf32, #tpu.memory_space<vmem>>, vector<144x1xf32>
    %12 = vector.broadcast %11 : vector<144x1xf32> to vector<144x768xf32>
    %13 = arith.addf %10, %12 : vector<144x768xf32>
    %cst_6 = arith.constant 0.000000e+00 : f32
    %14 = vector.broadcast %cst_6 : f32 to vector<144x768xf32>
    %15 = arith.maximumf %13, %14 : vector<144x768xf32>
    %c0_7 = arith.constant 0 : index
    %c0_8 = arith.constant 0 : index
    %16 = vector.load %arg4[%c0_7, %c0_8] : memref<144x144xf32, #tpu.memory_space<vmem>>, vector<144x144xf32>
    %c0_9 = arith.constant 0 : index
    %c0_10 = arith.constant 0 : index
    %17 = vector.load %arg5[%c0_9, %c0_10] : memref<768x768xf32, #tpu.memory_space<vmem>>, vector<768x768xf32>
    %cst_11 = arith.constant dense<0.000000e+00> : vector<144x768xf32>
    %18 = tpu.matmul %16, %15, %cst_11 {dimension_numbers = #tpu.dot_dimension_numbers<[1], [0], [0], [1], [0, 0, 1, 1], [], []>} : vector<144x144xf32>, vector<144x768xf32>, vector<144x768xf32> -> vector<144x768xf32>
    %19 = vector.extract_strided_slice %18 {offsets = [0, 0], sizes = [72, 768], strides = [1, 1]} : vector<144x768xf32> to vector<72x768xf32>
    %20 = vector.extract_strided_slice %18 {offsets = [72, 0], sizes = [72, 768], strides = [1, 1]} : vector<144x768xf32> to vector<72x768xf32>
    %21 = arith.maximumf %19, %20 : vector<72x768xf32>
    %cst_12 = arith.constant dense<0.000000e+00> : vector<72x768xf32>
    %22 = tpu.matmul %21, %17, %cst_12 {dimension_numbers = #tpu.dot_dimension_numbers<[1], [0], [0], [1], [0, 0, 1, 1], [], []>} : vector<72x768xf32>, vector<768x768xf32>, vector<72x768xf32> -> vector<72x768xf32>
    %23 = vector.extract_strided_slice %22 {offsets = [0, 0], sizes = [72, 384], strides = [1, 1]} : vector<72x768xf32> to vector<72x384xf32>
    %24 = vector.extract_strided_slice %22 {offsets = [0, 384], sizes = [72, 384], strides = [1, 1]} : vector<72x768xf32> to vector<72x384xf32>
    %25 = arith.maximumf %23, %24 : vector<72x384xf32>
    %26 = vector.extract_strided_slice %25 {offsets = [0, 0], sizes = [72, 256], strides = [1, 1]} : vector<72x384xf32> to vector<72x256xf32>
    %27 = vector.extract_strided_slice %25 {offsets = [0, 32], sizes = [72, 256], strides = [1, 1]} : vector<72x384xf32> to vector<72x256xf32>
    %28 = vector.extract_strided_slice %25 {offsets = [0, 64], sizes = [72, 256], strides = [1, 1]} : vector<72x384xf32> to vector<72x256xf32>
    %29 = vector.extract_strided_slice %25 {offsets = [0, 96], sizes = [72, 256], strides = [1, 1]} : vector<72x384xf32> to vector<72x256xf32>
    %30 = vector.extract_strided_slice %25 {offsets = [0, 128], sizes = [72, 256], strides = [1, 1]} : vector<72x384xf32> to vector<72x256xf32>
    %31 = tpu.concatenate %26, %27, %28, %29, %30 in 0 : vector<72x256xf32>, vector<72x256xf32>, vector<72x256xf32>, vector<72x256xf32>, vector<72x256xf32> -> vector<360x256xf32>
    %c0_13 = arith.constant 0 : index
    %c0_14 = arith.constant 0 : index
    %32 = vector.load %arg6[%c0_13, %c0_14] : memref<128x360xbf16, #tpu.memory_space<vmem>>, vector<128x360xbf16>
    %33 = arith.truncf %31 : vector<360x256xf32> to vector<360x256xbf16>
    %cst_15 = arith.constant dense<0.000000e+00> : vector<128x256xf32>
    %34 = tpu.matmul %32, %33, %cst_15 {dimension_numbers = #tpu.dot_dimension_numbers<[1], [0], [0], [1], [0, 0, 1, 1], [], []>} : vector<128x360xbf16>, vector<360x256xbf16>, vector<128x256xf32> -> vector<128x256xf32>
    %c0_16 = arith.constant 0 : index
    %c0_17 = arith.constant 0 : index
    %35 = vector.load %arg7[%c0_16, %c0_17] : memref<128x1xf32, #tpu.memory_space<vmem>>, vector<128x1xf32>
    %36 = vector.broadcast %35 : vector<128x1xf32> to vector<128x256xf32>
    %37 = arith.addf %34, %36 : vector<128x256xf32>
    %cst_18 = arith.constant 0.000000e+00 : f32
    %38 = vector.broadcast %cst_18 : f32 to vector<128x256xf32>
    %39 = arith.maximumf %37, %38 : vector<128x256xf32>
    %c0_19 = arith.constant 0 : index
    %c0_20 = arith.constant 0 : index
    %40 = vector.load %arg8[%c0_19, %c0_20] : memref<128x128xf32, #tpu.memory_space<vmem>>, vector<128x128xf32>
    %c0_21 = arith.constant 0 : index
    %c0_22 = arith.constant 0 : index
    %41 = vector.load %arg9[%c0_21, %c0_22] : memref<256x256xf32, #tpu.memory_space<vmem>>, vector<256x256xf32>
    %cst_23 = arith.constant dense<0.000000e+00> : vector<128x256xf32>
    %42 = tpu.matmul %40, %39, %cst_23 {dimension_numbers = #tpu.dot_dimension_numbers<[1], [0], [0], [1], [0, 0, 1, 1], [], []>} : vector<128x128xf32>, vector<128x256xf32>, vector<128x256xf32> -> vector<128x256xf32>
    %43 = vector.extract_strided_slice %42 {offsets = [0, 0], sizes = [64, 256], strides = [1, 1]} : vector<128x256xf32> to vector<64x256xf32>
    %44 = vector.extract_strided_slice %42 {offsets = [64, 0], sizes = [64, 256], strides = [1, 1]} : vector<128x256xf32> to vector<64x256xf32>
    %45 = arith.maximumf %43, %44 : vector<64x256xf32>
    %cst_24 = arith.constant dense<0.000000e+00> : vector<64x256xf32>
    %46 = tpu.matmul %45, %41, %cst_24 {dimension_numbers = #tpu.dot_dimension_numbers<[1], [0], [0], [1], [0, 0, 1, 1], [], []>} : vector<64x256xf32>, vector<256x256xf32>, vector<64x256xf32> -> vector<64x256xf32>
    %47 = vector.extract_strided_slice %46 {offsets = [0, 0], sizes = [64, 128], strides = [1, 1]} : vector<64x256xf32> to vector<64x128xf32>
    %48 = vector.extract_strided_slice %46 {offsets = [0, 128], sizes = [64, 128], strides = [1, 1]} : vector<64x256xf32> to vector<64x128xf32>
    %49 = arith.maximumf %47, %48 : vector<64x128xf32>
    %50 = vector.extract_strided_slice %49 {offsets = [0, 0], sizes = [64, 32], strides = [1, 1]} : vector<64x128xf32> to vector<64x32xf32>
    %51 = vector.extract_strided_slice %49 {offsets = [0, 32], sizes = [64, 32], strides = [1, 1]} : vector<64x128xf32> to vector<64x32xf32>
    %52 = vector.extract_strided_slice %49 {offsets = [0, 64], sizes = [64, 32], strides = [1, 1]} : vector<64x128xf32> to vector<64x32xf32>
    %53 = vector.extract_strided_slice %49 {offsets = [0, 96], sizes = [64, 32], strides = [1, 1]} : vector<64x128xf32> to vector<64x32xf32>
    %54 = tpu.concatenate %50, %51, %52, %53 in 0 : vector<64x32xf32>, vector<64x32xf32>, vector<64x32xf32>, vector<64x32xf32> -> vector<256x32xf32>
    %c0_25 = arith.constant 0 : index
    %c0_26 = arith.constant 0 : index
    %55 = vector.load %arg10[%c0_25, %c0_26] : memref<120x256xbf16, #tpu.memory_space<vmem>>, vector<120x256xbf16>
    %56 = arith.truncf %54 : vector<256x32xf32> to vector<256x32xbf16>
    %cst_27 = arith.constant dense<0.000000e+00> : vector<120x32xf32>
    %57 = tpu.matmul %55, %56, %cst_27 {dimension_numbers = #tpu.dot_dimension_numbers<[1], [0], [0], [1], [0, 0, 1, 1], [], []>} : vector<120x256xbf16>, vector<256x32xbf16>, vector<120x32xf32> -> vector<120x32xf32>
    %c0_28 = arith.constant 0 : index
    %c0_29 = arith.constant 0 : index
    %58 = vector.load %arg11[%c0_28, %c0_29] : memref<120x1xf32, #tpu.memory_space<vmem>>, vector<120x1xf32>
    %59 = vector.broadcast %58 : vector<120x1xf32> to vector<120x32xf32>
    %60 = arith.addf %57, %59 : vector<120x32xf32>
    %cst_30 = arith.constant 0.000000e+00 : f32
    %61 = vector.broadcast %cst_30 : f32 to vector<120x32xf32>
    %62 = arith.maximumf %60, %61 : vector<120x32xf32>
    %c0_31 = arith.constant 0 : index
    %c0_32 = arith.constant 0 : index
    %63 = vector.load %arg12[%c0_31, %c0_32] : memref<84x120xbf16, #tpu.memory_space<vmem>>, vector<84x120xbf16>
    %64 = arith.truncf %62 : vector<120x32xf32> to vector<120x32xbf16>
    %cst_33 = arith.constant dense<0.000000e+00> : vector<84x32xf32>
    %65 = tpu.matmul %63, %64, %cst_33 {dimension_numbers = #tpu.dot_dimension_numbers<[1], [0], [0], [1], [0, 0, 1, 1], [], []>} : vector<84x120xbf16>, vector<120x32xbf16>, vector<84x32xf32> -> vector<84x32xf32>
    %c0_34 = arith.constant 0 : index
    %c0_35 = arith.constant 0 : index
    %66 = vector.load %arg13[%c0_34, %c0_35] : memref<84x1xf32, #tpu.memory_space<vmem>>, vector<84x1xf32>
    %67 = vector.broadcast %66 : vector<84x1xf32> to vector<84x32xf32>
    %68 = arith.addf %65, %67 : vector<84x32xf32>
    %cst_36 = arith.constant 0.000000e+00 : f32
    %69 = vector.broadcast %cst_36 : f32 to vector<84x32xf32>
    %70 = arith.maximumf %68, %69 : vector<84x32xf32>
    %c0_37 = arith.constant 0 : index
    %c0_38 = arith.constant 0 : index
    %71 = vector.load %arg14[%c0_37, %c0_38] : memref<10x84xbf16, #tpu.memory_space<vmem>>, vector<10x84xbf16>
    %72 = arith.truncf %70 : vector<84x32xf32> to vector<84x32xbf16>
    %cst_39 = arith.constant dense<0.000000e+00> : vector<10x32xf32>
    %73 = tpu.matmul %71, %72, %cst_39 {dimension_numbers = #tpu.dot_dimension_numbers<[1], [0], [0], [1], [0, 0, 1, 1], [], []>} : vector<10x84xbf16>, vector<84x32xbf16>, vector<10x32xf32> -> vector<10x32xf32>
    %c0_40 = arith.constant 0 : index
    %c0_41 = arith.constant 0 : index
    %74 = vector.load %arg15[%c0_40, %c0_41] : memref<10x1xf32, #tpu.memory_space<vmem>>, vector<10x1xf32>
    %75 = vector.broadcast %74 : vector<10x1xf32> to vector<10x32xf32>
    %76 = arith.addf %73, %75 : vector<10x32xf32>
    %c0_42 = arith.constant 0 : index
    %c0_43 = arith.constant 0 : index
    %c0_44 = arith.constant 0 : index
    %77 = vector.load %arg16[%c0_42, %c0_43, %c0_44] : memref<1x10x32xf32, #tpu.memory_space<vmem>>, vector<1x10x32xf32>
    %78 = vector.shape_cast %77 : vector<1x10x32xf32> to vector<10x32xf32>
    %79 = vector.shape_cast %76 : vector<10x32xf32> to vector<1x10x32xf32>
    tpu.vector_store %arg16[%c0_42, %c0_43, %c0_44], %79 {strides = array<i32>} : memref<1x10x32xf32, #tpu.memory_space<vmem>>, vector<1x10x32xf32>,
    return
  }
  func.func @transform_0(%arg0: i32) -> (i32, i32, i32) {
    %c0_i32 = arith.constant 0 : i32
    %c0_i32_0 = arith.constant 0 : i32
    %c0_i32_1 = arith.constant 0 : i32
    return %arg0, %c0_i32, %c0_i32_0 : i32, i32, i32
  }
  func.func @transform_1(%arg0: i32) -> (i32, i32) {
    %c0_i32 = arith.constant 0 : i32
    %c0_i32_0 = arith.constant 0 : i32
    %c0_i32_1 = arith.constant 0 : i32
    return %c0_i32, %c0_i32_0 : i32, i32
  }
  func.func @transform_2(%arg0: i32) -> (i32, i32) {
    %c0_i32 = arith.constant 0 : i32
    %c0_i32_0 = arith.constant 0 : i32
    %c0_i32_1 = arith.constant 0 : i32
    return %c0_i32, %c0_i32_0 : i32, i32
  }
  func.func @transform_3(%arg0: i32) -> (i32, i32) {
    %c0_i32 = arith.constant 0 : i32
    %c0_i32_0 = arith.constant 0 : i32
    %c0_i32_1 = arith.constant 0 : i32
    return %c0_i32, %c0_i32_0 : i32, i32
  }
  func.func @transform_4(%arg0: i32) -> (i32, i32) {
    %c0_i32 = arith.constant 0 : i32
    %c0_i32_0 = arith.constant 0 : i32
    %c0_i32_1 = arith.constant 0 : i32
    return %c0_i32, %c0_i32_0 : i32, i32
  }
  func.func @transform_5(%arg0: i32) -> (i32, i32) {
    %c0_i32 = arith.constant 0 : i32
    %c0_i32_0 = arith.constant 0 : i32
    %c0_i32_1 = arith.constant 0 : i32
    return %c0_i32, %c0_i32_0 : i32, i32
  }
  func.func @transform_6(%arg0: i32) -> (i32, i32) {
    %c0_i32 = arith.constant 0 : i32
    %c0_i32_0 = arith.constant 0 : i32
    %c0_i32_1 = arith.constant 0 : i32
    return %c0_i32, %c0_i32_0 : i32, i32
  }
  func.func @transform_7(%arg0: i32) -> (i32, i32) {
    %c0_i32 = arith.constant 0 : i32
    %c0_i32_0 = arith.constant 0 : i32
    %c0_i32_1 = arith.constant 0 : i32
    return %c0_i32, %c0_i32_0 : i32, i32
  }
  func.func @transform_8(%arg0: i32) -> (i32, i32) {
    %c0_i32 = arith.constant 0 : i32
    %c0_i32_0 = arith.constant 0 : i32
    %c0_i32_1 = arith.constant 0 : i32
    return %c0_i32, %c0_i32_0 : i32, i32
  }
  func.func @transform_9(%arg0: i32) -> (i32, i32) {
    %c0_i32 = arith.constant 0 : i32
    %c0_i32_0 = arith.constant 0 : i32
    %c0_i32_1 = arith.constant 0 : i32
    return %c0_i32, %c0_i32_0 : i32, i32
  }
  func.func @transform_10(%arg0: i32) -> (i32, i32) {
    %c0_i32 = arith.constant 0 : i32
    %c0_i32_0 = arith.constant 0 : i32
    %c0_i32_1 = arith.constant 0 : i32
    return %c0_i32, %c0_i32_0 : i32, i32
  }
  func.func @transform_11(%arg0: i32) -> (i32, i32) {
    %c0_i32 = arith.constant 0 : i32
    %c0_i32_0 = arith.constant 0 : i32
    %c0_i32_1 = arith.constant 0 : i32
    return %c0_i32, %c0_i32_0 : i32, i32
  }
  func.func @transform_12(%arg0: i32) -> (i32, i32) {
    %c0_i32 = arith.constant 0 : i32
    %c0_i32_0 = arith.constant 0 : i32
    %c0_i32_1 = arith.constant 0 : i32
    return %c0_i32, %c0_i32_0 : i32, i32
  }
  func.func @transform_13(%arg0: i32) -> (i32, i32) {
    %c0_i32 = arith.constant 0 : i32
    %c0_i32_0 = arith.constant 0 : i32
    %c0_i32_1 = arith.constant 0 : i32
    return %c0_i32, %c0_i32_0 : i32, i32
  }
  func.func @transform_14(%arg0: i32) -> (i32, i32) {
    %c0_i32 = arith.constant 0 : i32
    %c0_i32_0 = arith.constant 0 : i32
    %c0_i32_1 = arith.constant 0 : i32
    return %c0_i32, %c0_i32_0 : i32, i32
  }
  func.func @transform_15(%arg0: i32) -> (i32, i32, i32) {
    %c0_i32 = arith.constant 0 : i32
    %c0_i32_0 = arith.constant 0 : i32
    %c0_i32_1 = arith.constant 0 : i32
    return %arg0, %c0_i32, %c0_i32_0 : i32, i32, i32
  }
}

</mosaic_0001>

<bundles_post_ra>
// kernel: lenet_forward.1
= control target key start
LH: loop header
LB: loop body
LE: loop exit
PB: predicated region body
PF: predicated region fallthrough
CT: control target
= control target key end

     0   :  { %s7889_s18 = smov 0   ;;  %s12077_s0 = inlined_call_operand.vmem [shape: f32[2,32,896], index: 0, kind: input, shape index: {}]   ;;  %s12078_s1 = inlined_call_operand.vmem [shape: bf16[144,160], index: 1, kind: input, shape index: {}]   ;;  %s12079_s2 = inlined_call_operand.vmem [shape: f32[144,1], index: 2, kind: input, shape index: {}]   ;;  %s12080_s3 = inlined_call_operand.vmem [shape: f32[144,144], index: 3, kind: input, shape index: {}]   ;;  %s12081_s4 = inlined_call_operand.vmem [shape: f32[768,768], index: 4, kind: input, shape index: {}]   ;;  %s12082_s5 = inlined_call_operand.vmem [shape: bf16[128,360], index: 5, kind: input, shape index: {}]   ;;  %s12083_s6 = inlined_call_operand.vmem [shape: f32[128,1], index: 6, kind: input, shape index: {}]   ;;  %s12084_s7 = inlined_call_operand.vmem [shape: f32[128,128], index: 7, kind: input, shape index: {}]   ;;  %s12085_s8 = inlined_call_operand.vmem [shape: f32[256,256], index: 8, kind: input, shape index: {}]   ;;  %s12086_s9 = inlined_call_operand.vmem [shape: bf16[120,256], index: 9, kind: input, shape index: {}]   ;;  %s12087_s10 = inlined_call_operand.vmem [shape: f32[120,1], index: 10, kind: input, shape index: {}]   ;;  %s12088_s11 = inlined_call_operand.vmem [shape: bf16[84,120], index: 11, kind: input, shape index: {}]   ;;  %s12089_s12 = inlined_call_operand.vmem [shape: f32[84,1], index: 12, kind: input, shape index: {}]   ;;  %s12090_s13 = inlined_call_operand.vmem [shape: bf16[10,84], index: 13, kind: input, shape index: {}]   ;;  %s12091_s14 = inlined_call_operand.vmem [shape: f32[10,1], index: 14, kind: input, shape index: {}]   ;;  %s12092_s15 = inlined_call_operand.vmem [shape: f32[2,10,32], index: 15, kind: output, shape index: {}]  }
   0x1 LB: > { %s5968_s19 = sadd.s32 4294967295, %s7801_s18   ;;  %p5972_p0 = scmp.ge.s32.totalorder %s7801_s18, 1  ;;  %s7801_s18 = sphi %s7889_s18, %s25_s18  }
   0x2   : > { %p437_p1 = scmp.lt.s32.totalorder %s7801_s18, 3 }
   0x4   : > { %p438_p2 = pnand %p5972_p0, %p437_p1 }
   0x6   : > { %441 = sbr.rel (%p438_p2) target bundleno = 3172 (0xc64), region = 80 }
   0xd   : > { %p485_p3 = scmp.lt.s32.totalorder %s5968_s19, 1  ;;  %s7803_s24 = smov 96   ;;  %v7964_v36 = vld [vmem:[%s12078_s1 + $0x4] ss:$8 sps:$4 sm:$0xff]   ;;  %vm818_vm0 = vcmask 261120   ;;  %v12093_v57 = vmov 0  }
   0xe   : > { %s7804_s25 = smov 64   ;;  %s7805_s26 = smov 32   ;;  %5994 = vmatprep.mubr.msk.bf16.mxu0 %vm818_vm0, %v7964_v36  ;;  %6003 = vmatprep.mubr.msk.bf16.mxu1 %vm818_vm0, %v7964_v36  ;;  %v935_v55 = vld [vmem:[%s12079_s2] sm:$0xff]  ;;  %v936_v56 = vld [vmem:[%s12079_s2 + $0x8] sm:$0xff]  ;;  %v938_v58 = vld [vmem:[%s12079_s2 + $0x18] sm:$0xff]  ;;  %vm608_vm1 = vcmask 785408  }
   0xf   : > { %s12130_s19 = smov (!%p485_p3, %s5968_s19), 1  ;;  %7449 = vset.pattern.permute.xlu1 %v12093_v57  ;;  %7448 = vset.pattern.permute.xlu0 %v12093_v57  ;;  %v937_v59 = vld [vmem:[%s12079_s2 + $0x10] sm:$0xff]  ;;  %v940_v60 = vld [vmem:[%s12079_s2 + $0x28] sm:$0xff]  ;;  %v939_v61 = vld [vmem:[%s12079_s2 + $0x20] sm:$0xff]  ;;  %vm713_vm2 = vcmask 523264   ;;  %vm2240_vm3 = vcmask 130048  }
  0x10   : > { %s7223_s20 = smul.u32 224, %s12130_s19  ;;  %vm4578_vm4 = vcmask 1043456   ;;  %vm4553_vm5 = vcmask 850944   ;;  %vm5723_vm6 = vcmask 982016   ;;  %vm7808_vm7 = vmmov 0   ;;  %s6140_s17 = sshll.u32 %s12130_s19, 4 }
  0x11   : > { %vm5865_vm8 = vcmask 1041408   ;;  %vm5861_vm9 = vcmask 687104   ;;  %s494_s22 = scalar_lea.vmem %s12092_s15, %s6140_s17  ;;  %vm5911_vm10 = vcmask 254976  }
  0x12   : > { %s7903_s23 = scalar_lea.vmem %s12077_s0, %s7223_s20 }
  0x13   : > { %v497_v0 = vld [vmem:[%s7903_s23 + $0x8] sm:$0xff]  ;;  %v498_v1 = vld [vmem:[%s7903_s23 + $0x10] sm:$0xff]  ;;  %v496_v2 = vld [vmem:[%s7903_s23] sm:$0xff] }
  0x14   : > { %v7238_v3 = vpack.i.bf16 %v498_v1, %v497_v0  ;;  %v503_v4 = vld [vmem:[%s7903_s23 + $0x38] sm:$0xff]  ;;  %v504_v5 = vld [vmem:[%s7903_s23 + $0x40] sm:$0xff]  ;;  %v505_v6 = vld [vmem:[%s7903_s23 + $0x48] sm:$0xff] }
  0x15   : > { %v7248_v7 = vpack.i.bf16 %v503_v4, %v496_v2  ;;  %v511_v8 = vld [vmem:[%s7903_s23 + $0x78] sm:$0xff]  ;;  %v512_v9 = vld [vmem:[%s7903_s23 + $0x80] sm:$0xff]  ;;  %v7243_v10 = vpack.i.bf16 %v505_v6, %v504_v5  ;;  %v518_v12 = vld [vmem:[%s7903_s23 + $0xb0] sm:$0xff]  ;;  %v7922_v18 = vpack.c.bf16 %v504_v5, %v497_v0  ;;  %v885_v19 = vpack.c.bf16 %v503_v4, %v496_v2 }
  0x16   : > { %7239 = vrot.lane.b32.xlu0 %v7238_v3, %s7803_s24  ;;  %v7253_v11 = vpack.i.bf16 %v512_v9, %v511_v8  ;;  %v519_v13 = vld [vmem:[%s7903_s23 + $0xb8] sm:$0xff]  ;;  %v510_v14 = vld [vmem:[%s7903_s23 + $0x70] sm:$0xff]  ;;  %v517_v15 = vld [vmem:[%s7903_s23 + $0xa8] sm:$0xff]  ;;  %v7925_v20 = vpack.c.bf16 %v518_v12, %v511_v8  ;;  %v7940_v27 = vpack.c.bf16 %v505_v6, %v498_v1 }
  0x17   : > { %7249 = vrot.lane.b32.xlu1 %v7248_v7, %s7803_s24  ;;  %v7258_v16 = vpack.i.bf16 %v519_v13, %v518_v12  ;;  %v7263_v17 = vpack.i.bf16 %v517_v15, %v510_v14  ;;  %1151 = vmatprep.subr.bf16.mxu0 %v7922_v18  ;;  %v891_v21 = vpack.c.bf16 %v517_v15, %v510_v14  ;;  %v499_v22 = vld [vmem:[%s7903_s23 + $0x18] sm:$0xff]  ;;  %v506_v23 = vld [vmem:[%s7903_s23 + $0x50] sm:$0xff]  ;;  %v513_v25 = vld [vmem:[%s7903_s23 + $0x88] sm:$0xff] }
  0x18   : > { %1152 = vmatpush1.bf16.msra.mxu0 %v885_v19  ;;  %v7935_v24 = vpack.c.bf16 %v506_v23, %v499_v22  ;;  %v520_v26 = vld [vmem:[%s7903_s23 + $0xc0] sm:$0xff]  ;;  %v7948_v29 = vpack.c.bf16 %v519_v13, %v512_v9  ;;  %v507_v31 = vld [vmem:[%s7903_s23 + $0x58] sm:$0xff]  ;;  %v514_v34 = vld [vmem:[%s7903_s23 + $0x90] sm:$0xff] }
  0x19   : > { %1153 = vmatprep.subr.bf16.mxu0 %v7925_v20  ;;  %v7945_v28 = vpack.c.bf16 %v520_v26, %v513_v25  ;;  %v500_v30 = vld [vmem:[%s7903_s23 + $0x20] sm:$0xff]  ;;  %v7333_v33 = vpack.i.bf16 %v507_v31, %v506_v23  ;;  %v521_v35 = vld [vmem:[%s7903_s23 + $0xc8] sm:$0xff]  ;;  %v7338_v37 = vpack.i.bf16 %v514_v34, %v513_v25  ;;  %v7984_v41 = vld [vmem:[%s7903_s23 + $0x30] sm:$0xff] }
  0x1a   : > { %7244 = vrot.lane.b32.xlu0 %v7243_v10, %s7803_s24  ;;  %1274 = vmatprep.subr.bf16.mxu1 %v7935_v24  ;;  %v7328_v32 = vpack.i.bf16 %v500_v30, %v499_v22  ;;  %v7343_v38 = vpack.i.bf16 %v521_v35, %v520_v26  ;;  %v7978_v39 = vpack.c.bf16 %v507_v31, %v500_v30  ;;  %v501_v40 = vld [vmem:[%s7903_s23 + $0x28] sm:$0xff]  ;;  %v508_v42 = vld [vmem:[%s7903_s23 + $0x60] sm:$0xff]  ;;  %v515_v47 = vld [vmem:[%s7903_s23 + $0x98] sm:$0xff] }
  0x1b   : > { %7254 = vrot.lane.b32.xlu1 %v7253_v11, %s7803_s24  ;;  %1275 = vmatpush1.bf16.msra.mxu1 %v7940_v27  ;;  %v7988_v43 = vld [vmem:[%s7903_s23 + $0x68] sm:$0xff]  ;;  %v7990_v44 = vpack.c.bf16 %v521_v35, %v514_v34  ;;  %v7388_v45 = vpack.i.bf16 %v7984_v41, %v501_v40  ;;  %v7998_v48 = vld [vmem:[%s7903_s23 + $0xa0] sm:$0xff]  ;;  %v522_v49 = vld [vmem:[%s7903_s23 + $0xd0] sm:$0xff]  ;;  %v8004_v51 = vpack.c.bf16 %v508_v42, %v501_v40 }
  0x1c   : > { %1154 = vmatpush1.bf16.msra.mxu0 %v891_v21  ;;  %1276 = vmatprep.subr.bf16.mxu1 %v7945_v28  ;;  %v7393_v46 = vpack.i.bf16 %v7988_v43, %v508_v42  ;;  %v8002_v50 = vld [vmem:[%s7903_s23 + $0xd8] sm:$0xff]  ;;  %v7398_v52 = vpack.i.bf16 %v7998_v48, %v515_v47  ;;  %v8010_v54 = vpack.c.bf16 %v522_v49, %v515_v47  ;;  %v941_v4 = vld [vmem:[%s12079_s2 + $0x30] sm:$0xff] }
  0x1d   : > { %v7403_v53 = vpack.i.bf16 %v8002_v50, %v522_v49  ;;  %v946_v34 = vld [vmem:[%s12079_s2 + $0x58] sm:$0xff]  ;;  %v945_v35 = vld [vmem:[%s12079_s2 + $0x50] sm:$0xff] }
  0x1e   : > { %7259 = vrot.lane.b32.xlu0 %v7258_v16, %s7803_s24 }
  0x1f   : > { %7264 = vrot.lane.b32.xlu1 %v7263_v17, %s7803_s24  ;;  %1277 = vmatpush1.bf16.msra.mxu1 %v7948_v29 }
  0x22   : > { %7269 = vrot.lane.b32.xlu0 %v7238_v3, %s7804_s25 }
  0x23   : > { %7274 = vrot.lane.b32.xlu1 %v7243_v10, %s7804_s25 }
  0x26   : > { %7279 = vrot.lane.b32.xlu0 %v7248_v7, %s7804_s25 }
  0x27   : > { %7284 = vrot.lane.b32.xlu1 %v7253_v11, %s7804_s25 }
  0x2a   : > { %7289 = vrot.lane.b32.xlu0 %v7258_v16, %s7804_s25 }
  0x2b   : > { %7294 = vrot.lane.b32.xlu1 %v7263_v17, %s7804_s25 }
  0x2e   : > { %7299 = vrot.lane.b32.xlu0 %v7238_v3, %s7805_s26  ;;  %v942_v3 = vld [vmem:[%s12079_s2 + $0x38] sm:$0xff] }
  0x2f   : > { %7304 = vrot.lane.b32.xlu1 %v7243_v10, %s7805_s26  ;;  %v944_v10 = vld [vmem:[%s12079_s2 + $0x48] sm:$0xff] }
  0x32   : > { %7309 = vrot.lane.b32.xlu0 %v7248_v7, %s7805_s26 }
  0x33   : > { %7314 = vrot.lane.b32.xlu1 %v7253_v11, %s7805_s26  ;;  %v943_v11 = vld [vmem:[%s12079_s2 + $0x40] sm:$0xff] }
  0x36   : > { %7319 = vrot.lane.b32.xlu0 %v7258_v16, %s7805_s26 }
  0x37   : > { %7324 = vrot.lane.b32.xlu1 %v7263_v17, %s7805_s26 }
  0x3a   : > { %7329 = vrot.lane.b32.xlu0 %v7328_v32, %s7803_s24 }
  0x3b   : > { %7334 = vrot.lane.b32.xlu1 %v7333_v33, %s7803_s24 }
  0x3e   : > { %7339 = vrot.lane.b32.xlu0 %v7338_v37, %s7803_s24 }
  0x3f   : > { %7344 = vrot.lane.b32.xlu1 %v7343_v38, %s7803_s24 }
  0x42   : > { %7349 = vrot.lane.b32.xlu0 %v7328_v32, %s7804_s25 }
  0x43   : > { %7354 = vrot.lane.b32.xlu1 %v7333_v33, %s7804_s25 }
  0x46   : > { %7359 = vrot.lane.b32.xlu0 %v7338_v37, %s7804_s25 }
  0x47   : > { %7364 = vrot.lane.b32.xlu1 %v7343_v38, %s7804_s25 }
  0x4a   : > { %7369 = vrot.lane.b32.xlu0 %v7328_v32, %s7805_s26 }
  0x4b   : > { %7374 = vrot.lane.b32.xlu1 %v7333_v33, %s7805_s26 }
  0x4e   : > { %7379 = vrot.lane.b32.xlu0 %v7338_v37, %s7805_s26 }
  0x4f   : > { %7384 = vrot.lane.b32.xlu1 %v7343_v38, %s7805_s26 }
  0x52   : > { %7389 = vrot.lane.b32.xlu0 %v7388_v45, %s7803_s24 }
  0x53   : > { %7394 = vrot.lane.b32.xlu1 %v7393_v46, %s7803_s24 }
  0x56   : > { %7399 = vrot.lane.b32.xlu0 %v7398_v52, %s7803_s24 }
  0x57   : > { %7404 = vrot.lane.b32.xlu1 %v7403_v53, %s7803_s24 }
  0x5a   : > { %7409 = vrot.lane.b32.xlu0 %v7388_v45, %s7804_s25 }
  0x5b   : > { %7414 = vrot.lane.b32.xlu1 %v7393_v46, %s7804_s25 }
  0x5e   : > { %7419 = vrot.lane.b32.xlu0 %v7398_v52, %s7804_s25 }
  0x5f   : > { %7424 = vrot.lane.b32.xlu1 %v7403_v53, %s7804_s25 }
  0x62   : > { %7429 = vrot.lane.b32.xlu0 %v7388_v45, %s7805_s26 }
  0x63   : > { %7434 = vrot.lane.b32.xlu1 %v7393_v46, %s7805_s26 }
  0x66   : > { %7439 = vrot.lane.b32.xlu0 %v7398_v52, %s7805_s26  ;;  %v948_v52 = vld [vmem:[%s12079_s2 + $0x68] sm:$0xff] }
  0x67   : > { %7444 = vrot.lane.b32.xlu1 %v7403_v53, %s7805_s26  ;;  %v947_v53 = vld [vmem:[%s12079_s2 + $0x60] sm:$0xff] }
  0x6a   : > { %955 = vperm.xlu0 %7448, %v935_v55  }
  0x6b   : > { %960 = vperm.xlu1 %7449, %v936_v56  }
  0x6e   : > { %970 = vperm.xlu0 %7448, %v938_v58  }
  0x6f   : > { %965 = vperm.xlu1 %7449, %v937_v59  }
  0x72   : > { %980 = vperm.xlu0 %7448, %v940_v60  }
  0x73   : > { %975 = vperm.xlu1 %7449, %v939_v61  }
  0x76   : > { %990 = vperm.xlu0 %7448, %v942_v3   ;;  %v950_v3 = vld [vmem:[%s12079_s2 + $0x78] sm:$0xff] }
  0x77   : > { %985 = vperm.xlu1 %7449, %v941_v4   ;;  %v949_v4 = vld [vmem:[%s12079_s2 + $0x70] sm:$0xff] }
  0x7a   : > { %1000 = vperm.xlu0 %7448, %v944_v10  }
  0x7b   : > { %995 = vperm.xlu1 %7449, %v943_v11  }
  0x7e   : > { %1010 = vperm.xlu0 %7448, %v946_v34  }
  0x7f   : > { %1005 = vperm.xlu1 %7449, %v945_v35  }
  0x82   : > { %1020 = vperm.xlu0 %7448, %v948_v52  }
  0x83   : > { %1015 = vperm.xlu1 %7449, %v947_v53  }
  0x86   : > { %1030 = vperm.xlu0 %7448, %v950_v3  }
  0x87   : > { %1025 = vperm.xlu1 %7449, %v949_v4  }
  0x88   : > { %v8042_v62 = vpop.permute.xlu0 %7239 }
  0x89   : > { %v7250_v63 = vpop.permute.xlu1 %7249  ;;  %v7242_v0 = vunpack.i.h.bf16 %v8042_v62  ;;  %v7241_v1 = vunpack.i.l.bf16 %v8042_v62 }
  0x8a   : > { %v7251_v2 = vunpack.i.l.bf16 %v7250_v63  ;;  %v7252_v6 = vunpack.i.h.bf16 %v7250_v63 }
  0x8b   : > { %v610_v12 = vsel %vm608_vm1, %v7241_v1, %v7242_v0 }
  0x8c   : > { %v8052_v5 = vpop.permute.xlu0 %7244  ;;  %v609_v13 = vsel %vm608_vm1, %v7251_v2, %v7241_v1 }
  0x8d   : > { %v7247_v7 = vunpack.i.h.bf16 %v8052_v5  ;;  %v7246_v8 = vunpack.i.l.bf16 %v8052_v5  ;;  %v8056_v9 = vpop.permute.xlu1 %7254 }
  0x8e   : > { %v7257_v14 = vunpack.i.h.bf16 %v8056_v9  ;;  %v7256_v15 = vunpack.i.l.bf16 %v8056_v9 }
  0x8f   : > { %v616_v16 = vsel %vm608_vm1, %v7246_v8, %v7247_v7  ;;  %v615_v17 = vsel %vm608_vm1, %v7252_v6, %v7246_v8 }
  0x90   : > { %v8074_v19 = vpop.permute.xlu0 %7259  ;;  %v898_v21 = vpack.c.bf16 %v616_v16, %v610_v12  ;;  %v897_v22 = vpack.c.bf16 %v615_v17, %v609_v13  ;;  %v622_v32 = vsel %vm608_vm1, %v7256_v15, %v7257_v14 }
  0x91   : > { %v7262_v23 = vunpack.i.h.bf16 %v8074_v19  ;;  %v7261_v25 = vunpack.i.l.bf16 %v8074_v19  ;;  %v7265_v26 = vpop.permute.xlu1 %7264 }
  0x92   : > { %v7267_v30 = vunpack.i.h.bf16 %v7265_v26  ;;  %v7266_v31 = vunpack.i.l.bf16 %v7265_v26  ;;  %1155 = vmatprep.subr.bf16.mxu0 %v898_v21  ;;  %v952_v21 = vld [vmem:[%s12079_s2 + $0x88] sm:$0xff] }
  0x93   : > { %1156 = vmatpush1.bf16.msra.mxu0 %v897_v22  ;;  %v628_v33 = vsel %vm608_vm1, %v7261_v25, %v7262_v23  ;;  %v951_v22 = vld [vmem:[%s12079_s2 + $0x80] sm:$0xff]  ;;  %1040 = vperm.xlu0 %7448, %v952_v21  }
  0x94   : > { %v8090_v37 = vpop.permute.xlu0 %7269  ;;  %v904_v38 = vpack.c.bf16 %v628_v33, %v622_v32  ;;  %v621_v40 = vsel %vm608_vm1, %v7266_v31, %v7256_v15  ;;  %v627_v42 = vsel %vm608_vm1, %v7267_v30, %v7261_v25  ;;  %1035 = vperm.xlu1 %7449, %v951_v22  }
  0x95   : > { %v7272_v45 = vunpack.i.h.bf16 %v8090_v37  ;;  %v7271_v46 = vunpack.i.l.bf16 %v8090_v37  ;;  %v8096_v47 = vpop.permute.xlu1 %7274  ;;  %v903_v49 = vpack.c.bf16 %v627_v42, %v621_v40 }
  0x96   : > { %v7277_v55 = vunpack.i.h.bf16 %v8096_v47  ;;  %v7276_v56 = vunpack.i.l.bf16 %v8096_v47  ;;  %1157 = vmatprep.subr.bf16.mxu0 %v904_v38 }
  0x97   : > { %1158 = vmatpush1.bf16.msra.mxu0 %v903_v49  ;;  %v715_v58 = vsel %vm713_vm2, %v7271_v46, %v7272_v45 }
  0x98   : > { %v7280_v59 = vpop.permute.xlu0 %7279  ;;  %v721_v60 = vsel %vm713_vm2, %v7276_v56, %v7277_v55 }
  0x99   : > { %v7282_v61 = vunpack.i.h.bf16 %v7280_v59  ;;  %v7281_v63 = vunpack.i.l.bf16 %v7280_v59  ;;  %v8112_v1 = vpop.permute.xlu1 %7284  ;;  %v910_v2 = vpack.c.bf16 %v721_v60, %v715_v58 }
  0x9a   : > { %v7287_v6 = vunpack.i.h.bf16 %v8112_v1  ;;  %v7286_v8 = vunpack.i.l.bf16 %v8112_v1 }
  0x9b   : > { %1159 = vmatprep.subr.bf16.mxu0 %v910_v2  ;;  %v714_v10 = vsel %vm713_vm2, %v7281_v63, %v7271_v46  ;;  %v720_v11 = vsel %vm713_vm2, %v7282_v61, %v7276_v56 }
  0x9c   : > { %v8124_v12 = vpop.permute.xlu0 %7289  ;;  %v909_v13 = vpack.c.bf16 %v720_v11, %v714_v10  ;;  %v727_v30 = vsel %vm713_vm2, %v7286_v8, %v7287_v6 }
  0x9d   : > { %v7292_v15 = vunpack.i.h.bf16 %v8124_v12  ;;  %v7291_v16 = vunpack.i.l.bf16 %v8124_v12  ;;  %v7295_v17 = vpop.permute.xlu1 %7294  ;;  %v8285_v12 = vld [vmem:[%s12078_s1 + $0x10] ss:$8 sps:$4 sm:$0xff]  }
  0x9e   : > { %v7297_v25 = vunpack.i.h.bf16 %v7295_v17  ;;  %v7296_v26 = vunpack.i.l.bf16 %v7295_v17  ;;  %1160 = vmatpush1.bf16.msra.mxu0 %v909_v13 }
  0x9f   : > { %v733_v31 = vsel %vm713_vm2, %v7291_v16, %v7292_v15 }
  0xa0   : > { %v8140_v32 = vpop.permute.xlu0 %7299  ;;  %v916_v33 = vpack.c.bf16 %v733_v31, %v727_v30  ;;  %v726_v34 = vsel %vm713_vm2, %v7296_v26, %v7286_v8  ;;  %v732_v35 = vsel %vm713_vm2, %v7297_v25, %v7291_v16 }
  0xa1   : > { %v7302_v38 = vunpack.i.h.bf16 %v8140_v32  ;;  %v7301_v40 = vunpack.i.l.bf16 %v8140_v32  ;;  %v8146_v42 = vpop.permute.xlu1 %7304  ;;  %v915_v46 = vpack.c.bf16 %v732_v35, %v726_v34 }
  0xa2   : > { %v7307_v49 = vunpack.i.h.bf16 %v8146_v42  ;;  %v7306_v52 = vunpack.i.l.bf16 %v8146_v42  ;;  %1161 = vmatprep.subr.bf16.mxu0 %v916_v33 }
  0xa3   : > { %1162 = vmatpush1.bf16.msra.mxu0 %v915_v46  ;;  %v820_v53 = vsel %vm818_vm0, %v7301_v40, %v7302_v38 }
  0xa4   : > { %v7310_v56 = vpop.permute.xlu0 %7309  ;;  %v826_v58 = vsel %vm818_vm0, %v7306_v52, %v7307_v49 }
  0xa5   : > { %v7312_v59 = vunpack.i.h.bf16 %v7310_v56  ;;  %v7311_v60 = vunpack.i.l.bf16 %v7310_v56  ;;  %v8156_v61 = vpop.permute.xlu1 %7314  ;;  %v922_v63 = vpack.c.bf16 %v826_v58, %v820_v53 }
  0xa6   : > { %v7317_v2 = vunpack.i.h.bf16 %v8156_v61  ;;  %v7316_v3 = vunpack.i.l.bf16 %v8156_v61 }
  0xa7   : > { %1163 = vmatprep.subr.bf16.mxu0 %v922_v63  ;;  %v819_v4 = vsel %vm818_vm0, %v7311_v60, %v7301_v40  ;;  %v825_v8 = vsel %vm818_vm0, %v7312_v59, %v7306_v52 }
  0xa8   : > { %v8162_v10 = vpop.permute.xlu0 %7319  ;;  %v921_v11 = vpack.c.bf16 %v825_v8, %v819_v4  ;;  %v832_v25 = vsel %vm818_vm0, %v7316_v3, %v7317_v2 }
  0xa9   : > { %v7322_v13 = vunpack.i.h.bf16 %v8162_v10  ;;  %v7321_v16 = vunpack.i.l.bf16 %v8162_v10  ;;  %v7325_v17 = vpop.permute.xlu1 %7324  ;;  %v8336_v10 = vld [vmem:[%s12078_s1 + $0x34] ss:$8 sps:$4 sm:$0xff]  }
  0xaa   : > { %v7327_v21 = vunpack.i.h.bf16 %v7325_v17  ;;  %v7326_v22 = vunpack.i.l.bf16 %v7325_v17  ;;  %1164 = vmatpush1.bf16.msra.mxu0 %v921_v11 }
  0xab   : > { %v838_v26 = vsel %vm818_vm0, %v7321_v16, %v7322_v13 }
  0xac   : > { %v8172_v30 = vpop.permute.xlu0 %7329  ;;  %v928_v31 = vpack.c.bf16 %v838_v26, %v832_v25  ;;  %v831_v33 = vsel %vm818_vm0, %v7326_v22, %v7316_v3  ;;  %v837_v34 = vsel %vm818_vm0, %v7327_v21, %v7321_v16 }
  0xad   : > { %v7332_v35 = vunpack.i.h.bf16 %v8172_v30  ;;  %v7331_v40 = vunpack.i.l.bf16 %v8172_v30  ;;  %v8178_v46 = vpop.permute.xlu1 %7334  ;;  %v927_v52 = vpack.c.bf16 %v837_v34, %v831_v33  ;;  %v8228_v33 = vld [vmem:[%s12078_s1] ss:$8 sps:$4 sm:$0xff]   ;;  %v8240_v34 = vld [vmem:[%s12078_s1 + $0x14] ss:$8 sps:$4 sm:$0xff]  }
  0xae   : > { %v7337_v53 = vunpack.i.h.bf16 %v8178_v46  ;;  %v7336_v56 = vunpack.i.l.bf16 %v8178_v46  ;;  %1165 = vmatprep.subr.bf16.mxu0 %v928_v31 }
  0xaf   : > { %1166 = vmatpush1.bf16.msra.mxu0 %v927_v52  ;;  %v612_v58 = vsel %vm608_vm1, %v7331_v40, %v7332_v35  ;;  %v611_v59 = vsel %vm608_vm1, %v7242_v0, %v7331_v40 }
  0xb0   : > { %v8188_v60 = vpop.permute.xlu0 %7339  ;;  %1167 = vmatprep.subr.bf16.mxu0 %v7940_v27  ;;  %v618_v63 = vsel %vm608_vm1, %v7336_v56, %v7337_v53  ;;  %v617_v3 = vsel %vm608_vm1, %v7247_v7, %v7336_v56 }
  0xb1   : > { %v7342_v4 = vunpack.i.h.bf16 %v8188_v60  ;;  %v7341_v8 = vunpack.i.l.bf16 %v8188_v60  ;;  %v8199_v11 = vpop.permute.xlu1 %7344  ;;  %v900_v62 = vpack.c.bf16 %v618_v63, %v612_v58  ;;  %v899_v0 = vpack.c.bf16 %v617_v3, %v611_v59 }
  0xb2   : > { %v7347_v16 = vunpack.i.h.bf16 %v8199_v11  ;;  %v7346_v27 = vunpack.i.l.bf16 %v8199_v11 }
  0xb3   : > { %1278 = vmatprep.subr.bf16.mxu1 %v900_v62  ;;  %1168 = vmatpush1.bf16.msra.mxu0 %v7922_v18  ;;  %v624_v5 = vsel %vm608_vm1, %v7341_v8, %v7342_v4  ;;  %v623_v7 = vsel %vm608_vm1, %v7257_v14, %v7341_v8 }
  0xb4   : > { %1279 = vmatpush1.bf16.msra.mxu1 %v899_v0  ;;  %v8210_v17 = vpop.permute.xlu0 %7349  ;;  %1169 = vmatprep.subr.bf16.mxu0 %v7948_v29  ;;  %v630_v21 = vsel %vm608_vm1, %v7346_v27, %v7347_v16  ;;  %v629_v18 = vsel %vm608_vm1, %v7262_v23, %v7346_v27 }
  0xb5   : > { %v7352_v22 = vunpack.i.h.bf16 %v8210_v17  ;;  %v7351_v25 = vunpack.i.l.bf16 %v8210_v17  ;;  %v8221_v9 = vpop.permute.xlu1 %7354  ;;  %v906_v14 = vpack.c.bf16 %v630_v21, %v624_v5  ;;  %v905_v26 = vpack.c.bf16 %v629_v18, %v623_v7 }
  0xb6   : > { %v7357_v31 = vunpack.i.h.bf16 %v8221_v9  ;;  %v7356_v29 = vunpack.i.l.bf16 %v8221_v9 }
  0xb7   : > { %1280 = vmatprep.subr.bf16.mxu1 %v906_v14  ;;  %1170 = vmatpush1.bf16.msra.mxu0 %v7925_v20  ;;  %v717_v19 = vsel %vm713_vm2, %v7351_v25, %v7352_v22  ;;  %v716_v23 = vsel %vm713_vm2, %v7272_v45, %v7351_v25  ;;  %v8296_v14 = vld [vmem:[%s12078_s1 + $0x24] ss:$8 sps:$4 sm:$0xff]  }
  0xb8   : > { %1281 = vmatpush1.bf16.msra.mxu1 %v905_v26  ;;  %v8242_v40 = vpop.permute.xlu0 %7359  ;;  %v723_v20 = vsel %vm713_vm2, %v7356_v29, %v7357_v31  ;;  %v722_v52 = vsel %vm713_vm2, %v7277_v55, %v7356_v29  ;;  %1397 = vmatprep.subr.bf16.mxu0 %v8004_v51 }
  0xb9   : > { %v7362_v37 = vunpack.i.h.bf16 %v8242_v40  ;;  %v7361_v45 = vunpack.i.l.bf16 %v8242_v40  ;;  %v8253_v56 = vpop.permute.xlu1 %7364  ;;  %v912_v58 = vpack.c.bf16 %v723_v20, %v717_v19  ;;  %v911_v59 = vpack.c.bf16 %v722_v52, %v716_v23 }
  0xba   : > { %v7367_v63 = vunpack.i.h.bf16 %v8253_v56  ;;  %v7366_v3 = vunpack.i.l.bf16 %v8253_v56  ;;  %1184 = vmatmul.mubr.bf16.vlgmr.msra.gmra.mrb[0].mxu0 %v8228_v33  ;;  %v8401_v56 = vld [vmem:[%s12078_s1 + $0x54] ss:$8 sps:$4 sm:$0xff]  }
  0xbb   : > { %1282 = vmatprep.subr.bf16.mxu1 %v912_v58  ;;  %v729_v47 = vsel %vm713_vm2, %v7361_v45, %v7362_v37  ;;  %v728_v55 = vsel %vm713_vm2, %v7287_v6, %v7361_v45  ;;  %5995 = vmatprep.mubr.msk.bf16.mxu0 %vm818_vm0, %v8240_v34 }
  0xbc   : > { %1283 = vmatpush1.bf16.msra.mxu1 %v911_v59  ;;  %v8266_v8 = vpop.permute.xlu0 %7369  ;;  %v735_v62 = vsel %vm713_vm2, %v7366_v3, %v7367_v63  ;;  %v734_v0 = vsel %vm713_vm2, %v7292_v15, %v7366_v3  ;;  %1398 = vmatpush1.bf16.msra.mxu0 %v7978_v39 }
  0xbd   : > { %v7372_v1 = vunpack.i.h.bf16 %v8266_v8  ;;  %v7371_v6 = vunpack.i.l.bf16 %v8266_v8  ;;  %v8277_v27 = vpop.permute.xlu1 %7374  ;;  %v918_v5 = vpack.c.bf16 %v735_v62, %v729_v47  ;;  %v917_v7 = vpack.c.bf16 %v734_v0, %v728_v55  ;;  %1399 = vmatprep.subr.bf16.mxu0 %v8010_v54 }
  0xbe   : > { %v7377_v21 = vunpack.i.h.bf16 %v8277_v27  ;;  %v7376_v18 = vunpack.i.l.bf16 %v8277_v27 }
  0xbf   : > { %1284 = vmatprep.subr.bf16.mxu1 %v918_v5  ;;  %v822_v15 = vsel %vm818_vm0, %v7371_v6, %v7372_v1  ;;  %v821_v25 = vsel %vm818_vm0, %v7302_v38, %v7371_v6 }
  0xc0   : > { %1285 = vmatpush1.bf16.msra.mxu1 %v917_v7  ;;  %v8298_v26 = vpop.permute.xlu0 %7379  ;;  %v828_v29 = vsel %vm818_vm0, %v7376_v18, %v7377_v21  ;;  %v827_v19 = vsel %vm818_vm0, %v7307_v49, %v7376_v18  ;;  %1400 = vmatpush1.bf16.msra.mxu0 %v7990_v44 }
  0xc1   : > { %v7382_v32 = vunpack.i.h.bf16 %v8298_v26  ;;  %v7381_v38 = vunpack.i.l.bf16 %v8298_v26  ;;  %v8309_v23 = vpop.permute.xlu1 %7384  ;;  %v924_v20 = vpack.c.bf16 %v828_v29, %v822_v15  ;;  %v923_v52 = vpack.c.bf16 %v827_v19, %v821_v25  ;;  %v7722_v26 = vld [vmem:[%s12078_s1 + $0x50] ss:$8 sps:$4 sm:$0xff]  }
  0xc2   : > { %v7387_v45 = vunpack.i.h.bf16 %v8309_v23  ;;  %v7386_v58 = vunpack.i.l.bf16 %v8309_v23  ;;  %1194 = vmatmul.mubr.bf16.gmra.mrb[4].mxu0 %v8285_v12  ;;  %v934_v23 = vpack.c.bf16 %v8002_v50, %v7998_v48  ;;  %v7728_v48 = vld [vmem:[%s12078_s1 + $0x70] ss:$8 sps:$4 sm:$0xff]   ;;  %v7729_v50 = vld [vmem:[%s12078_s1 + $0x84] ss:$8 sps:$4 sm:$0xff]  }
  0xc3   : > { %1286 = vmatprep.subr.bf16.mxu1 %v924_v20  ;;  %v834_v42 = vsel %vm818_vm0, %v7381_v38, %v7382_v32  ;;  %v833_v49 = vsel %vm818_vm0, %v7317_v2, %v7381_v38  ;;  %5996 = vmatprep.mubr.msk.bf16.mxu0 %vm818_vm0, %v8296_v14  ;;  %v8331_v2 = vld [vmem:[%s12078_s1 + $0x20] ss:$8 sps:$4 sm:$0xff]  }
  0xc4   : > { %1287 = vmatpush1.bf16.msra.mxu1 %v923_v52  ;;  %v840_v59 = vsel %vm818_vm0, %v7386_v58, %v7387_v45  ;;  %v839_v3 = vsel %vm818_vm0, %v7322_v13, %v7386_v58  ;;  %v7390_v47 = vpop.permute.xlu0 %7389 }
  0xc5   : > { %v930_v55 = vpack.c.bf16 %v840_v59, %v834_v42  ;;  %v929_v62 = vpack.c.bf16 %v839_v3, %v833_v49  ;;  %v7392_v0 = vunpack.i.h.bf16 %v7390_v47  ;;  %v7391_v6 = vunpack.i.l.bf16 %v7390_v47  ;;  %v7395_v61 = vpop.permute.xlu1 %7394 }
  0xc6   : > { %v7397_v5 = vunpack.i.h.bf16 %v7395_v61  ;;  %v7396_v7 = vunpack.i.l.bf16 %v7395_v61 }
  0xc7   : > { %1288 = vmatprep.subr.bf16.mxu1 %v930_v55  ;;  %v613_v13 = vsel %vm608_vm1, %v7332_v35, %v7391_v6  ;;  %v614_v18 = vsel %vm608_vm1, %v7391_v6, %v7392_v0  ;;  %v8363_v55 = vld [vmem:[%s12078_s1 + $0x30] ss:$8 sps:$4 sm:$0xff]  }
  0xc8   : > { %1289 = vmatpush1.bf16.msra.mxu1 %v929_v62  ;;  %v619_v15 = vsel %vm608_vm1, %v7337_v53, %v7396_v7  ;;  %v7400_v25 = vpop.permute.xlu0 %7399  ;;  %v620_v29 = vsel %vm608_vm1, %v7396_v7, %v7397_v5 }
  0xc9   : > { %1290 = vmatprep.subr.bf16.mxu1 %v7978_v39  ;;  %v7402_v19 = vunpack.i.h.bf16 %v7400_v25  ;;  %v7401_v38 = vunpack.i.l.bf16 %v7400_v25  ;;  %v7405_v20 = vpop.permute.xlu1 %7404  ;;  %v902_v52 = vpack.c.bf16 %v620_v29, %v614_v18  ;;  %v901_v58 = vpack.c.bf16 %v619_v15, %v613_v13 }
  0xca   : > { %1204 = vmatmul.mubr.bf16.gmra.mrb[8].mxu0 %v8331_v2  ;;  %v7407_v30 = vunpack.i.h.bf16 %v7405_v20  ;;  %v7406_v35 = vunpack.i.l.bf16 %v7405_v20 }
  0xcb   : > { %5997 = vmatprep.mubr.msk.bf16.mxu0 %vm818_vm0, %v8336_v10  ;;  %v625_v46 = vsel %vm608_vm1, %v7342_v4, %v7401_v38  ;;  %1401 = vmatprep.subr.bf16.mxu0 %v902_v52  ;;  %v626_v53 = vsel %vm608_vm1, %v7401_v38, %v7402_v19 }
  0xcc   : > { %1291 = vmatpush1.bf16.msra.mxu1 %v7935_v24  ;;  %v631_v39 = vsel %vm608_vm1, %v7347_v16, %v7406_v35  ;;  %1402 = vmatpush1.bf16.msra.mxu0 %v901_v58  ;;  %v7410_v42 = vpop.permute.xlu0 %7409  ;;  %v632_v49 = vsel %vm608_vm1, %v7406_v35, %v7407_v30  ;;  %v8368_v16 = vld [vmem:[%s12078_s1 + $0x44] ss:$8 sps:$4 sm:$0xff]  }
  0xcd   : > { %1292 = vmatprep.subr.bf16.mxu1 %v7990_v44  ;;  %v7412_v59 = vunpack.i.h.bf16 %v7410_v42  ;;  %v7411_v3 = vunpack.i.l.bf16 %v7410_v42  ;;  %v7415_v60 = vpop.permute.xlu1 %7414  ;;  %v908_v47 = vpack.c.bf16 %v632_v49, %v626_v53  ;;  %v907_v4 = vpack.c.bf16 %v631_v39, %v625_v46 }
  0xce   : > { %v7417_v24 = vunpack.i.h.bf16 %v7415_v60  ;;  %v7416_v11 = vunpack.i.l.bf16 %v7415_v60 }
  0xcf   : > { %v718_v44 = vsel %vm713_vm2, %v7352_v22, %v7411_v3  ;;  %1403 = vmatprep.subr.bf16.mxu0 %v908_v47  ;;  %v719_v62 = vsel %vm713_vm2, %v7411_v3, %v7412_v59 }
  0xd0   : > { %1293 = vmatpush1.bf16.msra.mxu1 %v7945_v28  ;;  %v724_v0 = vsel %vm713_vm2, %v7357_v31, %v7416_v11  ;;  %1404 = vmatpush1.bf16.msra.mxu0 %v907_v4  ;;  %v7420_v6 = vpop.permute.xlu0 %7419  ;;  %v725_v61 = vsel %vm713_vm2, %v7416_v11, %v7417_v24 }
  0xd1   : > { %v7422_v5 = vunpack.i.h.bf16 %v7420_v6  ;;  %v7421_v7 = vunpack.i.l.bf16 %v7420_v6  ;;  %v7425_v13 = vpop.permute.xlu1 %7424  ;;  %v914_v18 = vpack.c.bf16 %v725_v61, %v719_v62  ;;  %v913_v17 = vpack.c.bf16 %v724_v0, %v718_v44  ;;  %v7723_v44 = vld [vmem:[%s12078_s1 + $0x64] ss:$8 sps:$4 sm:$0xff]  }
  0xd2   : > { %1214 = vmatmul.mubr.bf16.gmra.mrb[12].mxu0 %v8363_v55  ;;  %v7427_v22 = vunpack.i.h.bf16 %v7425_v13  ;;  %v7426_v15 = vunpack.i.l.bf16 %v7425_v13 }
  0xd3   : > { %1307 = vmatmul.mubr.bf16.vlgmr.msra.gmra.mrb[0].mxu1 %v8228_v33  ;;  %5998 = vmatprep.mubr.msk.bf16.mxu0 %vm818_vm0, %v8368_v16  ;;  %v730_v28 = vsel %vm713_vm2, %v7362_v37, %v7421_v7  ;;  %v731_v9 = vsel %vm713_vm2, %v7421_v7, %v7422_v5  ;;  %v8396_v37 = vld [vmem:[%s12078_s1 + $0x40] ss:$8 sps:$4 sm:$0xff]  }
  0xd4   : > { %6004 = vmatprep.mubr.msk.bf16.mxu1 %vm818_vm0, %v8240_v34  ;;  %v736_v31 = vsel %vm713_vm2, %v7367_v63, %v7426_v15  ;;  %1405 = vmatprep.subr.bf16.mxu0 %v914_v18  ;;  %v7430_v25 = vpop.permute.xlu0 %7429  ;;  %v737_v29 = vsel %vm713_vm2, %v7426_v15, %v7427_v22 }
  0xd5   : > { %1406 = vmatpush1.bf16.msra.mxu0 %v913_v17  ;;  %v7432_v19 = vunpack.i.h.bf16 %v7430_v25  ;;  %v7431_v38 = vunpack.i.l.bf16 %v7430_v25  ;;  %v7435_v20 = vpop.permute.xlu1 %7434  ;;  %v920_v40 = vpack.c.bf16 %v737_v29, %v731_v9  ;;  %v919_v52 = vpack.c.bf16 %v736_v31, %v730_v28 }
  0xd6   : > { %v7437_v58 = vunpack.i.h.bf16 %v7435_v20  ;;  %v7436_v30 = vunpack.i.l.bf16 %v7435_v20 }
  0xd7   : > { %v823_v63 = vsel %vm818_vm0, %v7372_v1, %v7431_v38  ;;  %1407 = vmatprep.subr.bf16.mxu0 %v920_v40  ;;  %v824_v35 = vsel %vm818_vm0, %v7431_v38, %v7432_v19 }
  0xd8   : > { %v829_v46 = vsel %vm818_vm0, %v7377_v21, %v7436_v30  ;;  %v7440_v53 = vpop.permute.xlu0 %7439  ;;  %v830_v39 = vsel %vm818_vm0, %v7436_v30, %v7437_v58 }
  0xd9   : > { %1408 = vmatpush1.bf16.msra.mxu0 %v919_v52  ;;  %v7442_v42 = vunpack.i.h.bf16 %v7440_v53  ;;  %v7441_v49 = vunpack.i.l.bf16 %v7440_v53  ;;  %v7445_v59 = vpop.permute.xlu1 %7444  ;;  %v926_v3 = vpack.c.bf16 %v830_v39, %v824_v35  ;;  %v925_v60 = vpack.c.bf16 %v829_v46, %v823_v63 }
  0xda   : > { %1224 = vmatmul.mubr.bf16.gmra.mrb[16].mxu0 %v8396_v37  ;;  %v7447_v8 = vunpack.i.h.bf16 %v7445_v59  ;;  %v7446_v1 = vunpack.i.l.bf16 %v7445_v59 }
  0xdb   : > { %1317 = vmatmul.mubr.bf16.gmra.mrb[4].mxu1 %v8285_v12  ;;  %5999 = vmatprep.mubr.msk.bf16.mxu0 %vm818_vm0, %v8401_v56  ;;  %v835_v27 = vsel %vm818_vm0, %v7382_v32, %v7441_v49  ;;  %v836_v21 = vsel %vm818_vm0, %v7441_v49, %v7442_v42  ;;  %v933_v32 = vpack.c.bf16 %v7988_v43, %v7984_v41  ;;  %v7725_v41 = vld [vmem:[%s12078_s1 + $0x60] ss:$8 sps:$4 sm:$0xff]   ;;  %v7726_v43 = vld [vmem:[%s12078_s1 + $0x74] ss:$8 sps:$4 sm:$0xff]  }
  0xdc   : > { %6005 = vmatprep.mubr.msk.bf16.mxu1 %vm818_vm0, %v8296_v14  ;;  %v841_v47 = vsel %vm818_vm0, %v7387_v45, %v7446_v1  ;;  %1409 = vmatprep.subr.bf16.mxu0 %v926_v3  ;;  %v842_v4 = vsel %vm818_vm0, %v7446_v1, %v7447_v8 }
  0xdd   : > { %1410 = vmatpush1.bf16.msra.mxu0 %v925_v60  ;;  %v932_v24 = vpack.c.bf16 %v842_v4, %v836_v21  ;;  %v931_v11 = vpack.c.bf16 %v841_v47, %v835_v27 }
  0xdf   : > { %1411 = vmatprep.subr.bf16.mxu0 %v932_v24 }
  0xe1   : > { %1412 = vmatpush1.bf16.msra.mxu0 %v931_v11 }
  0xe2   : > { %1234 = vmatmul.mubr.bf16.gmra.mrb[20].mxu0 %v7722_v26  ;;  %1413 = vmatprep.subr.bf16.mxu0 %v933_v32 }
  0xe3   : > { %1327 = vmatmul.mubr.bf16.gmra.mrb[8].mxu1 %v8331_v2  ;;  %6000 = vmatprep.mubr.msk.bf16.mxu0 %vm818_vm0, %v7723_v44 }
  0xe4   : > { %6006 = vmatprep.mubr.msk.bf16.mxu1 %vm818_vm0, %v8336_v10 }
  0xe5   : > { %1414 = vmatpush1.bf16.msra.mxu0 %v8004_v51  ;;  %v7731_v51 = vld [vmem:[%s12078_s1 + $0x80] ss:$8 sps:$4 sm:$0xff]  }
  0xe6   : > { %1415 = vmatprep.subr.bf16.mxu0 %v934_v23 }
  0xe9   : > { %1416 = vmatpush1.bf16.msra.mxu0 %v8010_v54  ;;  %v8492_v54 = vpop.permute.xlu0 %955 }
  0xea   : > { %1244 = vmatmul.mubr.bf16.gmra.mrb[24].mxu0 %v7725_v41 }
  0xeb   : > { %1337 = vmatmul.mubr.bf16.gmra.mrb[12].mxu1 %v8363_v55  ;;  %6001 = vmatprep.mubr.msk.bf16.mxu0 %vm818_vm0, %v7726_v43 }
  0xec   : > { %6007 = vmatprep.mubr.msk.bf16.mxu1 %vm818_vm0, %v8368_v16 }
  0xed   : > { %v8503_v15 = vpop.permute.xlu0 %970 }
  0xf2   : > { %1254 = vmatmul.mubr.bf16.gmra.mrb[28].mxu0 %v7728_v48 }
  0xf3   : > { %1347 = vmatmul.mubr.bf16.gmra.mrb[16].mxu1 %v8396_v37  ;;  %6002 = vmatprep.mubr.msk.bf16.mxu0 %vm818_vm0, %v7729_v50 }
  0xf4   : > { %6008 = vmatprep.mubr.msk.bf16.mxu1 %vm818_vm0, %v8401_v56 }
  0xfa   : > { %1264 = vmatmul.mubr.bf16.gmra.mrb[32].mxu0 %v7731_v51 }
  0xfb   : > { %1357 = vmatmul.mubr.bf16.gmra.mrb[20].mxu1 %v7722_v26  ;;  %6012 = vmatprep.mubr.msk.bf16.mxu0 %vm818_vm0, %v7964_v36  ;;  %v1629_v36 = vld [vmem:[%s12080_s3 + $0x8] sm:$0xff] }
  0xfc   : > { %6009 = vmatprep.mubr.msk.bf16.mxu1 %vm818_vm0, %v7723_v44 }
 0x102   : > { %1430 = vmatmul.mubr.bf16.vlgmr.msra.gmra.mrb[36].mxu0 %v8228_v33  ;;  %v8494_v33 = vpop.permute.xlu1 %960 }
 0x103   : > { %1367 = vmatmul.mubr.bf16.gmra.mrb[24].mxu1 %v7725_v41  ;;  %6013 = vmatprep.mubr.msk.bf16.mxu0 %vm818_vm0, %v8240_v34 }
 0x104   : > { %6010 = vmatprep.mubr.msk.bf16.mxu1 %vm818_vm0, %v7726_v43 }
 0x106   : > { %v8500_v6 = vpop.permute.xlu1 %965 }
 0x10a   : > { %1440 = vmatmul.mubr.bf16.gmra.mrb[40].mxu0 %v8285_v12 }
 0x10b   : > { %1377 = vmatmul.mubr.bf16.gmra.mrb[28].mxu1 %v7728_v48  ;;  %6014 = vmatprep.mubr.msk.bf16.mxu0 %vm818_vm0, %v8296_v14 }
 0x10c   : > { %6011 = vmatprep.mubr.msk.bf16.mxu1 %vm818_vm0, %v7729_v50 }
 0x112   : > { %1450 = vmatmul.mubr.bf16.gmra.mrb[44].mxu0 %v8331_v2 }
 0x113   : > { %1387 = vmatmul.mubr.bf16.gmra.mrb[32].mxu1 %v7731_v51  ;;  %6015 = vmatprep.mubr.msk.bf16.mxu0 %vm818_vm0, %v8336_v10 }
 0x114   : > { %6021 = vmatprep.mubr.msk.f32.mxu1 %vm2240_vm3, %v1629_v36 }
 0x11a   : > { %1460 = vmatmul.mubr.bf16.gmra.mrb[48].mxu0 %v8363_v55 }
 0x11b   : > { %6016 = vmatprep.mubr.msk.bf16.mxu0 %vm818_vm0, %v8368_v16 }
 0x122   : > { %1470 = vmatmul.mubr.bf16.gmra.mrb[52].mxu0 %v8396_v37  ;;  %v8508_v37 = vpop.permute.xlu1 %975 }
 0x123   : > { %6017 = vmatprep.mubr.msk.bf16.mxu0 %vm818_vm0, %v8401_v56  ;;  %v8510_v56 = vpop.permute.xlu0 %980 }
 0x126   : > { %v8518_v21 = vpop.permute.xlu1 %985 }
 0x127   : > { %v8516_v1 = vpop.permute.xlu0 %990 }
 0x12a   : > { %1480 = vmatmul.mubr.bf16.gmra.mrb[56].mxu0 %v7722_v26 }
 0x12b   : > { %6018 = vmatprep.mubr.msk.bf16.mxu0 %vm818_vm0, %v7723_v44 }
 0x132   : > { %1490 = vmatmul.mubr.bf16.gmra.mrb[60].mxu0 %v7725_v41 }
 0x133   : > { %6019 = vmatprep.mubr.msk.bf16.mxu0 %vm818_vm0, %v7726_v43 }
 0x13a   : > { %1500 = vmatmul.mubr.bf16.gmra.mrb[64].mxu0 %v7728_v48 }
 0x13b   : > { %6020 = vmatprep.mubr.msk.bf16.mxu0 %vm818_vm0, %v7729_v50 }
 0x142   : > { %1510 = vmatmul.mubr.bf16.gmra.mrb[68].mxu0 %v7731_v51 }
 0x143   : > { %6039 = vmatprep.mubr.msk.f32.mxu0 %vm2240_vm3, %v1629_v36 }
 0x18d   : > { %v1185_v34 = vpop.f32.mrb[0].mxu0 }
 0x18e   : > { %v1186_v12 = vadd.f32 %v1185_v34, %v8492_v54  ;;  %v1187_v14 = vpop.f32.mrb[1].mxu0 }
 0x18f   : > { %v1188_v45 = vadd.f32 %v1187_v14, %v8492_v54  ;;  %v1189_v2 = vpop.f32.mrb[2].mxu0 }
 0x190   : > { %v1190_v10 = vadd.f32 %v1189_v2, %v8494_v33  ;;  %v1191_v55 = vpop.f32.mrb[3].mxu0  ;;  %v1520_v62 = vmax.f32 %v1186_v12, 0.0 }
 0x191   : > { %v1192_v16 = vadd.f32 %v1191_v55, %v8494_v33  ;;  %v1521_v61 = vmax.f32 %v1188_v45, 0.0 }
 0x192   : > { %v1526_v0 = vmax.f32 %v1190_v10, 0.0 }
 0x193   : > { %v1527_v5 = vmax.f32 %v1192_v16, 0.0 }
 0x194   : > { %v6272_v7 = vpack.c.bf16 %v1526_v0, %v1520_v62 }
 0x195   : > { %v6270_v13 = vpack.c.bf16 %v1527_v5, %v1521_v61  ;;  %v1195_v18 = vpop.f32.mrb[4].mxu0  ;;  %v8528_v61 = vpop.permute.xlu0 %1000 }
 0x196   : > { %v1196_v17 = vadd.f32 %v1195_v18, %v8500_v6  ;;  %v1197_v22 = vpop.f32.mrb[5].mxu0 }
 0x197   : > { %v1198_v28 = vadd.f32 %v1197_v22, %v8500_v6  ;;  %v1199_v9 = vpop.f32.mrb[6].mxu0  ;;  %6271 = vmatprep.subr.bf16.mxu1 %v6270_v13  ;;  %v8530_v13 = vpop.permute.xlu1 %995 }
 0x198   : > { %v1200_v31 = vadd.f32 %v1199_v9, %v8503_v15  ;;  %v1201_v25 = vpop.f32.mrb[7].mxu0  ;;  %6273 = vmatpush1.bf16.msra.mxu1 %v6272_v7  ;;  %v1532_v19 = vmax.f32 %v1196_v17, 0.0 }
 0x199   : > { %v1202_v29 = vadd.f32 %v1201_v25, %v8503_v15  ;;  %v1533_v20 = vmax.f32 %v1198_v28, 0.0 }
 0x19a   : > { %v1538_v38 = vmax.f32 %v1200_v31, 0.0 }
 0x19b   : > { %v1539_v40 = vmax.f32 %v1202_v29, 0.0 }
 0x19c   : > { %v6276_v52 = vpack.c.bf16 %v1538_v38, %v1532_v19 }
 0x19d   : > { %v6274_v58 = vpack.c.bf16 %v1539_v40, %v1533_v20  ;;  %v1205_v30 = vpop.f32.mrb[8].mxu0 }
 0x19e   : > { %v1206_v63 = vadd.f32 %v1205_v30, %v8508_v37  ;;  %v1207_v35 = vpop.f32.mrb[9].mxu0 }
 0x19f   : > { %v1208_v46 = vadd.f32 %v1207_v35, %v8508_v37  ;;  %v1209_v53 = vpop.f32.mrb[10].mxu0  ;;  %6275 = vmatprep.subr.bf16.mxu1 %v6274_v58 }
 0x1a0   : > { %v1210_v39 = vadd.f32 %v1209_v53, %v8510_v56  ;;  %v1211_v42 = vpop.f32.mrb[11].mxu0  ;;  %6277 = vmatpush1.bf16.msra.mxu1 %v6276_v52  ;;  %v1544_v59 = vmax.f32 %v1206_v63, 0.0 }
 0x1a1   : > { %v1212_v49 = vadd.f32 %v1211_v42, %v8510_v56  ;;  %v1545_v60 = vmax.f32 %v1208_v46, 0.0 }
 0x1a2   : > { %v1550_v3 = vmax.f32 %v1210_v39, 0.0 }
 0x1a3   : > { %v1551_v8 = vmax.f32 %v1212_v49, 0.0 }
 0x1a4   : > { %v6280_v27 = vpack.c.bf16 %v1550_v3, %v1544_v59 }
 0x1a5   : > { %v6278_v47 = vpack.c.bf16 %v1551_v8, %v1545_v60  ;;  %v1215_v4 = vpop.f32.mrb[12].mxu0 }
 0x1a6   : > { %v1216_v24 = vadd.f32 %v1215_v4, %v8518_v21  ;;  %v1308_v11 = vpop.f32.mrb[0].mxu1  ;;  %v1217_v26 = vpop.f32.mrb[13].mxu0 }
 0x1a7   : > { %v1309_v32 = vadd.f32 %v1308_v11, %v8492_v54  ;;  %v1218_v44 = vadd.f32 %v1217_v26, %v8518_v21  ;;  %v1310_v23 = vpop.f32.mrb[1].mxu1  ;;  %v1219_v41 = vpop.f32.mrb[14].mxu0  ;;  %6279 = vmatprep.subr.bf16.mxu1 %v6278_v47 }
 0x1a8   : > { %v1311_v43 = vadd.f32 %v1310_v23, %v8492_v54  ;;  %v1220_v48 = vadd.f32 %v1219_v41, %v8516_v1  ;;  %v1312_v50 = vpop.f32.mrb[2].mxu1  ;;  %v1221_v51 = vpop.f32.mrb[15].mxu0  ;;  %6281 = vmatpush1.bf16.msra.mxu1 %v6280_v27  ;;  %v1556_v45 = vmax.f32 %v1216_v24, 0.0 }
 0x1a9   : > { %v1522_v36 = vmax.f32 %v1309_v32, 0.0  ;;  %v1313_v34 = vadd.f32 %v1312_v50, %v8494_v33  ;;  %v1222_v12 = vadd.f32 %v1221_v51, %v8516_v1  ;;  %v1314_v14 = vpop.f32.mrb[3].mxu1  ;;  %v1557_v16 = vmax.f32 %v1218_v44, 0.0  ;;  %v8540_v27 = vpop.permute.xlu0 %1010 }
 0x1aa   : > { %v1523_v2 = vmax.f32 %v1311_v43, 0.0  ;;  %v1562_v10 = vmax.f32 %v1220_v48, 0.0  ;;  %v1315_v55 = vadd.f32 %v1314_v14, %v8494_v33  ;;  %v8542_v24 = vpop.permute.xlu1 %1005 }
 0x1ab   : > { %v1528_v62 = vmax.f32 %v1313_v34, 0.0  ;;  %v1563_v0 = vmax.f32 %v1222_v12, 0.0 }
 0x1ac   : > { %v6284_v5 = vpack.c.bf16 %v1562_v10, %v1556_v45  ;;  %v1529_v7 = vmax.f32 %v1315_v55, 0.0 }
 0x1ad   : > { %v6308_v18 = vpack.c.bf16 %v1528_v62, %v1522_v36  ;;  %v6282_v17 = vpack.c.bf16 %v1563_v0, %v1557_v16  ;;  %v1225_v22 = vpop.f32.mrb[16].mxu0 }
 0x1ae   : > { %v6306_v28 = vpack.c.bf16 %v1529_v7, %v1523_v2  ;;  %v1226_v9 = vadd.f32 %v1225_v22, %v8530_v13  ;;  %v1318_v31 = vpop.f32.mrb[4].mxu1  ;;  %v1227_v25 = vpop.f32.mrb[17].mxu0 }
 0x1af   : > { %v1319_v29 = vadd.f32 %v1318_v31, %v8500_v6  ;;  %v1228_v19 = vadd.f32 %v1227_v25, %v8530_v13  ;;  %v1320_v38 = vpop.f32.mrb[5].mxu1  ;;  %v1229_v20 = vpop.f32.mrb[18].mxu0  ;;  %6283 = vmatprep.subr.bf16.mxu1 %v6282_v17 }
 0x1b0   : > { %v1321_v40 = vadd.f32 %v1320_v38, %v8500_v6  ;;  %v1230_v52 = vadd.f32 %v1229_v20, %v8528_v61  ;;  %v1322_v58 = vpop.f32.mrb[6].mxu1  ;;  %6307 = vmatprep.subr.bf16.mxu0 %v6306_v28  ;;  %v1231_v30 = vpop.f32.mrb[19].mxu0  ;;  %6285 = vmatpush1.bf16.msra.mxu1 %v6284_v5  ;;  %v1568_v39 = vmax.f32 %v1226_v9, 0.0 }
 0x1b1   : > { %v1534_v63 = vmax.f32 %v1319_v29, 0.0  ;;  %v1323_v35 = vadd.f32 %v1322_v58, %v8503_v15  ;;  %v1232_v46 = vadd.f32 %v1231_v30, %v8528_v61  ;;  %v1324_v53 = vpop.f32.mrb[7].mxu1  ;;  %6309 = vmatpush1.bf16.msra.mxu0 %v6308_v18  ;;  %v1569_v3 = vmax.f32 %v1228_v19, 0.0  ;;  %v8552_v22 = vpop.permute.xlu0 %1020 }
 0x1b2   : > { %v1535_v42 = vmax.f32 %v1321_v40, 0.0  ;;  %v1574_v49 = vmax.f32 %v1230_v52, 0.0  ;;  %v1325_v59 = vadd.f32 %v1324_v53, %v8503_v15  ;;  %v8554_v25 = vpop.permute.xlu1 %1015 }
 0x1b3   : > { %v1540_v60 = vmax.f32 %v1323_v35, 0.0  ;;  %v1575_v8 = vmax.f32 %v1232_v46, 0.0 }
 0x1b4   : > { %v6288_v47 = vpack.c.bf16 %v1574_v49, %v1568_v39  ;;  %v1541_v4 = vmax.f32 %v1325_v59, 0.0 }
 0x1b5   : > { %v6312_v11 = vpack.c.bf16 %v1540_v60, %v1534_v63  ;;  %v6286_v26 = vpack.c.bf16 %v1575_v8, %v1569_v3  ;;  %v1235_v32 = vpop.f32.mrb[20].mxu0 }
 0x1b6   : > { %v6310_v44 = vpack.c.bf16 %v1541_v4, %v1535_v42  ;;  %v1236_v23 = vadd.f32 %v1235_v32, %v8542_v24  ;;  %v1328_v41 = vpop.f32.mrb[8].mxu1  ;;  %v1237_v43 = vpop.f32.mrb[21].mxu0 }
 0x1b7   : > { %v1329_v48 = vadd.f32 %v1328_v41, %v8508_v37  ;;  %v1238_v50 = vadd.f32 %v1237_v43, %v8542_v24  ;;  %v1330_v51 = vpop.f32.mrb[9].mxu1  ;;  %v1239_v36 = vpop.f32.mrb[22].mxu0  ;;  %6287 = vmatprep.subr.bf16.mxu1 %v6286_v26 }
 0x1b8   : > { %v1331_v34 = vadd.f32 %v1330_v51, %v8508_v37  ;;  %v1240_v12 = vadd.f32 %v1239_v36, %v8540_v27  ;;  %v1332_v14 = vpop.f32.mrb[10].mxu1  ;;  %6311 = vmatprep.subr.bf16.mxu0 %v6310_v44  ;;  %v1241_v45 = vpop.f32.mrb[23].mxu0  ;;  %6289 = vmatpush1.bf16.msra.mxu1 %v6288_v47  ;;  %v1580_v16 = vmax.f32 %v1236_v23, 0.0 }
 0x1b9   : > { %v1333_v2 = vadd.f32 %v1332_v14, %v8510_v56  ;;  %v1242_v10 = vadd.f32 %v1241_v45, %v8540_v27  ;;  %v1334_v55 = vpop.f32.mrb[11].mxu1  ;;  %6313 = vmatpush1.bf16.msra.mxu0 %v6312_v11  ;;  %v1546_v5 = vmax.f32 %v1329_v48, 0.0  ;;  %v1581_v7 = vmax.f32 %v1238_v50, 0.0  ;;  %v8564_v23 = vpop.permute.xlu0 %1030 }
 0x1ba   : > { %v1586_v62 = vmax.f32 %v1240_v12, 0.0  ;;  %v1335_v0 = vadd.f32 %v1334_v55, %v8510_v56  ;;  %v1547_v28 = vmax.f32 %v1331_v34, 0.0  ;;  %v8566_v50 = vpop.permute.xlu1 %1025 }
 0x1bb   : > { %v1552_v18 = vmax.f32 %v1333_v2, 0.0  ;;  %v1587_v17 = vmax.f32 %v1242_v10, 0.0 }
 0x1bc   : > { %v6292_v9 = vpack.c.bf16 %v1586_v62, %v1580_v16  ;;  %v1553_v31 = vmax.f32 %v1335_v0, 0.0 }
 0x1bd   : > { %v6316_v29 = vpack.c.bf16 %v1552_v18, %v1546_v5  ;;  %v6290_v19 = vpack.c.bf16 %v1587_v17, %v1581_v7  ;;  %v1245_v38 = vpop.f32.mrb[24].mxu0 }
 0x1be   : > { %v6314_v20 = vpack.c.bf16 %v1553_v31, %v1547_v28  ;;  %v1246_v40 = vadd.f32 %v1245_v38, %v8554_v25  ;;  %v1338_v52 = vpop.f32.mrb[12].mxu1  ;;  %v1247_v58 = vpop.f32.mrb[25].mxu0 }
 0x1bf   : > { %v1339_v30 = vadd.f32 %v1338_v52, %v8518_v21  ;;  %v1248_v63 = vadd.f32 %v1247_v58, %v8554_v25  ;;  %v1340_v35 = vpop.f32.mrb[13].mxu1  ;;  %v1249_v46 = vpop.f32.mrb[26].mxu0  ;;  %6291 = vmatprep.subr.bf16.mxu1 %v6290_v19 }
 0x1c0   : > { %v1341_v53 = vadd.f32 %v1340_v35, %v8518_v21  ;;  %v1250_v39 = vadd.f32 %v1249_v46, %v8552_v22  ;;  %v1342_v42 = vpop.f32.mrb[14].mxu1  ;;  %6315 = vmatprep.subr.bf16.mxu0 %v6314_v20  ;;  %v1251_v49 = vpop.f32.mrb[27].mxu0  ;;  %6293 = vmatpush1.bf16.msra.mxu1 %v6292_v9  ;;  %v1592_v8 = vmax.f32 %v1246_v40, 0.0 }
 0x1c1   : > { %v1343_v59 = vadd.f32 %v1342_v42, %v8516_v1  ;;  %v1252_v3 = vadd.f32 %v1251_v49, %v8552_v22  ;;  %v1344_v60 = vpop.f32.mrb[15].mxu1  ;;  %6317 = vmatpush1.bf16.msra.mxu0 %v6316_v29  ;;  %v1558_v11 = vmax.f32 %v1339_v30, 0.0  ;;  %v1593_v26 = vmax.f32 %v1248_v63, 0.0  ;;  %v8576_v58 = vpop.permute.xlu0 %1040 }
 0x1c2   : > { %v1598_v47 = vmax.f32 %v1250_v39, 0.0  ;;  %v1345_v4 = vadd.f32 %v1344_v60, %v8516_v1  ;;  %v1559_v41 = vmax.f32 %v1341_v53, 0.0  ;;  %v8578_v46 = vpop.permute.xlu1 %1035 }
 0x1c3   : > { %v1564_v32 = vmax.f32 %v1343_v59, 0.0  ;;  %v1599_v44 = vmax.f32 %v1252_v3, 0.0 }
 0x1c4   : > { %v6296_v43 = vpack.c.bf16 %v1598_v47, %v1592_v8  ;;  %v1565_v48 = vmax.f32 %v1345_v4, 0.0 }
 0x1c5   : > { %v6320_v51 = vpack.c.bf16 %v1564_v32, %v1558_v11  ;;  %v6294_v36 = vpack.c.bf16 %v1599_v44, %v1593_v26  ;;  %v1255_v34 = vpop.f32.mrb[28].mxu0 }
 0x1c6   : > { %v6318_v12 = vpack.c.bf16 %v1565_v48, %v1559_v41  ;;  %v1256_v14 = vadd.f32 %v1255_v34, %v8566_v50  ;;  %v1348_v45 = vpop.f32.mrb[16].mxu1  ;;  %v1257_v2 = vpop.f32.mrb[29].mxu0 }
 0x1c7   : > { %v1349_v10 = vadd.f32 %v1348_v45, %v8530_v13  ;;  %v1258_v55 = vadd.f32 %v1257_v2, %v8566_v50  ;;  %v1350_v16 = vpop.f32.mrb[17].mxu1  ;;  %v1259_v62 = vpop.f32.mrb[30].mxu0  ;;  %6295 = vmatprep.subr.bf16.mxu1 %v6294_v36 }
 0x1c8   : > { %v1351_v0 = vadd.f32 %v1350_v16, %v8530_v13  ;;  %v1260_v5 = vadd.f32 %v1259_v62, %v8564_v23  ;;  %v1352_v7 = vpop.f32.mrb[18].mxu1  ;;  %6319 = vmatprep.subr.bf16.mxu0 %v6318_v12  ;;  %v1261_v18 = vpop.f32.mrb[31].mxu0  ;;  %6297 = vmatpush1.bf16.msra.mxu1 %v6296_v43  ;;  %v1604_v31 = vmax.f32 %v1256_v14, 0.0 }
 0x1c9   : > { %v1353_v17 = vadd.f32 %v1352_v7, %v8528_v61  ;;  %v1262_v28 = vadd.f32 %v1261_v18, %v8564_v23  ;;  %v1354_v9 = vpop.f32.mrb[19].mxu1  ;;  %6321 = vmatpush1.bf16.msra.mxu0 %v6320_v51  ;;  %v1570_v38 = vmax.f32 %v1349_v10, 0.0  ;;  %v1605_v20 = vmax.f32 %v1258_v55, 0.0 }
 0x1ca   : > { %v1610_v29 = vmax.f32 %v1260_v5, 0.0  ;;  %v1355_v19 = vadd.f32 %v1354_v9, %v8528_v61  ;;  %v1571_v30 = vmax.f32 %v1351_v0, 0.0 }
 0x1cb   : > { %v1576_v40 = vmax.f32 %v1353_v17, 0.0  ;;  %v1611_v52 = vmax.f32 %v1262_v28, 0.0 }
 0x1cc   : > { %v6300_v63 = vpack.c.bf16 %v1610_v29, %v1604_v31  ;;  %v1577_v35 = vmax.f32 %v1355_v19, 0.0 }
 0x1cd   : > { %v6324_v53 = vpack.c.bf16 %v1576_v40, %v1570_v38  ;;  %v6298_v39 = vpack.c.bf16 %v1611_v52, %v1605_v20  ;;  %v1265_v42 = vpop.f32.mrb[32].mxu0 }
 0x1ce   : > { %v6322_v49 = vpack.c.bf16 %v1577_v35, %v1571_v30  ;;  %v1266_v59 = vadd.f32 %v1265_v42, %v8578_v46  ;;  %v1358_v3 = vpop.f32.mrb[20].mxu1  ;;  %v1267_v60 = vpop.f32.mrb[33].mxu0 }
 0x1cf   : > { %v1359_v8 = vadd.f32 %v1358_v3, %v8542_v24  ;;  %v1268_v47 = vadd.f32 %v1267_v60, %v8578_v46  ;;  %v1360_v4 = vpop.f32.mrb[21].mxu1  ;;  %v1269_v11 = vpop.f32.mrb[34].mxu0  ;;  %6299 = vmatprep.subr.bf16.mxu1 %v6298_v39  ;;  %v8603_v39 = vld [vmem:[%s12080_s3 + $0x18] sm:$0xff] }
 0x1d0   : > { %v1361_v26 = vadd.f32 %v1360_v4, %v8542_v24  ;;  %v1270_v32 = vadd.f32 %v1269_v11, %v8576_v58  ;;  %v1362_v44 = vpop.f32.mrb[22].mxu1  ;;  %6323 = vmatprep.subr.bf16.mxu0 %v6322_v49  ;;  %v1271_v41 = vpop.f32.mrb[35].mxu0  ;;  %6301 = vmatpush1.bf16.msra.mxu1 %v6300_v63  ;;  %v1616_v36 = vmax.f32 %v1266_v59, 0.0  ;;  %v8596_v63 = vld [vmem:[%s12080_s3] sm:$0xff] }
 0x1d1   : > { %v1363_v43 = vadd.f32 %v1362_v44, %v8540_v27  ;;  %v1272_v48 = vadd.f32 %v1271_v41, %v8576_v58  ;;  %v1364_v51 = vpop.f32.mrb[23].mxu1  ;;  %6325 = vmatpush1.bf16.msra.mxu0 %v6324_v53  ;;  %v1582_v14 = vmax.f32 %v1359_v8, 0.0  ;;  %v1617_v45 = vmax.f32 %v1268_v47, 0.0 }
 0x1d2   : > { %v1622_v34 = vmax.f32 %v1270_v32, 0.0  ;;  %v1365_v12 = vadd.f32 %v1364_v51, %v8540_v27  ;;  %v1583_v55 = vmax.f32 %v1361_v26, 0.0 }
 0x1d3   : > { %v1588_v2 = vmax.f32 %v1363_v43, 0.0  ;;  %v1623_v10 = vmax.f32 %v1272_v48, 0.0 }
 0x1d4   : > { %v6304_v16 = vpack.c.bf16 %v1622_v34, %v1616_v36  ;;  %v1589_v62 = vmax.f32 %v1365_v12, 0.0  ;;  %v8618_v34 = vld [vmem:[%s12080_s3 + $0x28] sm:$0xff] }
 0x1d5   : > { %v6328_v0 = vpack.c.bf16 %v1588_v2, %v1582_v14  ;;  %v6302_v5 = vpack.c.bf16 %v1623_v10, %v1617_v45  ;;  %v1431_v7 = vpop.f32.mrb[36].mxu0 }
 0x1d6   : > { %v6326_v18 = vpack.c.bf16 %v1589_v62, %v1583_v55  ;;  %v1368_v17 = vpop.f32.mrb[24].mxu1  ;;  %v1432_v28 = vadd.f32 %v1431_v7, %v8492_v54  ;;  %v1433_v9 = vpop.f32.mrb[37].mxu0 }
 0x1d7   : > { %v1369_v31 = vadd.f32 %v1368_v17, %v8554_v25  ;;  %v1370_v29 = vpop.f32.mrb[25].mxu1  ;;  %v1434_v19 = vadd.f32 %v1433_v9, %v8492_v54  ;;  %v1435_v38 = vpop.f32.mrb[38].mxu0  ;;  %6303 = vmatprep.subr.bf16.mxu1 %v6302_v5 }
 0x1d8   : > { %v1371_v20 = vadd.f32 %v1370_v29, %v8554_v25  ;;  %v1372_v40 = vpop.f32.mrb[26].mxu1  ;;  %v1436_v52 = vadd.f32 %v1435_v38, %v8494_v33  ;;  %6327 = vmatprep.subr.bf16.mxu0 %v6326_v18  ;;  %v1437_v30 = vpop.f32.mrb[39].mxu0  ;;  %6305 = vmatpush1.bf16.msra.mxu1 %v6304_v16  ;;  %v1524_v42 = vmax.f32 %v1432_v28, 0.0  ;;  %v8637_v18 = vld [vmem:[%s12080_s3 + $0x38] sm:$0xff] }
 0x1d9   : > { %v1373_v35 = vadd.f32 %v1372_v40, %v8552_v22  ;;  %v1374_v53 = vpop.f32.mrb[27].mxu1  ;;  %v1438_v54 = vadd.f32 %v1437_v30, %v8494_v33  ;;  %6329 = vmatpush1.bf16.msra.mxu0 %v6328_v0  ;;  %v1594_v3 = vmax.f32 %v1369_v31, 0.0  ;;  %v1525_v60 = vmax.f32 %v1434_v19, 0.0  ;;  %v8612_v33 = vld [vmem:[%s12080_s3 + $0x10] sm:$0xff]  ;;  %v8628_v0 = vld [vmem:[%s12080_s3 + $0x20] sm:$0xff] }
 0x1da   : > { %v1530_v49 = vmax.f32 %v1436_v52, 0.0  ;;  %v1375_v59 = vadd.f32 %v1374_v53, %v8552_v22  ;;  %v1595_v4 = vmax.f32 %v1371_v20, 0.0  ;;  %v8646_v52 = vld [vmem:[%s12080_s3 + $0x30] sm:$0xff] }
 0x1db   : > { %v1600_v8 = vmax.f32 %v1373_v35, 0.0  ;;  %v1531_v47 = vmax.f32 %v1438_v54, 0.0  ;;  %2360 = vmatmul.mubr.f32.vlgmr.msra.gmra.mrb[36].mxu1 %v8596_v63 }
 0x1dc   : > { %v6344_v11 = vpack.c.bf16 %v1530_v49, %v1524_v42  ;;  %v1601_v26 = vmax.f32 %v1375_v59, 0.0  ;;  %6022 = vmatprep.mubr.msk.f32.mxu1 %vm2240_vm3, %v8603_v39 }
 0x1dd   : > { %v6332_v32 = vpack.c.bf16 %v1600_v8, %v1594_v3  ;;  %v6342_v44 = vpack.c.bf16 %v1531_v47, %v1525_v60  ;;  %v1441_v41 = vpop.f32.mrb[40].mxu0  ;;  %v8652_v3 = vld [vmem:[%s12080_s3 + $0x48] sm:$0xff] }
 0x1de   : > { %v6330_v43 = vpack.c.bf16 %v1601_v26, %v1595_v4  ;;  %v1378_v48 = vpop.f32.mrb[28].mxu1  ;;  %v1442_v51 = vadd.f32 %v1441_v41, %v8500_v6  ;;  %v1443_v36 = vpop.f32.mrb[41].mxu0  ;;  %v8662_v41 = vld [vmem:[%s12080_s3 + $0x40] sm:$0xff] }
 0x1df   : > { %v1379_v12 = vadd.f32 %v1378_v48, %v8566_v50  ;;  %v1380_v14 = vpop.f32.mrb[29].mxu1  ;;  %v1444_v45 = vadd.f32 %v1443_v36, %v8500_v6  ;;  %v1445_v2 = vpop.f32.mrb[42].mxu0  ;;  %2366 = vmatmul.mubr.f32.gmra.mrb[38].mxu1 %v8612_v33  ;;  %6343 = vmatprep.subr.bf16.mxu1 %v6342_v44 }
 0x1e0   : > { %v1381_v10 = vadd.f32 %v1380_v14, %v8566_v50  ;;  %v1382_v55 = vpop.f32.mrb[30].mxu1  ;;  %v1446_v16 = vadd.f32 %v1445_v2, %v8503_v15  ;;  %6331 = vmatprep.subr.bf16.mxu0 %v6330_v43  ;;  %v1447_v62 = vpop.f32.mrb[43].mxu0  ;;  %6345 = vmatpush1.bf16.msra.mxu1 %v6344_v11  ;;  %v1536_v17 = vmax.f32 %v1442_v51, 0.0  ;;  %v8671_v51 = vld [vmem:[%s12080_s3 + $0x58] sm:$0xff] }
 0x1e1   : > { %v1383_v5 = vadd.f32 %v1382_v55, %v8564_v23  ;;  %v1384_v6 = vpop.f32.mrb[31].mxu1  ;;  %v1448_v7 = vadd.f32 %v1447_v62, %v8503_v15  ;;  %6333 = vmatpush1.bf16.msra.mxu0 %v6332_v32  ;;  %6023 = vmatprep.mubr.msk.f32.mxu1 %vm2240_vm3, %v8618_v34  ;;  %v1606_v31 = vmax.f32 %v1379_v12, 0.0  ;;  %v1537_v29 = vmax.f32 %v1444_v45, 0.0 }
 0x1e2   : > { %v1542_v28 = vmax.f32 %v1446_v16, 0.0  ;;  %v1385_v9 = vadd.f32 %v1384_v6, %v8564_v23  ;;  %v1607_v15 = vmax.f32 %v1381_v10, 0.0  ;;  %v1671_v16 = vld [vmem:[%s12081_s4 + $0x38] sm:$0xff] }
 0x1e3   : > { %v1612_v19 = vmax.f32 %v1383_v5, 0.0  ;;  %v1543_v38 = vmax.f32 %v1448_v7, 0.0  ;;  %2372 = vmatmul.mubr.f32.gmra.mrb[40].mxu1 %v8628_v0  ;;  %v8686_v7 = vld [vmem:[%s12080_s3 + $0x50] sm:$0xff] }
 0x1e4   : > { %v6348_v20 = vpack.c.bf16 %v1542_v28, %v1536_v17  ;;  %v1613_v40 = vmax.f32 %v1385_v9, 0.0  ;;  %6024 = vmatprep.mubr.msk.f32.mxu1 %vm2240_vm3, %v8637_v18 }
 0x1e5   : > { %v6336_v30 = vpack.c.bf16 %v1612_v19, %v1606_v31  ;;  %v6346_v35 = vpack.c.bf16 %v1543_v38, %v1537_v29  ;;  %v1451_v53 = vpop.f32.mrb[44].mxu0  ;;  %v8692_v38 = vld [vmem:[%s12080_s3 + $0x68] sm:$0xff] }
 0x1e6   : > { %v6334_v54 = vpack.c.bf16 %v1613_v40, %v1607_v15  ;;  %v1388_v42 = vpop.f32.mrb[32].mxu1  ;;  %v1452_v49 = vadd.f32 %v1451_v53, %v8508_v37  ;;  %v1453_v59 = vpop.f32.mrb[45].mxu0  ;;  %v1670_v40 = vld [vmem:[%s12081_s4 + $0x30] sm:$0xff]  ;;  %v1677_v53 = vld [vmem:[%s12081_s4 + $0x68] sm:$0xff] }
 0x1e7   : > { %v1389_v60 = vadd.f32 %v1388_v42, %v8578_v46  ;;  %v1390_v8 = vpop.f32.mrb[33].mxu1  ;;  %v1454_v47 = vadd.f32 %v1453_v59, %v8508_v37  ;;  %v1455_v4 = vpop.f32.mrb[46].mxu0  ;;  %2378 = vmatmul.mubr.f32.gmra.mrb[42].mxu1 %v8646_v52  ;;  %6347 = vmatprep.subr.bf16.mxu1 %v6346_v35 }
 0x1e8   : > { %v1391_v11 = vadd.f32 %v1390_v8, %v8578_v46  ;;  %v1392_v26 = vpop.f32.mrb[34].mxu1  ;;  %v1456_v32 = vadd.f32 %v1455_v4, %v8510_v56  ;;  %6335 = vmatprep.subr.bf16.mxu0 %v6334_v54  ;;  %v1457_v44 = vpop.f32.mrb[47].mxu0  ;;  %6349 = vmatpush1.bf16.msra.mxu1 %v6348_v20  ;;  %v1548_v36 = vmax.f32 %v1452_v49, 0.0  ;;  %v1664_v20 = vld [vmem:[%s12081_s4] sm:$0xff]  ;;  %v1683_v54 = vld [vmem:[%s12081_s4 + $0x98] sm:$0xff] }
 0x1e9   : > { %v1393_v43 = vadd.f32 %v1392_v26, %v8576_v58  ;;  %v1394_v37 = vpop.f32.mrb[35].mxu1  ;;  %v1458_v48 = vadd.f32 %v1457_v44, %v8510_v56  ;;  %6337 = vmatpush1.bf16.msra.mxu0 %v6336_v30  ;;  %6025 = vmatprep.mubr.msk.f32.mxu1 %vm2240_vm3, %v8652_v3  ;;  %v1618_v45 = vmax.f32 %v1389_v60, 0.0  ;;  %v1549_v2 = vmax.f32 %v1454_v47, 0.0  ;;  %v1665_v56 = vld [vmem:[%s12081_s4 + $0x8] sm:$0xff]  ;;  %v8720_v60 = vld [vmem:[%s12080_s3 + $0x78] sm:$0xff]  ;;  %v1682_v44 = vld [vmem:[%s12081_s4 + $0x90] sm:$0xff] }
 0x1ea   : > { %v1554_v12 = vmax.f32 %v1456_v32, 0.0  ;;  %v1395_v14 = vadd.f32 %v1394_v37, %v8576_v58  ;;  %v1619_v62 = vmax.f32 %v1391_v11, 0.0  ;;  %v6378_v15 = vpack.c.bf16 %v1671_v16, %v1665_v56  ;;  %v8735_v37 = vld [vmem:[%s12080_s3 + $0x70] sm:$0xff] }
 0x1eb   : > { %v1624_v10 = vmax.f32 %v1393_v43, 0.0  ;;  %v1555_v55 = vmax.f32 %v1458_v48, 0.0  ;;  %2384 = vmatmul.mubr.f32.gmra.mrb[44].mxu1 %v8662_v41  ;;  %v6380_v8 = vpack.c.bf16 %v1670_v40, %v1664_v20  ;;  %v6382_v11 = vpack.c.bf16 %v1683_v54, %v1677_v53  ;;  %v1689_v48 = vld [vmem:[%s12081_s4 + $0xc8] sm:$0xff]  ;;  %v1706_v53 = vld [vmem:[%s12081_s4 + $0x150] sm:$0xff] }
 0x1ec   : > { %v6352_v5 = vpack.c.bf16 %v1554_v12, %v1548_v36  ;;  %v1625_v6 = vmax.f32 %v1395_v14, 0.0  ;;  %6026 = vmatprep.mubr.msk.f32.mxu1 %vm2240_vm3, %v8671_v51  ;;  %v1695_v36 = vld [vmem:[%s12081_s4 + $0xf8] sm:$0xff]  ;;  %v1701_v20 = vld [vmem:[%s12081_s4 + $0x128] sm:$0xff] }
 0x1ed   : > { %v6340_v17 = vpack.c.bf16 %v1624_v10, %v1618_v45  ;;  %v6350_v28 = vpack.c.bf16 %v1555_v55, %v1549_v2  ;;  %v1461_v9 = vpop.f32.mrb[48].mxu0  ;;  %v8748_v45 = vld [vmem:[%s12080_s3 + $0x88] sm:$0xff] }
 0x1ee   : > { %v6338_v31 = vpack.c.bf16 %v1625_v6, %v1619_v62  ;;  %v1462_v29 = vadd.f32 %v1461_v9, %v8518_v21  ;;  %v1463_v19 = vpop.f32.mrb[49].mxu0  ;;  %v6386_v62 = vpack.c.bf16 %v1695_v36, %v1689_v48  ;;  %v1694_v6 = vld [vmem:[%s12081_s4 + $0xf0] sm:$0xff]  ;;  %v1712_v36 = vld [vmem:[%s12081_s4 + $0x180] sm:$0xff] }
 0x1ef   : > { %v1464_v30 = vadd.f32 %v1463_v19, %v8518_v21  ;;  %v1465_v35 = vpop.f32.mrb[50].mxu0  ;;  %2390 = vmatmul.mubr.f32.gmra.mrb[46].mxu1 %v8686_v7  ;;  %6351 = vmatprep.subr.bf16.mxu1 %v6350_v28  ;;  %v8712_v21 = vld [vmem:[%s12080_s3 + $0x60] sm:$0xff] }
 0x1f0   : > { %v1466_v42 = vadd.f32 %v1465_v35, %v8516_v1  ;;  %6339 = vmatprep.subr.bf16.mxu0 %v6338_v31  ;;  %v1467_v49 = vpop.f32.mrb[51].mxu0  ;;  %6353 = vmatpush1.bf16.msra.mxu1 %v6352_v5  ;;  %v1560_v47 = vmax.f32 %v1462_v29, 0.0  ;;  %v1688_v5 = vld [vmem:[%s12081_s4 + $0xc0] sm:$0xff]  ;;  %v8772_v31 = vld [vmem:[%s12080_s3 + $0x98] sm:$0xff] }
 0x1f1   : > { %v1468_v59 = vadd.f32 %v1467_v49, %v8516_v1  ;;  %6341 = vmatpush1.bf16.msra.mxu0 %v6340_v17  ;;  %6027 = vmatprep.mubr.msk.f32.mxu1 %vm2240_vm3, %v8692_v38  ;;  %v1561_v26 = vmax.f32 %v1464_v30, 0.0  ;;  %v1676_v1 = vld [vmem:[%s12081_s4 + $0x60] sm:$0xff]  ;;  %v1713_v49 = vld [vmem:[%s12081_s4 + $0x188] sm:$0xff] }
 0x1f2   : > { %v1566_v4 = vmax.f32 %v1466_v42, 0.0  ;;  %6379 = vmatprep.subr.bf16.mxu0 %v6378_v15  ;;  %v6384_v55 = vpack.c.bf16 %v1682_v44, %v1676_v1  ;;  %v6388_v15 = vpack.c.bf16 %v1694_v6, %v1688_v5  ;;  %v1700_v35 = vld [vmem:[%s12081_s4 + $0x120] sm:$0xff]  ;;  %v8794_v42 = vld [vmem:[%s12080_s3 + $0x90] sm:$0xff]  ;;  %v1725_v5 = vld [vmem:[%s12081_s4 + $0x1e8] sm:$0xff] }
 0x1f3   : > { %v1567_v32 = vmax.f32 %v1468_v59, 0.0  ;;  %2396 = vmatmul.mubr.f32.gmra.mrb[48].mxu1 %v8712_v21  ;;  %v1719_v59 = vld [vmem:[%s12081_s4 + $0x1b8] sm:$0xff]  ;;  %v6392_v1 = vpack.c.bf16 %v1706_v53, %v1700_v35 }
 0x1f4   : > { %v6356_v43 = vpack.c.bf16 %v1566_v4, %v1560_v47  ;;  %6028 = vmatprep.mubr.msk.f32.mxu1 %vm2240_vm3, %v8720_v60  ;;  %2533 = vmatmul.mubr.f32.vlgmr.msra.gmra.mrb[72].mxu0 %v8596_v63  ;;  %v8806_v4 = vld [vmem:[%s12080_s3 + $0xa8] sm:$0xff]  ;;  %v6394_v48 = vpack.c.bf16 %v1719_v59, %v1713_v49 }
 0x1f5   : > { %v6354_v12 = vpack.c.bf16 %v1567_v32, %v1561_v26  ;;  %v1471_v14 = vpop.f32.mrb[52].mxu0  ;;  %6040 = vmatprep.mubr.msk.f32.mxu0 %vm2240_vm3, %v8603_v39  ;;  %6381 = vmatpush1.bf16.msra.mxu0 %v6380_v8 }
 0x1f6   : > { %v1472_v2 = vadd.f32 %v1471_v14, %v8530_v13  ;;  %v1473_v10 = vpop.f32.mrb[53].mxu0  ;;  %6383 = vmatprep.subr.bf16.mxu0 %v6382_v11 }
 0x1f7   : > { %v1474_v56 = vadd.f32 %v1473_v10, %v8530_v13  ;;  %v1475_v16 = vpop.f32.mrb[54].mxu0  ;;  %2402 = vmatmul.mubr.f32.gmra.mrb[50].mxu1 %v8735_v37  ;;  %6355 = vmatprep.subr.bf16.mxu1 %v6354_v12  ;;  %v8765_v13 = vld [vmem:[%s12080_s3 + $0x80] sm:$0xff]  ;;  %v1718_v12 = vld [vmem:[%s12081_s4 + $0x1b0] sm:$0xff] }
 0x1f8   : > { %v1476_v17 = vadd.f32 %v1475_v16, %v8528_v61  ;;  %v1477_v28 = vpop.f32.mrb[55].mxu0  ;;  %6357 = vmatpush1.bf16.msra.mxu1 %v6356_v43  ;;  %6029 = vmatprep.mubr.msk.f32.mxu1 %vm2240_vm3, %v8748_v45  ;;  %v1572_v29 = vmax.f32 %v1472_v2, 0.0 }
 0x1f9   : > { %v1478_v9 = vadd.f32 %v1477_v28, %v8528_v61  ;;  %2539 = vmatmul.mubr.f32.gmra.mrb[74].mxu0 %v8612_v33  ;;  %v1707_v61 = vld [vmem:[%s12081_s4 + $0x158] sm:$0xff]  ;;  %v1573_v40 = vmax.f32 %v1474_v56, 0.0  ;;  %v1724_v28 = vld [vmem:[%s12081_s4 + $0x1e0] sm:$0xff] }
 0x1fa   : > { %v1578_v19 = vmax.f32 %v1476_v17, 0.0  ;;  %6041 = vmatprep.mubr.msk.f32.mxu0 %vm2240_vm3, %v8618_v34  ;;  %6385 = vmatpush1.bf16.msra.mxu0 %v6384_v55  ;;  %v6390_v11 = vpack.c.bf16 %v1707_v61, %v1701_v20  ;;  %v8832_v55 = vld [vmem:[%s12080_s3 + $0xb8] sm:$0xff]  ;;  %v8860_v61 = vld [vmem:[%s12080_s3 + $0xc8] sm:$0xff] }
 0x1fb   : > { %v1579_v30 = vmax.f32 %v1478_v9, 0.0  ;;  %2408 = vmatmul.mubr.f32.gmra.mrb[52].mxu1 %v8765_v13  ;;  %6387 = vmatprep.subr.bf16.mxu0 %v6386_v62  ;;  %v6396_v62 = vpack.c.bf16 %v1718_v12, %v1712_v36  ;;  %v1730_v9 = vld [vmem:[%s12081_s4 + $0x210] sm:$0xff]  ;;  %v8896_v12 = vld [vmem:[%s12080_s3 + $0xe8] sm:$0xff] }
 0x1fc   : > { %v6360_v54 = vpack.c.bf16 %v1578_v19, %v1572_v29  ;;  %6030 = vmatprep.mubr.msk.f32.mxu1 %vm2240_vm3, %v8772_v31  ;;  %v8854_v19 = vld [vmem:[%s12080_s3 + $0xb0] sm:$0xff]  ;;  %v6400_v53 = vpack.c.bf16 %v1730_v9, %v1724_v28 }
 0x1fd   : > { %v6358_v8 = vpack.c.bf16 %v1579_v30, %v1573_v40  ;;  %v1481_v47 = vpop.f32.mrb[56].mxu0  ;;  %2545 = vmatmul.mubr.f32.gmra.mrb[76].mxu0 %v8628_v0 }
 0x1fe   : > { %v1482_v26 = vadd.f32 %v1481_v47, %v8542_v24  ;;  %v1483_v32 = vpop.f32.mrb[57].mxu0  ;;  %6042 = vmatprep.mubr.msk.f32.mxu0 %vm2240_vm3, %v8637_v18  ;;  %6389 = vmatpush1.bf16.msra.mxu0 %v6388_v15  ;;  %v8873_v47 = vld [vmem:[%s12080_s3 + $0xc0] sm:$0xff] }
 0x1ff   : > { %v1484_v44 = vadd.f32 %v1483_v32, %v8542_v24  ;;  %v1485_v43 = vpop.f32.mrb[58].mxu0  ;;  %2414 = vmatmul.mubr.f32.gmra.mrb[54].mxu1 %v8794_v42  ;;  %6359 = vmatprep.subr.bf16.mxu1 %v6358_v8  ;;  %v8825_v24 = vld [vmem:[%s12080_s3 + $0xa0] sm:$0xff] }
 0x200   : > { %v1486_v14 = vadd.f32 %v1485_v43, %v8540_v27  ;;  %v1487_v2 = vpop.f32.mrb[59].mxu0  ;;  %6361 = vmatpush1.bf16.msra.mxu1 %v6360_v54  ;;  %6031 = vmatprep.mubr.msk.f32.mxu1 %vm2240_vm3, %v8806_v4  ;;  %v1584_v56 = vmax.f32 %v1482_v26, 0.0 }
 0x201   : > { %v1488_v10 = vadd.f32 %v1487_v2, %v8540_v27  ;;  %2551 = vmatmul.mubr.f32.gmra.mrb[78].mxu0 %v8646_v52  ;;  %6391 = vmatprep.subr.bf16.mxu0 %v6390_v11  ;;  %v1731_v27 = vld [vmem:[%s12081_s4 + $0x218] sm:$0xff]  ;;  %v1585_v6 = vmax.f32 %v1484_v44, 0.0 }
 0x202   : > { %v1590_v16 = vmax.f32 %v1486_v14, 0.0  ;;  %6043 = vmatprep.mubr.msk.f32.mxu0 %vm2240_vm3, %v8652_v3  ;;  %6393 = vmatpush1.bf16.msra.mxu0 %v6392_v1  ;;  %v6398_v40 = vpack.c.bf16 %v1731_v27, %v1725_v5  ;;  %v8909_v5 = vld [vmem:[%s12080_s3 + $0xe0] sm:$0xff] }
 0x203   : > { %v1591_v17 = vmax.f32 %v1488_v10, 0.0  ;;  %2420 = vmatmul.mubr.f32.gmra.mrb[56].mxu1 %v8825_v24  ;;  %6395 = vmatprep.subr.bf16.mxu0 %v6394_v48 }
 0x204   : > { %v6364_v29 = vpack.c.bf16 %v1590_v16, %v1584_v56  ;;  %6032 = vmatprep.mubr.msk.f32.mxu1 %vm2240_vm3, %v8832_v55 }
 0x205   : > { %v6362_v15 = vpack.c.bf16 %v1591_v17, %v1585_v6  ;;  %v1491_v20 = vpop.f32.mrb[60].mxu0  ;;  %2557 = vmatmul.mubr.f32.gmra.mrb[80].mxu0 %v8662_v41 }
 0x206   : > { %v1492_v30 = vadd.f32 %v1491_v20, %v8554_v25  ;;  %v1493_v35 = vpop.f32.mrb[61].mxu0  ;;  %6044 = vmatprep.mubr.msk.f32.mxu0 %vm2240_vm3, %v8671_v51  ;;  %6397 = vmatpush1.bf16.msra.mxu0 %v6396_v62 }
 0x207   : > { %v1494_v54 = vadd.f32 %v1493_v35, %v8554_v25  ;;  %v1495_v49 = vpop.f32.mrb[62].mxu0  ;;  %2426 = vmatmul.mubr.f32.gmra.mrb[58].mxu1 %v8854_v19  ;;  %6363 = vmatprep.subr.bf16.mxu1 %v6362_v15  ;;  %v8880_v25 = vld [vmem:[%s12080_s3 + $0xd8] sm:$0xff] }
 0x208   : > { %v1496_v59 = vadd.f32 %v1495_v49, %v8552_v22  ;;  %v1497_v8 = vpop.f32.mrb[63].mxu0  ;;  %6365 = vmatpush1.bf16.msra.mxu1 %v6364_v29  ;;  %6033 = vmatprep.mubr.msk.f32.mxu1 %vm2240_vm3, %v8860_v61  ;;  %v1596_v26 = vmax.f32 %v1492_v30, 0.0 }
 0x209   : > { %v1498_v11 = vadd.f32 %v1497_v8, %v8552_v22  ;;  %2563 = vmatmul.mubr.f32.gmra.mrb[82].mxu0 %v8686_v7  ;;  %6399 = vmatprep.subr.bf16.mxu0 %v6398_v40  ;;  %v1597_v1 = vmax.f32 %v1494_v54, 0.0  ;;  %v8890_v22 = vld [vmem:[%s12080_s3 + $0xd0] sm:$0xff]  ;;  %v8932_v40 = vld [vmem:[%s12080_s3 + $0x108] sm:$0xff]  ;;  %v8945_v8 = vld [vmem:[%s12080_s3 + $0x100] sm:$0xff] }
 0x20a   : > { %v1602_v32 = vmax.f32 %v1496_v59, 0.0  ;;  %6045 = vmatprep.mubr.msk.f32.mxu0 %vm2240_vm3, %v8692_v38  ;;  %6401 = vmatpush1.bf16.msra.mxu0 %v6400_v53 }
 0x20b   : > { %v1603_v44 = vmax.f32 %v1498_v11, 0.0  ;;  %2432 = vmatmul.mubr.f32.gmra.mrb[60].mxu1 %v8873_v47 }
 0x20c   : > { %v6368_v43 = vpack.c.bf16 %v1602_v32, %v1596_v26  ;;  %6034 = vmatprep.mubr.msk.f32.mxu1 %vm2240_vm3, %v8880_v25 }
 0x20d   : > { %v6366_v48 = vpack.c.bf16 %v1603_v44, %v1597_v1  ;;  %v1501_v36 = vpop.f32.mrb[64].mxu0  ;;  %2569 = vmatmul.mubr.f32.gmra.mrb[84].mxu0 %v8712_v21  ;;  %v1667_v1 = vld [vmem:[%s12081_s4 + $0x18] sm:$0xff] }
 0x20e   : > { %v1502_v14 = vadd.f32 %v1501_v36, %v8566_v50  ;;  %v1503_v2 = vpop.f32.mrb[65].mxu0  ;;  %6046 = vmatprep.mubr.msk.f32.mxu0 %vm2240_vm3, %v8720_v60  ;;  %v8968_v36 = vld [vmem:[%s12080_s3 + $0x110] sm:$0xff] }
 0x20f   : > { %v1504_v10 = vadd.f32 %v1503_v2, %v8566_v50  ;;  %v1505_v56 = vpop.f32.mrb[66].mxu0  ;;  %2438 = vmatmul.mubr.f32.gmra.mrb[62].mxu1 %v8890_v22  ;;  %6367 = vmatprep.subr.bf16.mxu1 %v6366_v48  ;;  %v8916_v50 = vld [vmem:[%s12080_s3 + $0xf8] sm:$0xff] }
 0x210   : > { %v1506_v16 = vadd.f32 %v1505_v56, %v8564_v23  ;;  %v1507_v62 = vpop.f32.mrb[67].mxu0  ;;  %6369 = vmatpush1.bf16.msra.mxu1 %v6368_v43  ;;  %6035 = vmatprep.mubr.msk.f32.mxu1 %vm2240_vm3, %v8896_v12  ;;  %v1608_v6 = vmax.f32 %v1502_v14, 0.0  ;;  %v1672_v56 = vld [vmem:[%s12081_s4 + $0x40] sm:$0xff] }
 0x211   : > { %v1508_v27 = vadd.f32 %v1507_v62, %v8564_v23  ;;  %2575 = vmatmul.mubr.f32.gmra.mrb[86].mxu0 %v8735_v37  ;;  %v1609_v28 = vmax.f32 %v1504_v10, 0.0  ;;  %v8926_v23 = vld [vmem:[%s12080_s3 + $0xf0] sm:$0xff]  ;;  %v1685_v62 = vld [vmem:[%s12081_s4 + $0xa8] sm:$0xff] }
 0x212   : > { %v1614_v17 = vmax.f32 %v1506_v16, 0.0  ;;  %6047 = vmatprep.mubr.msk.f32.mxu0 %vm2240_vm3, %v8748_v45  ;;  %v1666_v10 = vld [vmem:[%s12081_s4 + $0x10] sm:$0xff]  ;;  %v1679_v16 = vld [vmem:[%s12081_s4 + $0x78] sm:$0xff] }
 0x213   : > { %v1615_v9 = vmax.f32 %v1508_v27, 0.0  ;;  %2444 = vmatmul.mubr.f32.gmra.mrb[64].mxu1 %v8909_v5  ;;  %v7794_v27 = vld [vmem:[%s12080_s3 + $0x8] sm:$0xff] }
 0x214   : > { %v6372_v29 = vpack.c.bf16 %v1614_v17, %v1608_v6  ;;  %6036 = vmatprep.mubr.msk.f32.mxu1 %vm2240_vm3, %v8916_v50  ;;  %v6572_v6 = vpack.c.bf16 %v1672_v56, %v1666_v10  ;;  %v6574_v17 = vpack.c.bf16 %v1685_v62, %v1679_v16  ;;  %v1726_v16 = vld [vmem:[%s12081_s4 + $0x1f0] sm:$0xff]  ;;  %v1749_v62 = vld [vmem:[%s12081_s4 + $0x2a8] sm:$0xff] }
 0x215   : > { %v6370_v15 = vpack.c.bf16 %v1615_v9, %v1609_v28  ;;  %v1511_v20 = vpop.f32.mrb[68].mxu0  ;;  %2581 = vmatmul.mubr.f32.gmra.mrb[88].mxu0 %v8765_v13  ;;  %v1678_v28 = vld [vmem:[%s12081_s4 + $0x70] sm:$0xff]  ;;  %v1684_v9 = vld [vmem:[%s12081_s4 + $0xa0] sm:$0xff] }
 0x216   : > { %v1512_v30 = vadd.f32 %v1511_v20, %v8578_v46  ;;  %v1513_v35 = vpop.f32.mrb[69].mxu0  ;;  %6048 = vmatprep.mubr.msk.f32.mxu0 %vm2240_vm3, %v8772_v31  ;;  %v6576_v20 = vpack.c.bf16 %v1684_v9, %v1678_v28  ;;  %v1754_v28 = vld [vmem:[%s12081_s4 + $0x2d0] sm:$0xff]  ;;  %v1739_v9 = vld [vmem:[%s12081_s4 + $0x258] sm:$0xff] }
 0x217   : > { %v1514_v53 = vadd.f32 %v1513_v35, %v8578_v46  ;;  %v1515_v54 = vpop.f32.mrb[70].mxu0  ;;  %2450 = vmatmul.mubr.f32.gmra.mrb[66].mxu1 %v8926_v23  ;;  %6371 = vmatprep.subr.bf16.mxu1 %v6370_v15  ;;  %v8952_v46 = vld [vmem:[%s12080_s3 + $0x118] sm:$0xff]  ;;  %v1697_v15 = vld [vmem:[%s12081_s4 + $0x108] sm:$0xff]  ;;  %v1690_v35 = vld [vmem:[%s12081_s4 + $0xd0] sm:$0xff] }
 0x218   : > { %v1516_v49 = vadd.f32 %v1515_v54, %v8576_v58  ;;  %v1517_v59 = vpop.f32.mrb[71].mxu0  ;;  %6373 = vmatpush1.bf16.msra.mxu1 %v6372_v29  ;;  %6037 = vmatprep.mubr.msk.f32.mxu1 %vm2240_vm3, %v8932_v40  ;;  %v1620_v26 = vmax.f32 %v1512_v30, 0.0  ;;  %v1691_v29 = vld [vmem:[%s12081_s4 + $0xd8] sm:$0xff] }
 0x219   : > { %v1518_v11 = vadd.f32 %v1517_v59, %v8576_v58  ;;  %2587 = vmatmul.mubr.f32.gmra.mrb[90].mxu0 %v8794_v42  ;;  %v1673_v58 = vld [vmem:[%s12081_s4 + $0x48] sm:$0xff]  ;;  %v1621_v44 = vmax.f32 %v1514_v53, 0.0  ;;  %v6578_v30 = vpack.c.bf16 %v1697_v15, %v1691_v29  ;;  %v1696_v53 = vld [vmem:[%s12081_s4 + $0x100] sm:$0xff]  ;;  %v1702_v59 = vld [vmem:[%s12081_s4 + $0x130] sm:$0xff] }
 0x21a   : > { %v1626_v32 = vmax.f32 %v1516_v49, 0.0  ;;  %6049 = vmatprep.mubr.msk.f32.mxu0 %vm2240_vm3, %v8806_v4  ;;  %v6570_v2 = vpack.c.bf16 %v1673_v58, %v1667_v1  ;;  %v6580_v54 = vpack.c.bf16 %v1696_v53, %v1690_v35  ;;  %v1737_v1 = vld [vmem:[%s12081_s4 + $0x248] sm:$0xff]  ;;  %v1743_v58 = vld [vmem:[%s12081_s4 + $0x278] sm:$0xff] }
 0x21b   : > { %v1627_v43 = vmax.f32 %v1518_v11, 0.0  ;;  %2456 = vmatmul.mubr.f32.gmra.mrb[68].mxu1 %v8945_v8  ;;  %v1708_v11 = vld [vmem:[%s12081_s4 + $0x160] sm:$0xff]  ;;  %v1745_v29 = vld [vmem:[%s12081_s4 + $0x288] sm:$0xff]  ;;  %v1767_v53 = vld [vmem:[%s12081_s4 + $0x338] sm:$0xff] }
 0x21c   : > { %v6376_v48 = vpack.c.bf16 %v1626_v32, %v1620_v26  ;;  %6038 = vmatprep.mubr.msk.f32.mxu1 %vm2240_vm3, %v8952_v46  ;;  %v6584_v26 = vpack.c.bf16 %v1708_v11, %v1702_v59  ;;  %v1714_v32 = vld [vmem:[%s12081_s4 + $0x190] sm:$0xff]  ;;  %v1761_v35 = vld [vmem:[%s12081_s4 + $0x308] sm:$0xff] }
 0x21d   : > { %v6374_v14 = vpack.c.bf16 %v1627_v43, %v1621_v44  ;;  %2593 = vmatmul.mubr.f32.gmra.mrb[92].mxu0 %v8825_v24  ;;  %v6402_v44 = vpack.c.bf16 %v1743_v58, %v1737_v1  ;;  %v1736_v43 = vld [vmem:[%s12081_s4 + $0x240] sm:$0xff]  ;;  %v1757_v59 = vld [vmem:[%s12081_s4 + $0x2e8] sm:$0xff] }
 0x21e   : > { %6050 = vmatprep.mubr.msk.f32.mxu0 %vm2240_vm3, %v8832_v55  ;;  %v1772_v58 = vld [vmem:[%s12081_s4 + $0x360] sm:$0xff] }
 0x21f   : > { %2462 = vmatmul.mubr.f32.gmra.mrb[70].mxu1 %v8968_v36  ;;  %6375 = vmatprep.subr.bf16.mxu1 %v6374_v14  ;;  %v1727_v14 = vld [vmem:[%s12081_s4 + $0x1f8] sm:$0xff] }
 0x220   : > { %6377 = vmatpush1.bf16.msra.mxu1 %v6376_v48  ;;  %6057 = vmatprep.mubr.msk.f32.mxu1 %vm2240_vm3, %v7794_v27  ;;  %v1742_v48 = vld [vmem:[%s12081_s4 + $0x270] sm:$0xff]  ;;  %v1755_v27 = vld [vmem:[%s12081_s4 + $0x2d8] sm:$0xff] }
 0x221   : > { %2599 = vmatmul.mubr.f32.gmra.mrb[94].mxu0 %v8854_v19  ;;  %6571 = vmatprep.subr.bf16.mxu1 %v6570_v2  ;;  %v1733_v2 = vld [vmem:[%s12081_s4 + $0x228] sm:$0xff]  ;;  %v6404_v10 = vpack.c.bf16 %v1742_v48, %v1736_v43 }
 0x222   : > { %6051 = vmatprep.mubr.msk.f32.mxu0 %vm2240_vm3, %v8860_v61  ;;  %6403 = vmatprep.subr.bf16.mxu0 %v6402_v44  ;;  %v1769_v44 = vld [vmem:[%s12081_s4 + $0x348] sm:$0xff] }
 0x223   : > { %2706 = vmatmul.mubr.f32.vlgmr.msra.gmra.mrb[72].mxu1 %v8596_v63  ;;  %v1703_v63 = vld [vmem:[%s12081_s4 + $0x138] sm:$0xff]  ;;  %6405 = vmatpush1.bf16.msra.mxu0 %v6404_v10 }
 0x224   : > { %6058 = vmatprep.mubr.msk.f32.mxu1 %vm2240_vm3, %v8603_v39  ;;  %6573 = vmatpush1.bf16.msra.mxu1 %v6572_v6  ;;  %v1709_v39 = vld [vmem:[%s12081_s4 + $0x168] sm:$0xff]  ;;  %v6406_v6 = vpack.c.bf16 %v1755_v27, %v1749_v62  ;;  %v1791_v10 = vld [vmem:[%s12081_s4 + $0x3f8] sm:$0xff]  ;;  %v1790_v62 = vld [vmem:[%s12081_s4 + $0x3f0] sm:$0xff] }
 0x225   : > { %2605 = vmatmul.mubr.f32.gmra.mrb[96].mxu0 %v8873_v47  ;;  %6575 = vmatprep.subr.bf16.mxu1 %v6574_v17  ;;  %v6582_v49 = vpack.c.bf16 %v1709_v39, %v1703_v63  ;;  %v1748_v17 = vld [vmem:[%s12081_s4 + $0x2a0] sm:$0xff]  ;;  %v6410_v63 = vpack.c.bf16 %v1767_v53, %v1761_v35  ;;  %v1775_v27 = vld [vmem:[%s12081_s4 + $0x378] sm:$0xff]  ;;  %v1793_v35 = vld [vmem:[%s12081_s4 + $0x408] sm:$0xff] }
 0x226   : > { %6052 = vmatprep.mubr.msk.f32.mxu0 %vm2240_vm3, %v8880_v25  ;;  %v6408_v15 = vpack.c.bf16 %v1754_v28, %v1748_v17  ;;  %6407 = vmatprep.subr.bf16.mxu0 %v6406_v6  ;;  %v1760_v39 = vld [vmem:[%s12081_s4 + $0x300] sm:$0xff]  ;;  %v1774_v17 = vld [vmem:[%s12081_s4 + $0x370] sm:$0xff]  ;;  %v1797_v28 = vld [vmem:[%s12081_s4 + $0x428] sm:$0xff] }
 0x227   : > { %2712 = vmatmul.mubr.f32.gmra.mrb[74].mxu1 %v8612_v33  ;;  %v1715_v33 = vld [vmem:[%s12081_s4 + $0x198] sm:$0xff] }
 0x228   : > { %6059 = vmatprep.mubr.msk.f32.mxu1 %vm2240_vm3, %v8618_v34  ;;  %6577 = vmatpush1.bf16.msra.mxu1 %v6576_v20  ;;  %v1721_v34 = vld [vmem:[%s12081_s4 + $0x1c8] sm:$0xff] }
 0x229   : > { %2611 = vmatmul.mubr.f32.gmra.mrb[98].mxu0 %v8890_v22  ;;  %6579 = vmatprep.subr.bf16.mxu1 %v6578_v30  ;;  %v1738_v30 = vld [vmem:[%s12081_s4 + $0x250] sm:$0xff] }
 0x22a   : > { %6053 = vmatprep.mubr.msk.f32.mxu0 %vm2240_vm3, %v8896_v12  ;;  %6409 = vmatpush1.bf16.msra.mxu0 %v6408_v15  ;;  %v1796_v15 = vld [vmem:[%s12081_s4 + $0x420] sm:$0xff] }
 0x22b   : > { %2718 = vmatmul.mubr.f32.gmra.mrb[76].mxu1 %v8628_v0  ;;  %v6586_v0 = vpack.c.bf16 %v1721_v34, %v1715_v33  ;;  %6411 = vmatprep.subr.bf16.mxu0 %v6410_v63  ;;  %v1750_v34 = vld [vmem:[%s12081_s4 + $0x2b0] sm:$0xff]  ;;  %v1809_v63 = vld [vmem:[%s12081_s4 + $0x488] sm:$0xff] }
 0x22c   : > { %6060 = vmatprep.mubr.msk.f32.mxu1 %vm2240_vm3, %v8637_v18  ;;  %6581 = vmatpush1.bf16.msra.mxu1 %v6580_v54  ;;  %v1720_v18 = vld [vmem:[%s12081_s4 + $0x1c0] sm:$0xff]  ;;  %v1766_v54 = vld [vmem:[%s12081_s4 + $0x330] sm:$0xff] }
 0x22d   : > { %2617 = vmatmul.mubr.f32.gmra.mrb[100].mxu0 %v8909_v5  ;;  %6583 = vmatprep.subr.bf16.mxu1 %v6582_v49  ;;  %v6588_v56 = vpack.c.bf16 %v1720_v18, %v1714_v32  ;;  %v1751_v49 = vld [vmem:[%s12081_s4 + $0x2b8] sm:$0xff]  ;;  %v6412_v11 = vpack.c.bf16 %v1766_v54, %v1760_v39 }
 0x22e   : > { %6054 = vmatprep.mubr.msk.f32.mxu0 %vm2240_vm3, %v8916_v50  ;;  %v1779_v32 = vld [vmem:[%s12081_s4 + $0x398] sm:$0xff] }
 0x22f   : > { %2724 = vmatmul.mubr.f32.gmra.mrb[78].mxu1 %v8646_v52  ;;  %v6590_v52 = vpack.c.bf16 %v1733_v2, %v1727_v14  ;;  %v1763_v18 = vld [vmem:[%s12081_s4 + $0x318] sm:$0xff]  ;;  %6413 = vmatpush1.bf16.msra.mxu0 %v6412_v11  ;;  %v1762_v14 = vld [vmem:[%s12081_s4 + $0x310] sm:$0xff]  ;;  %v1785_v2 = vld [vmem:[%s12081_s4 + $0x3c8] sm:$0xff] }
 0x230   : > { %6061 = vmatprep.mubr.msk.f32.mxu1 %vm2240_vm3, %v8652_v3  ;;  %6585 = vmatpush1.bf16.msra.mxu1 %v6584_v26  ;;  %v1732_v3 = vld [vmem:[%s12081_s4 + $0x220] sm:$0xff]  ;;  %v1773_v26 = vld [vmem:[%s12081_s4 + $0x368] sm:$0xff]  ;;  %v1815_v39 = vld [vmem:[%s12081_s4 + $0x4b8] sm:$0xff] }
 0x231   : > { %2623 = vmatmul.mubr.f32.gmra.mrb[102].mxu0 %v8926_v23  ;;  %6587 = vmatprep.subr.bf16.mxu1 %v6586_v0  ;;  %v6592_v20 = vpack.c.bf16 %v1732_v3, %v1726_v16  ;;  %v6414_v1 = vpack.c.bf16 %v1779_v32, %v1773_v26  ;;  %v1778_v0 = vld [vmem:[%s12081_s4 + $0x390] sm:$0xff]  ;;  %v1784_v16 = vld [vmem:[%s12081_s4 + $0x3c0] sm:$0xff]  ;;  %v6426_v54 = vpack.c.bf16 %v1815_v39, %v1809_v63  ;;  %v1799_v11 = vld [vmem:[%s12081_s4 + $0x438] sm:$0xff] }
 0x232   : > { %6055 = vmatprep.mubr.msk.f32.mxu0 %vm2240_vm3, %v8932_v40  ;;  %v6416_v43 = vpack.c.bf16 %v1778_v0, %v1772_v58  ;;  %v6420_v3 = vpack.c.bf16 %v1790_v62, %v1784_v16  ;;  %v1798_v32 = vld [vmem:[%s12081_s4 + $0x430] sm:$0xff]  ;;  %v1820_v58 = vld [vmem:[%s12081_s4 + $0x4e0] sm:$0xff]  ;;  %v1823_v16 = vld [vmem:[%s12081_s4 + $0x4f8] sm:$0xff] }
 0x233   : > { %2730 = vmatmul.mubr.f32.gmra.mrb[80].mxu1 %v8662_v41  ;;  %v6594_v41 = vpack.c.bf16 %v1745_v29, %v1739_v9  ;;  %6415 = vmatprep.subr.bf16.mxu0 %v6414_v1  ;;  %v1803_v9 = vld [vmem:[%s12081_s4 + $0x458] sm:$0xff]  ;;  %v1826_v0 = vld [vmem:[%s12081_s4 + $0x510] sm:$0xff]  ;;  %v1829_v62 = vld [vmem:[%s12081_s4 + $0x528] sm:$0xff] }
 0x234   : > { %6062 = vmatprep.mubr.msk.f32.mxu1 %vm2240_vm3, %v8671_v51  ;;  %6589 = vmatpush1.bf16.msra.mxu1 %v6588_v56  ;;  %v1744_v51 = vld [vmem:[%s12081_s4 + $0x280] sm:$0xff]  ;;  %v6418_v56 = vpack.c.bf16 %v1791_v10, %v1785_v2  ;;  %v6422_v29 = vpack.c.bf16 %v1803_v9, %v1797_v28  ;;  %v1833_v2 = vld [vmem:[%s12081_s4 + $0x548] sm:$0xff]  ;;  %v1839_v10 = vld [vmem:[%s12081_s4 + $0x578] sm:$0xff] }
 0x235   : > { %2629 = vmatmul.mubr.f32.gmra.mrb[104].mxu0 %v8945_v8  ;;  %6591 = vmatprep.subr.bf16.mxu1 %v6590_v52  ;;  %v6596_v33 = vpack.c.bf16 %v1744_v51, %v1738_v30  ;;  %v1781_v52 = vld [vmem:[%s12081_s4 + $0x3a8] sm:$0xff]  ;;  %v1787_v30 = vld [vmem:[%s12081_s4 + $0x3d8] sm:$0xff]  ;;  %v1786_v51 = vld [vmem:[%s12081_s4 + $0x3d0] sm:$0xff] }
 0x236   : > { %6056 = vmatprep.mubr.msk.f32.mxu0 %vm2240_vm3, %v8952_v46  ;;  %6417 = vmatpush1.bf16.msra.mxu0 %v6416_v43  ;;  %v6432_v43 = vpack.c.bf16 %v1826_v0, %v1820_v58  ;;  %v1844_v9 = vld [vmem:[%s12081_s4 + $0x5a0] sm:$0xff]  ;;  %v1853_v63 = vld [vmem:[%s12081_s4 + $0x5e8] sm:$0xff] }
 0x237   : > { %2736 = vmatmul.mubr.f32.gmra.mrb[82].mxu1 %v8686_v7  ;;  %v6598_v7 = vpack.c.bf16 %v1757_v59, %v1751_v49  ;;  %6419 = vmatprep.subr.bf16.mxu0 %v6418_v56  ;;  %v1808_v49 = vld [vmem:[%s12081_s4 + $0x480] sm:$0xff]  ;;  %v1814_v59 = vld [vmem:[%s12081_s4 + $0x4b0] sm:$0xff] }
 0x238   : > { %6063 = vmatprep.mubr.msk.f32.mxu1 %vm2240_vm3, %v8692_v38  ;;  %6593 = vmatpush1.bf16.msra.mxu1 %v6592_v20  ;;  %v1756_v38 = vld [vmem:[%s12081_s4 + $0x2e0] sm:$0xff]  ;;  %v1802_v20 = vld [vmem:[%s12081_s4 + $0x450] sm:$0xff] }
 0x239   : > { %2635 = vmatmul.mubr.f32.gmra.mrb[106].mxu0 %v8968_v36  ;;  %6595 = vmatprep.subr.bf16.mxu1 %v6594_v41  ;;  %v6600_v48 = vpack.c.bf16 %v1756_v38, %v1750_v34  ;;  %v6424_v53 = vpack.c.bf16 %v1802_v20, %v1796_v15  ;;  %v6428_v34 = vpack.c.bf16 %v1814_v59, %v1808_v49  ;;  %v1827_v38 = vld [vmem:[%s12081_s4 + $0x518] sm:$0xff]  ;;  %v1838_v56 = vld [vmem:[%s12081_s4 + $0x570] sm:$0xff] }
 0x23a   : > { %6421 = vmatpush1.bf16.msra.mxu0 %v6420_v3  ;;  %v1822_v3 = vld [vmem:[%s12081_s4 + $0x4f0] sm:$0xff] }
 0x23b   : > { %2742 = vmatmul.mubr.f32.gmra.mrb[84].mxu1 %v8712_v21  ;;  %v6602_v21 = vpack.c.bf16 %v1769_v44, %v1763_v18  ;;  %6423 = vmatprep.subr.bf16.mxu0 %v6422_v29  ;;  %v1811_v18 = vld [vmem:[%s12081_s4 + $0x498] sm:$0xff]  ;;  %v1817_v44 = vld [vmem:[%s12081_s4 + $0x4c8] sm:$0xff] }
 0x23c   : > { %6064 = vmatprep.mubr.msk.f32.mxu1 %vm2240_vm3, %v8720_v60  ;;  %6597 = vmatpush1.bf16.msra.mxu1 %v6596_v33  ;;  %v1768_v60 = vld [vmem:[%s12081_s4 + $0x340] sm:$0xff]  ;;  %v1805_v33 = vld [vmem:[%s12081_s4 + $0x468] sm:$0xff] }
 0x23d   : > { %6599 = vmatprep.subr.bf16.mxu1 %v6598_v7  ;;  %v6604_v6 = vpack.c.bf16 %v1768_v60, %v1762_v14  ;;  %v1821_v7 = vld [vmem:[%s12081_s4 + $0x4e8] sm:$0xff]  ;;  %v1810_v14 = vld [vmem:[%s12081_s4 + $0x490] sm:$0xff]  ;;  %v1832_v60 = vld [vmem:[%s12081_s4 + $0x540] sm:$0xff] }
 0x23e   : > { %6425 = vmatpush1.bf16.msra.mxu0 %v6424_v53  ;;  %v6430_v1 = vpack.c.bf16 %v1827_v38, %v1821_v7  ;;  %v1841_v29 = vld [vmem:[%s12081_s4 + $0x588] sm:$0xff] }
 0x23f   : > { %2748 = vmatmul.mubr.f32.gmra.mrb[86].mxu1 %v8735_v37  ;;  %v6606_v37 = vpack.c.bf16 %v1781_v52, %v1775_v27  ;;  %6427 = vmatprep.subr.bf16.mxu0 %v6426_v54  ;;  %v6436_v27 = vpack.c.bf16 %v1838_v56, %v1832_v60  ;;  %v1852_v54 = vld [vmem:[%s12081_s4 + $0x5e0] sm:$0xff]  ;;  %v1875_v56 = vld [vmem:[%s12081_s4 + $0x698] sm:$0xff] }
 0x240   : > { %6065 = vmatprep.mubr.msk.f32.mxu1 %vm2240_vm3, %v8748_v45  ;;  %6601 = vmatpush1.bf16.msra.mxu1 %v6600_v48  ;;  %v1780_v45 = vld [vmem:[%s12081_s4 + $0x3a0] sm:$0xff] }
 0x241   : > { %6603 = vmatprep.subr.bf16.mxu1 %v6602_v21  ;;  %v6608_v41 = vpack.c.bf16 %v1780_v45, %v1774_v17  ;;  %v6434_v21 = vpack.c.bf16 %v1839_v10, %v1833_v2  ;;  %v1851_v17 = vld [vmem:[%s12081_s4 + $0x5d8] sm:$0xff]  ;;  %v1858_v10 = vld [vmem:[%s12081_s4 + $0x610] sm:$0xff] }
 0x242   : > { %6429 = vmatpush1.bf16.msra.mxu0 %v6428_v34  ;;  %v1835_v45 = vld [vmem:[%s12081_s4 + $0x558] sm:$0xff] }
 0x243   : > { %2754 = vmatmul.mubr.f32.gmra.mrb[88].mxu1 %v8765_v13  ;;  %v6610_v13 = vpack.c.bf16 %v1793_v35, %v1787_v30  ;;  %6431 = vmatprep.subr.bf16.mxu0 %v6430_v1  ;;  %v1857_v30 = vld [vmem:[%s12081_s4 + $0x608] sm:$0xff]  ;;  %v1863_v35 = vld [vmem:[%s12081_s4 + $0x638] sm:$0xff]  ;;  %v6626_v53 = vpack.c.bf16 %v1841_v29, %v1835_v45  ;;  %v1870_v45 = vld [vmem:[%s12081_s4 + $0x670] sm:$0xff] }
 0x244   : > { %6066 = vmatprep.mubr.msk.f32.mxu1 %vm2240_vm3, %v8772_v31  ;;  %6605 = vmatpush1.bf16.msra.mxu1 %v6604_v6  ;;  %v1792_v31 = vld [vmem:[%s12081_s4 + $0x400] sm:$0xff]  ;;  %v1845_v6 = vld [vmem:[%s12081_s4 + $0x5a8] sm:$0xff] }
 0x245   : > { %6607 = vmatprep.subr.bf16.mxu1 %v6606_v37  ;;  %v6612_v26 = vpack.c.bf16 %v1792_v31, %v1786_v51  ;;  %v6438_v28 = vpack.c.bf16 %v1851_v17, %v1845_v6  ;;  %v1850_v37 = vld [vmem:[%s12081_s4 + $0x5d0] sm:$0xff]  ;;  %v1847_v51 = vld [vmem:[%s12081_s4 + $0x5b8] sm:$0xff]  ;;  %v1876_v29 = vld [vmem:[%s12081_s4 + $0x6a0] sm:$0xff] }
 0x246   : > { %6433 = vmatpush1.bf16.msra.mxu0 %v6432_v43  ;;  %v6440_v15 = vpack.c.bf16 %v1850_v37, %v1844_v9  ;;  %v1846_v31 = vld [vmem:[%s12081_s4 + $0x5b0] sm:$0xff] }
 0x247   : > { %2760 = vmatmul.mubr.f32.gmra.mrb[90].mxu1 %v8794_v42  ;;  %v6614_v42 = vpack.c.bf16 %v1805_v33, %v1799_v11  ;;  %6435 = vmatprep.subr.bf16.mxu0 %v6434_v21  ;;  %v6632_v49 = vpack.c.bf16 %v1852_v54, %v1846_v31  ;;  %v1886_v31 = vld [vmem:[%s12081_s4 + $0x6f0] sm:$0xff] }
 0x248   : > { %6067 = vmatprep.mubr.msk.f32.mxu1 %vm2240_vm3, %v8806_v4  ;;  %6609 = vmatpush1.bf16.msra.mxu1 %v6608_v41  ;;  %v1804_v4 = vld [vmem:[%s12081_s4 + $0x460] sm:$0xff]  ;;  %v6442_v41 = vpack.c.bf16 %v1863_v35, %v1857_v30  ;;  %v1887_v35 = vld [vmem:[%s12081_s4 + $0x6f8] sm:$0xff] }
 0x249   : > { %6611 = vmatprep.subr.bf16.mxu1 %v6610_v13  ;;  %v6616_v48 = vpack.c.bf16 %v1804_v4, %v1798_v32  ;;  %v6630_v13 = vpack.c.bf16 %v1853_v63, %v1847_v51 }
 0x24a   : > { %6437 = vmatpush1.bf16.msra.mxu0 %v6436_v27 }
 0x24b   : > { %2766 = vmatmul.mubr.f32.gmra.mrb[92].mxu1 %v8825_v24  ;;  %v6618_v24 = vpack.c.bf16 %v1817_v44, %v1811_v18  ;;  %6439 = vmatprep.subr.bf16.mxu0 %v6438_v28 }
 0x24c   : > { %6068 = vmatprep.mubr.msk.f32.mxu1 %vm2240_vm3, %v8832_v55  ;;  %6613 = vmatpush1.bf16.msra.mxu1 %v6612_v26  ;;  %v1816_v55 = vld [vmem:[%s12081_s4 + $0x4c0] sm:$0xff] }
 0x24d   : > { %6615 = vmatprep.subr.bf16.mxu1 %v6614_v42  ;;  %v6620_v52 = vpack.c.bf16 %v1816_v55, %v1810_v14  ;;  %v1862_v14 = vld [vmem:[%s12081_s4 + $0x630] sm:$0xff]  ;;  %v1869_v55 = vld [vmem:[%s12081_s4 + $0x668] sm:$0xff] }
 0x24e   : > { %6441 = vmatpush1.bf16.msra.mxu0 %v6440_v15  ;;  %v6446_v9 = vpack.c.bf16 %v1875_v56, %v1869_v55  ;;  %v1881_v15 = vld [vmem:[%s12081_s4 + $0x6c8] sm:$0xff] }
 0x24f   : > { %2772 = vmatmul.mubr.f32.gmra.mrb[94].mxu1 %v8854_v19  ;;  %v6622_v19 = vpack.c.bf16 %v1829_v62, %v1823_v16  ;;  %6443 = vmatprep.subr.bf16.mxu0 %v6442_v41  ;;  %v1871_v16 = vld [vmem:[%s12081_s4 + $0x678] sm:$0xff]  ;;  %v1877_v62 = vld [vmem:[%s12081_s4 + $0x6a8] sm:$0xff] }
 0x250   : > { %6069 = vmatprep.mubr.msk.f32.mxu1 %vm2240_vm3, %v8860_v61  ;;  %6617 = vmatpush1.bf16.msra.mxu1 %v6616_v48  ;;  %v1828_v61 = vld [vmem:[%s12081_s4 + $0x520] sm:$0xff]  ;;  %v6638_v37 = vpack.c.bf16 %v1877_v62, %v1871_v16 }
 0x251   : > { %6619 = vmatprep.subr.bf16.mxu1 %v6618_v24  ;;  %v6624_v20 = vpack.c.bf16 %v1828_v61, %v1822_v3  ;;  %v1856_v48 = vld [vmem:[%s12081_s4 + $0x600] sm:$0xff]  ;;  %v1874_v61 = vld [vmem:[%s12081_s4 + $0x690] sm:$0xff] }
 0x252   : > { %v1864_v24 = vld [vmem:[%s12081_s4 + $0x640] sm:$0xff]  ;;  %v6444_v6 = vpack.c.bf16 %v1862_v14, %v1856_v48  ;;  %v1895_v48 = vld [vmem:[%s12081_s4 + $0x738] sm:$0xff]  ;;  %v1901_v14 = vld [vmem:[%s12081_s4 + $0x768] sm:$0xff] }
 0x253   : > { %2778 = vmatmul.mubr.f32.gmra.mrb[96].mxu1 %v8873_v47  ;;  %v1834_v47 = vld [vmem:[%s12081_s4 + $0x550] sm:$0xff]  ;;  %v6636_v17 = vpack.c.bf16 %v1864_v24, %v1858_v10  ;;  %v1892_v16 = vld [vmem:[%s12081_s4 + $0x720] sm:$0xff] }
 0x254   : > { %6070 = vmatprep.mubr.msk.f32.mxu1 %vm2240_vm3, %v8880_v25  ;;  %6621 = vmatpush1.bf16.msra.mxu1 %v6620_v52  ;;  %v1840_v25 = vld [vmem:[%s12081_s4 + $0x580] sm:$0xff] }
 0x255   : > { %6623 = vmatprep.subr.bf16.mxu1 %v6622_v19  ;;  %v6628_v39 = vpack.c.bf16 %v1840_v25, %v1834_v47  ;;  %v1868_v19 = vld [vmem:[%s12081_s4 + $0x660] sm:$0xff]  ;;  %v1889_v47 = vld [vmem:[%s12081_s4 + $0x708] sm:$0xff] }
 0x256   : > { %v6448_v63 = vpack.c.bf16 %v1874_v61, %v1868_v19  ;;  %v1905_v61 = vld [vmem:[%s12081_s4 + $0x788] sm:$0xff] }
 0x257   : > { %2784 = vmatmul.mubr.f32.gmra.mrb[98].mxu1 %v8890_v22  ;;  %v1859_v22 = vld [vmem:[%s12081_s4 + $0x618] sm:$0xff] }
 0x258   : > { %6071 = vmatprep.mubr.msk.f32.mxu1 %vm2240_vm3, %v8896_v12  ;;  %6625 = vmatpush1.bf16.msra.mxu1 %v6624_v20  ;;  %v1865_v12 = vld [vmem:[%s12081_s4 + $0x648] sm:$0xff] }
 0x259   : > { %6627 = vmatprep.subr.bf16.mxu1 %v6626_v53  ;;  %v6634_v59 = vpack.c.bf16 %v1865_v12, %v1859_v22  ;;  %v1883_v53 = vld [vmem:[%s12081_s4 + $0x6d8] sm:$0xff]  ;;  %v6450_v22 = vpack.c.bf16 %v1887_v35, %v1881_v15 }
 0x25a   : > { %v6642_v12 = vpack.c.bf16 %v1889_v47, %v1883_v53 }
 0x25b   : > { %2790 = vmatmul.mubr.f32.gmra.mrb[100].mxu1 %v8909_v5 }
 0x25c   : > { %6072 = vmatprep.mubr.msk.f32.mxu1 %vm2240_vm3, %v8916_v50  ;;  %6629 = vmatpush1.bf16.msra.mxu1 %v6628_v39  ;;  %v6640_v39 = vpack.c.bf16 %v1876_v29, %v1870_v45  ;;  %v1907_v45 = vld [vmem:[%s12081_s4 + $0x798] sm:$0xff]  ;;  %v1913_v29 = vld [vmem:[%s12081_s4 + $0x7c8] sm:$0xff] }
 0x25d   : > { %6631 = vmatprep.subr.bf16.mxu1 %v6630_v13  ;;  %v1880_v13 = vld [vmem:[%s12081_s4 + $0x6c0] sm:$0xff] }
 0x25f   : > { %2796 = vmatmul.mubr.f32.gmra.mrb[102].mxu1 %v8926_v23 }
 0x260   : > { %6073 = vmatprep.mubr.msk.f32.mxu1 %vm2240_vm3, %v8932_v40  ;;  %6633 = vmatpush1.bf16.msra.mxu1 %v6632_v49  ;;  %v1882_v49 = vld [vmem:[%s12081_s4 + $0x6d0] sm:$0xff] }
 0x261   : > { %6635 = vmatprep.subr.bf16.mxu1 %v6634_v59  ;;  %v1888_v59 = vld [vmem:[%s12081_s4 + $0x700] sm:$0xff] }
 0x262   : > { %v6644_v56 = vpack.c.bf16 %v1888_v59, %v1882_v49  ;;  %v1923_v59 = vld [vmem:[%s12081_s4 + $0x818] sm:$0xff] }
 0x263   : > { %2802 = vmatmul.mubr.f32.gmra.mrb[104].mxu1 %v8945_v8 }
 0x264   : > { %6074 = vmatprep.mubr.msk.f32.mxu1 %vm2240_vm3, %v8952_v46 }
 0x267   : > { %2808 = vmatmul.mubr.f32.gmra.mrb[106].mxu1 %v8968_v36 }
 0x2ae   : > { %v2361_v5 = vpop.f32.mrb[36].mxu1 }
 0x2af   : > { %v2363_v50 = vpop.f32.mrb[37].mxu1 }
 0x2b2   : > { %v2367_v11 = vpop.f32.mrb[38].mxu1 }
 0x2b3   : > { %v2369_v33 = vpop.f32.mrb[39].mxu1 }
 0x2b6   : > { %v9367_v34 = vpop.f32.mrb[40].mxu1 }
 0x2b7   : > { %v9369_v26 = vpop.f32.mrb[41].mxu1 }
 0x2ba   : > { %v9371_v23 = vpop.f32.mrb[42].mxu1 }
 0x2bb   : > { %v9373_v40 = vpop.f32.mrb[43].mxu1 }
 0x2be   : > { %v9375_v32 = vpop.f32.mrb[44].mxu1 }
 0x2bf   : > { %v9377_v8 = vpop.f32.mrb[45].mxu1 }
 0x2c2   : > { %v9379_v7 = vpop.f32.mrb[46].mxu1 }
 0x2c3   : > { %v9381_v46 = vpop.f32.mrb[47].mxu1 }
 0x2c6   : > { %v9383_v36 = vpop.f32.mrb[48].mxu1 }
 0x2c7   : > { %v9385_v38 = vpop.f32.mrb[49].mxu1  ;;  %v9387_v42 = vpop.f32.mrb[72].mxu0 }
 0x2c8   : > { %v9389_v4 = vpop.f32.mrb[73].mxu0 }
 0x2ca   : > { %v9391_v1 = vpop.f32.mrb[50].mxu1 }
 0x2cb   : > { %v9393_v58 = vpop.f32.mrb[51].mxu1 }
 0x2cc   : > { %v9395_v0 = vpop.f32.mrb[74].mxu0 }
 0x2cd   : > { %v9397_v18 = vpop.f32.mrb[75].mxu0 }
 0x2ce   : > { %v9399_v44 = vpop.f32.mrb[52].mxu1 }
 0x2cf   : > { %v9401_v43 = vpop.f32.mrb[53].mxu1 }
 0x2d0   : > { %v9409_v2 = vpop.f32.mrb[76].mxu0 }
 0x2d1   : > { %v9420_v21 = vpop.f32.mrb[77].mxu0 }
 0x2d2   : > { %v2415_v60 = vpop.f32.mrb[54].mxu1 }
 0x2d3   : > { %v9431_v27 = vmax.f32 %v2361_v5, %v2415_v60  ;;  %v2417_v52 = vpop.f32.mrb[55].mxu1  ;;  %v1893_v5 = vld [vmem:[%s12081_s4 + $0x728] sm:$0xff]  ;;  %v6452_v60 = vpack.c.bf16 %v1886_v31, %v1880_v13  ;;  %v6650_v13 = vpack.c.bf16 %v1913_v29, %v1907_v45  ;;  %v1912_v31 = vld [vmem:[%s12081_s4 + $0x7c0] sm:$0xff] }
 0x2d4   : > { %v9433_v3 = vmax.f32 %v2363_v50, %v2417_v52  ;;  %v9441_v28 = vpop.f32.mrb[78].mxu0  ;;  %v1937_v45 = vld [vmem:[%s12081_s4 + $0x888] sm:$0xff] }
 0x2d5   : > { %v9452_v20 = vpop.f32.mrb[79].mxu0 }
 0x2d6   : > { %v2421_v30 = vpop.f32.mrb[56].mxu1  ;;  %2932 = vmatprep.mubr.f32.mxu0 %v9433_v3  ;;  %3289 = vmatprep.mubr.f32.mxu1 %v9433_v3 }
 0x2d7   : > { %v9465_v25 = vmax.f32 %v2367_v11, %v2421_v30  ;;  %v2423_v41 = vpop.f32.mrb[57].mxu1  ;;  %2933 = vmatmul.mubr.f32.vlgmr.msra.gmra.mrb[108].mxu0 %v9431_v27  ;;  %3290 = vmatmul.mubr.f32.vlgmr.msra.gmra.mrb[108].mxu1 %v9431_v27 }
 0x2d8   : > { %v9469_v51 = vmax.f32 %v2369_v33, %v2423_v41  ;;  %6445 = vmatpush1.bf16.msra.mxu0 %v6444_v6  ;;  %6637 = vmatpush1.bf16.msra.mxu1 %v6636_v17  ;;  %v9477_v54 = vpop.f32.mrb[80].mxu0  ;;  %v1899_v33 = vld [vmem:[%s12081_s4 + $0x758] sm:$0xff]  ;;  %v6646_v6 = vpack.c.bf16 %v1901_v14, %v1895_v48  ;;  %v1900_v17 = vld [vmem:[%s12081_s4 + $0x760] sm:$0xff] }
 0x2d9   : > { %6447 = vmatprep.subr.bf16.mxu0 %v6446_v9  ;;  %6639 = vmatprep.subr.bf16.mxu1 %v6638_v37  ;;  %v9488_v50 = vpop.f32.mrb[81].mxu0  ;;  %v6454_v52 = vpack.c.bf16 %v1899_v33, %v1893_v5  ;;  %v1911_v37 = vld [vmem:[%s12081_s4 + $0x7b8] sm:$0xff] }
 0x2da   : > { %v2427_v11 = vpop.f32.mrb[58].mxu1  ;;  %2938 = vmatprep.mubr.f32.mxu0 %v9469_v51  ;;  %3295 = vmatprep.mubr.f32.mxu1 %v9469_v51  ;;  %v1919_v5 = vld [vmem:[%s12081_s4 + $0x7f8] sm:$0xff] }
 0x2db   : > { %v9502_v10 = vmax.f32 %v9367_v34, %v2427_v11  ;;  %v2429_v24 = vpop.f32.mrb[59].mxu1  ;;  %2939 = vmatmul.mubr.f32.gmra.mrb[110].mxu0 %v9465_v25  ;;  %3296 = vmatmul.mubr.f32.gmra.mrb[110].mxu1 %v9465_v25  ;;  %v1898_v34 = vld [vmem:[%s12081_s4 + $0x750] sm:$0xff]  ;;  %v1925_v11 = vld [vmem:[%s12081_s4 + $0x828] sm:$0xff] }
 0x2dc   : > { %v9507_v55 = vmax.f32 %v9369_v26, %v2429_v24  ;;  %6449 = vmatpush1.bf16.msra.mxu0 %v6448_v63  ;;  %6641 = vmatpush1.bf16.msra.mxu1 %v6640_v39  ;;  %v9515_v62 = vpop.f32.mrb[82].mxu0  ;;  %v1894_v26 = vld [vmem:[%s12081_s4 + $0x730] sm:$0xff]  ;;  %v6456_v53 = vpack.c.bf16 %v1898_v34, %v1892_v16  ;;  %v1904_v63 = vld [vmem:[%s12081_s4 + $0x780] sm:$0xff]  ;;  %v6458_v39 = vpack.c.bf16 %v1911_v37, %v1905_v61  ;;  %v1931_v37 = vld [vmem:[%s12081_s4 + $0x858] sm:$0xff] }
 0x2dd   : > { %6451 = vmatprep.subr.bf16.mxu0 %v6450_v22  ;;  %6643 = vmatprep.subr.bf16.mxu1 %v6642_v12  ;;  %v9523_v19 = vpop.f32.mrb[83].mxu0  ;;  %v6648_v47 = vpack.c.bf16 %v1900_v17, %v1894_v26  ;;  %v1917_v12 = vld [vmem:[%s12081_s4 + $0x7e8] sm:$0xff]  ;;  %v1916_v16 = vld [vmem:[%s12081_s4 + $0x7e0] sm:$0xff] }
 0x2de   : > { %v2433_v9 = vpop.f32.mrb[60].mxu1  ;;  %2944 = vmatprep.mubr.f32.mxu0 %v9507_v55  ;;  %3301 = vmatprep.mubr.f32.mxu1 %v9507_v55  ;;  %v1924_v26 = vld [vmem:[%s12081_s4 + $0x820] sm:$0xff]  ;;  %v1929_v17 = vld [vmem:[%s12081_s4 + $0x848] sm:$0xff] }
 0x2df   : > { %v9540_v15 = vmax.f32 %v9371_v23, %v2433_v9  ;;  %v2435_v30 = vpop.f32.mrb[61].mxu1  ;;  %2945 = vmatmul.mubr.f32.gmra.mrb[112].mxu0 %v9502_v10  ;;  %3302 = vmatmul.mubr.f32.gmra.mrb[112].mxu1 %v9502_v10  ;;  %v1910_v23 = vld [vmem:[%s12081_s4 + $0x7b0] sm:$0xff]  ;;  %v1935_v9 = vld [vmem:[%s12081_s4 + $0x878] sm:$0xff] }
 0x2e0   : > { %v9545_v35 = vmax.f32 %v9373_v40, %v2435_v30  ;;  %6453 = vmatpush1.bf16.msra.mxu0 %v6452_v60  ;;  %6645 = vmatpush1.bf16.msra.mxu1 %v6644_v56  ;;  %v9547_v41 = vpop.f32.mrb[84].mxu0  ;;  %v1906_v40 = vld [vmem:[%s12081_s4 + $0x790] sm:$0xff]  ;;  %v6460_v24 = vpack.c.bf16 %v1910_v23, %v1904_v63 }
 0x2e1   : > { %6455 = vmatprep.subr.bf16.mxu0 %v6454_v52  ;;  %6647 = vmatprep.subr.bf16.mxu1 %v6646_v6  ;;  %v9561_v22 = vpop.f32.mrb[85].mxu0  ;;  %v6652_v60 = vpack.c.bf16 %v1912_v31, %v1906_v40  ;;  %v6654_v52 = vpack.c.bf16 %v1925_v11, %v1919_v5  ;;  %v1918_v6 = vld [vmem:[%s12081_s4 + $0x7f0] sm:$0xff]  ;;  %v6658_v40 = vpack.c.bf16 %v1937_v45, %v1931_v37  ;;  %v1947_v5 = vld [vmem:[%s12081_s4 + $0x8d8] sm:$0xff]  ;;  %v1948_v37 = vld [vmem:[%s12081_s4 + $0x8e0] sm:$0xff] }
 0x2e2   : > { %v2439_v49 = vpop.f32.mrb[62].mxu1  ;;  %2950 = vmatprep.mubr.f32.mxu0 %v9545_v35  ;;  %3307 = vmatprep.mubr.f32.mxu1 %v9545_v35  ;;  %v6656_v23 = vpack.c.bf16 %v1924_v26, %v1918_v6  ;;  %v1930_v31 = vld [vmem:[%s12081_s4 + $0x850] sm:$0xff]  ;;  %v1943_v11 = vld [vmem:[%s12081_s4 + $0x8b8] sm:$0xff]  ;;  %v1940_v6 = vld [vmem:[%s12081_s4 + $0x8a0] sm:$0xff] }
 0x2e3   : > { %v9578_v33 = vmax.f32 %v9375_v32, %v2439_v49  ;;  %v2441_v48 = vpop.f32.mrb[63].mxu1  ;;  %2951 = vmatmul.mubr.f32.gmra.mrb[114].mxu0 %v9540_v15  ;;  %3308 = vmatmul.mubr.f32.gmra.mrb[114].mxu1 %v9540_v15  ;;  %v1922_v32 = vld [vmem:[%s12081_s4 + $0x810] sm:$0xff]  ;;  %v1941_v49 = vld [vmem:[%s12081_s4 + $0x8a8] sm:$0xff] }
 0x2e4   : > { %v9583_v14 = vmax.f32 %v9377_v8, %v2441_v48  ;;  %6457 = vmatpush1.bf16.msra.mxu0 %v6456_v53  ;;  %6649 = vmatpush1.bf16.msra.mxu1 %v6648_v47  ;;  %v9585_v56 = vpop.f32.mrb[86].mxu0  ;;  %v6462_v8 = vpack.c.bf16 %v1923_v59, %v1917_v12  ;;  %v6464_v63 = vpack.c.bf16 %v1922_v32, %v1916_v16  ;;  %v1936_v12 = vld [vmem:[%s12081_s4 + $0x880] sm:$0xff]  ;;  %v1949_v48 = vld [vmem:[%s12081_s4 + $0x8e8] sm:$0xff] }
 0x2e5   : > { %6459 = vmatprep.subr.bf16.mxu0 %v6458_v39  ;;  %6651 = vmatprep.subr.bf16.mxu1 %v6650_v13  ;;  %v9593_v34 = vpop.f32.mrb[87].mxu0  ;;  %v1928_v39 = vld [vmem:[%s12081_s4 + $0x840] sm:$0xff]  ;;  %v1953_v45 = vld [vmem:[%s12081_s4 + $0x908] sm:$0xff] }
 0x2e6   : > { %v2445_v61 = vpop.f32.mrb[64].mxu1  ;;  %2956 = vmatprep.mubr.f32.mxu0 %v9583_v14  ;;  %3313 = vmatprep.mubr.f32.mxu1 %v9583_v14 }
 0x2e7   : > { %v9616_v29 = vmax.f32 %v9379_v7, %v2445_v61  ;;  %v2447_v30 = vpop.f32.mrb[65].mxu1  ;;  %2957 = vmatmul.mubr.f32.gmra.mrb[116].mxu0 %v9578_v33  ;;  %3314 = vmatmul.mubr.f32.gmra.mrb[116].mxu1 %v9578_v33  ;;  %v1934_v7 = vld [vmem:[%s12081_s4 + $0x870] sm:$0xff]  ;;  %v6662_v61 = vpack.c.bf16 %v1949_v48, %v1943_v11 }
 0x2e8   : > { %v9621_v53 = vmax.f32 %v9381_v46, %v2447_v30  ;;  %6461 = vmatpush1.bf16.msra.mxu0 %v6460_v24  ;;  %6653 = vmatpush1.bf16.msra.mxu1 %v6652_v60  ;;  %v9623_v47 = vpop.f32.mrb[88].mxu0  ;;  %v6466_v46 = vpack.c.bf16 %v1935_v9, %v1929_v17  ;;  %v1942_v9 = vld [vmem:[%s12081_s4 + $0x8b0] sm:$0xff] }
 0x2e9   : > { %6463 = vmatprep.subr.bf16.mxu0 %v6462_v8  ;;  %6655 = vmatprep.subr.bf16.mxu1 %v6654_v52  ;;  %v9631_v13 = vpop.f32.mrb[89].mxu0  ;;  %v6468_v8 = vpack.c.bf16 %v1934_v7, %v1928_v39  ;;  %v6660_v52 = vpack.c.bf16 %v1936_v12, %v1930_v31  ;;  %v1961_v39 = vld [vmem:[%s12081_s4 + $0x948] sm:$0xff]  ;;  %v6664_v12 = vpack.c.bf16 %v1948_v37, %v1942_v9  ;;  %v1954_v48 = vld [vmem:[%s12081_s4 + $0x910] sm:$0xff]  ;;  %v1964_v37 = vld [vmem:[%s12081_s4 + $0x960] sm:$0xff] }
 0x2ea   : > { %v2451_v59 = vpop.f32.mrb[66].mxu1  ;;  %2962 = vmatprep.mubr.f32.mxu0 %v9621_v53  ;;  %3319 = vmatprep.mubr.f32.mxu1 %v9621_v53 }
 0x2eb   : > { %v9654_v24 = vmax.f32 %v9383_v36, %v2451_v59  ;;  %v2453_v60 = vpop.f32.mrb[67].mxu1  ;;  %2963 = vmatmul.mubr.f32.gmra.mrb[118].mxu0 %v9616_v29  ;;  %3320 = vmatmul.mubr.f32.gmra.mrb[118].mxu1 %v9616_v29  ;;  %v1946_v36 = vld [vmem:[%s12081_s4 + $0x8d0] sm:$0xff] }
 0x2ec   : > { %v9659_v16 = vmax.f32 %v9385_v38, %v2453_v60  ;;  %6465 = vmatpush1.bf16.msra.mxu0 %v6464_v63  ;;  %6657 = vmatpush1.bf16.msra.mxu1 %v6656_v23  ;;  %v2588_v32 = vpop.f32.mrb[90].mxu0  ;;  %v6470_v38 = vpack.c.bf16 %v1947_v5, %v1941_v49  ;;  %v1959_v63 = vld [vmem:[%s12081_s4 + $0x938] sm:$0xff]  ;;  %v6472_v31 = vpack.c.bf16 %v1946_v36, %v1940_v6  ;;  %v1952_v49 = vld [vmem:[%s12081_s4 + $0x900] sm:$0xff] }
 0x2ed   : > { %12106 = vst [vmem:[#allocation2_spill] sm:$0xff] %v9654_v24  ;;  %v9668_v26 = vmax.f32 %v9387_v42, %v2588_v32  ;;  %v2590_v17 = vpop.f32.mrb[91].mxu0  ;;  %6467 = vmatprep.subr.bf16.mxu0 %v6466_v46  ;;  %6659 = vmatprep.subr.bf16.mxu1 %v6658_v40  ;;  %v1955_v23 = vld [vmem:[%s12081_s4 + $0x918] sm:$0xff]  ;;  %v6474_v5 = vpack.c.bf16 %v1959_v63, %v1953_v45  ;;  %v1960_v60 = vld [vmem:[%s12081_s4 + $0x940] sm:$0xff]  ;;  %v1970_v45 = vld [vmem:[%s12081_s4 + $0x990] sm:$0xff] }
 0x2ee   : > { %12107 = vst [vmem:[#allocation3_spill] sm:$0xff] %v9659_v16  ;;  %v2457_v30 = vpop.f32.mrb[68].mxu1  ;;  %v9680_v42 = vmax.f32 %v9389_v4, %v2590_v17  ;;  %2968 = vmatprep.mubr.f32.mxu0 %v9659_v16  ;;  %3325 = vmatprep.mubr.f32.mxu1 %v9659_v16  ;;  %v6666_v11 = vpack.c.bf16 %v1961_v39, %v1955_v23  ;;  %v1967_v36 = vld [vmem:[%s12081_s4 + $0x978] sm:$0xff]  ;;  %v1973_v17 = vld [vmem:[%s12081_s4 + $0x9a8] sm:$0xff]  ;;  %v1972_v23 = vld [vmem:[%s12081_s4 + $0x9a0] sm:$0xff] }
 0x2ef   : > { %12108 = vst [vmem:[#allocation4_spill] sm:$0xff] %v9668_v26  ;;  %v9694_v7 = vmax.f32 %v9391_v1, %v2457_v30  ;;  %v2459_v4 = vpop.f32.mrb[69].mxu1  ;;  %2969 = vmatmul.mubr.f32.gmra.mrb[120].mxu0 %v9654_v24  ;;  %3326 = vmatmul.mubr.f32.gmra.mrb[120].mxu1 %v9654_v24  ;;  %v6668_v9 = vpack.c.bf16 %v1960_v60, %v1954_v48  ;;  %v1977_v39 = vld [vmem:[%s12081_s4 + $0x9c8] sm:$0xff]  ;;  %v1976_v48 = vld [vmem:[%s12081_s4 + $0x9c0] sm:$0xff]  ;;  %v1982_v60 = vld [vmem:[%s12081_s4 + $0x9f0] sm:$0xff] }
 0x2f0   : > { %12109 = vst [vmem:[#allocation5_spill] sm:$0xff] %v9680_v42  ;;  %v9699_v46 = vmax.f32 %v9393_v58, %v2459_v4  ;;  %6469 = vmatpush1.bf16.msra.mxu0 %v6468_v8  ;;  %6661 = vmatpush1.bf16.msra.mxu1 %v6660_v52  ;;  %v2594_v40 = vpop.f32.mrb[92].mxu0  ;;  %v1958_v58 = vld [vmem:[%s12081_s4 + $0x930] sm:$0xff]  ;;  %v1965_v8 = vld [vmem:[%s12081_s4 + $0x968] sm:$0xff] }
 0x2f1   : > { %12110 = vst [vmem:[#allocation6_spill] sm:$0xff] %v9694_v7  ;;  %v9705_v1 = vmax.f32 %v9395_v0, %v2594_v40  ;;  %v2596_v59 = vpop.f32.mrb[93].mxu0  ;;  %6471 = vmatprep.subr.bf16.mxu0 %v6470_v38  ;;  %6663 = vmatprep.subr.bf16.mxu1 %v6662_v61  ;;  %v6476_v61 = vpack.c.bf16 %v1958_v58, %v1952_v49  ;;  %v1985_v49 = vld [vmem:[%s12081_s4 + $0xa08] sm:$0xff]  ;;  %v2062_v16 = vld [vmem:[%s12081_s4 + $0xc70] sm:$0xff] }
 0x2f2   : > { %12111 = vst [vmem:[#allocation7_spill] sm:$0xff] %v9699_v46  ;;  %v2463_v32 = vpop.f32.mrb[70].mxu1  ;;  %v9717_v0 = vmax.f32 %v9397_v18, %v2596_v59  ;;  %2974 = vmatprep.mubr.f32.mxu0 %v9699_v46  ;;  %3331 = vmatprep.mubr.f32.mxu1 %v9699_v46  ;;  %v1971_v18 = vld [vmem:[%s12081_s4 + $0x998] sm:$0xff]  ;;  %v6670_v40 = vpack.c.bf16 %v1973_v17, %v1967_v36  ;;  %v1978_v36 = vld [vmem:[%s12081_s4 + $0x9d0] sm:$0xff]  ;;  %v1984_v17 = vld [vmem:[%s12081_s4 + $0xa00] sm:$0xff] }
 0x2f3   : > { %12112 = vst [vmem:[#allocation8_spill] sm:$0xff] %v9705_v1  ;;  %v9725_v52 = vmax.f32 %v9399_v44, %v2463_v32  ;;  %v2465_v6 = vpop.f32.mrb[71].mxu1  ;;  %2975 = vmatmul.mubr.f32.gmra.mrb[122].mxu0 %v9694_v7  ;;  %3332 = vmatmul.mubr.f32.gmra.mrb[122].mxu1 %v9694_v7  ;;  %v2050_v46 = vld [vmem:[%s12081_s4 + $0xc10] sm:$0xff] }
 0x2f4   : > { %v9739_v44 = vmax.f32 %v9401_v43, %v2465_v6  ;;  %6473 = vmatpush1.bf16.msra.mxu0 %v6472_v31  ;;  %6665 = vmatpush1.bf16.msra.mxu1 %v6664_v12  ;;  %v2600_v38 = vpop.f32.mrb[94].mxu0  ;;  %v1966_v43 = vld [vmem:[%s12081_s4 + $0x970] sm:$0xff]  ;;  %v1983_v31 = vld [vmem:[%s12081_s4 + $0x9f8] sm:$0xff] }
 0x2f5   : > { %12113 = vst [vmem:[#allocation9_spill] sm:$0xff] %v9725_v52  ;;  %v9748_v30 = vmax.f32 %v9409_v2, %v2600_v38  ;;  %v2602_v63 = vpop.f32.mrb[95].mxu0  ;;  %6475 = vmatprep.subr.bf16.mxu0 %v6474_v5  ;;  %6667 = vmatprep.subr.bf16.mxu1 %v6666_v11  ;;  %v6478_v2 = vpack.c.bf16 %v1971_v18, %v1965_v8  ;;  %v1979_v12 = vld [vmem:[%s12081_s4 + $0x9d8] sm:$0xff]  ;;  %v1989_v38 = vld [vmem:[%s12081_s4 + $0xa28] sm:$0xff] }
 0x2f6   : > { %12114 = vst [vmem:[#allocation10_spill] sm:$0xff] %v9739_v44  ;;  %v9760_v4 = vmax.f32 %v9420_v21, %v2602_v63  ;;  %2980 = vmatprep.mubr.f32.mxu0 %v9739_v44  ;;  %3337 = vmatprep.mubr.f32.mxu1 %v9739_v44  ;;  %v9773_v21 = vpop.f32.mrb[72].mxu1  ;;  %v6480_v11 = vpack.c.bf16 %v1970_v45, %v1964_v37  ;;  %v1997_v37 = vld [vmem:[%s12081_s4 + $0xa68] sm:$0xff] }
 0x2f7   : > { %2981 = vmatmul.mubr.f32.gmra.mrb[124].mxu0 %v9725_v52  ;;  %3338 = vmatmul.mubr.f32.gmra.mrb[124].mxu1 %v9725_v52  ;;  %v9777_v59 = vpop.f32.mrb[73].mxu1  ;;  %v6672_v58 = vpack.c.bf16 %v1972_v23, %v1966_v43  ;;  %v6482_v6 = vpack.c.bf16 %v1983_v31, %v1977_v39  ;;  %v6674_v18 = vpack.c.bf16 %v1985_v49, %v1979_v12  ;;  %v1988_v39 = vld [vmem:[%s12081_s4 + $0xa20] sm:$0xff] }
 0x2f8   : > { %6477 = vmatpush1.bf16.msra.mxu0 %v6476_v61  ;;  %6669 = vmatpush1.bf16.msra.mxu1 %v6668_v9  ;;  %v2606_v5 = vpop.f32.mrb[96].mxu0  ;;  %v1991_v9 = vld [vmem:[%s12081_s4 + $0xa38] sm:$0xff]  ;;  %v6484_v43 = vpack.c.bf16 %v1982_v60, %v1976_v48  ;;  %v6676_v23 = vpack.c.bf16 %v1984_v17, %v1978_v36 }
 0x2f9   : > { %3051 = vmatprep.mubr.f32.mxu0 %v9680_v42  ;;  %3408 = vmatprep.mubr.f32.mxu1 %v9680_v42  ;;  %v9788_v32 = vmax.f32 %v9441_v28, %v2606_v5  ;;  %v2608_v8 = vpop.f32.mrb[97].mxu0  ;;  %v1995_v28 = vld [vmem:[%s12081_s4 + $0xa58] sm:$0xff]  ;;  %v6678_v49 = vpack.c.bf16 %v1997_v37, %v1991_v9  ;;  %v1990_v5 = vld [vmem:[%s12081_s4 + $0xa30] sm:$0xff] }
 0x2fa   : > { %v9800_v61 = vmax.f32 %v9452_v20, %v2608_v8  ;;  %6479 = vmatprep.subr.bf16.mxu0 %v6478_v2  ;;  %6671 = vmatprep.subr.bf16.mxu1 %v6670_v40  ;;  %v9811_v45 = vpop.f32.mrb[74].mxu1  ;;  %v1994_v2 = vld [vmem:[%s12081_s4 + $0xa50] sm:$0xff]  ;;  %v6486_v12 = vpack.c.bf16 %v1995_v28, %v1989_v38  ;;  %v2007_v48 = vld [vmem:[%s12081_s4 + $0xab8] sm:$0xff]  ;;  %v2009_v8 = vld [vmem:[%s12081_s4 + $0xac8] sm:$0xff] }
 0x2fb   : > { %v9813_v63 = vpop.f32.mrb[75].mxu1  ;;  %v2003_v60 = vld [vmem:[%s12081_s4 + $0xa98] sm:$0xff]  ;;  %v6488_v36 = vpack.c.bf16 %v1994_v2, %v1988_v39  ;;  %v2000_v38 = vld [vmem:[%s12081_s4 + $0xa80] sm:$0xff]  ;;  %v2006_v28 = vld [vmem:[%s12081_s4 + $0xab0] sm:$0xff] }
 0x2fc   : > { %6481 = vmatpush1.bf16.msra.mxu0 %v6480_v11  ;;  %6673 = vmatpush1.bf16.msra.mxu1 %v6672_v58  ;;  %v2612_v20 = vpop.f32.mrb[98].mxu0  ;;  %v1996_v11 = vld [vmem:[%s12081_s4 + $0xa60] sm:$0xff]  ;;  %v2001_v58 = vld [vmem:[%s12081_s4 + $0xa88] sm:$0xff] }
 0x2fd   : > { %v9822_v40 = vmax.f32 %v9477_v54, %v2612_v20  ;;  %v2614_v31 = vpop.f32.mrb[99].mxu0  ;;  %6483 = vmatprep.subr.bf16.mxu0 %v6482_v6  ;;  %6675 = vmatprep.subr.bf16.mxu1 %v6674_v18  ;;  %v6680_v17 = vpack.c.bf16 %v1996_v11, %v1990_v5  ;;  %v6490_v20 = vpack.c.bf16 %v2007_v48, %v2001_v58  ;;  %v2008_v39 = vld [vmem:[%s12081_s4 + $0xac0] sm:$0xff]  ;;  %v2013_v2 = vld [vmem:[%s12081_s4 + $0xae8] sm:$0xff] }
 0x2fe   : > { %v9834_v54 = vmax.f32 %v9488_v50, %v2614_v31  ;;  %v9845_v6 = vpop.f32.mrb[76].mxu1  ;;  %v2019_v31 = vld [vmem:[%s12081_s4 + $0xb18] sm:$0xff]  ;;  %v6492_v58 = vpack.c.bf16 %v2006_v28, %v2000_v38  ;;  %v2020_v38 = vld [vmem:[%s12081_s4 + $0xb20] sm:$0xff]  ;;  %v2025_v28 = vld [vmem:[%s12081_s4 + $0xb48] sm:$0xff] }
 0x2ff   : > { %v9847_v18 = vpop.f32.mrb[77].mxu1  ;;  %v6494_v57 = vpack.c.bf16 %v2019_v31, %v2013_v2 }
 0x300   : > { %6485 = vmatpush1.bf16.msra.mxu0 %v6484_v43  ;;  %6677 = vmatpush1.bf16.msra.mxu1 %v6676_v23  ;;  %v2618_v50 = vpop.f32.mrb[100].mxu0  ;;  %v6682_v43 = vpack.c.bf16 %v2009_v8, %v2003_v60  ;;  %v2002_v23 = vld [vmem:[%s12081_s4 + $0xa90] sm:$0xff]  ;;  %v2012_v60 = vld [vmem:[%s12081_s4 + $0xae0] sm:$0xff] }
 0x301   : > { %v9856_v9 = vmax.f32 %v9515_v62, %v2618_v50  ;;  %v2620_v37 = vpop.f32.mrb[101].mxu0  ;;  %6487 = vmatprep.subr.bf16.mxu0 %v6486_v12  ;;  %6679 = vmatprep.subr.bf16.mxu1 %v6678_v49  ;;  %v2015_v12 = vld [vmem:[%s12081_s4 + $0xaf8] sm:$0xff]  ;;  %v2021_v49 = vld [vmem:[%s12081_s4 + $0xb28] sm:$0xff]  ;;  %v6684_v48 = vpack.c.bf16 %v2008_v39, %v2002_v23  ;;  %v2018_v8 = vld [vmem:[%s12081_s4 + $0xb10] sm:$0xff] }
 0x302   : > { %v9868_v62 = vmax.f32 %v9523_v19, %v2620_v37  ;;  %v9879_v5 = vpop.f32.mrb[78].mxu1  ;;  %v2033_v23 = vld [vmem:[%s12081_s4 + $0xb88] sm:$0xff]  ;;  %v6496_v31 = vpack.c.bf16 %v2018_v8, %v2012_v60  ;;  %v2032_v60 = vld [vmem:[%s12081_s4 + $0xb80] sm:$0xff] }
 0x303   : > { %v9881_v11 = vpop.f32.mrb[79].mxu1  ;;  %v2037_v8 = vld [vmem:[%s12081_s4 + $0xba8] sm:$0xff] }
 0x304   : > { %6489 = vmatpush1.bf16.msra.mxu0 %v6488_v36  ;;  %6681 = vmatpush1.bf16.msra.mxu1 %v6680_v17  ;;  %v2624_v19 = vpop.f32.mrb[102].mxu0  ;;  %v6686_v36 = vpack.c.bf16 %v2021_v49, %v2015_v12  ;;  %v2014_v17 = vld [vmem:[%s12081_s4 + $0xaf0] sm:$0xff]  ;;  %v2024_v49 = vld [vmem:[%s12081_s4 + $0xb40] sm:$0xff] }
 0x305   : > { %v9890_v50 = vmax.f32 %v9547_v41, %v2624_v19  ;;  %v2626_v37 = vpop.f32.mrb[103].mxu0  ;;  %6491 = vmatprep.subr.bf16.mxu0 %v6490_v20  ;;  %6683 = vmatprep.subr.bf16.mxu1 %v6682_v43  ;;  %v2031_v20 = vld [vmem:[%s12081_s4 + $0xb78] sm:$0xff]  ;;  %v6688_v12 = vpack.c.bf16 %v2020_v38, %v2014_v17  ;;  %v2030_v19 = vld [vmem:[%s12081_s4 + $0xb70] sm:$0xff]  ;;  %v2045_v17 = vld [vmem:[%s12081_s4 + $0xbe8] sm:$0xff] }
 0x306   : > { %v9902_v41 = vmax.f32 %v9561_v22, %v2626_v37  ;;  %v2027_v43 = vld [vmem:[%s12081_s4 + $0xb58] sm:$0xff]  ;;  %v9913_v39 = vpop.f32.mrb[80].mxu1  ;;  %v6498_v52 = vpack.c.bf16 %v2031_v20, %v2025_v28 }
 0x307   : > { %v9915_v2 = vpop.f32.mrb[81].mxu1 }
 0x308   : > { %6493 = vmatpush1.bf16.msra.mxu0 %v6492_v58  ;;  %6685 = vmatpush1.bf16.msra.mxu1 %v6684_v48  ;;  %v2630_v22 = vpop.f32.mrb[104].mxu0  ;;  %v6690_v58 = vpack.c.bf16 %v2033_v23, %v2027_v43  ;;  %v2026_v48 = vld [vmem:[%s12081_s4 + $0xb50] sm:$0xff]  ;;  %v2036_v43 = vld [vmem:[%s12081_s4 + $0xba0] sm:$0xff] }
 0x309   : > { %v9924_v37 = vmax.f32 %v9585_v56, %v2630_v22  ;;  %v2632_v42 = vpop.f32.mrb[105].mxu0  ;;  %6495 = vmatprep.subr.bf16.mxu0 %v6494_v57  ;;  %6687 = vmatprep.subr.bf16.mxu1 %v6686_v36  ;;  %v2043_v57 = vld [vmem:[%s12081_s4 + $0xbd8] sm:$0xff]  ;;  %v6692_v20 = vpack.c.bf16 %v2032_v60, %v2026_v48  ;;  %v2042_v23 = vld [vmem:[%s12081_s4 + $0xbd0] sm:$0xff]  ;;  %v2057_v48 = vld [vmem:[%s12081_s4 + $0xc48] sm:$0xff] }
 0x30a   : > { %v9936_v56 = vmax.f32 %v9593_v34, %v2632_v42  ;;  %v2039_v36 = vld [vmem:[%s12081_s4 + $0xbb8] sm:$0xff]  ;;  %v9947_v38 = vpop.f32.mrb[82].mxu1  ;;  %v6500_v42 = vpack.c.bf16 %v2030_v19, %v2024_v49  ;;  %v6502_v7 = vpack.c.bf16 %v2043_v57, %v2037_v8  ;;  %v2044_v49 = vld [vmem:[%s12081_s4 + $0xbe0] sm:$0xff]  ;;  %v2049_v19 = vld [vmem:[%s12081_s4 + $0xc08] sm:$0xff] }
 0x30b   : > { %v9949_v28 = vpop.f32.mrb[83].mxu1 }
 0x30c   : > { %6497 = vmatpush1.bf16.msra.mxu0 %v6496_v31  ;;  %6689 = vmatpush1.bf16.msra.mxu1 %v6688_v12  ;;  %v2636_v34 = vpop.f32.mrb[106].mxu0  ;;  %v6694_v31 = vpack.c.bf16 %v2045_v17, %v2039_v36  ;;  %v2038_v12 = vld [vmem:[%s12081_s4 + $0xbb0] sm:$0xff]  ;;  %v2048_v17 = vld [vmem:[%s12081_s4 + $0xc00] sm:$0xff] }
 0x30d   : > { %v9958_v22 = vmax.f32 %v9623_v47, %v2636_v34  ;;  %v2638_v44 = vpop.f32.mrb[107].mxu0  ;;  %6499 = vmatprep.subr.bf16.mxu0 %v6498_v52  ;;  %6691 = vmatprep.subr.bf16.mxu1 %v6690_v58  ;;  %v2055_v52 = vld [vmem:[%s12081_s4 + $0xc38] sm:$0xff]  ;;  %v2054_v34 = vld [vmem:[%s12081_s4 + $0xc30] sm:$0xff] }
 0x30e   : > { %v9970_v47 = vmax.f32 %v9631_v13, %v2638_v44  ;;  %v2051_v58 = vld [vmem:[%s12081_s4 + $0xc18] sm:$0xff]  ;;  %v9981_v60 = vpop.f32.mrb[84].mxu1  ;;  %v6504_v13 = vpack.c.bf16 %v2042_v23, %v2036_v43  ;;  %v6696_v44 = vpack.c.bf16 %v2044_v49, %v2038_v12  ;;  %v6506_v57 = vpack.c.bf16 %v2055_v52, %v2049_v19  ;;  %v2060_v52 = vld [vmem:[%s12081_s4 + $0xc60] sm:$0xff] }
 0x30f   : > { %12115 = vst [vmem:[#allocation11_spill] sm:$0xff] %v9958_v22  ;;  %v9983_v8 = vpop.f32.mrb[85].mxu1  ;;  %v6698_v36 = vpack.c.bf16 %v2057_v48, %v2051_v58  ;;  %v2067_v43 = vld [vmem:[%s12081_s4 + $0xc98] sm:$0xff]  ;;  %v6508_v49 = vpack.c.bf16 %v2054_v34, %v2048_v17  ;;  %v2066_v58 = vld [vmem:[%s12081_s4 + $0xc90] sm:$0xff]  ;;  %v2081_v17 = vld [vmem:[%s12081_s4 + $0xd08] sm:$0xff] }
 0x310   : > { %6501 = vmatpush1.bf16.msra.mxu0 %v6500_v42  ;;  %6693 = vmatpush1.bf16.msra.mxu1 %v6692_v20  ;;  %v2056_v42 = vld [vmem:[%s12081_s4 + $0xc40] sm:$0xff]  ;;  %v2063_v23 = vld [vmem:[%s12081_s4 + $0xc78] sm:$0xff] }
 0x311   : > { %6503 = vmatprep.subr.bf16.mxu0 %v6502_v7  ;;  %6695 = vmatprep.subr.bf16.mxu1 %v6694_v31  ;;  %v2061_v7 = vld [vmem:[%s12081_s4 + $0xc68] sm:$0xff]  ;;  %v6700_v19 = vpack.c.bf16 %v2056_v42, %v2050_v46  ;;  %v6512_v42 = vpack.c.bf16 %v2066_v58, %v2060_v52  ;;  %v2087_v58 = vld [vmem:[%s12081_s4 + $0xd38] sm:$0xff] }
 0x312   : > { %v10000_v20 = vpop.f32.mrb[86].mxu1  ;;  %v2069_v31 = vld [vmem:[%s12081_s4 + $0xca8] sm:$0xff]  ;;  %v6510_v48 = vpack.c.bf16 %v2067_v43, %v2061_v7  ;;  %v2072_v43 = vld [vmem:[%s12081_s4 + $0xcc0] sm:$0xff] }
 0x313   : > { %v10011_v12 = vpop.f32.mrb[87].mxu1  ;;  %v6702_v24 = vpack.c.bf16 %v2069_v31, %v2063_v23  ;;  %v2073_v46 = vld [vmem:[%s12081_s4 + $0xcc8] sm:$0xff]  ;;  %v2078_v23 = vld [vmem:[%s12081_s4 + $0xcf0] sm:$0xff] }
 0x314   : > { %6505 = vmatpush1.bf16.msra.mxu0 %v6504_v13  ;;  %6697 = vmatpush1.bf16.msra.mxu1 %v6696_v44  ;;  %v2068_v13 = vld [vmem:[%s12081_s4 + $0xca0] sm:$0xff] }
 0x315   : > { %6507 = vmatprep.subr.bf16.mxu0 %v6506_v57  ;;  %6699 = vmatprep.subr.bf16.mxu1 %v6698_v36  ;;  %v2079_v57 = vld [vmem:[%s12081_s4 + $0xcf8] sm:$0xff]  ;;  %v6704_v7 = vpack.c.bf16 %v2068_v13, %v2062_v16  ;;  %v2080_v16 = vld [vmem:[%s12081_s4 + $0xd00] sm:$0xff] }
 0x316   : > { %v10028_v44 = vpop.f32.mrb[88].mxu1  ;;  %v2075_v36 = vld [vmem:[%s12081_s4 + $0xcd8] sm:$0xff]  ;;  %v6514_v31 = vpack.c.bf16 %v2079_v57, %v2073_v46  ;;  %v6516_v57 = vpack.c.bf16 %v2078_v23, %v2072_v43  ;;  %v2097_v43 = vld [vmem:[%s12081_s4 + $0xd88] sm:$0xff] }
 0x317   : > { %3052 = vmatmul.mubr.f32.vlgmr.msra.gmra.mrb[108].mxu0 %v9668_v26  ;;  %3409 = vmatmul.mubr.f32.vlgmr.msra.gmra.mrb[108].mxu1 %v9668_v26  ;;  %v10041_v34 = vpop.f32.mrb[89].mxu1  ;;  %v6706_v26 = vpack.c.bf16 %v2081_v17, %v2075_v36 }
 0x318   : > { %3057 = vmatprep.mubr.f32.mxu0 %v9717_v0  ;;  %6509 = vmatpush1.bf16.msra.mxu0 %v6508_v49  ;;  %v2074_v49 = vld [vmem:[%s12081_s4 + $0xcd0] sm:$0xff] }
 0x319   : > { %3414 = vmatprep.mubr.f32.mxu1 %v9717_v0  ;;  %6701 = vmatpush1.bf16.msra.mxu1 %v6700_v19  ;;  %v2085_v19 = vld [vmem:[%s12081_s4 + $0xd28] sm:$0xff]  ;;  %v6708_v17 = vpack.c.bf16 %v2080_v16, %v2074_v49 }
 0x31a   : > { %6511 = vmatprep.subr.bf16.mxu0 %v6510_v48  ;;  %6703 = vmatprep.subr.bf16.mxu1 %v6702_v24  ;;  %v2761_v52 = vpop.f32.mrb[90].mxu1  ;;  %v2091_v24 = vld [vmem:[%s12081_s4 + $0xd58] sm:$0xff]  ;;  %v2093_v48 = vld [vmem:[%s12081_s4 + $0xd68] sm:$0xff] }
 0x31b   : > { %3058 = vmatmul.mubr.f32.gmra.mrb[110].mxu0 %v9705_v1  ;;  %3415 = vmatmul.mubr.f32.gmra.mrb[110].mxu1 %v9705_v1  ;;  %v10072_v13 = vmax.f32 %v9773_v21, %v2761_v52  ;;  %v2763_v46 = vpop.f32.mrb[91].mxu1  ;;  %v2084_v1 = vld [vmem:[%s12081_s4 + $0xd20] sm:$0xff]  ;;  %v2090_v21 = vld [vmem:[%s12081_s4 + $0xd50] sm:$0xff]  ;;  %v6518_v52 = vpack.c.bf16 %v2091_v24, %v2085_v19  ;;  %v2105_v49 = vld [vmem:[%s12081_s4 + $0xdc8] sm:$0xff] }
 0x31c   : > { %3063 = vmatprep.mubr.f32.mxu0 %v9760_v4  ;;  %6513 = vmatpush1.bf16.msra.mxu0 %v6512_v42  ;;  %v10076_v36 = vmax.f32 %v9777_v59, %v2763_v46  ;;  %v6710_v42 = vpack.c.bf16 %v2093_v48, %v2087_v58  ;;  %v2086_v59 = vld [vmem:[%s12081_s4 + $0xd30] sm:$0xff]  ;;  %v6520_v24 = vpack.c.bf16 %v2090_v21, %v2084_v1  ;;  %v2096_v46 = vld [vmem:[%s12081_s4 + $0xd80] sm:$0xff] }
 0x31d   : > { %3420 = vmatprep.mubr.f32.mxu1 %v9760_v4  ;;  %6705 = vmatpush1.bf16.msra.mxu1 %v6704_v7  ;;  %v2092_v7 = vld [vmem:[%s12081_s4 + $0xd60] sm:$0xff]  ;;  %v2098_v1 = vld [vmem:[%s12081_s4 + $0xd90] sm:$0xff] }
 0x31e   : > { %12116 = vst [vmem:[#allocation12_spill] sm:$0xff] %v10076_v36  ;;  %6515 = vmatprep.subr.bf16.mxu0 %v6514_v31  ;;  %6707 = vmatprep.subr.bf16.mxu1 %v6706_v26  ;;  %v2767_v23 = vpop.f32.mrb[92].mxu1  ;;  %v2103_v26 = vld [vmem:[%s12081_s4 + $0xdb8] sm:$0xff]  ;;  %v6712_v48 = vpack.c.bf16 %v2092_v7, %v2086_v59  ;;  %v2117_v59 = vld [vmem:[%s12081_s4 + $0xe28] sm:$0xff] }
 0x31f   : > { %3064 = vmatmul.mubr.f32.gmra.mrb[112].mxu0 %v9748_v30  ;;  %3421 = vmatmul.mubr.f32.gmra.mrb[112].mxu1 %v9748_v30  ;;  %v2099_v31 = vld [vmem:[%s12081_s4 + $0xd98] sm:$0xff]  ;;  %v10106_v16 = vmax.f32 %v9811_v45, %v2767_v23  ;;  %v2769_v19 = vpop.f32.mrb[93].mxu1  ;;  %v2102_v45 = vld [vmem:[%s12081_s4 + $0xdb0] sm:$0xff]  ;;  %v6522_v23 = vpack.c.bf16 %v2103_v26, %v2097_v43 }
 0x320   : > { %3069 = vmatprep.mubr.f32.mxu0 %v9800_v61  ;;  %6517 = vmatpush1.bf16.msra.mxu0 %v6516_v57  ;;  %v10110_v58 = vmax.f32 %v9813_v63, %v2769_v19  ;;  %v6714_v57 = vpack.c.bf16 %v2105_v49, %v2099_v31  ;;  %v2104_v63 = vld [vmem:[%s12081_s4 + $0xdc0] sm:$0xff]  ;;  %v6524_v26 = vpack.c.bf16 %v2102_v45, %v2096_v46  ;;  %v2121_v46 = vld [vmem:[%s12081_s4 + $0xe48] sm:$0xff] }
 0x321   : > { %3426 = vmatprep.mubr.f32.mxu1 %v9800_v61  ;;  %6709 = vmatpush1.bf16.msra.mxu1 %v6708_v17  ;;  %v2109_v17 = vld [vmem:[%s12081_s4 + $0xde8] sm:$0xff]  ;;  %v6716_v49 = vpack.c.bf16 %v2104_v63, %v2098_v1  ;;  %v2108_v19 = vld [vmem:[%s12081_s4 + $0xde0] sm:$0xff] }
 0x322   : > { %6519 = vmatprep.subr.bf16.mxu0 %v6518_v52  ;;  %6711 = vmatprep.subr.bf16.mxu1 %v6710_v42  ;;  %v2773_v21 = vpop.f32.mrb[94].mxu1  ;;  %v2115_v52 = vld [vmem:[%s12081_s4 + $0xe18] sm:$0xff]  ;;  %v2129_v1 = vld [vmem:[%s12081_s4 + $0xe88] sm:$0xff] }
 0x323   : > { %3070 = vmatmul.mubr.f32.gmra.mrb[114].mxu0 %v9788_v32  ;;  %3427 = vmatmul.mubr.f32.gmra.mrb[114].mxu1 %v9788_v32  ;;  %v2111_v42 = vld [vmem:[%s12081_s4 + $0xdf8] sm:$0xff]  ;;  %v10140_v7 = vmax.f32 %v9845_v6, %v2773_v21  ;;  %v2775_v43 = vpop.f32.mrb[95].mxu1  ;;  %v2114_v6 = vld [vmem:[%s12081_s4 + $0xe10] sm:$0xff]  ;;  %v6526_v21 = vpack.c.bf16 %v2115_v52, %v2109_v17 }
 0x324   : > { %3075 = vmatprep.mubr.f32.mxu0 %v9834_v54  ;;  %6521 = vmatpush1.bf16.msra.mxu0 %v6520_v24  ;;  %v10144_v31 = vmax.f32 %v9847_v18, %v2775_v43  ;;  %v6718_v24 = vpack.c.bf16 %v2117_v59, %v2111_v42  ;;  %v2110_v18 = vld [vmem:[%s12081_s4 + $0xdf0] sm:$0xff]  ;;  %v6528_v52 = vpack.c.bf16 %v2114_v6, %v2108_v19  ;;  %v2120_v43 = vld [vmem:[%s12081_s4 + $0xe40] sm:$0xff]  ;;  %v2133_v19 = vld [vmem:[%s12081_s4 + $0xea8] sm:$0xff] }
 0x325   : > { %3432 = vmatprep.mubr.f32.mxu1 %v9834_v54  ;;  %6713 = vmatpush1.bf16.msra.mxu1 %v6712_v48  ;;  %v2116_v48 = vld [vmem:[%s12081_s4 + $0xe20] sm:$0xff] }
 0x326   : > { %6523 = vmatprep.subr.bf16.mxu0 %v6522_v23  ;;  %6715 = vmatprep.subr.bf16.mxu1 %v6714_v57  ;;  %v2779_v45 = vpop.f32.mrb[96].mxu1  ;;  %v2127_v23 = vld [vmem:[%s12081_s4 + $0xe78] sm:$0xff]  ;;  %v6720_v59 = vpack.c.bf16 %v2116_v48, %v2110_v18  ;;  %v2141_v18 = vld [vmem:[%s12081_s4 + $0xee8] sm:$0xff] }
 0x327   : > { %3076 = vmatmul.mubr.f32.gmra.mrb[116].mxu0 %v9822_v40  ;;  %3433 = vmatmul.mubr.f32.gmra.mrb[116].mxu1 %v9822_v40  ;;  %v2123_v57 = vld [vmem:[%s12081_s4 + $0xe58] sm:$0xff]  ;;  %v10174_v63 = vmax.f32 %v9879_v5, %v2779_v45  ;;  %v2781_v17 = vpop.f32.mrb[97].mxu1  ;;  %v2126_v5 = vld [vmem:[%s12081_s4 + $0xe70] sm:$0xff]  ;;  %v6530_v45 = vpack.c.bf16 %v2127_v23, %v2121_v46 }
 0x328   : > { %3081 = vmatprep.mubr.f32.mxu0 %v9868_v62  ;;  %6525 = vmatpush1.bf16.msra.mxu0 %v6524_v26  ;;  %v10178_v42 = vmax.f32 %v9881_v11, %v2781_v17  ;;  %v6722_v26 = vpack.c.bf16 %v2129_v1, %v2123_v57  ;;  %v2122_v11 = vld [vmem:[%s12081_s4 + $0xe50] sm:$0xff]  ;;  %v6532_v23 = vpack.c.bf16 %v2126_v5, %v2120_v43  ;;  %v2132_v17 = vld [vmem:[%s12081_s4 + $0xea0] sm:$0xff]  ;;  %v2145_v43 = vld [vmem:[%s12081_s4 + $0xf08] sm:$0xff] }
 0x329   : > { %3438 = vmatprep.mubr.f32.mxu1 %v9868_v62  ;;  %6717 = vmatpush1.bf16.msra.mxu1 %v6716_v49  ;;  %v2128_v49 = vld [vmem:[%s12081_s4 + $0xe80] sm:$0xff] }
 0x32a   : > { %6527 = vmatprep.subr.bf16.mxu0 %v6526_v21  ;;  %6719 = vmatprep.subr.bf16.mxu1 %v6718_v24  ;;  %v2785_v6 = vpop.f32.mrb[98].mxu1  ;;  %v2139_v21 = vld [vmem:[%s12081_s4 + $0xed8] sm:$0xff]  ;;  %v6724_v1 = vpack.c.bf16 %v2128_v49, %v2122_v11  ;;  %v2153_v11 = vld [vmem:[%s12081_s4 + $0xf48] sm:$0xff] }
 0x32b   : > { %3082 = vmatmul.mubr.f32.gmra.mrb[118].mxu0 %v9856_v9  ;;  %3439 = vmatmul.mubr.f32.gmra.mrb[118].mxu1 %v9856_v9  ;;  %v2135_v24 = vld [vmem:[%s12081_s4 + $0xeb8] sm:$0xff]  ;;  %v10208_v48 = vmax.f32 %v9913_v39, %v2785_v6  ;;  %v2787_v46 = vpop.f32.mrb[99].mxu1  ;;  %v2138_v39 = vld [vmem:[%s12081_s4 + $0xed0] sm:$0xff]  ;;  %v6534_v6 = vpack.c.bf16 %v2139_v21, %v2133_v19 }
 0x32c   : > { %3087 = vmatprep.mubr.f32.mxu0 %v9902_v41  ;;  %6529 = vmatpush1.bf16.msra.mxu0 %v6528_v52  ;;  %v10212_v57 = vmax.f32 %v9915_v2, %v2787_v46  ;;  %v6726_v52 = vpack.c.bf16 %v2141_v18, %v2135_v24  ;;  %v2134_v2 = vld [vmem:[%s12081_s4 + $0xeb0] sm:$0xff]  ;;  %v6536_v21 = vpack.c.bf16 %v2138_v39, %v2132_v17  ;;  %v2144_v46 = vld [vmem:[%s12081_s4 + $0xf00] sm:$0xff]  ;;  %v2157_v17 = vld [vmem:[%s12081_s4 + $0xf68] sm:$0xff] }
 0x32d   : > { %3444 = vmatprep.mubr.f32.mxu1 %v9902_v41  ;;  %6721 = vmatpush1.bf16.msra.mxu1 %v6720_v59  ;;  %v2140_v59 = vld [vmem:[%s12081_s4 + $0xee0] sm:$0xff] }
 0x32e   : > { %6531 = vmatprep.subr.bf16.mxu0 %v6530_v45  ;;  %6723 = vmatprep.subr.bf16.mxu1 %v6722_v26  ;;  %v2791_v5 = vpop.f32.mrb[100].mxu1  ;;  %v2151_v45 = vld [vmem:[%s12081_s4 + $0xf38] sm:$0xff]  ;;  %v6728_v18 = vpack.c.bf16 %v2140_v59, %v2134_v2  ;;  %v2165_v2 = vld [vmem:[%s12081_s4 + $0xfa8] sm:$0xff] }
 0x32f   : > { %3088 = vmatmul.mubr.f32.gmra.mrb[120].mxu0 %v9890_v50  ;;  %3445 = vmatmul.mubr.f32.gmra.mrb[120].mxu1 %v9890_v50  ;;  %v2147_v26 = vld [vmem:[%s12081_s4 + $0xf18] sm:$0xff]  ;;  %v10242_v49 = vmax.f32 %v9947_v38, %v2791_v5  ;;  %v2793_v19 = vpop.f32.mrb[101].mxu1  ;;  %v2150_v38 = vld [vmem:[%s12081_s4 + $0xf30] sm:$0xff]  ;;  %v6538_v5 = vpack.c.bf16 %v2151_v45, %v2145_v43 }
 0x330   : > { %3093 = vmatprep.mubr.f32.mxu0 %v9936_v56  ;;  %6533 = vmatpush1.bf16.msra.mxu0 %v6532_v23  ;;  %v10246_v24 = vmax.f32 %v9949_v28, %v2793_v19  ;;  %v6730_v23 = vpack.c.bf16 %v2153_v11, %v2147_v26  ;;  %v2146_v28 = vld [vmem:[%s12081_s4 + $0xf10] sm:$0xff]  ;;  %v6540_v45 = vpack.c.bf16 %v2150_v38, %v2144_v46  ;;  %v2156_v19 = vld [vmem:[%s12081_s4 + $0xf60] sm:$0xff]  ;;  %v2169_v38 = vld [vmem:[%s12081_s4 + $0xfc8] sm:$0xff] }
 0x331   : > { %3450 = vmatprep.mubr.f32.mxu1 %v9936_v56  ;;  %6725 = vmatpush1.bf16.msra.mxu1 %v6724_v1  ;;  %v2152_v1 = vld [vmem:[%s12081_s4 + $0xf40] sm:$0xff] }
 0x332   : > { %6535 = vmatprep.subr.bf16.mxu0 %v6534_v6  ;;  %6727 = vmatprep.subr.bf16.mxu1 %v6726_v52  ;;  %v2797_v39 = vpop.f32.mrb[102].mxu1  ;;  %v2163_v6 = vld [vmem:[%s12081_s4 + $0xf98] sm:$0xff]  ;;  %v6732_v11 = vpack.c.bf16 %v2152_v1, %v2146_v28 }
 0x333   : > { %3094 = vmatmul.mubr.f32.gmra.mrb[122].mxu0 %v9924_v37  ;;  %3451 = vmatmul.mubr.f32.gmra.mrb[122].mxu1 %v9924_v37  ;;  %v2159_v52 = vld [vmem:[%s12081_s4 + $0xf78] sm:$0xff]  ;;  %v10276_v59 = vmax.f32 %v9981_v60, %v2797_v39  ;;  %v2799_v43 = vpop.f32.mrb[103].mxu1  ;;  %v2162_v60 = vld [vmem:[%s12081_s4 + $0xf90] sm:$0xff] }
 0x334   : > { %3099 = vmatprep.mubr.f32.mxu0 %v9970_v47  ;;  %6537 = vmatpush1.bf16.msra.mxu0 %v6536_v21  ;;  %v10280_v26 = vmax.f32 %v9983_v8, %v2799_v43  ;;  %v2158_v21 = vld [vmem:[%s12081_s4 + $0xf70] sm:$0xff]  ;;  %v6542_v8 = vpack.c.bf16 %v2163_v6, %v2157_v17  ;;  %v6734_v46 = vpack.c.bf16 %v2165_v2, %v2159_v52  ;;  %v2175_v28 = vld [vmem:[%s12081_s4 + $0xff8] sm:$0xff] }
 0x335   : > { %3456 = vmatprep.mubr.f32.mxu1 %v9970_v47  ;;  %6729 = vmatpush1.bf16.msra.mxu1 %v6728_v18  ;;  %v2164_v18 = vld [vmem:[%s12081_s4 + $0xfa0] sm:$0xff]  ;;  %v6544_v6 = vpack.c.bf16 %v2162_v60, %v2156_v19  ;;  %v6546_v43 = vpack.c.bf16 %v2175_v28, %v2169_v38  ;;  %v2181_v19 = vld [vmem:[%s12081_s4 + $0x1028] sm:$0xff]  ;;  %v2187_v60 = vld [vmem:[%s12081_s4 + $0x1058] sm:$0xff] }
 0x336   : > { %6539 = vmatprep.subr.bf16.mxu0 %v6538_v5  ;;  %6731 = vmatprep.subr.bf16.mxu1 %v6730_v23  ;;  %v2803_v1 = vpop.f32.mrb[104].mxu1  ;;  %v2171_v5 = vld [vmem:[%s12081_s4 + $0xfd8] sm:$0xff]  ;;  %v2177_v23 = vld [vmem:[%s12081_s4 + $0x1008] sm:$0xff]  ;;  %v6736_v2 = vpack.c.bf16 %v2164_v18, %v2158_v21 }
 0x337   : > { %3100 = vmatmul.mubr.f32.gmra.mrb[124].mxu0 %v9958_v22  ;;  %3457 = vmatmul.mubr.f32.gmra.mrb[124].mxu1 %v9958_v22  ;;  %v10310_v17 = vmax.f32 %v10000_v20, %v2803_v1  ;;  %v2805_v39 = vpop.f32.mrb[105].mxu1  ;;  %v2168_v22 = vld [vmem:[%s12081_s4 + $0xfc0] sm:$0xff]  ;;  %v2174_v20 = vld [vmem:[%s12081_s4 + $0xff0] sm:$0xff]  ;;  %v2183_v18 = vld [vmem:[%s12081_s4 + $0x1038] sm:$0xff] }
 0x338   : > { %6541 = vmatpush1.bf16.msra.mxu0 %v6540_v45  ;;  %3170 = vmatprep.mubr.f32.mxu0 %v10076_v36  ;;  %v10314_v52 = vmax.f32 %v10011_v12, %v2805_v39  ;;  %v2170_v45 = vld [vmem:[%s12081_s4 + $0xfd0] sm:$0xff]  ;;  %v6738_v12 = vpack.c.bf16 %v2177_v23, %v2171_v5  ;;  %v6548_v28 = vpack.c.bf16 %v2174_v20, %v2168_v22  ;;  %v2180_v39 = vld [vmem:[%s12081_s4 + $0x1020] sm:$0xff]  ;;  %v2201_v20 = vld [vmem:[%s12081_s4 + $0x10c8] sm:$0xff] }
 0x339   : > { %6733 = vmatpush1.bf16.msra.mxu1 %v6732_v11  ;;  %3527 = vmatprep.mubr.f32.mxu1 %v10076_v36  ;;  %v2176_v11 = vld [vmem:[%s12081_s4 + $0x1000] sm:$0xff]  ;;  %v6550_v23 = vpack.c.bf16 %v2187_v60, %v2181_v19  ;;  %v2186_v36 = vld [vmem:[%s12081_s4 + $0x1050] sm:$0xff] }
 0x33a   : > { %6543 = vmatprep.subr.bf16.mxu0 %v6542_v8  ;;  %6735 = vmatprep.subr.bf16.mxu1 %v6734_v46  ;;  %v2809_v21 = vpop.f32.mrb[106].mxu1  ;;  %v2189_v8 = vld [vmem:[%s12081_s4 + $0x1068] sm:$0xff]  ;;  %v6740_v5 = vpack.c.bf16 %v2176_v11, %v2170_v45  ;;  %v6552_v45 = vpack.c.bf16 %v2186_v36, %v2180_v39  ;;  %v2192_v19 = vld [vmem:[%s12081_s4 + $0x1080] sm:$0xff]  ;;  %v2198_v60 = vld [vmem:[%s12081_s4 + $0x10b0] sm:$0xff] }
 0x33b   : > { %v10342_v46 = vmax.f32 %v10028_v44, %v2809_v21  ;;  %v2811_v38 = vpop.f32.mrb[107].mxu1  ;;  %v2182_v44 = vld [vmem:[%s12081_s4 + $0x1030] sm:$0xff]  ;;  %v6742_v22 = vpack.c.bf16 %v2189_v8, %v2183_v18  ;;  %v2200_v36 = vld [vmem:[%s12081_s4 + $0x10c0] sm:$0xff]  ;;  %v2205_v8 = vld [vmem:[%s12081_s4 + $0x10e8] sm:$0xff] }
 0x33c   : > { %6545 = vmatpush1.bf16.msra.mxu0 %v6544_v6  ;;  %v10345_v1 = vmax.f32 %v10041_v34, %v2811_v38  ;;  %v2188_v34 = vld [vmem:[%s12081_s4 + $0x1060] sm:$0xff]  ;;  %v2193_v6 = vld [vmem:[%s12081_s4 + $0x1088] sm:$0xff]  ;;  %v2194_v21 = vld [vmem:[%s12081_s4 + $0x1090] sm:$0xff] }
 0x33d   : > { %6737 = vmatpush1.bf16.msra.mxu1 %v6736_v2  ;;  %6547 = vmatprep.subr.bf16.mxu0 %v6546_v43  ;;  %v2199_v2 = vld [vmem:[%s12081_s4 + $0x10b8] sm:$0xff]  ;;  %v6748_v39 = vpack.c.bf16 %v2200_v36, %v2194_v21  ;;  %v2222_v36 = vld [vmem:[%s12081_s4 + $0x1170] sm:$0xff] }
 0x33e   : > { %6739 = vmatprep.subr.bf16.mxu1 %v6738_v12  ;;  %v2195_v43 = vld [vmem:[%s12081_s4 + $0x1098] sm:$0xff]  ;;  %v6744_v12 = vpack.c.bf16 %v2188_v34, %v2182_v44  ;;  %v6554_v11 = vpack.c.bf16 %v2199_v2, %v2193_v6  ;;  %v2210_v34 = vld [vmem:[%s12081_s4 + $0x1110] sm:$0xff] }
 0x33f   : > { %v6746_v18 = vpack.c.bf16 %v2201_v20, %v2195_v43  ;;  %v2211_v38 = vld [vmem:[%s12081_s4 + $0x1118] sm:$0xff]  ;;  %v2206_v6 = vld [vmem:[%s12081_s4 + $0x10f0] sm:$0xff]  ;;  %v2212_v43 = vld [vmem:[%s12081_s4 + $0x1120] sm:$0xff] }
 0x340   : > { %6549 = vmatpush1.bf16.msra.mxu0 %v6548_v28  ;;  %v2207_v28 = vld [vmem:[%s12081_s4 + $0x10f8] sm:$0xff]  ;;  %v6558_v44 = vpack.c.bf16 %v2211_v38, %v2205_v8  ;;  %v2217_v20 = vld [vmem:[%s12081_s4 + $0x1148] sm:$0xff]  ;;  %v2218_v8 = vld [vmem:[%s12081_s4 + $0x1150] sm:$0xff] }
 0x341   : > { %6741 = vmatpush1.bf16.msra.mxu1 %v6740_v5  ;;  %6551 = vmatprep.subr.bf16.mxu0 %v6550_v23  ;;  %v2213_v5 = vld [vmem:[%s12081_s4 + $0x1128] sm:$0xff]  ;;  %v6556_v23 = vpack.c.bf16 %v2198_v60, %v2192_v19  ;;  %v6752_v60 = vpack.c.bf16 %v2212_v43, %v2206_v6  ;;  %v2234_v43 = vld [vmem:[%s12081_s4 + $0x11d0] sm:$0xff] }
 0x342   : > { %6743 = vmatprep.subr.bf16.mxu1 %v6742_v22  ;;  %v2204_v22 = vld [vmem:[%s12081_s4 + $0x10e0] sm:$0xff]  ;;  %v6750_v2 = vpack.c.bf16 %v2213_v5, %v2207_v28  ;;  %v2229_v5 = vld [vmem:[%s12081_s4 + $0x11a8] sm:$0xff] }
 0x343   : > { %v6560_v19 = vpack.c.bf16 %v2210_v34, %v2204_v22  ;;  %v2224_v28 = vld [vmem:[%s12081_s4 + $0x1180] sm:$0xff] }
 0x344   : > { %6553 = vmatpush1.bf16.msra.mxu0 %v6552_v45  ;;  %v2223_v45 = vld [vmem:[%s12081_s4 + $0x1178] sm:$0xff]  ;;  %v6756_v34 = vpack.c.bf16 %v2224_v28, %v2218_v8  ;;  %v1674_v8 = vld [vmem:[%s12081_s4 + $0x50] sm:$0xff] }
 0x345   : > { %6745 = vmatpush1.bf16.msra.mxu1 %v6744_v12  ;;  %6555 = vmatprep.subr.bf16.mxu0 %v6554_v11  ;;  %v2219_v12 = vld [vmem:[%s12081_s4 + $0x1158] sm:$0xff]  ;;  %v2225_v11 = vld [vmem:[%s12081_s4 + $0x1188] sm:$0xff]  ;;  %v6562_v21 = vpack.c.bf16 %v2223_v45, %v2217_v20  ;;  %v2230_v20 = vld [vmem:[%s12081_s4 + $0x11b0] sm:$0xff] }
 0x346   : > { %6747 = vmatprep.subr.bf16.mxu1 %v6746_v18  ;;  %v2216_v18 = vld [vmem:[%s12081_s4 + $0x1140] sm:$0xff]  ;;  %v6754_v38 = vpack.c.bf16 %v2225_v11, %v2219_v12  ;;  %v1669_v11 = vld [vmem:[%s12081_s4 + $0x28] sm:$0xff]  ;;  %v1687_v28 = vld [vmem:[%s12081_s4 + $0xb8] sm:$0xff] }
 0x347   : > { %v6564_v22 = vpack.c.bf16 %v2222_v36, %v2216_v18  ;;  %v2236_v12 = vld [vmem:[%s12081_s4 + $0x11e0] sm:$0xff] }
 0x348   : > { %6557 = vmatpush1.bf16.msra.mxu0 %v6556_v23  ;;  %v2235_v23 = vld [vmem:[%s12081_s4 + $0x11d8] sm:$0xff]  ;;  %v1668_v36 = vld [vmem:[%s12081_s4 + $0x20] sm:$0xff] }
 0x349   : > { %6749 = vmatpush1.bf16.msra.mxu1 %v6748_v39  ;;  %6559 = vmatprep.subr.bf16.mxu0 %v6558_v44  ;;  %v2231_v39 = vld [vmem:[%s12081_s4 + $0x11b8] sm:$0xff]  ;;  %v2237_v44 = vld [vmem:[%s12081_s4 + $0x11e8] sm:$0xff]  ;;  %v6566_v6 = vpack.c.bf16 %v2235_v23, %v2229_v5  ;;  %v6764_v5 = vpack.c.bf16 %v1674_v8, %v1668_v36 }
 0x34a   : > { %6751 = vmatprep.subr.bf16.mxu1 %v6750_v2  ;;  %v2228_v2 = vld [vmem:[%s12081_s4 + $0x11a0] sm:$0xff]  ;;  %v6758_v45 = vpack.c.bf16 %v2237_v44, %v2231_v39  ;;  %v1686_v44 = vld [vmem:[%s12081_s4 + $0xb0] sm:$0xff]  ;;  %v1723_v36 = vld [vmem:[%s12081_s4 + $0x1d8] sm:$0xff] }
 0x34b   : > { %v1680_v39 = vld [vmem:[%s12081_s4 + $0x80] sm:$0xff] }
 0x34c   : > { %6561 = vmatpush1.bf16.msra.mxu0 %v6560_v19  ;;  %v1675_v19 = vld [vmem:[%s12081_s4 + $0x58] sm:$0xff] }
 0x34d   : > { %6753 = vmatpush1.bf16.msra.mxu1 %v6752_v60  ;;  %6563 = vmatprep.subr.bf16.mxu0 %v6562_v21  ;;  %v6568_v60 = vpack.c.bf16 %v2234_v43, %v2228_v2  ;;  %v6760_v21 = vpack.c.bf16 %v2236_v12, %v2230_v20  ;;  %v6762_v18 = vpack.c.bf16 %v1675_v19, %v1669_v11  ;;  %v1692_v43 = vld [vmem:[%s12081_s4 + $0xe0] sm:$0xff]  ;;  %v1698_v20 = vld [vmem:[%s12081_s4 + $0x110] sm:$0xff]  ;;  %v1711_v12 = vld [vmem:[%s12081_s4 + $0x178] sm:$0xff] }
 0x34e   : > { %6755 = vmatprep.subr.bf16.mxu1 %v6754_v38  ;;  %v1681_v38 = vld [vmem:[%s12081_s4 + $0x88] sm:$0xff]  ;;  %v6772_v11 = vpack.c.bf16 %v1698_v20, %v1692_v43  ;;  %v1747_v43 = vld [vmem:[%s12081_s4 + $0x298] sm:$0xff] }
 0x34f   : > { %v6766_v23 = vpack.c.bf16 %v1687_v28, %v1681_v38  ;;  %v1716_v28 = vld [vmem:[%s12081_s4 + $0x1a0] sm:$0xff] }
 0x350   : > { %6565 = vmatpush1.bf16.msra.mxu0 %v6564_v22  ;;  %v1693_v22 = vld [vmem:[%s12081_s4 + $0xe8] sm:$0xff] }
 0x351   : > { %6757 = vmatpush1.bf16.msra.mxu1 %v6756_v34  ;;  %6567 = vmatprep.subr.bf16.mxu0 %v6566_v6  ;;  %v1699_v34 = vld [vmem:[%s12081_s4 + $0x118] sm:$0xff]  ;;  %v6768_v6 = vpack.c.bf16 %v1686_v44, %v1680_v39 }
 0x352   : > { %6759 = vmatprep.subr.bf16.mxu1 %v6758_v45  ;;  %v6770_v2 = vpack.c.bf16 %v1699_v34, %v1693_v22  ;;  %v1705_v45 = vld [vmem:[%s12081_s4 + $0x148] sm:$0xff]  ;;  %v1735_v39 = vld [vmem:[%s12081_s4 + $0x238] sm:$0xff]  ;;  %v1728_v34 = vld [vmem:[%s12081_s4 + $0x200] sm:$0xff] }
 0x353   : > { %v6774_v19 = vpack.c.bf16 %v1711_v12, %v1705_v45  ;;  %v1740_v12 = vld [vmem:[%s12081_s4 + $0x260] sm:$0xff] }
 0x354   : > { %6569 = vmatpush1.bf16.msra.mxu0 %v6568_v60  ;;  %v1704_v60 = vld [vmem:[%s12081_s4 + $0x140] sm:$0xff] }
 0x355   : > { %6761 = vmatpush1.bf16.msra.mxu1 %v6760_v21  ;;  %6763 = vmatprep.subr.bf16.mxu0 %v6762_v18  ;;  %v1710_v21 = vld [vmem:[%s12081_s4 + $0x170] sm:$0xff]  ;;  %v1717_v18 = vld [vmem:[%s12081_s4 + $0x1a8] sm:$0xff] }
 0x356   : > { %v6776_v8 = vpack.c.bf16 %v1710_v21, %v1704_v60  ;;  %v6778_v38 = vpack.c.bf16 %v1723_v36, %v1717_v18  ;;  %v1759_v60 = vld [vmem:[%s12081_s4 + $0x2f8] sm:$0xff]  ;;  %v1752_v36 = vld [vmem:[%s12081_s4 + $0x2c0] sm:$0xff] }
 0x357   : > { %3171 = vmatmul.mubr.f32.vlgmr.msra.gmra.mrb[108].mxu0 %v10072_v13 }
 0x358   : > { %3528 = vmatmul.mubr.f32.vlgmr.msra.gmra.mrb[108].mxu1 %v10072_v13  ;;  %3176 = vmatprep.mubr.f32.mxu0 %v10110_v58 }
 0x359   : > { %3533 = vmatprep.mubr.f32.mxu1 %v10110_v58  ;;  %6765 = vmatpush1.bf16.msra.mxu0 %v6764_v5  ;;  %v1722_v5 = vld [vmem:[%s12081_s4 + $0x1d0] sm:$0xff] }
 0x35a   : > { %6767 = vmatprep.subr.bf16.mxu0 %v6766_v23  ;;  %v1729_v23 = vld [vmem:[%s12081_s4 + $0x208] sm:$0xff]  ;;  %v6780_v44 = vpack.c.bf16 %v1722_v5, %v1716_v28  ;;  %v1771_v28 = vld [vmem:[%s12081_s4 + $0x358] sm:$0xff] }
 0x35b   : > { %3177 = vmatmul.mubr.f32.gmra.mrb[110].mxu0 %v10106_v16  ;;  %v6782_v22 = vpack.c.bf16 %v1735_v39, %v1729_v23  ;;  %v1764_v39 = vld [vmem:[%s12081_s4 + $0x320] sm:$0xff] }
 0x35c   : > { %3534 = vmatmul.mubr.f32.gmra.mrb[110].mxu1 %v10106_v16  ;;  %3182 = vmatprep.mubr.f32.mxu0 %v10144_v31 }
 0x35d   : > { %3539 = vmatprep.mubr.f32.mxu1 %v10144_v31  ;;  %6769 = vmatpush1.bf16.msra.mxu0 %v6768_v6  ;;  %v1734_v6 = vld [vmem:[%s12081_s4 + $0x230] sm:$0xff] }
 0x35e   : > { %6771 = vmatprep.subr.bf16.mxu0 %v6770_v2  ;;  %v1741_v2 = vld [vmem:[%s12081_s4 + $0x268] sm:$0xff]  ;;  %v6784_v20 = vpack.c.bf16 %v1734_v6, %v1728_v34  ;;  %v1783_v34 = vld [vmem:[%s12081_s4 + $0x3b8] sm:$0xff] }
 0x35f   : > { %3183 = vmatmul.mubr.f32.gmra.mrb[112].mxu0 %v10140_v7  ;;  %v6786_v45 = vpack.c.bf16 %v1747_v43, %v1741_v2  ;;  %v1776_v43 = vld [vmem:[%s12081_s4 + $0x380] sm:$0xff] }
 0x360   : > { %3540 = vmatmul.mubr.f32.gmra.mrb[112].mxu1 %v10140_v7  ;;  %3188 = vmatprep.mubr.f32.mxu0 %v10178_v42 }
 0x361   : > { %3545 = vmatprep.mubr.f32.mxu1 %v10178_v42  ;;  %6773 = vmatpush1.bf16.msra.mxu0 %v6772_v11  ;;  %v1746_v11 = vld [vmem:[%s12081_s4 + $0x290] sm:$0xff] }
 0x362   : > { %6775 = vmatprep.subr.bf16.mxu0 %v6774_v19  ;;  %v1753_v19 = vld [vmem:[%s12081_s4 + $0x2c8] sm:$0xff]  ;;  %v6788_v21 = vpack.c.bf16 %v1746_v11, %v1740_v12  ;;  %v1795_v12 = vld [vmem:[%s12081_s4 + $0x418] sm:$0xff] }
 0x363   : > { %3189 = vmatmul.mubr.f32.gmra.mrb[114].mxu0 %v10174_v63  ;;  %v6790_v18 = vpack.c.bf16 %v1759_v60, %v1753_v19  ;;  %v1788_v60 = vld [vmem:[%s12081_s4 + $0x3e0] sm:$0xff] }
 0x364   : > { %3546 = vmatmul.mubr.f32.gmra.mrb[114].mxu1 %v10174_v63  ;;  %3194 = vmatprep.mubr.f32.mxu0 %v10212_v57 }
 0x365   : > { %3551 = vmatprep.mubr.f32.mxu1 %v10212_v57  ;;  %6777 = vmatpush1.bf16.msra.mxu0 %v6776_v8  ;;  %v1758_v8 = vld [vmem:[%s12081_s4 + $0x2f0] sm:$0xff] }
 0x366   : > { %6779 = vmatprep.subr.bf16.mxu0 %v6778_v38  ;;  %v1765_v38 = vld [vmem:[%s12081_s4 + $0x328] sm:$0xff]  ;;  %v6792_v5 = vpack.c.bf16 %v1758_v8, %v1752_v36 }
 0x367   : > { %3195 = vmatmul.mubr.f32.gmra.mrb[116].mxu0 %v10208_v48  ;;  %v6794_v23 = vpack.c.bf16 %v1771_v28, %v1765_v38  ;;  %v1800_v38 = vld [vmem:[%s12081_s4 + $0x440] sm:$0xff]  ;;  %v1806_v28 = vld [vmem:[%s12081_s4 + $0x470] sm:$0xff] }
 0x368   : > { %3552 = vmatmul.mubr.f32.gmra.mrb[116].mxu1 %v10208_v48  ;;  %3200 = vmatprep.mubr.f32.mxu0 %v10246_v24 }
 0x369   : > { %3557 = vmatprep.mubr.f32.mxu1 %v10246_v24  ;;  %6781 = vmatpush1.bf16.msra.mxu0 %v6780_v44  ;;  %v1770_v44 = vld [vmem:[%s12081_s4 + $0x350] sm:$0xff] }
 0x36a   : > { %6783 = vmatprep.subr.bf16.mxu0 %v6782_v22  ;;  %v1777_v22 = vld [vmem:[%s12081_s4 + $0x388] sm:$0xff]  ;;  %v6796_v6 = vpack.c.bf16 %v1770_v44, %v1764_v39  ;;  %v6808_v39 = vpack.c.bf16 %v1806_v28, %v1800_v38 }
 0x36b   : > { %3201 = vmatmul.mubr.f32.gmra.mrb[118].mxu0 %v10242_v49  ;;  %v6798_v2 = vpack.c.bf16 %v1783_v34, %v1777_v22  ;;  %v1812_v22 = vld [vmem:[%s12081_s4 + $0x4a0] sm:$0xff]  ;;  %v1818_v34 = vld [vmem:[%s12081_s4 + $0x4d0] sm:$0xff] }
 0x36c   : > { %3558 = vmatmul.mubr.f32.gmra.mrb[118].mxu1 %v10242_v49  ;;  %3206 = vmatprep.mubr.f32.mxu0 %v10280_v26 }
 0x36d   : > { %3563 = vmatprep.mubr.f32.mxu1 %v10280_v26  ;;  %6785 = vmatpush1.bf16.msra.mxu0 %v6784_v20  ;;  %v1782_v20 = vld [vmem:[%s12081_s4 + $0x3b0] sm:$0xff] }
 0x36e   : > { %6787 = vmatprep.subr.bf16.mxu0 %v6786_v45  ;;  %v1789_v45 = vld [vmem:[%s12081_s4 + $0x3e8] sm:$0xff]  ;;  %v6800_v11 = vpack.c.bf16 %v1782_v20, %v1776_v43  ;;  %v6812_v43 = vpack.c.bf16 %v1818_v34, %v1812_v22 }
 0x36f   : > { %3207 = vmatmul.mubr.f32.gmra.mrb[120].mxu0 %v10276_v59  ;;  %v6802_v19 = vpack.c.bf16 %v1795_v12, %v1789_v45  ;;  %v1824_v45 = vld [vmem:[%s12081_s4 + $0x500] sm:$0xff]  ;;  %v1830_v12 = vld [vmem:[%s12081_s4 + $0x530] sm:$0xff] }
 0x370   : > { %3564 = vmatmul.mubr.f32.gmra.mrb[120].mxu1 %v10276_v59  ;;  %3212 = vmatprep.mubr.f32.mxu0 %v10314_v52 }
 0x371   : > { %3569 = vmatprep.mubr.f32.mxu1 %v10314_v52  ;;  %6789 = vmatpush1.bf16.msra.mxu0 %v6788_v21  ;;  %v1794_v21 = vld [vmem:[%s12081_s4 + $0x410] sm:$0xff] }
 0x372   : > { %6791 = vmatprep.subr.bf16.mxu0 %v6790_v18  ;;  %v1801_v18 = vld [vmem:[%s12081_s4 + $0x448] sm:$0xff]  ;;  %v6804_v36 = vpack.c.bf16 %v1794_v21, %v1788_v60  ;;  %v6816_v60 = vpack.c.bf16 %v1830_v12, %v1824_v45 }
 0x373   : > { %3213 = vmatmul.mubr.f32.gmra.mrb[122].mxu0 %v10310_v17 }
 0x374   : > { %3570 = vmatmul.mubr.f32.gmra.mrb[122].mxu1 %v10310_v17  ;;  %3218 = vmatprep.mubr.f32.mxu0 %v10345_v1 }
 0x375   : > { %3575 = vmatprep.mubr.f32.mxu1 %v10345_v1  ;;  %6793 = vmatpush1.bf16.msra.mxu0 %v6792_v5  ;;  %v1813_v5 = vld [vmem:[%s12081_s4 + $0x4a8] sm:$0xff] }
 0x376   : > { %6795 = vmatprep.subr.bf16.mxu0 %v6794_v23  ;;  %v1819_v23 = vld [vmem:[%s12081_s4 + $0x4d8] sm:$0xff] }
 0x377   : > { %3219 = vmatmul.mubr.f32.gmra.mrb[124].mxu0 %v10342_v46  ;;  %v6810_v44 = vpack.c.bf16 %v1819_v23, %v1813_v5  ;;  %v1848_v5 = vld [vmem:[%s12081_s4 + $0x5c0] sm:$0xff]  ;;  %v1854_v23 = vld [vmem:[%s12081_s4 + $0x5f0] sm:$0xff] }
 0x378   : > { %3576 = vmatmul.mubr.f32.gmra.mrb[124].mxu1 %v10342_v46  ;;  %3646 = vmatprep.mubr.f32.mxu0 %v9433_v3  ;;  %v1807_v3 = vld [vmem:[%s12081_s4 + $0x478] sm:$0xff]  ;;  %v6824_v22 = vpack.c.bf16 %v1854_v23, %v1848_v5  ;;  %v1896_v5 = vld [vmem:[%s12081_s4 + $0x740] sm:$0xff]  ;;  %v1902_v23 = vld [vmem:[%s12081_s4 + $0x770] sm:$0xff] }
 0x379   : > { %6797 = vmatpush1.bf16.msra.mxu0 %v6796_v6  ;;  %v6806_v8 = vpack.c.bf16 %v1807_v3, %v1801_v18  ;;  %v1825_v6 = vld [vmem:[%s12081_s4 + $0x508] sm:$0xff]  ;;  %v1836_v18 = vld [vmem:[%s12081_s4 + $0x560] sm:$0xff]  ;;  %v1842_v3 = vld [vmem:[%s12081_s4 + $0x590] sm:$0xff] }
 0x37a   : > { %6799 = vmatprep.subr.bf16.mxu0 %v6798_v2  ;;  %v1831_v2 = vld [vmem:[%s12081_s4 + $0x538] sm:$0xff]  ;;  %v6820_v38 = vpack.c.bf16 %v1842_v3, %v1836_v18 }
 0x37b   : > { %v6814_v20 = vpack.c.bf16 %v1831_v2, %v1825_v6  ;;  %v1860_v6 = vld [vmem:[%s12081_s4 + $0x620] sm:$0xff]  ;;  %v1866_v2 = vld [vmem:[%s12081_s4 + $0x650] sm:$0xff] }
 0x37c   : > { %v6828_v45 = vpack.c.bf16 %v1866_v2, %v1860_v6  ;;  %v1921_v6 = vld [vmem:[%s12081_s4 + $0x808] sm:$0xff] }
 0x37d   : > { %6801 = vmatpush1.bf16.msra.mxu0 %v6800_v11  ;;  %v1837_v11 = vld [vmem:[%s12081_s4 + $0x568] sm:$0xff] }
 0x37e   : > { %6803 = vmatprep.subr.bf16.mxu0 %v6802_v19  ;;  %v1843_v19 = vld [vmem:[%s12081_s4 + $0x598] sm:$0xff] }
 0x37f   : > { %v6818_v21 = vpack.c.bf16 %v1843_v19, %v1837_v11  ;;  %v1872_v11 = vld [vmem:[%s12081_s4 + $0x680] sm:$0xff]  ;;  %v1878_v19 = vld [vmem:[%s12081_s4 + $0x6b0] sm:$0xff] }
 0x380   : > { %v6832_v18 = vpack.c.bf16 %v1878_v19, %v1872_v11  ;;  %v1932_v11 = vld [vmem:[%s12081_s4 + $0x860] sm:$0xff]  ;;  %v1938_v19 = vld [vmem:[%s12081_s4 + $0x890] sm:$0xff] }
 0x381   : > { %6805 = vmatpush1.bf16.msra.mxu0 %v6804_v36  ;;  %v1849_v36 = vld [vmem:[%s12081_s4 + $0x5c8] sm:$0xff] }
 0x382   : > { %6807 = vmatprep.subr.bf16.mxu0 %v6806_v8  ;;  %v1855_v8 = vld [vmem:[%s12081_s4 + $0x5f8] sm:$0xff] }
 0x383   : > { %v6822_v28 = vpack.c.bf16 %v1855_v8, %v1849_v36  ;;  %v1884_v36 = vld [vmem:[%s12081_s4 + $0x6e0] sm:$0xff]  ;;  %v1890_v8 = vld [vmem:[%s12081_s4 + $0x710] sm:$0xff] }
 0x385   : > { %6809 = vmatpush1.bf16.msra.mxu0 %v6808_v39  ;;  %v1861_v39 = vld [vmem:[%s12081_s4 + $0x628] sm:$0xff] }
 0x386   : > { %6811 = vmatprep.subr.bf16.mxu0 %v6810_v44  ;;  %v1867_v44 = vld [vmem:[%s12081_s4 + $0x658] sm:$0xff] }
 0x387   : > { %v6826_v34 = vpack.c.bf16 %v1867_v44, %v1861_v39  ;;  %v1909_v39 = vld [vmem:[%s12081_s4 + $0x7a8] sm:$0xff] }
 0x389   : > { %6813 = vmatpush1.bf16.msra.mxu0 %v6812_v43  ;;  %v1873_v43 = vld [vmem:[%s12081_s4 + $0x688] sm:$0xff] }
 0x38a   : > { %6815 = vmatprep.subr.bf16.mxu0 %v6814_v20  ;;  %v1879_v20 = vld [vmem:[%s12081_s4 + $0x6b8] sm:$0xff] }
 0x38b   : > { %v6830_v12 = vpack.c.bf16 %v1879_v20, %v1873_v43  ;;  %v1920_v43 = vld [vmem:[%s12081_s4 + $0x800] sm:$0xff]  ;;  %v1926_v20 = vld [vmem:[%s12081_s4 + $0x830] sm:$0xff] }
 0x38d   : > { %6817 = vmatpush1.bf16.msra.mxu0 %v6816_v60  ;;  %v1885_v60 = vld [vmem:[%s12081_s4 + $0x6e8] sm:$0xff] }
 0x38e   : > { %6819 = vmatprep.subr.bf16.mxu0 %v6818_v21  ;;  %v1891_v21 = vld [vmem:[%s12081_s4 + $0x718] sm:$0xff] }
 0x38f   : > { %v6834_v3 = vpack.c.bf16 %v1891_v21, %v1885_v60  ;;  %v1945_v60 = vld [vmem:[%s12081_s4 + $0x8c8] sm:$0xff]  ;;  %v6852_v21 = vpack.c.bf16 %v1938_v19, %v1932_v11  ;;  %v1999_v19 = vld [vmem:[%s12081_s4 + $0xa78] sm:$0xff] }
 0x390   : > { %v1993_v11 = vld [vmem:[%s12081_s4 + $0xa48] sm:$0xff] }
 0x391   : > { %6821 = vmatpush1.bf16.msra.mxu0 %v6820_v38  ;;  %v1897_v38 = vld [vmem:[%s12081_s4 + $0x748] sm:$0xff] }
 0x392   : > { %6823 = vmatprep.subr.bf16.mxu0 %v6822_v28 }
 0x395   : > { %6825 = vmatpush1.bf16.msra.mxu0 %v6824_v22  ;;  %v1908_v22 = vld [vmem:[%s12081_s4 + $0x7a0] sm:$0xff] }
 0x396   : > { %6827 = vmatprep.subr.bf16.mxu0 %v6826_v34  ;;  %v1914_v34 = vld [vmem:[%s12081_s4 + $0x7d0] sm:$0xff] }
 0x398   : > { %3647 = vmatmul.mubr.f32.vlgmr.msra.gmra.mrb[126].mxu0 %v9431_v27  ;;  %v1903_v27 = vld [vmem:[%s12081_s4 + $0x778] sm:$0xff] }
 0x399   : > { %3652 = vmatprep.mubr.f32.mxu0 %v9469_v51  ;;  %6829 = vmatpush1.bf16.msra.mxu0 %v6828_v45  ;;  %v6836_v51 = vpack.c.bf16 %v1890_v8, %v1884_v36  ;;  %v6838_v28 = vpack.c.bf16 %v1903_v27, %v1897_v38  ;;  %v1933_v45 = vld [vmem:[%s12081_s4 + $0x868] sm:$0xff]  ;;  %v1950_v36 = vld [vmem:[%s12081_s4 + $0x8f0] sm:$0xff]  ;;  %v12118_v38 = vld [vmem:[#allocation2_spill] sm:$0xff] }
 0x39a   : > { %6831 = vmatprep.subr.bf16.mxu0 %v6830_v12  ;;  %v1957_v8 = vld [vmem:[%s12081_s4 + $0x928] sm:$0xff] }
 0x39b   : > { %v12119_v27 = vld [vmem:[#allocation7_spill] sm:$0xff] }
 0x39c   : > { %3653 = vmatmul.mubr.f32.gmra.mrb[128].mxu0 %v9465_v25  ;;  %v1915_v25 = vld [vmem:[%s12081_s4 + $0x7d8] sm:$0xff] }
 0x39d   : > { %3658 = vmatprep.mubr.f32.mxu0 %v9507_v55  ;;  %6833 = vmatpush1.bf16.msra.mxu0 %v6832_v18  ;;  %v6840_v55 = vpack.c.bf16 %v1902_v23, %v1896_v5  ;;  %v6842_v44 = vpack.c.bf16 %v1915_v25, %v1909_v39  ;;  %v1956_v5 = vld [vmem:[%s12081_s4 + $0x920] sm:$0xff]  ;;  %v1962_v23 = vld [vmem:[%s12081_s4 + $0x950] sm:$0xff]  ;;  %v1969_v39 = vld [vmem:[%s12081_s4 + $0x988] sm:$0xff] }
 0x39e   : > { %6835 = vmatprep.subr.bf16.mxu0 %v6834_v3  ;;  %v1944_v3 = vld [vmem:[%s12081_s4 + $0x8c0] sm:$0xff]  ;;  %v1975_v25 = vld [vmem:[%s12081_s4 + $0x9b8] sm:$0xff] }
 0x3a0   : > { %3659 = vmatmul.mubr.f32.gmra.mrb[130].mxu0 %v9502_v10  ;;  %v1927_v10 = vld [vmem:[%s12081_s4 + $0x838] sm:$0xff] }
 0x3a1   : > { %3664 = vmatprep.mubr.f32.mxu0 %v9545_v35  ;;  %6837 = vmatpush1.bf16.msra.mxu0 %v6836_v51  ;;  %v6844_v35 = vpack.c.bf16 %v1914_v34, %v1908_v22  ;;  %v6846_v2 = vpack.c.bf16 %v1927_v10, %v1921_v6  ;;  %v6856_v51 = vpack.c.bf16 %v1950_v36, %v1944_v3  ;;  %v1968_v6 = vld [vmem:[%s12081_s4 + $0x980] sm:$0xff]  ;;  %v1974_v10 = vld [vmem:[%s12081_s4 + $0x9b0] sm:$0xff]  ;;  %v2011_v3 = vld [vmem:[%s12081_s4 + $0xad8] sm:$0xff] }
 0x3a2   : > { %6839 = vmatprep.subr.bf16.mxu0 %v6838_v28  ;;  %v6860_v22 = vpack.c.bf16 %v1962_v23, %v1956_v5  ;;  %v6862_v34 = vpack.c.bf16 %v1975_v25, %v1969_v39  ;;  %v2016_v23 = vld [vmem:[%s12081_s4 + $0xb00] sm:$0xff]  ;;  %v2022_v39 = vld [vmem:[%s12081_s4 + $0xb30] sm:$0xff]  ;;  %v2029_v25 = vld [vmem:[%s12081_s4 + $0xb68] sm:$0xff] }
 0x3a4   : > { %3665 = vmatmul.mubr.f32.gmra.mrb[132].mxu0 %v9540_v15  ;;  %v1939_v15 = vld [vmem:[%s12081_s4 + $0x898] sm:$0xff] }
 0x3a5   : > { %3670 = vmatprep.mubr.f32.mxu0 %v9583_v14  ;;  %6841 = vmatpush1.bf16.msra.mxu0 %v6840_v55  ;;  %v6848_v14 = vpack.c.bf16 %v1926_v20, %v1920_v43  ;;  %v6850_v12 = vpack.c.bf16 %v1939_v15, %v1933_v45  ;;  %v12120_v55 = vld [vmem:[#allocation6_spill] sm:$0xff]  ;;  %v12122_v43 = vld [vmem:[#allocation9_spill] sm:$0xff]  ;;  %v6864_v45 = vpack.c.bf16 %v1974_v10, %v1968_v6  ;;  %v2034_v6 = vld [vmem:[%s12081_s4 + $0xb90] sm:$0xff] }
 0x3a6   : > { %6843 = vmatprep.subr.bf16.mxu0 %v6842_v44  ;;  %v12121_v44 = vld [vmem:[#allocation10_spill] sm:$0xff]  ;;  %v12123_v20 = vld [vmem:[#allocation5_spill] sm:$0xff]  ;;  %v2041_v10 = vld [vmem:[%s12081_s4 + $0xbc8] sm:$0xff] }
 0x3a8   : > { %3671 = vmatmul.mubr.f32.gmra.mrb[134].mxu0 %v9578_v33  ;;  %v1951_v33 = vld [vmem:[%s12081_s4 + $0x8f8] sm:$0xff] }
 0x3a9   : > { %3676 = vmatprep.mubr.f32.mxu0 %v9621_v53  ;;  %6845 = vmatpush1.bf16.msra.mxu0 %v6844_v35  ;;  %v12117_v53 = vld [vmem:[#allocation3_spill] sm:$0xff]  ;;  %v6854_v18 = vpack.c.bf16 %v1951_v33, %v1945_v60  ;;  %v6870_v33 = vpack.c.bf16 %v1999_v19, %v1993_v11  ;;  %v2052_v19 = vld [vmem:[%s12081_s4 + $0xc20] sm:$0xff] }
 0x3aa   : > { %6847 = vmatprep.subr.bf16.mxu0 %v6846_v2  ;;  %v1981_v35 = vld [vmem:[%s12081_s4 + $0x9e8] sm:$0xff]  ;;  %v1987_v2 = vld [vmem:[%s12081_s4 + $0xa18] sm:$0xff] }
 0x3ab   : > { %v6866_v15 = vpack.c.bf16 %v1987_v2, %v1981_v35  ;;  %v2047_v35 = vld [vmem:[%s12081_s4 + $0xbf8] sm:$0xff] }
 0x3ac   : > { %3677 = vmatmul.mubr.f32.gmra.mrb[136].mxu0 %v9616_v29  ;;  %v1963_v29 = vld [vmem:[%s12081_s4 + $0x958] sm:$0xff] }
 0x3ad   : > { %3682 = vmatprep.mubr.f32.mxu0 %v12117_v53  ;;  %6849 = vmatpush1.bf16.msra.mxu0 %v6848_v14  ;;  %v6858_v28 = vpack.c.bf16 %v1963_v29, %v1957_v8  ;;  %v1980_v14 = vld [vmem:[%s12081_s4 + $0x9e0] sm:$0xff] }
 0x3ae   : > { %6851 = vmatprep.subr.bf16.mxu0 %v6850_v12  ;;  %v1986_v12 = vld [vmem:[%s12081_s4 + $0xa10] sm:$0xff]  ;;  %v1992_v53 = vld [vmem:[%s12081_s4 + $0xa40] sm:$0xff] }
 0x3af   : > { %v6868_v60 = vpack.c.bf16 %v1986_v12, %v1980_v14  ;;  %v2004_v29 = vld [vmem:[%s12081_s4 + $0xaa0] sm:$0xff]  ;;  %v2059_v14 = vld [vmem:[%s12081_s4 + $0xc58] sm:$0xff] }
 0x3b0   : > { %3683 = vmatmul.mubr.f32.gmra.mrb[138].mxu0 %v12118_v38  ;;  %v2010_v38 = vld [vmem:[%s12081_s4 + $0xad0] sm:$0xff] }
 0x3b1   : > { %3688 = vmatprep.mubr.f32.mxu0 %v12119_v27  ;;  %6853 = vmatpush1.bf16.msra.mxu0 %v6852_v21  ;;  %v1998_v21 = vld [vmem:[%s12081_s4 + $0xa70] sm:$0xff]  ;;  %v2017_v27 = vld [vmem:[%s12081_s4 + $0xb08] sm:$0xff] }
 0x3b2   : > { %6855 = vmatprep.subr.bf16.mxu0 %v6854_v18  ;;  %v2005_v18 = vld [vmem:[%s12081_s4 + $0xaa8] sm:$0xff]  ;;  %v6872_v36 = vpack.c.bf16 %v1998_v21, %v1992_v53  ;;  %v2071_v53 = vld [vmem:[%s12081_s4 + $0xcb8] sm:$0xff] }
 0x3b3   : > { %v6874_v8 = vpack.c.bf16 %v2011_v3, %v2005_v18  ;;  %v2064_v3 = vld [vmem:[%s12081_s4 + $0xc80] sm:$0xff] }
 0x3b4   : > { %3689 = vmatmul.mubr.f32.gmra.mrb[140].mxu0 %v12120_v55  ;;  %v2035_v55 = vld [vmem:[%s12081_s4 + $0xb98] sm:$0xff] }
 0x3b5   : > { %3694 = vmatprep.mubr.f32.mxu0 %v12121_v44  ;;  %6857 = vmatpush1.bf16.msra.mxu0 %v6856_v51  ;;  %v2023_v51 = vld [vmem:[%s12081_s4 + $0xb38] sm:$0xff]  ;;  %v6880_v44 = vpack.c.bf16 %v2022_v39, %v2016_v23  ;;  %v2089_v23 = vld [vmem:[%s12081_s4 + $0xd48] sm:$0xff]  ;;  %v12125_v39 = vld [vmem:[#allocation8_spill] sm:$0xff] }
 0x3b6   : > { %6859 = vmatprep.subr.bf16.mxu0 %v6858_v28  ;;  %v6876_v28 = vpack.c.bf16 %v2010_v38, %v2004_v29  ;;  %v6878_v5 = vpack.c.bf16 %v2023_v51, %v2017_v27  ;;  %v2083_v29 = vld [vmem:[%s12081_s4 + $0xd18] sm:$0xff]  ;;  %v12124_v38 = vld [vmem:[#allocation4_spill] sm:$0xff] }
 0x3b8   : > { %3695 = vmatmul.mubr.f32.gmra.mrb[142].mxu0 %v12122_v43  ;;  %v6886_v43 = vpack.c.bf16 %v2047_v35, %v2041_v10  ;;  %v2100_v35 = vld [vmem:[%s12081_s4 + $0xda0] sm:$0xff] }
 0x3b9   : > { %6861 = vmatpush1.bf16.msra.mxu0 %v6860_v22  ;;  %3765 = vmatprep.mubr.f32.mxu0 %v12123_v20  ;;  %v6882_v22 = vpack.c.bf16 %v2035_v55, %v2029_v25  ;;  %v2040_v20 = vld [vmem:[%s12081_s4 + $0xbc0] sm:$0xff] }
 0x3ba   : > { %6863 = vmatprep.subr.bf16.mxu0 %v6862_v34  ;;  %v2028_v34 = vld [vmem:[%s12081_s4 + $0xb60] sm:$0xff] }
 0x3bb   : > { %v6884_v2 = vpack.c.bf16 %v2034_v6, %v2028_v34  ;;  %v2101_v34 = vld [vmem:[%s12081_s4 + $0xda8] sm:$0xff] }
 0x3bd   : > { %6865 = vmatpush1.bf16.msra.mxu0 %v6864_v45  ;;  %v2046_v45 = vld [vmem:[%s12081_s4 + $0xbf0] sm:$0xff] }
 0x3be   : > { %6867 = vmatprep.subr.bf16.mxu0 %v6866_v15  ;;  %v2053_v15 = vld [vmem:[%s12081_s4 + $0xc28] sm:$0xff]  ;;  %v6888_v12 = vpack.c.bf16 %v2046_v45, %v2040_v20  ;;  %v2112_v45 = vld [vmem:[%s12081_s4 + $0xe00] sm:$0xff] }
 0x3bf   : > { %v6890_v11 = vpack.c.bf16 %v2059_v14, %v2053_v15  ;;  %v2118_v15 = vld [vmem:[%s12081_s4 + $0xe30] sm:$0xff]  ;;  %v2125_v14 = vld [vmem:[%s12081_s4 + $0xe68] sm:$0xff] }
 0x3c1   : > { %6869 = vmatpush1.bf16.msra.mxu0 %v6868_v60  ;;  %v2058_v60 = vld [vmem:[%s12081_s4 + $0xc50] sm:$0xff] }
 0x3c2   : > { %6871 = vmatprep.subr.bf16.mxu0 %v6870_v33  ;;  %v2065_v33 = vld [vmem:[%s12081_s4 + $0xc88] sm:$0xff]  ;;  %v6892_v21 = vpack.c.bf16 %v2058_v60, %v2052_v19  ;;  %v2130_v19 = vld [vmem:[%s12081_s4 + $0xe90] sm:$0xff] }
 0x3c3   : > { %v6894_v18 = vpack.c.bf16 %v2071_v53, %v2065_v33  ;;  %v2137_v60 = vld [vmem:[%s12081_s4 + $0xec8] sm:$0xff]  ;;  %v2136_v53 = vld [vmem:[%s12081_s4 + $0xec0] sm:$0xff] }
 0x3c5   : > { %6873 = vmatpush1.bf16.msra.mxu0 %v6872_v36  ;;  %v2070_v36 = vld [vmem:[%s12081_s4 + $0xcb0] sm:$0xff] }
 0x3c6   : > { %6875 = vmatprep.subr.bf16.mxu0 %v6874_v8  ;;  %v2077_v8 = vld [vmem:[%s12081_s4 + $0xce8] sm:$0xff]  ;;  %v6896_v27 = vpack.c.bf16 %v2070_v36, %v2064_v3  ;;  %v2148_v36 = vld [vmem:[%s12081_s4 + $0xf20] sm:$0xff] }
 0x3c7   : > { %v6898_v51 = vpack.c.bf16 %v2083_v29, %v2077_v8  ;;  %v2154_v8 = vld [vmem:[%s12081_s4 + $0xf50] sm:$0xff]  ;;  %v2161_v29 = vld [vmem:[%s12081_s4 + $0xf88] sm:$0xff] }
 0x3c9   : > { %6877 = vmatpush1.bf16.msra.mxu0 %v6876_v28  ;;  %v2076_v28 = vld [vmem:[%s12081_s4 + $0xce0] sm:$0xff] }
 0x3ca   : > { %6879 = vmatprep.subr.bf16.mxu0 %v6878_v5  ;;  %v2082_v5 = vld [vmem:[%s12081_s4 + $0xd10] sm:$0xff] }
 0x3cb   : > { %v6900_v25 = vpack.c.bf16 %v2082_v5, %v2076_v28  ;;  %v2173_v28 = vld [vmem:[%s12081_s4 + $0xfe8] sm:$0xff]  ;;  %v12127_v5 = vld [vmem:[#allocation12_spill] sm:$0xff] }
 0x3cd   : > { %6881 = vmatpush1.bf16.msra.mxu0 %v6880_v44  ;;  %v2088_v44 = vld [vmem:[%s12081_s4 + $0xd40] sm:$0xff] }
 0x3ce   : > { %6883 = vmatprep.subr.bf16.mxu0 %v6882_v22  ;;  %v2094_v22 = vld [vmem:[%s12081_s4 + $0xd70] sm:$0xff] }
 0x3cf   : > { %v6904_v6 = vpack.c.bf16 %v2094_v22, %v2088_v44  ;;  %v2191_v44 = vld [vmem:[%s12081_s4 + $0x1078] sm:$0xff] }
 0x3d1   : > { %6885 = vmatpush1.bf16.msra.mxu0 %v6884_v2  ;;  %v2106_v2 = vld [vmem:[%s12081_s4 + $0xdd0] sm:$0xff] }
 0x3d2   : > { %6887 = vmatprep.subr.bf16.mxu0 %v6886_v43  ;;  %v2113_v43 = vld [vmem:[%s12081_s4 + $0xe08] sm:$0xff] }
 0x3d5   : > { %6889 = vmatpush1.bf16.msra.mxu0 %v6888_v12 }
 0x3d6   : > { %6891 = vmatprep.subr.bf16.mxu0 %v6890_v11  ;;  %v2124_v11 = vld [vmem:[%s12081_s4 + $0xe60] sm:$0xff] }
 0x3d8   : > { %3766 = vmatmul.mubr.f32.vlgmr.msra.gmra.mrb[126].mxu0 %v12124_v38 }
 0x3d9   : > { %3771 = vmatprep.mubr.f32.mxu0 %v9717_v0  ;;  %6893 = vmatpush1.bf16.msra.mxu0 %v6892_v21  ;;  %v2095_v0 = vld [vmem:[%s12081_s4 + $0xd78] sm:$0xff]  ;;  %v2142_v21 = vld [vmem:[%s12081_s4 + $0xef0] sm:$0xff] }
 0x3da   : > { %6895 = vmatprep.subr.bf16.mxu0 %v6894_v18  ;;  %v6902_v55 = vpack.c.bf16 %v2095_v0, %v2089_v23  ;;  %v2149_v18 = vld [vmem:[%s12081_s4 + $0xf28] sm:$0xff] }
 0x3dc   : > { %3772 = vmatmul.mubr.f32.gmra.mrb[128].mxu0 %v12125_v39  ;;  %v2172_v39 = vld [vmem:[%s12081_s4 + $0xfe0] sm:$0xff] }
 0x3dd   : > { %3777 = vmatprep.mubr.f32.mxu0 %v9760_v4  ;;  %6897 = vmatpush1.bf16.msra.mxu0 %v6896_v27  ;;  %v2107_v4 = vld [vmem:[%s12081_s4 + $0xdd8] sm:$0xff]  ;;  %v2160_v27 = vld [vmem:[%s12081_s4 + $0xf80] sm:$0xff] }
 0x3de   : > { %6899 = vmatprep.subr.bf16.mxu0 %v6898_v51  ;;  %v6906_v10 = vpack.c.bf16 %v2107_v4, %v2101_v34  ;;  %v2166_v51 = vld [vmem:[%s12081_s4 + $0xfb0] sm:$0xff]  ;;  %v2184_v4 = vld [vmem:[%s12081_s4 + $0x1040] sm:$0xff] }
 0x3df   : > { %v6928_v23 = vpack.c.bf16 %v2166_v51, %v2160_v27 }
 0x3e0   : > { %3778 = vmatmul.mubr.f32.gmra.mrb[130].mxu0 %v9748_v30  ;;  %v2119_v30 = vld [vmem:[%s12081_s4 + $0xe38] sm:$0xff] }
 0x3e1   : > { %3783 = vmatprep.mubr.f32.mxu0 %v9800_v61  ;;  %6901 = vmatpush1.bf16.msra.mxu0 %v6900_v25  ;;  %v6908_v61 = vpack.c.bf16 %v2106_v2, %v2100_v35  ;;  %v6910_v20 = vpack.c.bf16 %v2119_v30, %v2113_v43  ;;  %v2178_v25 = vld [vmem:[%s12081_s4 + $0x1010] sm:$0xff]  ;;  %v2203_v35 = vld [vmem:[%s12081_s4 + $0x10d8] sm:$0xff]  ;;  %v2196_v30 = vld [vmem:[%s12081_s4 + $0x10a0] sm:$0xff] }
 0x3e2   : > { %6903 = vmatprep.subr.bf16.mxu0 %v6902_v55  ;;  %v2185_v55 = vld [vmem:[%s12081_s4 + $0x1048] sm:$0xff]  ;;  %v6932_v22 = vpack.c.bf16 %v2178_v25, %v2172_v39 }
 0x3e3   : > { %v6934_v34 = vpack.c.bf16 %v2191_v44, %v2185_v55 }
 0x3e4   : > { %3784 = vmatmul.mubr.f32.gmra.mrb[132].mxu0 %v9788_v32  ;;  %v2131_v32 = vld [vmem:[%s12081_s4 + $0xe98] sm:$0xff] }
 0x3e5   : > { %3789 = vmatprep.mubr.f32.mxu0 %v9834_v54  ;;  %6905 = vmatpush1.bf16.msra.mxu0 %v6904_v6  ;;  %v6912_v54 = vpack.c.bf16 %v2118_v15, %v2112_v45  ;;  %v6914_v12 = vpack.c.bf16 %v2131_v32, %v2125_v14  ;;  %v2190_v6 = vld [vmem:[%s12081_s4 + $0x1070] sm:$0xff]  ;;  %v2215_v45 = vld [vmem:[%s12081_s4 + $0x1138] sm:$0xff]  ;;  %v2208_v32 = vld [vmem:[%s12081_s4 + $0x1100] sm:$0xff] }
 0x3e6   : > { %6907 = vmatprep.subr.bf16.mxu0 %v6906_v10  ;;  %v2197_v10 = vld [vmem:[%s12081_s4 + $0x10a8] sm:$0xff]  ;;  %v6936_v2 = vpack.c.bf16 %v2190_v6, %v2184_v4 }
 0x3e7   : > { %v6938_v43 = vpack.c.bf16 %v2203_v35, %v2197_v10 }
 0x3e8   : > { %3790 = vmatmul.mubr.f32.gmra.mrb[134].mxu0 %v9822_v40  ;;  %v2143_v40 = vld [vmem:[%s12081_s4 + $0xef8] sm:$0xff] }
 0x3e9   : > { %3795 = vmatprep.mubr.f32.mxu0 %v9868_v62  ;;  %6909 = vmatpush1.bf16.msra.mxu0 %v6908_v61  ;;  %v6916_v62 = vpack.c.bf16 %v2130_v19, %v2124_v11  ;;  %v6918_v33 = vpack.c.bf16 %v2143_v40, %v2137_v60  ;;  %v2202_v61 = vld [vmem:[%s12081_s4 + $0x10d0] sm:$0xff]  ;;  %v2227_v11 = vld [vmem:[%s12081_s4 + $0x1198] sm:$0xff]  ;;  %v2220_v40 = vld [vmem:[%s12081_s4 + $0x1160] sm:$0xff] }
 0x3ea   : > { %6911 = vmatprep.subr.bf16.mxu0 %v6910_v20  ;;  %v2209_v20 = vld [vmem:[%s12081_s4 + $0x1108] sm:$0xff]  ;;  %v6940_v15 = vpack.c.bf16 %v2202_v61, %v2196_v30 }
 0x3eb   : > { %v6942_v14 = vpack.c.bf16 %v2215_v45, %v2209_v20 }
 0x3ec   : > { %3796 = vmatmul.mubr.f32.gmra.mrb[136].mxu0 %v9856_v9  ;;  %v2155_v9 = vld [vmem:[%s12081_s4 + $0xf58] sm:$0xff] }
 0x3ed   : > { %3801 = vmatprep.mubr.f32.mxu0 %v9902_v41  ;;  %6913 = vmatpush1.bf16.msra.mxu0 %v6912_v54  ;;  %v6920_v41 = vpack.c.bf16 %v2142_v21, %v2136_v53  ;;  %v6922_v3 = vpack.c.bf16 %v2155_v9, %v2149_v18  ;;  %v2214_v54 = vld [vmem:[%s12081_s4 + $0x1130] sm:$0xff]  ;;  %v2239_v53 = vld [vmem:[%s12081_s4 + $0x11f8] sm:$0xff]  ;;  %v2232_v9 = vld [vmem:[%s12081_s4 + $0x11c0] sm:$0xff] }
 0x3ee   : > { %6915 = vmatprep.subr.bf16.mxu0 %v6914_v12  ;;  %v2221_v12 = vld [vmem:[%s12081_s4 + $0x1168] sm:$0xff]  ;;  %v6944_v19 = vpack.c.bf16 %v2214_v54, %v2208_v32 }
 0x3ef   : > { %v6946_v60 = vpack.c.bf16 %v2227_v11, %v2221_v12 }
 0x3f0   : > { %3802 = vmatmul.mubr.f32.gmra.mrb[138].mxu0 %v9890_v50  ;;  %v2167_v50 = vld [vmem:[%s12081_s4 + $0xfb8] sm:$0xff] }
 0x3f1   : > { %3807 = vmatprep.mubr.f32.mxu0 %v9936_v56  ;;  %6917 = vmatpush1.bf16.msra.mxu0 %v6916_v62  ;;  %v6924_v56 = vpack.c.bf16 %v2154_v8, %v2148_v36  ;;  %v6926_v38 = vpack.c.bf16 %v2167_v50, %v2161_v29  ;;  %v2226_v62 = vld [vmem:[%s12081_s4 + $0x1190] sm:$0xff] }
 0x3f2   : > { %6919 = vmatprep.subr.bf16.mxu0 %v6918_v33  ;;  %v2233_v33 = vld [vmem:[%s12081_s4 + $0x11c8] sm:$0xff]  ;;  %v6948_v21 = vpack.c.bf16 %v2226_v62, %v2220_v40 }
 0x3f3   : > { %v6950_v18 = vpack.c.bf16 %v2239_v53, %v2233_v33 }
 0x3f4   : > { %3808 = vmatmul.mubr.f32.gmra.mrb[140].mxu0 %v9924_v37  ;;  %v2179_v37 = vld [vmem:[%s12081_s4 + $0x1018] sm:$0xff] }
 0x3f5   : > { %3813 = vmatprep.mubr.f32.mxu0 %v9970_v47  ;;  %6921 = vmatpush1.bf16.msra.mxu0 %v6920_v41  ;;  %v12126_v47 = vld [vmem:[#allocation11_spill] sm:$0xff]  ;;  %v6930_v0 = vpack.c.bf16 %v2179_v37, %v2173_v28  ;;  %v2238_v41 = vld [vmem:[%s12081_s4 + $0x11f0] sm:$0xff] }
 0x3f6   : > { %6923 = vmatprep.subr.bf16.mxu0 %v6922_v3  ;;  %v6952_v3 = vpack.c.bf16 %v2238_v41, %v2232_v9 }
 0x3f8   : > { %3814 = vmatmul.mubr.f32.gmra.mrb[142].mxu0 %v12126_v47 }
 0x3f9   : > { %6925 = vmatpush1.bf16.msra.mxu0 %v6924_v56  ;;  %3884 = vmatprep.mubr.f32.mxu0 %v12127_v5 }
 0x3fa   : > { %6927 = vmatprep.subr.bf16.mxu0 %v6926_v38 }
 0x3fd   : > { %6929 = vmatpush1.bf16.msra.mxu0 %v6928_v23 }
 0x3fe   : > { %6931 = vmatprep.subr.bf16.mxu0 %v6930_v0 }
 0x401   : > { %6933 = vmatpush1.bf16.msra.mxu0 %v6932_v22 }
 0x402   : > { %6935 = vmatprep.subr.bf16.mxu0 %v6934_v34 }
 0x405   : > { %6937 = vmatpush1.bf16.msra.mxu0 %v6936_v2 }
 0x406   : > { %6939 = vmatprep.subr.bf16.mxu0 %v6938_v43 }
 0x409   : > { %6941 = vmatpush1.bf16.msra.mxu0 %v6940_v15 }
 0x40a   : > { %6943 = vmatprep.subr.bf16.mxu0 %v6942_v14 }
 0x40d   : > { %6945 = vmatpush1.bf16.msra.mxu0 %v6944_v19 }
 0x40e   : > { %6947 = vmatprep.subr.bf16.mxu0 %v6946_v60 }
 0x411   : > { %6949 = vmatpush1.bf16.msra.mxu0 %v6948_v21 }
 0x412   : > { %6951 = vmatprep.subr.bf16.mxu0 %v6950_v18 }
 0x415   : > { %6953 = vmatpush1.bf16.msra.mxu0 %v6952_v3 }
 0x418   : > { %3885 = vmatmul.mubr.f32.vlgmr.msra.gmra.mrb[126].mxu0 %v10072_v13 }
 0x419   : > { %3890 = vmatprep.mubr.f32.mxu0 %v10110_v58 }
 0x41c   : > { %3891 = vmatmul.mubr.f32.gmra.mrb[128].mxu0 %v10106_v16 }
 0x41d   : > { %3896 = vmatprep.mubr.f32.mxu0 %v10144_v31 }
 0x420   : > { %3897 = vmatmul.mubr.f32.gmra.mrb[130].mxu0 %v10140_v7 }
 0x421   : > { %3902 = vmatprep.mubr.f32.mxu0 %v10178_v42 }
 0x424   : > { %3903 = vmatmul.mubr.f32.gmra.mrb[132].mxu0 %v10174_v63 }
 0x425   : > { %3908 = vmatprep.mubr.f32.mxu0 %v10212_v57 }
 0x428   : > { %3909 = vmatmul.mubr.f32.gmra.mrb[134].mxu0 %v10208_v48 }
 0x429   : > { %3914 = vmatprep.mubr.f32.mxu0 %v10246_v24 }
 0x42a   : > { %v3172_v36 = vpop.f32.mrb[108].mxu0 }
 0x42b   : > { %v11112_v13 = vpop.f32.mrb[108].mxu1  ;;  %v3174_v58 = vpop.f32.mrb[109].mxu0 }
 0x42c   : > { %v3531_v8 = vpop.f32.mrb[109].mxu1  ;;  %3915 = vmatmul.mubr.f32.gmra.mrb[136].mxu0 %v10242_v49 }
 0x42d   : > { %v11115_v16 = vmax.f32 %v3172_v36, %v3531_v8  ;;  %3920 = vmatprep.mubr.f32.mxu0 %v10280_v26 }
 0x42e   : > { %v3178_v7 = vpop.f32.mrb[110].mxu0 }
 0x42f   : > { %v3535_v31 = vpop.f32.mrb[110].mxu1  ;;  %v3180_v63 = vpop.f32.mrb[111].mxu0 }
 0x430   : > { %v3537_v42 = vpop.f32.mrb[111].mxu1  ;;  %3921 = vmatmul.mubr.f32.gmra.mrb[138].mxu0 %v10276_v59 }
 0x431   : > { %v11119_v48 = vmax.f32 %v3178_v7, %v3537_v42  ;;  %3926 = vmatprep.mubr.f32.mxu0 %v10314_v52 }
 0x432   : > { %v3184_v57 = vpop.f32.mrb[112].mxu0 }
 0x433   : > { %v11122_v24 = vpop.f32.mrb[112].mxu1  ;;  %v3186_v29 = vpop.f32.mrb[113].mxu0  ;;  %v7450_v49 = vpack.i.bf16 %v11119_v48, %v11115_v16  ;;  %v4295_v36 = vpack.c.bf16 %v11119_v48, %v11115_v16 }
 0x434   : > { %v3543_v50 = vpop.f32.mrb[113].mxu1  ;;  %3927 = vmatmul.mubr.f32.gmra.mrb[140].mxu0 %v10310_v17 }
 0x435   : > { %v11127_v26 = vmax.f32 %v3184_v57, %v3543_v50  ;;  %7451 = vrot.lane.b32.xlu1 %v7450_v49, %s7804_s25  ;;  %3932 = vmatprep.mubr.f32.mxu0 %v10345_v1 }
 0x436   : > { %v3190_v59 = vpop.f32.mrb[114].mxu0 }
 0x437   : > { %v11131_v56 = vpop.f32.mrb[114].mxu1  ;;  %v11133_v52 = vpop.f32.mrb[115].mxu0 }
 0x438   : > { %v3549_v38 = vpop.f32.mrb[115].mxu1  ;;  %3933 = vmatmul.mubr.f32.gmra.mrb[142].mxu0 %v10342_v46 }
 0x439   : > { %v11136_v27 = vmax.f32 %v3190_v59, %v3549_v38 }
 0x43a   : > { %v3196_v51 = vpop.f32.mrb[116].mxu0 }
 0x43b   : > { %v11138_v28 = vpop.f32.mrb[116].mxu1  ;;  %v11140_v17 = vpop.f32.mrb[117].mxu0  ;;  %v7455_v37 = vpack.i.bf16 %v11136_v27, %v11127_v26 }
 0x43c   : > { %v3555_v47 = vpop.f32.mrb[117].mxu1 }
 0x43d   : > { %v11144_v1 = vmax.f32 %v3196_v51, %v3555_v47  ;;  %7456 = vrot.lane.b32.xlu0 %v7455_v37, %s7804_s25 }
 0x43e   : > { %v3202_v5 = vpop.f32.mrb[118].mxu0 }
 0x43f   : > { %v11147_v23 = vpop.f32.mrb[118].mxu1  ;;  %v11149_v0 = vpop.f32.mrb[119].mxu0 }
 0x440   : > { %v3561_v46 = vpop.f32.mrb[119].mxu1 }
 0x441   : > { %v11151_v39 = vmax.f32 %v3202_v5, %v3561_v46 }
 0x442   : > { %v3208_v25 = vpop.f32.mrb[120].mxu0 }
 0x443   : > { %v11153_v55 = vpop.f32.mrb[120].mxu1  ;;  %v11155_v44 = vpop.f32.mrb[121].mxu0  ;;  %v4299_v22 = vpack.c.bf16 %v11151_v39, %v11144_v1  ;;  %v7555_v34 = vpack.i.bf16 %v11151_v39, %v11144_v1 }
 0x444   : > { %v3567_v4 = vpop.f32.mrb[121].mxu1 }
 0x445   : > { %v11161_v6 = vmax.f32 %v3208_v25, %v3567_v4 }
 0x446   : > { %v3214_v10 = vpop.f32.mrb[122].mxu0 }
 0x447   : > { %v11163_v35 = vpop.f32.mrb[122].mxu1  ;;  %v11165_v2 = vpop.f32.mrb[123].mxu0  ;;  %v7625_v43 = vpack.i.bf16 %v11161_v6, %v11151_v39 }
 0x448   : > { %v3573_v30 = vpop.f32.mrb[123].mxu1 }
 0x449   : > { %v11169_v61 = vmax.f32 %v3214_v10, %v3573_v30 }
 0x44a   : > { %v3220_v20 = vpop.f32.mrb[124].mxu0 }
 0x44b   : > { %v11171_v45 = vpop.f32.mrb[124].mxu1  ;;  %v11173_v15 = vpop.f32.mrb[125].mxu0  ;;  %v4301_v14 = vpack.c.bf16 %v11169_v61, %v11161_v6  ;;  %v7570_v32 = vpack.i.bf16 %v11169_v61, %v11161_v6 }
 0x44c   : > { %v3579_v54 = vpop.f32.mrb[125].mxu1 }
 0x44d   : > { %v11179_v12 = vmax.f32 %v3220_v20, %v3579_v54 }
 0x44f   : > { %4041 = vrot.lane.b32.xlu0 %v11179_v12, %s7803_s24 }
 0x4eb   : > { %v3886_v11 = vpop.f32.mrb[126].mxu0 }
 0x4ec   : > { %v3940_v19 = vmax.f32 %v3174_v58, %v3886_v11  ;;  %v3888_v60 = vpop.f32.mrb[127].mxu0 }
 0x4ed   : > { %v11184_v40 = vmax.f32 %v11112_v13, %v3888_v60 }
 0x4ef   : > { %v3892_v62 = vpop.f32.mrb[128].mxu0  ;;  %v11187_v33 = vpack.i.bf16 %v11184_v40, %v3940_v19 }
 0x4f0   : > { %v3943_v53 = vmax.f32 %v3180_v63, %v3892_v62  ;;  %v3894_v21 = vpop.f32.mrb[129].mxu0 }
 0x4f1   : > { %v11189_v18 = vmax.f32 %v3535_v31, %v3894_v21  ;;  %7461 = vrot.lane.b32.xlu1 %v11187_v33, %s7803_s24 }
 0x4f2   : > { %v11194_v9 = vpack.i.bf16 %v3943_v53, %v11115_v16  ;;  %v11196_v41 = vpack.c.bf16 %v3943_v53, %v3940_v19 }
 0x4f3   : > { %v3898_v3 = vpop.f32.mrb[130].mxu0  ;;  %v7475_v13 = vpack.i.bf16 %v11189_v18, %v3943_v53  ;;  %v4331_v58 = vpack.c.bf16 %v11189_v18, %v11184_v40  ;;  %v7743_v40 = vld [vmem:[%s12082_s5 + $0x48] ss:$12 sps:$4 sm:$0xff]  }
 0x4f4   : > { %v3946_v8 = vmax.f32 %v3186_v29, %v3898_v3  ;;  %7471 = vrot.lane.b32.xlu0 %v11194_v9, %s7803_s24  ;;  %v3900_v7 = vpop.f32.mrb[131].mxu0  ;;  %4585 = vmatprep.subr.bf16.mxu1 %v11196_v41 }
 0x4f5   : > { %v11207_v31 = vmax.f32 %v11122_v24, %v3900_v7  ;;  %7466 = vrot.lane.b32.xlu1 %v11187_v33, %s7804_s25  ;;  %4586 = vmatpush1.bf16.msra.mxu1 %v4295_v36 }
 0x4f6   : > { %v11212_v16 = vpack.i.bf16 %v3946_v8, %v11189_v18  ;;  %v7744_v18 = vld [vmem:[%s12082_s5 + $0x64] ss:$12 sps:$4 sm:$0xff]  }
 0x4f7   : > { %v3904_v63 = vpop.f32.mrb[132].mxu0  ;;  %v7490_v42 = vpack.i.bf16 %v11207_v31, %v3946_v8  ;;  %v11224_v24 = vpack.i.bf16 %v11119_v48, %v11207_v31 }
 0x4f8   : > { %v3949_v57 = vmax.f32 %v11133_v52, %v3904_v63  ;;  %7476 = vrot.lane.b32.xlu0 %v7475_v13, %s7804_s25  ;;  %v3906_v29 = vpop.f32.mrb[133].mxu0  ;;  %v4297_v52 = vpack.c.bf16 %v11136_v27, %v11127_v26 }
 0x4f9   : > { %v11218_v49 = vmax.f32 %v11131_v56, %v3906_v29  ;;  %7481 = vrot.lane.b32.xlu1 %v11212_v16, %s7803_s24  ;;  %v4347_v29 = vld [vmem:[%s12083_s6 + $0x50] sm:$0xff] }
 0x4fa   : > { %v11226_v50 = vpack.c.bf16 %v3949_v57, %v3946_v8  ;;  %v11229_v59 = vpack.i.bf16 %v3949_v57, %v11127_v26 }
 0x4fb   : > { %v3910_v38 = vpop.f32.mrb[134].mxu0  ;;  %v7500_v51 = vpack.i.bf16 %v11218_v49, %v3949_v57  ;;  %v4332_v56 = vpack.c.bf16 %v11218_v49, %v11207_v31  ;;  %v4348_v57 = vld [vmem:[%s12083_s6 + $0x58] sm:$0xff] }
 0x4fc   : > { %v3952_v37 = vmax.f32 %v11140_v17, %v3910_v38  ;;  %7486 = vrot.lane.b32.xlu0 %v11224_v24, %s7803_s24  ;;  %v3912_v48 = vpop.f32.mrb[135].mxu0  ;;  %4587 = vmatprep.subr.bf16.mxu1 %v11226_v50  ;;  %v4352_v38 = vld [vmem:[%s12083_s6 + $0x78] sm:$0xff] }
 0x4fd   : > { %v11241_v47 = vmax.f32 %v11138_v28, %v3912_v48  ;;  %7496 = vrot.lane.b32.xlu1 %v11229_v59, %s7803_s24  ;;  %4588 = vmatpush1.bf16.msra.mxu1 %v4297_v52  ;;  %v4351_v52 = vld [vmem:[%s12083_s6 + $0x70] sm:$0xff] }
 0x4fe   : > { %v7505_v26 = vpack.i.bf16 %v3952_v37, %v11218_v49  ;;  %v7746_v49 = vld [vmem:[%s12082_s5 + $0x60] ss:$12 sps:$4 sm:$0xff]  }
 0x4ff   : > { %v3916_v5 = vpop.f32.mrb[136].mxu0  ;;  %v7515_v46 = vpack.i.bf16 %v11241_v47, %v3952_v37  ;;  %v7510_v20 = vpack.i.bf16 %v11136_v27, %v11241_v47 }
 0x500   : > { %v3955_v17 = vmax.f32 %v11149_v0, %v3916_v5  ;;  %7491 = vrot.lane.b32.xlu0 %v7490_v42, %s7804_s25  ;;  %v3918_v25 = vpop.f32.mrb[137].mxu0  ;;  %v4345_v42 = vld [vmem:[%s12083_s6 + $0x40] sm:$0xff] }
 0x501   : > { %v11250_v4 = vmax.f32 %v11147_v23, %v3918_v25  ;;  %7501 = vrot.lane.b32.xlu1 %v7500_v51, %s7804_s25  ;;  %v11398_v51 = vpop.permute.xlu0 %7456 }
 0x502   : > { %v11253_v28 = vpack.c.bf16 %v3955_v17, %v3952_v37  ;;  %v7520_v10 = vpack.i.bf16 %v3955_v17, %v11144_v1  ;;  %v11400_v37 = vpop.permute.xlu1 %7451 }
 0x503   : > { %v3922_v30 = vpop.f32.mrb[138].mxu0  ;;  %v7545_v54 = vpack.i.bf16 %v11250_v4, %v3955_v17  ;;  %v4333_v0 = vpack.c.bf16 %v11250_v4, %v11241_v47  ;;  %v7750_v47 = vld [vmem:[%s12082_s5 + $0x94] ss:$12 sps:$4 sm:$0xff]  }
 0x504   : > { %v3958_v11 = vmax.f32 %v11155_v44, %v3922_v30  ;;  %7506 = vrot.lane.b32.xlu0 %v7505_v26, %s7803_s24  ;;  %v3924_v23 = vpop.f32.mrb[139].mxu0  ;;  %4589 = vmatprep.subr.bf16.mxu1 %v11253_v28 }
 0x505   : > { %v11265_v19 = vmax.f32 %v11153_v55, %v3924_v23  ;;  %7511 = vrot.lane.b32.xlu1 %v7510_v20, %s7803_s24  ;;  %4590 = vmatpush1.bf16.msra.mxu1 %v4299_v22  ;;  %v11402_v48 = vpop.permute.xlu0 %4041 }
 0x506   : > { %v7525_v27 = vpack.i.bf16 %v3958_v11, %v11250_v4  ;;  %v7752_v4 = vld [vmem:[%s12082_s5 + $0x90] ss:$12 sps:$4 sm:$0xff]  }
 0x507   : > { %v3928_v60 = vpop.f32.mrb[140].mxu0  ;;  %v7530_v44 = vpack.i.bf16 %v11151_v39, %v11265_v19  ;;  %v7560_v62 = vpack.i.bf16 %v11265_v19, %v3958_v11  ;;  %v4340_v39 = vld [vmem:[%s12083_s6 + $0x18] sm:$0xff] }
 0x508   : > { %v3961_v53 = vmax.f32 %v11165_v2, %v3928_v60  ;;  %7521 = vrot.lane.b32.xlu0 %v7520_v10, %s7803_s24  ;;  %v3930_v55 = vpop.f32.mrb[141].mxu0 }
 0x509   : > { %v11278_v21 = vmax.f32 %v11163_v35, %v3930_v55  ;;  %7516 = vrot.lane.b32.xlu1 %v7515_v46, %s7804_s25 }
 0x50a   : > { %v11281_v3 = vpack.c.bf16 %v3961_v53, %v3958_v11  ;;  %v7535_v22 = vpack.i.bf16 %v3961_v53, %v11161_v6  ;;  %v4339_v6 = vld [vmem:[%s12083_s6 + $0x10] sm:$0xff] }
 0x50b   : > { %v3934_v36 = vpop.f32.mrb[142].mxu0  ;;  %v7565_v13 = vpack.i.bf16 %v11278_v21, %v3961_v53  ;;  %v4334_v8 = vpack.c.bf16 %v11278_v21, %v11265_v19  ;;  %v12128_v19 = vmov 0  }
 0x50c   : > { %v11288_v2 = vmax.f32 %v11173_v15, %v3934_v36  ;;  %7531 = vrot.lane.b32.xlu0 %v7530_v44, %s7803_s24  ;;  %v3936_v7 = vpop.f32.mrb[143].mxu0  ;;  %4591 = vmatprep.subr.bf16.mxu1 %v11281_v3 }
 0x50d   : > { %v11293_v35 = vmax.f32 %v11171_v45, %v3936_v7  ;;  %7526 = vrot.lane.b32.xlu1 %v7525_v27, %s7803_s24  ;;  %4592 = vmatpush1.bf16.msra.mxu1 %v4301_v14  ;;  %v7734_v45 = vld [vmem:[%s12082_s5 + $0x4] ss:$12 sps:$4 sm:$0xff]   ;;  %v7640_v14 = vpack.i.bf16 %v11179_v12, %v11169_v61 }
 0x50e   : > { %v7540_v63 = vpack.i.bf16 %v11288_v2, %v11278_v21  ;;  %4617 = vmatprep.mubr.bf16.mxu1 %v7734_v45  ;;  %v7756_v21 = vld [vmem:[%s12082_s5 + $0x8] ss:$12 sps:$4 sm:$0xff]  }
 0x50f   : > { %v7550_v15 = vpack.i.bf16 %v11169_v61, %v11293_v35  ;;  %v4341_v61 = vld [vmem:[%s12083_s6 + $0x20] sm:$0xff] }
 0x510   : > { %7541 = vrot.lane.b32.xlu0 %v7540_v63, %s7803_s24 }
 0x511   : > { %7536 = vrot.lane.b32.xlu1 %v7535_v22, %s7803_s24 }
 0x514   : > { %7546 = vrot.lane.b32.xlu0 %v7545_v54, %s7804_s25 }
 0x515   : > { %7551 = vrot.lane.b32.xlu1 %v7550_v15, %s7803_s24 }
 0x518   : > { %7561 = vrot.lane.b32.xlu0 %v7560_v62, %s7804_s25 }
 0x519   : > { %7556 = vrot.lane.b32.xlu1 %v7555_v34, %s7804_s25  ;;  %v7595_v34 = vpack.i.bf16 %v11293_v35, %v11288_v2 }
 0x51c   : > { %7571 = vrot.lane.b32.xlu0 %v7570_v32, %s7804_s25  ;;  %v4337_v32 = vld [vmem:[%s12083_s6] sm:$0xff] }
 0x51d   : > { %7566 = vrot.lane.b32.xlu1 %v7565_v13, %s7804_s25 }
 0x520   : > { %7576 = vrot.lane.b32.xlu0 %v11187_v33, %s7805_s26  ;;  %v4344_v33 = vld [vmem:[%s12083_s6 + $0x38] sm:$0xff] }
 0x521   : > { %4131 = vrot.lane.b32.xlu1 %v11179_v12, %s7804_s25 }
 0x524   : > { %7581 = vrot.lane.b32.xlu0 %v11194_v9, %s7805_s26  ;;  %v4343_v9 = vld [vmem:[%s12083_s6 + $0x30] sm:$0xff] }
 0x525   : > { %7586 = vrot.lane.b32.xlu1 %v11212_v16, %s7805_s26  ;;  %v4346_v16 = vld [vmem:[%s12083_s6 + $0x48] sm:$0xff] }
 0x528   : > { %7591 = vrot.lane.b32.xlu0 %v11224_v24, %s7805_s26  ;;  %v4350_v24 = vld [vmem:[%s12083_s6 + $0x68] sm:$0xff] }
 0x529   : > { %7596 = vrot.lane.b32.xlu1 %v7595_v34, %s7804_s25 }
 0x52c   : > { %7606 = vrot.lane.b32.xlu0 %v7505_v26, %s7805_s26 }
 0x52d   : > { %7601 = vrot.lane.b32.xlu1 %v11229_v59, %s7805_s26  ;;  %v4349_v59 = vld [vmem:[%s12083_s6 + $0x60] sm:$0xff] }
 0x530   : > { %4197 = vrot.lane.b32.xlu0 %v11144_v1, %s7805_s26  ;;  %v4338_v1 = vld [vmem:[%s12083_s6 + $0x8] sm:$0xff] }
 0x531   : > { %7611 = vrot.lane.b32.xlu1 %v7510_v20, %s7805_s26 }
 0x534   : > { %7621 = vrot.lane.b32.xlu0 %v7560_v62, %s7805_s26 }
 0x535   : > { %7616 = vrot.lane.b32.xlu1 %v7545_v54, %s7805_s26 }
 0x538   : > { %7631 = vrot.lane.b32.xlu0 %v7565_v13, %s7805_s26 }
 0x539   : > { %7626 = vrot.lane.b32.xlu1 %v7625_v43, %s7805_s26  ;;  %v4342_v43 = vld [vmem:[%s12083_s6 + $0x28] sm:$0xff] }
 0x53c   : > { %7641 = vrot.lane.b32.xlu0 %v7640_v14, %s7805_s26 }
 0x53d   : > { %7636 = vrot.lane.b32.xlu1 %v7595_v34, %s7805_s26 }
 0x540   : > { %4360 = vperm.xlu0 %7448, %v4338_v1  }
 0x541   : > { %4355 = vperm.xlu1 %7449, %v4337_v32  }
 0x544   : > { %4370 = vperm.xlu0 %7448, %v4340_v39  }
 0x545   : > { %4365 = vperm.xlu1 %7449, %v4339_v6  }
 0x548   : > { %4380 = vperm.xlu0 %7448, %v4342_v43  }
 0x549   : > { %4375 = vperm.xlu1 %7449, %v4341_v61  }
 0x54c   : > { %4390 = vperm.xlu0 %7448, %v4344_v33  }
 0x54d   : > { %4385 = vperm.xlu1 %7449, %v4343_v9  }
 0x550   : > { %4400 = vperm.xlu0 %7448, %v4346_v16  }
 0x551   : > { %4395 = vperm.xlu1 %7449, %v4345_v42  }
 0x554   : > { %4410 = vperm.xlu0 %7448, %v4348_v57  }
 0x555   : > { %4405 = vperm.xlu1 %7449, %v4347_v29  }
 0x558   : > { %4420 = vperm.xlu0 %7448, %v4350_v24  }
 0x559   : > { %4415 = vperm.xlu1 %7449, %v4349_v59  }
 0x55c   : > { %4430 = vperm.xlu0 %7448, %v4352_v38  }
 0x55d   : > { %4425 = vperm.xlu1 %7449, %v4351_v52  }
 0x563   : > { %v7462_v26 = vpop.permute.xlu1 %7461 }
 0x564   : > { %v7464_v5 = vunpack.i.h.bf16 %v7462_v26  ;;  %v7463_v46 = vunpack.i.l.bf16 %v7462_v26 }
 0x566   : > { %v7472_v17 = vpop.permute.xlu0 %7471  ;;  %v4048_v25 = vsel %vm608_vm1, %v7463_v46, %v7464_v5 }
 0x567   : > { %v7473_v10 = vunpack.i.l.bf16 %v7472_v17  ;;  %v11405_v30 = vpop.permute.xlu1 %7466  ;;  %v4304_v20 = vpack.c.bf16 %v4048_v25, %v11288_v2  ;;  %v7474_v62 = vunpack.i.h.bf16 %v7472_v17 }
 0x569   : > { %v4047_v54 = vsel %vm608_vm1, %v7473_v10, %v7463_v46  ;;  %4593 = vmatprep.subr.bf16.mxu1 %v4304_v20 }
 0x56a   : > { %v4303_v11 = vpack.c.bf16 %v4047_v54, %v11179_v12  ;;  %v11410_v23 = vpop.permute.xlu0 %7476 }
 0x56b   : > { %v7482_v27 = vpop.permute.xlu1 %7481 }
 0x56c   : > { %4594 = vmatpush1.bf16.msra.mxu1 %v4303_v11  ;;  %v7483_v60 = vunpack.i.l.bf16 %v7482_v27  ;;  %v7484_v53 = vunpack.i.h.bf16 %v7482_v27 }
 0x56e   : > { %v7487_v44 = vpop.permute.xlu0 %7486  ;;  %v4050_v63 = vsel %vm608_vm1, %v7474_v62, %v7483_v60 }
 0x56f   : > { %v7489_v55 = vunpack.i.h.bf16 %v7487_v44  ;;  %v7488_v22 = vunpack.i.l.bf16 %v7487_v44  ;;  %v7497_v36 = vpop.permute.xlu1 %7496 }
 0x570   : > { %v7498_v13 = vunpack.i.l.bf16 %v7497_v36  ;;  %v7499_v39 = vunpack.i.h.bf16 %v7497_v36 }
 0x571   : > { %v4049_v7 = vsel %vm608_vm1, %v7489_v55, %v7474_v62  ;;  %v4052_v15 = vsel %vm608_vm1, %v7484_v53, %v7488_v22  ;;  %v7478_v55 = vunpack.i.l.bf16 %v11410_v23 }
 0x572   : > { %v4051_v12 = vsel %vm608_vm1, %v7498_v13, %v7484_v53  ;;  %v11416_v34 = vpop.permute.xlu0 %7491  ;;  %v4306_v45 = vpack.c.bf16 %v4052_v15, %v4050_v63  ;;  %v7479_v53 = vunpack.i.h.bf16 %v11410_v23 }
 0x573   : > { %v4305_v14 = vpack.c.bf16 %v4051_v12, %v4049_v7  ;;  %v11418_v1 = vpop.permute.xlu1 %7501 }
 0x574   : > { %4595 = vmatprep.subr.bf16.mxu1 %v4306_v45  ;;  %v7469_v45 = vunpack.i.h.bf16 %v11405_v30  ;;  %v4140_v23 = vsel %vm713_vm2, %v7478_v55, %v7479_v53 }
 0x575   : > { %4596 = vmatpush1.bf16.msra.mxu1 %v4305_v14 }
 0x576   : > { %v7507_v32 = vpop.permute.xlu0 %7506 }
 0x577   : > { %v7509_v6 = vunpack.i.h.bf16 %v7507_v32  ;;  %v7508_v43 = vunpack.i.l.bf16 %v7507_v32  ;;  %v7512_v61 = vpop.permute.xlu1 %7511 }
 0x578   : > { %v7513_v33 = vunpack.i.l.bf16 %v7512_v61  ;;  %v7514_v9 = vunpack.i.h.bf16 %v7512_v61  ;;  %v7494_v61 = vunpack.i.h.bf16 %v11416_v34 }
 0x579   : > { %v4054_v16 = vsel %vm608_vm1, %v7499_v39, %v7508_v43 }
 0x57a   : > { %v7522_v42 = vpop.permute.xlu0 %7521  ;;  %v4056_v57 = vsel %vm608_vm1, %v7509_v6, %v7513_v33  ;;  %v4053_v38 = vsel %vm608_vm1, %v7514_v9, %v7499_v39  ;;  %v7468_v39 = vunpack.i.l.bf16 %v11405_v30  ;;  %v7493_v33 = vunpack.i.l.bf16 %v11416_v34 }
 0x57b   : > { %v7523_v29 = vunpack.i.l.bf16 %v7522_v42  ;;  %v11422_v24 = vpop.permute.xlu1 %7516  ;;  %v4308_v59 = vpack.c.bf16 %v4056_v57, %v4054_v16  ;;  %v7524_v25 = vunpack.i.h.bf16 %v7522_v42  ;;  %v7504_v9 = vunpack.i.h.bf16 %v11418_v1 }
 0x57c   : > { %v7503_v16 = vunpack.i.l.bf16 %v11418_v1  ;;  %v4138_v1 = vsel %vm713_vm2, %v7468_v39, %v7469_v45 }
 0x57d   : > { %v4055_v52 = vsel %vm608_vm1, %v7523_v29, %v7509_v6  ;;  %4597 = vmatprep.subr.bf16.mxu1 %v4308_v59 }
 0x57e   : > { %v4307_v26 = vpack.c.bf16 %v4055_v52, %v4053_v38  ;;  %v7532_v5 = vpop.permute.xlu0 %7531  ;;  %v7454_v38 = vunpack.i.h.bf16 %v11400_v37 }
 0x57f   : > { %v7533_v46 = vunpack.i.l.bf16 %v7532_v5  ;;  %v7527_v17 = vpop.permute.xlu1 %7526  ;;  %v7534_v54 = vunpack.i.h.bf16 %v7532_v5  ;;  %v7453_v5 = vunpack.i.l.bf16 %v11400_v37 }
 0x580   : > { %v7529_v10 = vunpack.i.h.bf16 %v7527_v17  ;;  %v7528_v20 = vunpack.i.l.bf16 %v7527_v17  ;;  %4598 = vmatpush1.bf16.msra.mxu1 %v4307_v26  ;;  %v4139_v17 = vsel %vm713_vm2, %v7454_v38, %v7478_v55 }
 0x581   : > { %v4057_v36 = vsel %vm608_vm1, %v7534_v54, %v7524_v25  ;;  %v4137_v37 = vsel %vm713_vm2, %v7453_v5, %v7468_v39 }
 0x582   : > { %v7542_v11 = vpop.permute.xlu0 %7541  ;;  %v4058_v27 = vsel %vm608_vm1, %v7524_v25, %v7528_v20  ;;  %v4060_v60 = vsel %vm608_vm1, %v7529_v10, %v7533_v46  ;;  %v7459_v46 = vunpack.i.h.bf16 %v11398_v51  ;;  %v4314_v25 = vpack.c.bf16 %v4140_v23, %v4138_v1 }
 0x583   : > { %v7537_v44 = vpop.permute.xlu1 %7536  ;;  %v4310_v62 = vpack.c.bf16 %v4060_v60, %v4058_v27  ;;  %v7544_v13 = vunpack.i.h.bf16 %v7542_v11  ;;  %v7543_v7 = vunpack.i.l.bf16 %v7542_v11  ;;  %v4142_v11 = vsel %vm713_vm2, %v7493_v33, %v7494_v61 }
 0x584   : > { %v7538_v22 = vunpack.i.l.bf16 %v7537_v44  ;;  %v7539_v63 = vunpack.i.h.bf16 %v7537_v44  ;;  %v4144_v27 = vsel %vm713_vm2, %v7503_v16, %v7504_v9  ;;  %v7519_v60 = vunpack.i.h.bf16 %v11422_v24 }
 0x585   : > { %4599 = vmatprep.subr.bf16.mxu1 %v4310_v62  ;;  %v4063_v42 = vsel %vm608_vm1, %v11402_v48, %v7544_v13  ;;  %v7458_v48 = vunpack.i.l.bf16 %v11398_v51  ;;  %v7518_v44 = vunpack.i.l.bf16 %v11422_v24  ;;  %v4313_v51 = vpack.c.bf16 %v4139_v17, %v4137_v37 }
 0x586   : > { %v4059_v15 = vsel %vm608_vm1, %v7538_v22, %v7529_v10  ;;  %v7547_v12 = vpop.permute.xlu0 %7546  ;;  %v4062_v30 = vsel %vm608_vm1, %v7539_v63, %v7543_v7  ;;  %v4143_v55 = vsel %vm713_vm2, %v7459_v46, %v7503_v16 }
 0x587   : > { %v4309_v14 = vpack.c.bf16 %v4059_v15, %v4057_v36  ;;  %v7552_v32 = vpop.permute.xlu1 %7551  ;;  %v7549_v10 = vunpack.i.h.bf16 %v7547_v12  ;;  %v7548_v20 = vunpack.i.l.bf16 %v7547_v12  ;;  %v4141_v53 = vsel %vm713_vm2, %v7458_v48, %v7493_v33 }
 0x588   : > { %v7554_v6 = vunpack.i.h.bf16 %v7552_v32  ;;  %v7553_v43 = vunpack.i.l.bf16 %v7552_v32  ;;  %v4315_v45 = vpack.c.bf16 %v4143_v55, %v4141_v53  ;;  %v4146_v24 = vsel %vm713_vm2, %v7518_v44, %v7519_v60 }
 0x589   : > { %4600 = vmatpush1.bf16.msra.mxu1 %v4309_v14  ;;  %v4148_v12 = vsel %vm713_vm2, %v7548_v20, %v7549_v10 }
 0x58a   : > { %v4061_v57 = vsel %vm608_vm1, %v7554_v6, %v7539_v63  ;;  %v7562_v29 = vpop.permute.xlu0 %7561  ;;  %v4064_v59 = vsel %vm608_vm1, %v7544_v13, %v7553_v43  ;;  %v4316_v13 = vpack.c.bf16 %v4144_v27, %v4142_v11  ;;  %v4318_v33 = vpack.c.bf16 %v4148_v12, %v4146_v24 }
 0x58b   : > { %v4311_v52 = vpack.c.bf16 %v4063_v42, %v4061_v57  ;;  %v7557_v26 = vpop.permute.xlu1 %7556  ;;  %v4312_v34 = vpack.c.bf16 %v4064_v59, %v4062_v30  ;;  %v7564_v32 = vunpack.i.h.bf16 %v7562_v29  ;;  %v7563_v39 = vunpack.i.l.bf16 %v7562_v29 }
 0x58c   : > { %v7559_v22 = vunpack.i.h.bf16 %v7557_v26  ;;  %v7558_v36 = vunpack.i.l.bf16 %v7557_v26 }
 0x58d   : > { %4601 = vmatprep.subr.bf16.mxu1 %v4312_v34  ;;  %v4150_v29 = vsel %vm713_vm2, %v7563_v39, %v7564_v32 }
 0x58e   : > { %v7572_v54 = vpop.permute.xlu0 %7571  ;;  %4602 = vmatpush1.bf16.msra.mxu1 %v4311_v52  ;;  %v4147_v23 = vsel %vm713_vm2, %v7559_v22, %v7548_v20  ;;  %v4145_v61 = vsel %vm713_vm2, %v7558_v36, %v7518_v44 }
 0x58f   : > { %v7567_v62 = vpop.permute.xlu1 %7566  ;;  %4603 = vmatprep.subr.bf16.mxu1 %v4314_v25  ;;  %v7574_v6 = vunpack.i.h.bf16 %v7572_v54  ;;  %v7573_v43 = vunpack.i.l.bf16 %v7572_v54  ;;  %v4317_v57 = vpack.c.bf16 %v4147_v23, %v4145_v61 }
 0x590   : > { %v7569_v7 = vunpack.i.h.bf16 %v7567_v62  ;;  %v7568_v63 = vunpack.i.l.bf16 %v7567_v62 }
 0x591   : > { %v4149_v30 = vsel %vm713_vm2, %v7573_v43, %v7563_v39 }
 0x592   : > { %v7577_v15 = vpop.permute.xlu0 %7576  ;;  %4604 = vmatpush1.bf16.msra.mxu1 %v4313_v51  ;;  %v4152_v16 = vsel %vm713_vm2, %v7568_v63, %v7569_v7  ;;  %v4151_v59 = vsel %vm713_vm2, %v7574_v6, %v7568_v63 }
 0x593   : > { %v4132_v14 = vpop.permute.xlu1 %4131  ;;  %4605 = vmatprep.subr.bf16.mxu1 %v4316_v13  ;;  %v7579_v38 = vunpack.i.h.bf16 %v7577_v15  ;;  %v7578_v52 = vunpack.i.l.bf16 %v7577_v15  ;;  %v4320_v34 = vpack.c.bf16 %v4152_v16, %v4150_v29  ;;  %v4319_v1 = vpack.c.bf16 %v4151_v59, %v4149_v30 }
 0x595   : > { %v4228_v27 = vsel %vm818_vm0, %v7578_v52, %v7579_v38 }
 0x596   : > { %v7582_v9 = vpop.permute.xlu0 %7581  ;;  %4606 = vmatpush1.bf16.msra.mxu1 %v4315_v45 }
 0x597   : > { %v7587_v42 = vpop.permute.xlu1 %7586  ;;  %4607 = vmatprep.subr.bf16.mxu1 %v4318_v33  ;;  %v7583_v26 = vunpack.i.l.bf16 %v7582_v9  ;;  %v7584_v46 = vunpack.i.h.bf16 %v7582_v9 }
 0x598   : > { %v7589_v25 = vunpack.i.h.bf16 %v7587_v42  ;;  %v7588_v10 = vunpack.i.l.bf16 %v7587_v42 }
 0x599   : > { %v4227_v11 = vsel %vm818_vm0, %v7583_v26, %v7578_v52  ;;  %v7732_v26 = vld [vmem:[%s12082_s5] ss:$12 sps:$4 sm:$0xff]  }
 0x59a   : > { %v7592_v5 = vpop.permute.xlu0 %7591  ;;  %4608 = vmatpush1.bf16.msra.mxu1 %v4317_v57  ;;  %v4230_v13 = vsel %vm818_vm0, %v7584_v46, %v7588_v10 }
 0x59b   : > { %v7593_v48 = vunpack.i.l.bf16 %v7592_v5  ;;  %v7597_v17 = vpop.permute.xlu1 %7596  ;;  %4609 = vmatprep.subr.bf16.mxu1 %v4320_v34  ;;  %v7594_v37 = vunpack.i.h.bf16 %v7592_v5 }
 0x59c   : > { %v7599_v20 = vunpack.i.h.bf16 %v7597_v17  ;;  %v7598_v54 = vunpack.i.l.bf16 %v7597_v17 }
 0x59d   : > { %v4232_v51 = vsel %vm818_vm0, %v7589_v25, %v7593_v48  ;;  %v4229_v63 = vsel %vm818_vm0, %v7594_v37, %v7584_v46  ;;  %v7735_v46 = vld [vmem:[%s12082_s5 + $0x1c] ss:$12 sps:$4 sm:$0xff]  }
 0x59e   : > { %v4153_v60 = vsel %vm713_vm2, %v4132_v14, %v7598_v54  ;;  %v7607_v44 = vpop.permute.xlu0 %7606  ;;  %4610 = vmatpush1.bf16.msra.mxu1 %v4319_v1  ;;  %v4154_v62 = vsel %vm713_vm2, %v7598_v54, %v7599_v20  ;;  %v4324_v7 = vpack.c.bf16 %v4232_v51, %v4230_v13 }
 0x59f   : > { %v4321_v53 = vpack.c.bf16 %v4227_v11, %v4153_v60  ;;  %v7602_v55 = vpop.permute.xlu1 %7601  ;;  %v4322_v22 = vpack.c.bf16 %v4228_v27, %v4154_v62  ;;  %v7608_v15 = vunpack.i.l.bf16 %v7607_v44  ;;  %v7609_v39 = vunpack.i.h.bf16 %v7607_v44 }
 0x5a0   : > { %v7603_v36 = vunpack.i.l.bf16 %v7602_v55  ;;  %v7604_v12 = vunpack.i.h.bf16 %v7602_v55 }
 0x5a1   : > { %4611 = vmatprep.subr.bf16.mxu1 %v4322_v22 }
 0x5a2   : > { %v4231_v45 = vsel %vm818_vm0, %v7603_v36, %v7589_v25  ;;  %v4198_v14 = vpop.permute.xlu0 %4197  ;;  %4612 = vmatpush1.bf16.msra.mxu1 %v4321_v53  ;;  %v4234_v9 = vsel %vm818_vm0, %v7604_v12, %v7608_v15  ;;  %v7737_v36 = vld [vmem:[%s12082_s5 + $0x18] ss:$12 sps:$4 sm:$0xff]   ;;  %v7738_v15 = vld [vmem:[%s12082_s5 + $0x34] ss:$12 sps:$4 sm:$0xff]  }
 0x5a3   : > { %v4323_v24 = vpack.c.bf16 %v4231_v45, %v4229_v63  ;;  %v7612_v32 = vpop.permute.xlu1 %7611  ;;  %4613 = vmatprep.subr.bf16.mxu1 %v4324_v7  ;;  %v4235_v23 = vsel %vm818_vm0, %v4198_v14, %v7609_v39  ;;  %v7740_v14 = vld [vmem:[%s12082_s5 + $0x30] ss:$12 sps:$4 sm:$0xff]  }
 0x5a4   : > { %v7614_v6 = vunpack.i.h.bf16 %v7612_v32  ;;  %v7613_v43 = vunpack.i.l.bf16 %v7612_v32  ;;  %v7761_v32 = vld [vmem:[%s12082_s5 + $0x80] ss:$12 sps:$4 sm:$0xff]  }
 0x5a6   : > { %v4233_v61 = vsel %vm818_vm0, %v7614_v6, %v7604_v12  ;;  %v7622_v33 = vpop.permute.xlu0 %7621  ;;  %4614 = vmatpush1.bf16.msra.mxu1 %v4323_v24  ;;  %v4236_v16 = vsel %vm818_vm0, %v7609_v39, %v7613_v43  ;;  %v7741_v24 = vld [vmem:[%s12082_s5 + $0x4c] ss:$12 sps:$4 sm:$0xff]   ;;  %v7763_v6 = vld [vmem:[%s12082_s5 + $0xb0] ss:$12 sps:$4 sm:$0xff]   ;;  %v7807_v43 = vmov 0.0  }
 0x5a7   : > { %v4325_v42 = vpack.c.bf16 %v4235_v23, %v4233_v61  ;;  %v7624_v57 = vunpack.i.h.bf16 %v7622_v33  ;;  %v7623_v30 = vunpack.i.l.bf16 %v7622_v33  ;;  %v7617_v59 = vpop.permute.xlu1 %7616  ;;  %v4326_v29 = vpack.c.bf16 %v4236_v16, %v4234_v9  ;;  %v7762_v39 = vld [vmem:[%s12082_s5 + $0x98] ss:$12 sps:$4 sm:$0xff]  }
 0x5a8   : > { %v7619_v38 = vunpack.i.h.bf16 %v7617_v59  ;;  %v7618_v52 = vunpack.i.l.bf16 %v7617_v59  ;;  %v4862_v59 = vld [vmem:[%s12085_s8 + $0x18] sm:$0xff] }
 0x5a9   : > { %4615 = vmatprep.subr.bf16.mxu1 %v4326_v29  ;;  %v4240_v34 = vsel %vm818_vm0, %v7623_v30, %v7624_v57  ;;  %v4859_v29 = vld [vmem:[%s12085_s8] sm:$0xff] }
 0x5aa   : > { %v7632_v5 = vpop.permute.xlu0 %7631  ;;  %4616 = vmatpush1.bf16.msra.mxu1 %v4325_v42  ;;  %v4238_v1 = vsel %vm818_vm0, %v7618_v52, %v7619_v38 }
 0x5ab   : > { %v7627_v48 = vpop.permute.xlu1 %7626  ;;  %v4328_v17 = vpack.c.bf16 %v4240_v34, %v4238_v1  ;;  %v7634_v20 = vunpack.i.h.bf16 %v7632_v5  ;;  %v7633_v54 = vunpack.i.l.bf16 %v7632_v5  ;;  %v4861_v34 = vld [vmem:[%s12085_s8 + $0x10] sm:$0xff]  ;;  %v4864_v5 = vld [vmem:[%s12085_s8 + $0x28] sm:$0xff]  ;;  %v4866_v1 = vld [vmem:[%s12085_s8 + $0x38] sm:$0xff] }
 0x5ac   : > { %v7629_v25 = vunpack.i.h.bf16 %v7627_v48  ;;  %v7628_v10 = vunpack.i.l.bf16 %v7627_v48  ;;  %v6988_v48 = vpack.c.bf16 %v4861_v34, %v4859_v29 }
 0x5ad   : > { %4618 = vmatmul.mubr.bf16.vlgmr.msra.gmra.mrb[128].mxu1 %v7732_v26  ;;  %4698 = vmatprep.subr.bf16.mxu1 %v4328_v17  ;;  %v4242_v7 = vsel %vm818_vm0, %v7633_v54, %v7634_v20  ;;  %v6990_v17 = vpack.c.bf16 %v4866_v1, %v4864_v5  ;;  %v4868_v20 = vld [vmem:[%s12085_s8 + $0x48] sm:$0xff]  ;;  %v4886_v1 = vld [vmem:[%s12085_s8 + $0xd8] sm:$0xff] }
 0x5ae   : > { %v4239_v11 = vsel %vm818_vm0, %v7629_v25, %v7623_v30  ;;  %v4237_v27 = vsel %vm818_vm0, %v7628_v10, %v7618_v52  ;;  %v7642_v37 = vpop.permute.xlu0 %7641  ;;  %4627 = vmatprep.mubr.bf16.mxu1 %v7735_v46  ;;  %v4860_v30 = vld [vmem:[%s12085_s8 + $0x8] sm:$0xff]  ;;  %v4863_v25 = vld [vmem:[%s12085_s8 + $0x20] sm:$0xff]  ;;  %v4865_v10 = vld [vmem:[%s12085_s8 + $0x30] sm:$0xff] }
 0x5af   : > { %v4327_v60 = vpack.c.bf16 %v4239_v11, %v4237_v27  ;;  %v7644_v44 = vunpack.i.h.bf16 %v7642_v37  ;;  %v7643_v62 = vunpack.i.l.bf16 %v7642_v37  ;;  %v7637_v51 = vpop.permute.xlu1 %7636  ;;  %v6986_v26 = vpack.c.bf16 %v4862_v59, %v4860_v30  ;;  %v4870_v27 = vld [vmem:[%s12085_s8 + $0x58] sm:$0xff]  ;;  %v4884_v5 = vld [vmem:[%s12085_s8 + $0xc8] sm:$0xff] }
 0x5b0   : > { %v7639_v53 = vunpack.i.h.bf16 %v7637_v51  ;;  %v7638_v55 = vunpack.i.l.bf16 %v7637_v51  ;;  %v6994_v51 = vpack.c.bf16 %v4870_v27, %v4868_v20  ;;  %v4885_v27 = vld [vmem:[%s12085_s8 + $0xd0] sm:$0xff] }
 0x5b1   : > { %v4241_v22 = vsel %vm818_vm0, %v7643_v62, %v7633_v54  ;;  %4699 = vmatpush1.bf16.msra.mxu1 %v4327_v60  ;;  %6987 = vmatprep.subr.bf16.mxu0 %v6986_v26  ;;  %v4881_v26 = vld [vmem:[%s12085_s8 + $0xb0] sm:$0xff] }
 0x5b2   : > { %v4243_v13 = vsel %vm818_vm0, %v7644_v44, %v7638_v55  ;;  %v4244_v63 = vsel %vm818_vm0, %v7638_v55, %v7639_v53  ;;  %6989 = vmatpush1.bf16.msra.mxu0 %v6988_v48  ;;  %v6992_v44 = vpack.c.bf16 %v4865_v10, %v4863_v25  ;;  %v4867_v53 = vld [vmem:[%s12085_s8 + $0x40] sm:$0xff]  ;;  %v4869_v55 = vld [vmem:[%s12085_s8 + $0x50] sm:$0xff] }
 0x5b3   : > { %v4329_v12 = vpack.c.bf16 %v4243_v13, %v4241_v22  ;;  %v4330_v45 = vpack.c.bf16 %v4244_v63, %v4242_v7  ;;  %6991 = vmatprep.subr.bf16.mxu0 %v6990_v17  ;;  %v4872_v7 = vld [vmem:[%s12085_s8 + $0x68] sm:$0xff]  ;;  %v4874_v63 = vld [vmem:[%s12085_s8 + $0x78] sm:$0xff] }
 0x5b5   : > { %4628 = vmatmul.mubr.bf16.gmra.mrb[132].mxu1 %v7737_v36  ;;  %4700 = vmatprep.subr.bf16.mxu1 %v4330_v45 }
 0x5b6   : > { %4701 = vmatpush1.bf16.msra.mxu1 %v4329_v12  ;;  %4637 = vmatprep.mubr.bf16.mxu1 %v7738_v15 }
 0x5b7   : > { %4702 = vmatprep.subr.bf16.mxu1 %v4331_v58  ;;  %v4335_v58 = vpack.c.bf16 %v11288_v2, %v11288_v2  ;;  %v7759_v2 = vld [vmem:[%s12082_s5 + $0x50] ss:$12 sps:$4 sm:$0xff]   ;;  %6993 = vmatpush1.bf16.msra.mxu0 %v6992_v44 }
 0x5b8   : > { %6995 = vmatprep.subr.bf16.mxu0 %v6994_v51 }
 0x5b9   : > { %v4580_v31 = vsel %vm4578_vm4, %v4335_v58, 0  ;;  %v6998_v58 = vpack.c.bf16 %v4874_v63, %v4872_v7 }
 0x5ba   : > { %4703 = vmatpush1.bf16.msra.mxu1 %v11196_v41  ;;  %v4336_v41 = vpack.c.bf16 %v11293_v35, %v11293_v35  ;;  %v7760_v35 = vld [vmem:[%s12082_s5 + $0x68] ss:$12 sps:$4 sm:$0xff]  }
 0x5bb   : > { %4704 = vmatprep.subr.bf16.mxu1 %v4332_v56  ;;  %v7749_v56 = vld [vmem:[%s12082_s5 + $0x78] ss:$12 sps:$4 sm:$0xff]  }
 0x5bd   : > { %4638 = vmatmul.mubr.bf16.gmra.mrb[136].mxu1 %v7740_v14 }
 0x5be   : > { %4705 = vmatpush1.bf16.msra.mxu1 %v11226_v50  ;;  %4647 = vmatprep.mubr.bf16.mxu1 %v7741_v24  ;;  %v7747_v50 = vld [vmem:[%s12082_s5 + $0x7c] ss:$12 sps:$4 sm:$0xff]  }
 0x5bf   : > { %4706 = vmatprep.subr.bf16.mxu1 %v4333_v0  ;;  %v7755_v0 = vld [vmem:[%s12082_s5 + $0xa8] ss:$12 sps:$4 sm:$0xff]   ;;  %v4361_v16 = vpop.permute.xlu0 %4360 }
 0x5c0   : > { %v4356_v23 = vpop.permute.xlu1 %4355 }
 0x5c2   : > { %4707 = vmatpush1.bf16.msra.mxu1 %v11253_v28  ;;  %v7753_v28 = vld [vmem:[%s12082_s5 + $0xac] ss:$12 sps:$4 sm:$0xff]  }
 0x5c3   : > { %4708 = vmatprep.subr.bf16.mxu1 %v4334_v8  ;;  %v7758_v8 = vld [vmem:[%s12082_s5 + $0x38] ss:$12 sps:$4 sm:$0xff]   ;;  %v4371_v45 = vpop.permute.xlu0 %4370 }
 0x5c4   : > { %v4366_v22 = vpop.permute.xlu1 %4365 }
 0x5c5   : > { %4648 = vmatmul.mubr.bf16.gmra.mrb[140].mxu1 %v7743_v40  ;;  %v6996_v40 = vpack.c.bf16 %v4869_v55, %v4867_v53 }
 0x5c6   : > { %4709 = vmatpush1.bf16.msra.mxu1 %v11281_v3  ;;  %4657 = vmatprep.mubr.bf16.mxu1 %v7744_v18  ;;  %v7757_v3 = vld [vmem:[%s12082_s5 + $0x20] ss:$12 sps:$4 sm:$0xff]  }
 0x5c7   : > { %6099 = vmatprep.subr.msk.bf16.mxu1 %vm4578_vm4, %v4336_v41  ;;  %6997 = vmatpush1.bf16.msra.mxu0 %v6996_v40 }
 0x5c8   : > { %6999 = vmatprep.subr.bf16.mxu0 %v6998_v58 }
 0x5ca   : > { %4711 = vmatpush1.bf16.msra.mxu1 %v4580_v31  ;;  %v4871_v31 = vld [vmem:[%s12085_s8 + $0x60] sm:$0xff] }
 0x5cd   : > { %4658 = vmatmul.mubr.bf16.gmra.mrb[144].mxu1 %v7746_v49  ;;  %v4873_v49 = vld [vmem:[%s12085_s8 + $0x70] sm:$0xff] }
 0x5ce   : > { %4667 = vmatprep.mubr.bf16.mxu1 %v7747_v50 }
 0x5d5   : > { %4668 = vmatmul.mubr.bf16.gmra.mrb[148].mxu1 %v7749_v56  ;;  %v4876_v56 = vld [vmem:[%s12085_s8 + $0x88] sm:$0xff] }
 0x5d6   : > { %4677 = vmatprep.mubr.bf16.mxu1 %v7750_v47  ;;  %v4878_v47 = vld [vmem:[%s12085_s8 + $0x98] sm:$0xff] }
 0x5dd   : > { %4678 = vmatmul.mubr.bf16.gmra.mrb[152].mxu1 %v7752_v4 }
 0x5de   : > { %4687 = vmatprep.mubr.bf16.mxu1 %v7753_v28 }
 0x5e5   : > { %4688 = vmatmul.mubr.bf16.gmra.mrb[156].mxu1 %v7755_v0 }
 0x5e6   : > { %4730 = vmatprep.mubr.bf16.mxu1 %v12128_v19 }
 0x5ed   : > { %6100 = vmatmul.mubr.msk.bf16.vlgmr.msra.gmra.mrb[128].mxu1 %vm4553_vm5, %v7756_v21  ;;  %v7000_v21 = vpack.c.bf16 %v4873_v49, %v4871_v31 }
 0x5ee   : > { %4740 = vmatprep.mubr.bf16.mxu1 %v12128_v19 }
 0x5ef   : > { %7001 = vmatpush1.bf16.msra.mxu0 %v7000_v21 }
 0x5f5   : > { %6101 = vmatmul.mubr.msk.bf16.gmra.mrb[132].mxu1 %vm4553_vm5, %v7757_v3 }
 0x5f6   : > { %4750 = vmatprep.mubr.bf16.mxu1 %v12128_v19 }
 0x5fd   : > { %6102 = vmatmul.mubr.msk.bf16.gmra.mrb[136].mxu1 %vm4553_vm5, %v7758_v8  ;;  %v7002_v8 = vpack.c.bf16 %v4878_v47, %v4876_v56 }
 0x5fe   : > { %4760 = vmatprep.mubr.bf16.mxu1 %v12128_v19 }
 0x5ff   : > { %7003 = vmatprep.subr.bf16.mxu0 %v7002_v8 }
 0x605   : > { %6103 = vmatmul.mubr.msk.bf16.gmra.mrb[140].mxu1 %vm4553_vm5, %v7759_v2  ;;  %v4875_v2 = vld [vmem:[%s12085_s8 + $0x80] sm:$0xff] }
 0x606   : > { %4770 = vmatprep.mubr.bf16.mxu1 %v12128_v19 }
 0x60d   : > { %6104 = vmatmul.mubr.msk.bf16.gmra.mrb[144].mxu1 %vm4553_vm5, %v7760_v35  ;;  %v4877_v35 = vld [vmem:[%s12085_s8 + $0x90] sm:$0xff] }
 0x60e   : > { %4780 = vmatprep.mubr.bf16.mxu1 %v12128_v19  ;;  %v7004_v30 = vpack.c.bf16 %v4877_v35, %v4875_v2 }
 0x610   : > { %7005 = vmatpush1.bf16.msra.mxu0 %v7004_v30 }
 0x615   : > { %6105 = vmatmul.mubr.msk.bf16.gmra.mrb[148].mxu1 %vm4553_vm5, %v7761_v32  ;;  %v4376_v32 = vpop.permute.xlu1 %4375 }
 0x616   : > { %4790 = vmatprep.mubr.bf16.mxu1 %v12128_v19 }
 0x61d   : > { %6106 = vmatmul.mubr.msk.bf16.gmra.mrb[152].mxu1 %vm4553_vm5, %v7762_v39 }
 0x61e   : > { %4800 = vmatprep.mubr.bf16.mxu1 %v12128_v19 }
 0x625   : > { %6107 = vmatmul.mubr.msk.bf16.gmra.mrb[156].mxu1 %vm4553_vm5, %v7763_v6 }
 0x626   : > { %4987 = vmatprep.mubr.f32.mxu1 %v7807_v43 }
 0x6c0   : > { %v4732_v61 = vpop.f32.mrb[128].mxu1 }
 0x6c1   : > { %v7050_v33 = vadd.f32 %v4732_v61, %v4356_v23  ;;  %v4734_v9 = vpop.f32.mrb[129].mxu1  ;;  %v4882_v61 = vld [vmem:[%s12085_s8 + $0xb8] sm:$0xff] }
 0x6c2   : > { %v7051_v42 = vadd.f32 %v4734_v9, %v4356_v23  ;;  %v4736_v57 = vpop.f32.mrb[130].mxu1  ;;  %v4880_v23 = vld [vmem:[%s12085_s8 + $0xa8] sm:$0xff] }
 0x6c3   : > { %v7052_v38 = vadd.f32 %v4736_v57, %v4361_v16  ;;  %v4738_v52 = vpop.f32.mrb[131].mxu1  ;;  %v4811_v54 = vmax.f32 %v7050_v33, 0.0 }
 0x6c4   : > { %v7053_v46 = vadd.f32 %v4738_v52, %v4361_v16  ;;  %v4812_v37 = vmax.f32 %v7051_v42, 0.0  ;;  %v4381_v16 = vpop.permute.xlu0 %4380  ;;  %v4879_v52 = vld [vmem:[%s12085_s8 + $0xa0] sm:$0xff] }
 0x6c5   : > { %v4813_v11 = vmax.f32 %v7052_v38, 0.0  ;;  %v7006_v38 = vpack.c.bf16 %v4882_v61, %v4880_v23  ;;  %v7008_v10 = vpack.c.bf16 %v4881_v26, %v4879_v52 }
 0x6c6   : > { %v4814_v60 = vmax.f32 %v7053_v46, 0.0 }
 0x6c7   : > { %v6956_v62 = vpack.c.bf16 %v4813_v11, %v4811_v54  ;;  %7007 = vmatprep.subr.bf16.mxu0 %v7006_v38  ;;  %v7010_v54 = vpack.c.bf16 %v4886_v1, %v4884_v5  ;;  %v4883_v11 = vld [vmem:[%s12085_s8 + $0xc0] sm:$0xff] }
 0x6c8   : > { %v6954_v36 = vpack.c.bf16 %v4814_v60, %v4812_v37  ;;  %v4742_v13 = vpop.f32.mrb[132].mxu1  ;;  %v4386_v37 = vpop.permute.xlu1 %4385  ;;  %7009 = vmatpush1.bf16.msra.mxu0 %v7008_v10 }
 0x6c9   : > { %v7054_v15 = vadd.f32 %v4742_v13, %v4366_v22  ;;  %v4744_v12 = vpop.f32.mrb[133].mxu1  ;;  %v4391_v53 = vpop.permute.xlu0 %4390  ;;  %7011 = vmatprep.subr.bf16.mxu0 %v7010_v54 }
 0x6ca   : > { %v7055_v14 = vadd.f32 %v4744_v12, %v4366_v22  ;;  %v4746_v24 = vpop.f32.mrb[134].mxu1  ;;  %6955 = vmatprep.subr.bf16.mxu1 %v6954_v36  ;;  %v7012_v36 = vpack.c.bf16 %v4885_v27, %v4883_v11 }
 0x6cb   : > { %v7056_v18 = vadd.f32 %v4746_v24, %v4371_v45  ;;  %v4748_v41 = vpop.f32.mrb[135].mxu1  ;;  %6957 = vmatpush1.bf16.msra.mxu1 %v6956_v62  ;;  %v4815_v4 = vmax.f32 %v7054_v15, 0.0 }
 0x6cc   : > { %v7057_v50 = vadd.f32 %v4748_v41, %v4371_v45  ;;  %v4816_v0 = vmax.f32 %v7055_v14, 0.0  ;;  %7013 = vmatpush1.bf16.msra.mxu0 %v7012_v36  ;;  %v4396_v40 = vpop.permute.xlu1 %4395 }
 0x6cd   : > { %v4817_v28 = vmax.f32 %v7056_v18, 0.0  ;;  %v4401_v49 = vpop.permute.xlu0 %4400 }
 0x6ce   : > { %v4818_v19 = vmax.f32 %v7057_v50, 0.0 }
 0x6cf   : > { %v6960_v3 = vpack.c.bf16 %v4817_v28, %v4815_v4 }
 0x6d0   : > { %v6958_v39 = vpack.c.bf16 %v4818_v19, %v4816_v0  ;;  %v4752_v6 = vpop.f32.mrb[136].mxu1  ;;  %v4406_v2 = vpop.permute.xlu1 %4405 }
 0x6d1   : > { %v7058_v33 = vadd.f32 %v4752_v6, %v4376_v32  ;;  %v4754_v9 = vpop.f32.mrb[137].mxu1  ;;  %v4411_v23 = vpop.permute.xlu0 %4410 }
 0x6d2   : > { %v7059_v42 = vadd.f32 %v4754_v9, %v4376_v32  ;;  %v4756_v57 = vpop.f32.mrb[138].mxu1  ;;  %6959 = vmatprep.subr.bf16.mxu1 %v6958_v39 }
 0x6d3   : > { %v7060_v59 = vadd.f32 %v4756_v57, %v4381_v16  ;;  %v4758_v29 = vpop.f32.mrb[139].mxu1  ;;  %6961 = vmatpush1.bf16.msra.mxu1 %v6960_v3  ;;  %v4819_v46 = vmax.f32 %v7058_v33, 0.0 }
 0x6d4   : > { %v7061_v34 = vadd.f32 %v4758_v29, %v4381_v16  ;;  %v4820_v17 = vmax.f32 %v7059_v42, 0.0  ;;  %v4416_v52 = vpop.permute.xlu1 %4415 }
 0x6d5   : > { %v4821_v48 = vmax.f32 %v7060_v59, 0.0 }
 0x6d6   : > { %v4822_v25 = vmax.f32 %v7061_v34, 0.0 }
 0x6d7   : > { %v6964_v20 = vpack.c.bf16 %v4821_v48, %v4819_v46  ;;  %v4421_v46 = vpop.permute.xlu0 %4420 }
 0x6d8   : > { %v6962_v60 = vpack.c.bf16 %v4822_v25, %v4820_v17  ;;  %v4762_v44 = vpop.f32.mrb[140].mxu1 }
 0x6d9   : > { %v7062_v62 = vadd.f32 %v4762_v44, %v4386_v37  ;;  %v4764_v51 = vpop.f32.mrb[141].mxu1  ;;  %v4426_v44 = vpop.permute.xlu1 %4425 }
 0x6da   : > { %v7063_v55 = vadd.f32 %v4764_v51, %v4386_v37  ;;  %v4766_v22 = vpop.f32.mrb[142].mxu1  ;;  %6963 = vmatprep.subr.bf16.mxu1 %v6962_v60 }
 0x6db   : > { %v7064_v13 = vadd.f32 %v4766_v22, %v4391_v53  ;;  %v4768_v7 = vpop.f32.mrb[143].mxu1  ;;  %6965 = vmatpush1.bf16.msra.mxu1 %v6964_v20  ;;  %v4823_v15 = vmax.f32 %v7062_v62, 0.0  ;;  %v4431_v22 = vpop.permute.xlu0 %4430 }
 0x6dc   : > { %v7065_v63 = vadd.f32 %v4768_v7, %v4391_v53  ;;  %v4824_v45 = vmax.f32 %v7063_v55, 0.0 }
 0x6dd   : > { %v4825_v12 = vmax.f32 %v7064_v13, 0.0 }
 0x6de   : > { %v4826_v14 = vmax.f32 %v7065_v63, 0.0 }
 0x6df   : > { %v6968_v24 = vpack.c.bf16 %v4825_v12, %v4823_v15 }
 0x6e0   : > { %v6966_v18 = vpack.c.bf16 %v4826_v14, %v4824_v45  ;;  %v4772_v41 = vpop.f32.mrb[144].mxu1 }
 0x6e1   : > { %v7066_v58 = vadd.f32 %v4772_v41, %v4396_v40  ;;  %v4774_v31 = vpop.f32.mrb[145].mxu1  ;;  %v4843_v41 = vld [vmem:[%s12084_s7] sm:$0xff] }
 0x6e2   : > { %v7067_v50 = vadd.f32 %v4774_v31, %v4396_v40  ;;  %v4776_v56 = vpop.f32.mrb[146].mxu1  ;;  %6967 = vmatprep.subr.bf16.mxu1 %v6966_v18  ;;  %v4845_v31 = vld [vmem:[%s12084_s7 + $0x10] sm:$0xff] }
 0x6e3   : > { %v7068_v47 = vadd.f32 %v4776_v56, %v4401_v49  ;;  %v4778_v4 = vpop.f32.mrb[147].mxu1  ;;  %6969 = vmatpush1.bf16.msra.mxu1 %v6968_v24  ;;  %v4827_v0 = vmax.f32 %v7066_v58, 0.0  ;;  %v4844_v58 = vld [vmem:[%s12084_s7 + $0x8] sm:$0xff] }
 0x6e4   : > { %v7069_v28 = vadd.f32 %v4778_v4, %v4401_v49  ;;  %v4828_v21 = vmax.f32 %v7067_v50, 0.0  ;;  %v4846_v49 = vld [vmem:[%s12084_s7 + $0x18] sm:$0xff]  ;;  %v4847_v50 = vld [vmem:[%s12084_s7 + $0x20] sm:$0xff]  ;;  %v4848_v56 = vld [vmem:[%s12084_s7 + $0x28] sm:$0xff] }
 0x6e5   : > { %v4829_v19 = vmax.f32 %v7068_v47, 0.0  ;;  %v4849_v47 = vld [vmem:[%s12084_s7 + $0x30] sm:$0xff]  ;;  %v4850_v4 = vld [vmem:[%s12084_s7 + $0x38] sm:$0xff] }
 0x6e6   : > { %v4830_v3 = vmax.f32 %v7069_v28, 0.0  ;;  %v4851_v28 = vld [vmem:[%s12084_s7 + $0x40] sm:$0xff] }
 0x6e7   : > { %v6972_v8 = vpack.c.bf16 %v4829_v19, %v4827_v0  ;;  %v4852_v0 = vld [vmem:[%s12084_s7 + $0x48] sm:$0xff]  ;;  %v4853_v19 = vld [vmem:[%s12084_s7 + $0x50] sm:$0xff] }
 0x6e8   : > { %v6970_v35 = vpack.c.bf16 %v4830_v3, %v4828_v21  ;;  %v4782_v32 = vpop.f32.mrb[148].mxu1  ;;  %v4854_v21 = vld [vmem:[%s12084_s7 + $0x58] sm:$0xff]  ;;  %v4855_v3 = vld [vmem:[%s12084_s7 + $0x60] sm:$0xff] }
 0x6e9   : > { %v7070_v39 = vadd.f32 %v4782_v32, %v4406_v2  ;;  %v4784_v6 = vpop.f32.mrb[149].mxu1  ;;  %v4888_v32 = vld [vmem:[%s12085_s8 + $0xe8] sm:$0xff] }
 0x6ea   : > { %v7071_v61 = vadd.f32 %v4784_v6, %v4406_v2  ;;  %v4786_v33 = vpop.f32.mrb[150].mxu1  ;;  %6971 = vmatprep.subr.bf16.mxu1 %v6970_v35  ;;  %v4857_v2 = vld [vmem:[%s12084_s7 + $0x70] sm:$0xff]  ;;  %v4858_v35 = vld [vmem:[%s12084_s7 + $0x78] sm:$0xff] }
 0x6eb   : > { %v7072_v9 = vadd.f32 %v4786_v33, %v4411_v23  ;;  %v4788_v16 = vpop.f32.mrb[151].mxu1  ;;  %6973 = vmatpush1.bf16.msra.mxu1 %v6972_v8  ;;  %v4831_v57 = vmax.f32 %v7070_v39, 0.0  ;;  %v4856_v8 = vld [vmem:[%s12084_s7 + $0x68] sm:$0xff]  ;;  %v4890_v39 = vld [vmem:[%s12085_s8 + $0xf8] sm:$0xff] }
 0x6ec   : > { %v7073_v42 = vadd.f32 %v4788_v16, %v4411_v23  ;;  %v4832_v59 = vmax.f32 %v7071_v61, 0.0  ;;  %v7014_v6 = vpack.c.bf16 %v4890_v39, %v4888_v32  ;;  %v4887_v23 = vld [vmem:[%s12085_s8 + $0xe0] sm:$0xff]  ;;  %v4889_v61 = vld [vmem:[%s12085_s8 + $0xf0] sm:$0xff]  ;;  %v4894_v16 = vld [vmem:[%s12085_s8 + $0x118] sm:$0xff] }
 0x6ed   : > { %v4833_v30 = vmax.f32 %v7072_v9, 0.0  ;;  %v7016_v33 = vpack.c.bf16 %v4889_v61, %v4887_v23  ;;  %v4892_v9 = vld [vmem:[%s12085_s8 + $0x108] sm:$0xff] }
 0x6ee   : > { %v4834_v29 = vmax.f32 %v7073_v42, 0.0  ;;  %7015 = vmatprep.subr.bf16.mxu0 %v7014_v6  ;;  %v7018_v42 = vpack.c.bf16 %v4894_v16, %v4892_v9 }
 0x6ef   : > { %v6976_v38 = vpack.c.bf16 %v4833_v30, %v4831_v57  ;;  %7017 = vmatpush1.bf16.msra.mxu0 %v7016_v33  ;;  %v4891_v57 = vld [vmem:[%s12085_s8 + $0x100] sm:$0xff]  ;;  %v4893_v30 = vld [vmem:[%s12085_s8 + $0x110] sm:$0xff] }
 0x6f0   : > { %v6974_v26 = vpack.c.bf16 %v4834_v29, %v4832_v59  ;;  %v4792_v34 = vpop.f32.mrb[152].mxu1  ;;  %v7020_v59 = vpack.c.bf16 %v4893_v30, %v4891_v57  ;;  %7019 = vmatprep.subr.bf16.mxu0 %v7018_v42  ;;  %v4896_v29 = vld [vmem:[%s12085_s8 + $0x128] sm:$0xff] }
 0x6f1   : > { %v7074_v5 = vadd.f32 %v4792_v34, %v4416_v52  ;;  %v4794_v1 = vpop.f32.mrb[153].mxu1  ;;  %v4897_v34 = vld [vmem:[%s12085_s8 + $0x130] sm:$0xff] }
 0x6f2   : > { %v7075_v48 = vadd.f32 %v4794_v1, %v4416_v52  ;;  %v4796_v17 = vpop.f32.mrb[154].mxu1  ;;  %6975 = vmatprep.subr.bf16.mxu1 %v6974_v26  ;;  %v4895_v26 = vld [vmem:[%s12085_s8 + $0x120] sm:$0xff]  ;;  %v4900_v1 = vld [vmem:[%s12085_s8 + $0x148] sm:$0xff] }
 0x6f3   : > { %v7076_v25 = vadd.f32 %v4796_v17, %v4421_v46  ;;  %v4798_v10 = vpop.f32.mrb[155].mxu1  ;;  %6977 = vmatpush1.bf16.msra.mxu1 %v6976_v38  ;;  %v4835_v54 = vmax.f32 %v7074_v5, 0.0  ;;  %7021 = vmatpush1.bf16.msra.mxu0 %v7020_v59  ;;  %v4898_v38 = vld [vmem:[%s12085_s8 + $0x138] sm:$0xff]  ;;  %v7024_v5 = vpack.c.bf16 %v4897_v34, %v4895_v26  ;;  %v4899_v17 = vld [vmem:[%s12085_s8 + $0x140] sm:$0xff] }
 0x6f4   : > { %v7077_v20 = vadd.f32 %v4798_v10, %v4421_v46  ;;  %v4836_v27 = vmax.f32 %v7075_v48, 0.0  ;;  %v7022_v52 = vpack.c.bf16 %v4898_v38, %v4896_v29  ;;  %v4902_v46 = vld [vmem:[%s12085_s8 + $0x158] sm:$0xff] }
 0x6f5   : > { %v4837_v11 = vmax.f32 %v7076_v25, 0.0  ;;  %v7026_v48 = vpack.c.bf16 %v4902_v46, %v4900_v1  ;;  %v4901_v25 = vld [vmem:[%s12085_s8 + $0x150] sm:$0xff] }
 0x6f6   : > { %v4838_v37 = vmax.f32 %v7077_v20, 0.0  ;;  %7023 = vmatprep.subr.bf16.mxu0 %v7022_v52  ;;  %v7028_v10 = vpack.c.bf16 %v4901_v25, %v4899_v17  ;;  %v4904_v20 = vld [vmem:[%s12085_s8 + $0x168] sm:$0xff] }
 0x6f7   : > { %v6980_v60 = vpack.c.bf16 %v4837_v11, %v4835_v54  ;;  %7025 = vmatpush1.bf16.msra.mxu0 %v7024_v5  ;;  %v4906_v54 = vld [vmem:[%s12085_s8 + $0x178] sm:$0xff] }
 0x6f8   : > { %v6978_v62 = vpack.c.bf16 %v4838_v37, %v4836_v27  ;;  %v4802_v51 = vpop.f32.mrb[156].mxu1  ;;  %7027 = vmatprep.subr.bf16.mxu0 %v7026_v48  ;;  %v7030_v11 = vpack.c.bf16 %v4906_v54, %v4904_v20  ;;  %v4903_v27 = vld [vmem:[%s12085_s8 + $0x160] sm:$0xff]  ;;  %v4905_v37 = vld [vmem:[%s12085_s8 + $0x170] sm:$0xff] }
 0x6f9   : > { %v7078_v53 = vadd.f32 %v4802_v51, %v4426_v44  ;;  %v4804_v55 = vpop.f32.mrb[157].mxu1 }
 0x6fa   : > { %v7079_v36 = vadd.f32 %v4804_v55, %v4426_v44  ;;  %v4806_v13 = vpop.f32.mrb[158].mxu1  ;;  %6979 = vmatprep.subr.bf16.mxu1 %v6978_v62  ;;  %v4908_v44 = vld [vmem:[%s12085_s8 + $0x188] sm:$0xff]  ;;  %v4910_v62 = vld [vmem:[%s12085_s8 + $0x198] sm:$0xff]  ;;  %v4909_v55 = vld [vmem:[%s12085_s8 + $0x190] sm:$0xff] }
 0x6fb   : > { %v7080_v7 = vadd.f32 %v4806_v13, %v4431_v22  ;;  %v4808_v63 = vpop.f32.mrb[159].mxu1  ;;  %6981 = vmatpush1.bf16.msra.mxu1 %v6980_v60  ;;  %v4839_v12 = vmax.f32 %v7078_v53, 0.0  ;;  %7029 = vmatpush1.bf16.msra.mxu0 %v7028_v10  ;;  %v7032_v60 = vpack.c.bf16 %v4905_v37, %v4903_v27  ;;  %v7034_v51 = vpack.c.bf16 %v4910_v62, %v4908_v44  ;;  %v4907_v53 = vld [vmem:[%s12085_s8 + $0x180] sm:$0xff]  ;;  %v4914_v13 = vld [vmem:[%s12085_s8 + $0x1b8] sm:$0xff] }
 0x6fc   : > { %v7081_v15 = vadd.f32 %v4808_v63, %v4431_v22  ;;  %v4840_v14 = vmax.f32 %v7079_v36, 0.0  ;;  %7031 = vmatprep.subr.bf16.mxu0 %v7030_v11  ;;  %v7036_v22 = vpack.c.bf16 %v4909_v55, %v4907_v53  ;;  %v4912_v36 = vld [vmem:[%s12085_s8 + $0x1a8] sm:$0xff]  ;;  %v4911_v63 = vld [vmem:[%s12085_s8 + $0x1a0] sm:$0xff] }
 0x6fd   : > { %v4841_v45 = vmax.f32 %v7080_v7, 0.0  ;;  %v7038_v7 = vpack.c.bf16 %v4914_v13, %v4912_v36 }
 0x6fe   : > { %v4842_v24 = vmax.f32 %v7081_v15, 0.0  ;;  %v4913_v15 = vld [vmem:[%s12085_s8 + $0x1b0] sm:$0xff] }
 0x6ff   : > { %v6984_v40 = vpack.c.bf16 %v4841_v45, %v4839_v12  ;;  %7033 = vmatpush1.bf16.msra.mxu0 %v7032_v60  ;;  %v7040_v12 = vpack.c.bf16 %v4913_v15, %v4911_v63  ;;  %v4916_v45 = vld [vmem:[%s12085_s8 + $0x1c8] sm:$0xff] }
 0x700   : > { %v6982_v18 = vpack.c.bf16 %v4842_v24, %v4840_v14  ;;  %7035 = vmatprep.subr.bf16.mxu0 %v7034_v51  ;;  %v4918_v14 = vld [vmem:[%s12085_s8 + $0x1d8] sm:$0xff] }
 0x701   : > { %v7042_v24 = vpack.c.bf16 %v4918_v14, %v4916_v45 }
 0x702   : > { %6983 = vmatprep.subr.bf16.mxu1 %v6982_v18  ;;  %v4917_v18 = vld [vmem:[%s12085_s8 + $0x1d0] sm:$0xff] }
 0x703   : > { %6985 = vmatpush1.bf16.msra.mxu1 %v6984_v40  ;;  %7037 = vmatpush1.bf16.msra.mxu0 %v7036_v22  ;;  %v4915_v40 = vld [vmem:[%s12085_s8 + $0x1c0] sm:$0xff] }
 0x704   : > { %7039 = vmatprep.subr.bf16.mxu0 %v7038_v7 }
 0x706   : > { %4988 = vmatmul.mubr.f32.vlgmr.msra.gmra.mrb[126].mxu1 %v4843_v41  ;;  %v7044_v41 = vpack.c.bf16 %v4917_v18, %v4915_v40 }
 0x707   : > { %4993 = vmatprep.mubr.f32.mxu1 %v7807_v43  ;;  %7041 = vmatpush1.bf16.msra.mxu0 %v7040_v12 }
 0x708   : > { %7043 = vmatprep.subr.bf16.mxu0 %v7042_v24 }
 0x70a   : > { %4994 = vmatmul.mubr.f32.gmra.mrb[160].mxu1 %v4844_v58  ;;  %v4920_v58 = vld [vmem:[%s12085_s8 + $0x1e8] sm:$0xff] }
 0x70b   : > { %4999 = vmatprep.mubr.f32.mxu1 %v7807_v43  ;;  %7045 = vmatpush1.bf16.msra.mxu0 %v7044_v41 }
 0x70e   : > { %5000 = vmatmul.mubr.f32.gmra.mrb[162].mxu1 %v4845_v31  ;;  %v4922_v31 = vld [vmem:[%s12085_s8 + $0x1f8] sm:$0xff] }
 0x70f   : > { %5005 = vmatprep.mubr.f32.mxu1 %v7807_v43 }
 0x712   : > { %5006 = vmatmul.mubr.f32.gmra.mrb[164].mxu1 %v4846_v49  ;;  %v7046_v49 = vpack.c.bf16 %v4922_v31, %v4920_v58 }
 0x713   : > { %5011 = vmatprep.mubr.f32.mxu1 %v7807_v43 }
 0x714   : > { %7047 = vmatprep.subr.bf16.mxu0 %v7046_v49 }
 0x716   : > { %5012 = vmatmul.mubr.f32.gmra.mrb[166].mxu1 %v4847_v50  ;;  %v4919_v50 = vld [vmem:[%s12085_s8 + $0x1e0] sm:$0xff] }
 0x717   : > { %5017 = vmatprep.mubr.f32.mxu1 %v7807_v43 }
 0x71a   : > { %5018 = vmatmul.mubr.f32.gmra.mrb[168].mxu1 %v4848_v56  ;;  %v4921_v56 = vld [vmem:[%s12085_s8 + $0x1f0] sm:$0xff] }
 0x71b   : > { %5023 = vmatprep.mubr.f32.mxu1 %v7807_v43 }
 0x71e   : > { %5024 = vmatmul.mubr.f32.gmra.mrb[170].mxu1 %v4849_v47  ;;  %v7048_v47 = vpack.c.bf16 %v4921_v56, %v4919_v50 }
 0x71f   : > { %5029 = vmatprep.mubr.f32.mxu1 %v7807_v43 }
 0x720   : > { %7049 = vmatpush1.bf16.msra.mxu0 %v7048_v47 }
 0x722   : > { %5030 = vmatmul.mubr.f32.gmra.mrb[172].mxu1 %v4850_v4 }
 0x723   : > { %5035 = vmatprep.mubr.f32.mxu1 %v7807_v43 }
 0x726   : > { %5036 = vmatmul.mubr.f32.gmra.mrb[174].mxu1 %v4851_v28 }
 0x727   : > { %5041 = vmatprep.mubr.f32.mxu1 %v7807_v43 }
 0x72a   : > { %5042 = vmatmul.mubr.f32.gmra.mrb[176].mxu1 %v4852_v0 }
 0x72b   : > { %5047 = vmatprep.mubr.f32.mxu1 %v7807_v43 }
 0x72e   : > { %5048 = vmatmul.mubr.f32.gmra.mrb[178].mxu1 %v4853_v19 }
 0x72f   : > { %5053 = vmatprep.mubr.f32.mxu1 %v7807_v43 }
 0x732   : > { %5054 = vmatmul.mubr.f32.gmra.mrb[180].mxu1 %v4854_v21 }
 0x733   : > { %5059 = vmatprep.mubr.f32.mxu1 %v7807_v43 }
 0x736   : > { %5060 = vmatmul.mubr.f32.gmra.mrb[182].mxu1 %v4855_v3 }
 0x737   : > { %5065 = vmatprep.mubr.f32.mxu1 %v7807_v43 }
 0x73a   : > { %5066 = vmatmul.mubr.f32.gmra.mrb[184].mxu1 %v4856_v8 }
 0x73b   : > { %5071 = vmatprep.mubr.f32.mxu1 %v7807_v43 }
 0x73e   : > { %5072 = vmatmul.mubr.f32.gmra.mrb[186].mxu1 %v4857_v2 }
 0x73f   : > { %5077 = vmatprep.mubr.f32.mxu1 %v7807_v43 }
 0x742   : > { %5078 = vmatmul.mubr.f32.gmra.mrb[188].mxu1 %v4858_v35 }
 0x7d9   : > { %v4989_v4 = vpop.f32.mrb[126].mxu1 }
 0x7da   : > { %v4991_v28 = vpop.f32.mrb[127].mxu1 }
 0x7dd   : > { %v4995_v0 = vpop.f32.mrb[160].mxu1 }
 0x7de   : > { %v4997_v19 = vpop.f32.mrb[161].mxu1 }
 0x7e1   : > { %v5001_v21 = vpop.f32.mrb[162].mxu1 }
 0x7e2   : > { %v5003_v3 = vpop.f32.mrb[163].mxu1 }
 0x7e5   : > { %v5007_v8 = vpop.f32.mrb[164].mxu1 }
 0x7e6   : > { %v5009_v2 = vpop.f32.mrb[165].mxu1 }
 0x7e9   : > { %v5013_v35 = vpop.f32.mrb[166].mxu1 }
 0x7ea   : > { %v5015_v32 = vpop.f32.mrb[167].mxu1 }
 0x7ed   : > { %v5019_v39 = vpop.f32.mrb[168].mxu1 }
 0x7ee   : > { %v5021_v6 = vpop.f32.mrb[169].mxu1 }
 0x7f1   : > { %v5025_v23 = vpop.f32.mrb[170].mxu1 }
 0x7f2   : > { %v5027_v61 = vpop.f32.mrb[171].mxu1 }
 0x7f5   : > { %v5031_v33 = vpop.f32.mrb[172].mxu1 }
 0x7f6   : > { %v5033_v9 = vpop.f32.mrb[173].mxu1 }
 0x7f9   : > { %v5037_v16 = vpop.f32.mrb[174].mxu1 }
 0x7fa   : > { %v5084_v42 = vmax.f32 %v4989_v4, %v5037_v16  ;;  %v5039_v57 = vpop.f32.mrb[175].mxu1 }
 0x7fb   : > { %v5085_v30 = vmax.f32 %v4991_v28, %v5039_v57  ;;  %v5332_v57 = vld [vmem:[%s12087_s10] sm:$0xff] }
 0x7fd   : > { %v5043_v59 = vpop.f32.mrb[176].mxu1  ;;  %5164 = vmatprep.mubr.f32.mxu0 %v5085_v30  ;;  %v5334_v30 = vld [vmem:[%s12087_s10 + $0x10] sm:$0xff] }
 0x7fe   : > { %v5086_v29 = vmax.f32 %v4995_v0, %v5043_v59  ;;  %v5045_v38 = vpop.f32.mrb[177].mxu1  ;;  %5165 = vmatmul.mubr.f32.vlgmr.msra.gmra.mrb[144].mxu0 %v5084_v42  ;;  %v7766_v42 = vld [vmem:[%s12086_s9 + $0x4] ss:$8 sps:$4 sm:$0xff]  }
 0x7ff   : > { %v5087_v52 = vmax.f32 %v4997_v19, %v5045_v38  ;;  %5531 = vmatprep.mubr.bf16.mxu1 %v7766_v42  ;;  %v5336_v59 = vld [vmem:[%s12087_s10 + $0x20] sm:$0xff]  ;;  %v5338_v38 = vld [vmem:[%s12087_s10 + $0x30] sm:$0xff] }
 0x801   : > { %v5049_v26 = vpop.f32.mrb[178].mxu1  ;;  %5170 = vmatprep.mubr.f32.mxu0 %v5087_v52  ;;  %v5335_v52 = vld [vmem:[%s12087_s10 + $0x18] sm:$0xff] }
 0x802   : > { %v5088_v34 = vmax.f32 %v5001_v21, %v5049_v26  ;;  %v5051_v5 = vpop.f32.mrb[179].mxu1  ;;  %5171 = vmatmul.mubr.f32.gmra.mrb[146].mxu0 %v5086_v29  ;;  %v5333_v29 = vld [vmem:[%s12087_s10 + $0x8] sm:$0xff]  ;;  %v5340_v26 = vld [vmem:[%s12087_s10 + $0x40] sm:$0xff] }
 0x803   : > { %v5089_v1 = vmax.f32 %v5003_v3, %v5051_v5  ;;  %v5342_v5 = vld [vmem:[%s12087_s10 + $0x50] sm:$0xff] }
 0x805   : > { %v5055_v46 = vpop.f32.mrb[180].mxu1  ;;  %5176 = vmatprep.mubr.f32.mxu0 %v5089_v1  ;;  %v5339_v1 = vld [vmem:[%s12087_s10 + $0x38] sm:$0xff] }
 0x806   : > { %v5090_v48 = vmax.f32 %v5007_v8, %v5055_v46  ;;  %v5057_v17 = vpop.f32.mrb[181].mxu1  ;;  %5177 = vmatmul.mubr.f32.gmra.mrb[148].mxu0 %v5088_v34  ;;  %v5337_v34 = vld [vmem:[%s12087_s10 + $0x28] sm:$0xff]  ;;  %v5344_v46 = vld [vmem:[%s12087_s10 + $0x60] sm:$0xff] }
 0x807   : > { %v5091_v25 = vmax.f32 %v5009_v2, %v5057_v17  ;;  %v5346_v17 = vld [vmem:[%s12087_s10 + $0x70] sm:$0xff] }
 0x809   : > { %v5061_v10 = vpop.f32.mrb[182].mxu1  ;;  %5182 = vmatprep.mubr.f32.mxu0 %v5091_v25  ;;  %v5343_v25 = vld [vmem:[%s12087_s10 + $0x58] sm:$0xff] }
 0x80a   : > { %v5092_v20 = vmax.f32 %v5013_v35, %v5061_v10  ;;  %v5063_v54 = vpop.f32.mrb[183].mxu1  ;;  %5183 = vmatmul.mubr.f32.gmra.mrb[150].mxu0 %v5090_v48  ;;  %v5341_v48 = vld [vmem:[%s12087_s10 + $0x48] sm:$0xff] }
 0x80b   : > { %v5093_v11 = vmax.f32 %v5015_v32, %v5063_v54  ;;  %v5630_v10 = vld [vmem:[%s12089_s12 + $0x8] sm:$0xff]  ;;  %v5632_v54 = vld [vmem:[%s12089_s12 + $0x18] sm:$0xff] }
 0x80d   : > { %v5067_v27 = vpop.f32.mrb[184].mxu1  ;;  %5188 = vmatprep.mubr.f32.mxu0 %v5093_v11  ;;  %v5629_v11 = vld [vmem:[%s12089_s12] sm:$0xff] }
 0x80e   : > { %v5094_v37 = vmax.f32 %v5019_v39, %v5067_v27  ;;  %v5069_v60 = vpop.f32.mrb[185].mxu1  ;;  %5189 = vmatmul.mubr.f32.gmra.mrb[152].mxu0 %v5092_v20  ;;  %v5345_v20 = vld [vmem:[%s12087_s10 + $0x68] sm:$0xff] }
 0x80f   : > { %v5095_v44 = vmax.f32 %v5021_v6, %v5069_v60  ;;  %v5634_v27 = vld [vmem:[%s12089_s12 + $0x28] sm:$0xff]  ;;  %v5636_v60 = vld [vmem:[%s12089_s12 + $0x38] sm:$0xff] }
 0x811   : > { %v5073_v62 = vpop.f32.mrb[186].mxu1  ;;  %5194 = vmatprep.mubr.f32.mxu0 %v5095_v44  ;;  %v5633_v44 = vld [vmem:[%s12089_s12 + $0x20] sm:$0xff] }
 0x812   : > { %v5096_v51 = vmax.f32 %v5025_v23, %v5073_v62  ;;  %v5075_v53 = vpop.f32.mrb[187].mxu1  ;;  %5195 = vmatmul.mubr.f32.gmra.mrb[154].mxu0 %v5094_v37  ;;  %v5631_v37 = vld [vmem:[%s12089_s12 + $0x10] sm:$0xff]  ;;  %v5638_v62 = vld [vmem:[%s12089_s12 + $0x48] sm:$0xff] }
 0x813   : > { %v5097_v55 = vmax.f32 %v5027_v61, %v5075_v53  ;;  %v5844_v53 = vld [vmem:[%s12091_s14] sm:$0xff] }
 0x815   : > { %v5079_v22 = vpop.f32.mrb[188].mxu1  ;;  %5200 = vmatprep.mubr.f32.mxu0 %v5097_v55  ;;  %v5637_v55 = vld [vmem:[%s12089_s12 + $0x40] sm:$0xff] }
 0x816   : > { %v5098_v36 = vmax.f32 %v5031_v33, %v5079_v22  ;;  %v5081_v13 = vpop.f32.mrb[189].mxu1  ;;  %5201 = vmatmul.mubr.f32.gmra.mrb[156].mxu0 %v5096_v51  ;;  %v5635_v51 = vld [vmem:[%s12089_s12 + $0x30] sm:$0xff] }
 0x817   : > { %v5099_v7 = vmax.f32 %v5033_v9, %v5081_v13  ;;  %v5639_v22 = vld [vmem:[%s12089_s12 + $0x50] sm:$0xf] }
 0x819   : > { %5206 = vmatprep.mubr.f32.mxu0 %v5099_v7 }
 0x81a   : > { %5207 = vmatmul.mubr.f32.gmra.mrb[158].mxu0 %v5098_v36  ;;  %v5845_v36 = vld [vmem:[%s12091_s14 + $0x8] sm:$0x3] }
 0x8d1   : > { %v5166_v63 = vpop.f32.mrb[144].mxu0 }
 0x8d2   : > { %v5168_v15 = vpop.f32.mrb[145].mxu0 }
 0x8d3   : > { %v11848_v12 = vmax.f32 %v5166_v63, %v5168_v15 }
 0x8d5   : > { %v5172_v45 = vpop.f32.mrb[146].mxu0 }
 0x8d6   : > { %v5174_v14 = vpop.f32.mrb[147].mxu0 }
 0x8d7   : > { %v11850_v24 = vmax.f32 %v5172_v45, %v5174_v14 }
 0x8d9   : > { %v5178_v40 = vpop.f32.mrb[148].mxu0  ;;  %v7645_v18 = vpack.i.bf16 %v11850_v24, %v11848_v12  ;;  %v5316_v41 = vpack.c.bf16 %v11850_v24, %v11848_v12 }
 0x8da   : > { %v5180_v58 = vpop.f32.mrb[149].mxu0 }
 0x8db   : > { %v11856_v31 = vmax.f32 %v5178_v40, %v5180_v58  ;;  %7646 = vrot.lane.b32.xlu1 %v7645_v18, %s7804_s25 }
 0x8dd   : > { %v5184_v49 = vpop.f32.mrb[150].mxu0 }
 0x8de   : > { %v5186_v50 = vpop.f32.mrb[151].mxu0 }
 0x8df   : > { %v11859_v56 = vmax.f32 %v5184_v49, %v5186_v50 }
 0x8e1   : > { %v5190_v47 = vpop.f32.mrb[152].mxu0  ;;  %v7650_v4 = vpack.i.bf16 %v11859_v56, %v11856_v31  ;;  %v5317_v28 = vpack.c.bf16 %v11859_v56, %v11856_v31 }
 0x8e2   : > { %v5192_v0 = vpop.f32.mrb[153].mxu0 }
 0x8e3   : > { %v11865_v19 = vmax.f32 %v5190_v47, %v5192_v0  ;;  %7651 = vrot.lane.b32.xlu0 %v7650_v4, %s7804_s25 }
 0x8e5   : > { %v5196_v21 = vpop.f32.mrb[154].mxu0 }
 0x8e6   : > { %v5198_v3 = vpop.f32.mrb[155].mxu0 }
 0x8e7   : > { %v11868_v8 = vmax.f32 %v5196_v21, %v5198_v3 }
 0x8e9   : > { %v5202_v2 = vpop.f32.mrb[156].mxu0  ;;  %v7655_v35 = vpack.i.bf16 %v11868_v8, %v11865_v19  ;;  %v5318_v32 = vpack.c.bf16 %v11868_v8, %v11865_v19 }
 0x8ea   : > { %v5204_v39 = vpop.f32.mrb[157].mxu0 }
 0x8eb   : > { %v11874_v6 = vmax.f32 %v5202_v2, %v5204_v39  ;;  %7656 = vrot.lane.b32.xlu1 %v7655_v35, %s7804_s25 }
 0x8ed   : > { %v5208_v23 = vpop.f32.mrb[158].mxu0 }
 0x8ee   : > { %v5210_v61 = vpop.f32.mrb[159].mxu0 }
 0x8ef   : > { %v11877_v33 = vmax.f32 %v5208_v23, %v5210_v61  ;;  %7666 = vrot.lane.b32.xlu1 %v7645_v18, %s7805_s26 }
 0x8f1   : > { %v7660_v9 = vpack.i.bf16 %v11877_v33, %v11874_v6  ;;  %v5319_v16 = vpack.c.bf16 %v11877_v33, %v11874_v6 }
 0x8f3   : > { %7676 = vrot.lane.b32.xlu1 %v7650_v4, %s7805_s26  ;;  %7661 = vrot.lane.b32.xlu0 %v7660_v9, %s7804_s25 }
 0x8f7   : > { %7686 = vrot.lane.b32.xlu1 %v7655_v35, %s7805_s26  ;;  %7671 = vrot.lane.b32.xlu0 %v7645_v18, %s7803_s24 }
 0x8fb   : > { %7696 = vrot.lane.b32.xlu1 %v7660_v9, %s7805_s26  ;;  %7681 = vrot.lane.b32.xlu0 %v7650_v4, %s7803_s24 }
 0x8ff   : > { %5349 = vperm.xlu1 %7449, %v5332_v57   ;;  %7691 = vrot.lane.b32.xlu0 %v7655_v35, %s7803_s24 }
 0x903   : > { %5359 = vperm.xlu1 %7449, %v5334_v30   ;;  %7701 = vrot.lane.b32.xlu0 %v7660_v9, %s7803_s24 }
 0x907   : > { %5369 = vperm.xlu1 %7449, %v5336_v59   ;;  %5354 = vperm.xlu0 %7448, %v5333_v29  }
 0x90b   : > { %5379 = vperm.xlu1 %7449, %v5338_v38   ;;  %5364 = vperm.xlu0 %7448, %v5335_v52  }
 0x90f   : > { %5389 = vperm.xlu1 %7449, %v5340_v26   ;;  %5374 = vperm.xlu0 %7448, %v5337_v34  }
 0x913   : > { %5399 = vperm.xlu1 %7449, %v5342_v5   ;;  %5384 = vperm.xlu0 %7448, %v5339_v1  }
 0x917   : > { %5409 = vperm.xlu1 %7449, %v5344_v46   ;;  %5394 = vperm.xlu0 %7448, %v5341_v48  }
 0x91b   : > { %5419 = vperm.xlu1 %7449, %v5346_v17   ;;  %5404 = vperm.xlu0 %7448, %v5343_v25   ;;  %v7764_v25 = vld [vmem:[%s12086_s9] ss:$8 sps:$4 sm:$0xff]  }
 0x91f   : > { %5647 = vperm.xlu1 %7449, %v5630_v10   ;;  %5414 = vperm.xlu0 %7448, %v5345_v20   ;;  %v7767_v10 = vld [vmem:[%s12086_s9 + $0x14] ss:$8 sps:$4 sm:$0xff]   ;;  %v7769_v20 = vld [vmem:[%s12086_s9 + $0x10] ss:$8 sps:$4 sm:$0xff]  }
 0x923   : > { %5657 = vperm.xlu1 %7449, %v5632_v54   ;;  %5642 = vperm.xlu0 %7448, %v5629_v11   ;;  %v7770_v54 = vld [vmem:[%s12086_s9 + $0x24] ss:$8 sps:$4 sm:$0xff]   ;;  %v7772_v11 = vld [vmem:[%s12086_s9 + $0x20] ss:$8 sps:$4 sm:$0xff]  }
 0x927   : > { %5667 = vperm.xlu1 %7449, %v5634_v27   ;;  %5652 = vperm.xlu0 %7448, %v5631_v37   ;;  %v7773_v27 = vld [vmem:[%s12086_s9 + $0x34] ss:$8 sps:$4 sm:$0xff]   ;;  %v7775_v37 = vld [vmem:[%s12086_s9 + $0x30] ss:$8 sps:$4 sm:$0xff]  }
 0x92b   : > { %5677 = vperm.xlu1 %7449, %v5636_v60   ;;  %5662 = vperm.xlu0 %7448, %v5633_v44   ;;  %v7776_v60 = vld [vmem:[%s12086_s9 + $0x44] ss:$8 sps:$4 sm:$0xff]   ;;  %v7778_v44 = vld [vmem:[%s12086_s9 + $0x40] ss:$8 sps:$4 sm:$0xff]  }
 0x92f   : > { %5687 = vperm.xlu1 %7449, %v5638_v62   ;;  %5672 = vperm.xlu0 %7448, %v5635_v51   ;;  %v7779_v62 = vld [vmem:[%s12086_s9 + $0x54] ss:$8 sps:$4 sm:$0xff]   ;;  %v7781_v51 = vld [vmem:[%s12086_s9 + $0x50] ss:$8 sps:$4 sm:$0xff]  }
 0x933   : > { %5848 = vperm.xlu1 %7449, %v5844_v53   ;;  %5682 = vperm.xlu0 %7448, %v5637_v55   ;;  %v7782_v53 = vld [vmem:[%s12086_s9 + $0x64] ss:$8 sps:$4 sm:$0xff]   ;;  %v5315_v55 = vld [vmem:[%s12086_s9 + $0x70] sm:$0xff] }
 0x937   : > { %5692 = vperm.xlu0 %7448, %v5639_v22   ;;  %v7784_v22 = vld [vmem:[%s12086_s9 + $0x60] ss:$8 sps:$4 sm:$0xff]  }
 0x93b   : > { %5853 = vperm.xlu0 %7448, %v5845_v36   ;;  %v6123_v36 = vcombine.high %v5315_v55, %v5315_v55 }
 0x94d   : > { %v7647_v13 = vpop.permute.xlu1 %7646 }
 0x94e   : > { %v7649_v7 = vunpack.i.h.bf16 %v7647_v13  ;;  %v7648_v63 = vunpack.i.l.bf16 %v7647_v13  ;;  %v6122_v13 = vcombine.low %v5315_v55, %v5315_v55 }
 0x950   : > { %v5324_v15 = vpack.c.bf16 %v7649_v7, %v7648_v63  ;;  %v7787_v7 = vld [vmem:[%s12088_s11] sm:$0xff]  }
 0x951   : > { %6242 = vmatprep.mubr.msk.bf16.mxu0 %vm5723_vm6, %v7787_v7 }
 0x952   : > { %6141 = vmatprep.subr.bf16.mxu1 %v5324_v15 }
 0x953   : > { %6142 = vmatpush3.bf16.msra.mxu1 %v5316_v41 }
 0x955   : > { %v7652_v45 = vpop.permute.xlu0 %7651 }
 0x956   : > { %v7654_v14 = vunpack.i.h.bf16 %v7652_v45  ;;  %v7653_v40 = vunpack.i.l.bf16 %v7652_v45 }
 0x958   : > { %v5325_v18 = vpack.c.bf16 %v7654_v14, %v7653_v40 }
 0x95a   : > { %6143 = vmatprep.subr.bf16.mxu1 %v5325_v18 }
 0x95b   : > { %6144 = vmatpush3.bf16.msra.mxu1 %v5317_v28 }
 0x95d   : > { %v7657_v58 = vpop.permute.xlu1 %7656 }
 0x95e   : > { %v7659_v49 = vunpack.i.h.bf16 %v7657_v58  ;;  %v7658_v50 = vunpack.i.l.bf16 %v7657_v58 }
 0x960   : > { %v5326_v47 = vpack.c.bf16 %v7659_v49, %v7658_v50 }
 0x961   : > { %v7667_v4 = vpop.permute.xlu1 %7666 }
 0x962   : > { %6145 = vmatprep.subr.bf16.mxu1 %v5326_v47  ;;  %v7669_v12 = vunpack.i.h.bf16 %v7667_v4  ;;  %v7668_v24 = vunpack.i.l.bf16 %v7667_v4 }
 0x963   : > { %6146 = vmatpush3.bf16.msra.mxu1 %v5318_v32 }
 0x964   : > { %v5328_v35 = vpack.c.bf16 %v7669_v12, %v7668_v24 }
 0x965   : > { %v7677_v41 = vpop.permute.xlu1 %7676  ;;  %v7662_v0 = vpop.permute.xlu0 %7661 }
 0x966   : > { %v7664_v21 = vunpack.i.h.bf16 %v7662_v0  ;;  %v7663_v3 = vunpack.i.l.bf16 %v7662_v0  ;;  %v7679_v28 = vunpack.i.h.bf16 %v7677_v41  ;;  %v7678_v39 = vunpack.i.l.bf16 %v7677_v41 }
 0x968   : > { %v5327_v2 = vpack.c.bf16 %v7664_v21, %v7663_v3  ;;  %v5329_v42 = vpack.c.bf16 %v7679_v28, %v7678_v39 }
 0x969   : > { %v7687_v31 = vpop.permute.xlu1 %7686  ;;  %v7672_v56 = vpop.permute.xlu0 %7671 }
 0x96a   : > { %v7674_v23 = vunpack.i.h.bf16 %v7672_v56  ;;  %v7673_v61 = vunpack.i.l.bf16 %v7672_v56  ;;  %6147 = vmatprep.subr.bf16.mxu1 %v5327_v2  ;;  %v7689_v8 = vunpack.i.h.bf16 %v7687_v31  ;;  %v7688_v32 = vunpack.i.l.bf16 %v7687_v31 }
 0x96b   : > { %6148 = vmatpush3.bf16.msra.mxu1 %v5319_v16 }
 0x96c   : > { %v5320_v19 = vpack.c.bf16 %v7674_v23, %v7673_v61  ;;  %6149 = vmatprep.subr.bf16.mxu1 %v5328_v35  ;;  %v5330_v38 = vpack.c.bf16 %v7689_v8, %v7688_v32 }
 0x96d   : > { %v7682_v9 = vpop.permute.xlu0 %7681  ;;  %v7697_v59 = vpop.permute.xlu1 %7696 }
 0x96e   : > { %v7684_v57 = vunpack.i.h.bf16 %v7682_v9  ;;  %v7683_v30 = vunpack.i.l.bf16 %v7682_v9  ;;  %v7699_v26 = vunpack.i.h.bf16 %v7697_v59  ;;  %v7698_v34 = vunpack.i.l.bf16 %v7697_v59 }
 0x96f   : > { %6150 = vmatpush3.bf16.msra.mxu1 %v5320_v19 }
 0x970   : > { %v5321_v29 = vpack.c.bf16 %v7684_v57, %v7683_v30  ;;  %6151 = vmatprep.subr.bf16.mxu1 %v5329_v42  ;;  %v5331_v16 = vpack.c.bf16 %v7699_v26, %v7698_v34 }
 0x971   : > { %v7692_v52 = vpop.permute.xlu0 %7691 }
 0x972   : > { %v7694_v5 = vunpack.i.h.bf16 %v7692_v52  ;;  %v7693_v1 = vunpack.i.l.bf16 %v7692_v52 }
 0x973   : > { %6152 = vmatpush3.bf16.msra.mxu1 %v5321_v29 }
 0x974   : > { %v5322_v6 = vpack.c.bf16 %v7694_v5, %v7693_v1  ;;  %6153 = vmatprep.subr.bf16.mxu1 %v5330_v38 }
 0x975   : > { %v7702_v33 = vpop.permute.xlu0 %7701 }
 0x976   : > { %v7704_v46 = vunpack.i.h.bf16 %v7702_v33  ;;  %v7703_v48 = vunpack.i.l.bf16 %v7702_v33 }
 0x977   : > { %6154 = vmatpush3.bf16.msra.mxu1 %v5322_v6 }
 0x978   : > { %v5323_v17 = vpack.c.bf16 %v7704_v46, %v7703_v48  ;;  %6155 = vmatprep.subr.bf16.mxu1 %v5331_v16 }
 0x97b   : > { %6156 = vmatpush3.bf16.msra.mxu1 %v5323_v17 }
 0x97e   : > { %5532 = vmatmul.mubr.bf16.vlgmr.msra.gmra.mrb[192].mxu1 %v7764_v25  ;;  %v5350_v40 = vpop.permute.xlu1 %5349 }
 0x97f   : > { %5539 = vmatprep.mubr.bf16.mxu1 %v7767_v10 }
 0x982   : > { %v5360_v2 = vpop.permute.xlu1 %5359 }
 0x986   : > { %5540 = vmatmul.mubr.bf16.gmra.mrb[196].mxu1 %v7769_v20  ;;  %v5355_v50 = vpop.permute.xlu0 %5354  ;;  %v5370_v57 = vpop.permute.xlu1 %5369 }
 0x987   : > { %5547 = vmatprep.mubr.bf16.mxu1 %v7770_v54 }
 0x98a   : > { %v5365_v28 = vpop.permute.xlu0 %5364  ;;  %v5380_v46 = vpop.permute.xlu1 %5379 }
 0x98e   : > { %5548 = vmatmul.mubr.bf16.gmra.mrb[200].mxu1 %v7772_v11  ;;  %v5375_v38 = vpop.permute.xlu0 %5374 }
 0x98f   : > { %5555 = vmatprep.mubr.bf16.mxu1 %v7773_v27 }
 0x992   : > { %v5385_v10 = vpop.permute.xlu0 %5384 }
 0x996   : > { %5556 = vmatmul.mubr.bf16.gmra.mrb[204].mxu1 %v7775_v37 }
 0x997   : > { %5563 = vmatprep.mubr.bf16.mxu1 %v7776_v60 }
 0x99e   : > { %5564 = vmatmul.mubr.bf16.gmra.mrb[208].mxu1 %v7778_v44 }
 0x99f   : > { %5571 = vmatprep.mubr.bf16.mxu1 %v7779_v62 }
 0x9a6   : > { %5572 = vmatmul.mubr.bf16.gmra.mrb[212].mxu1 %v7781_v51  ;;  %v5390_v51 = vpop.permute.xlu1 %5389 }
 0x9a7   : > { %5579 = vmatprep.mubr.bf16.mxu1 %v7782_v53 }
 0x9ae   : > { %5580 = vmatmul.mubr.bf16.gmra.mrb[216].mxu1 %v7784_v22 }
 0x9af   : > { %5587 = vmatprep.mubr.bf16.mxu1 %v6123_v36  ;;  %v5395_v36 = vpop.permute.xlu0 %5394 }
 0x9b6   : > { %5588 = vmatmul.mubr.bf16.gmra.mrb[220].mxu1 %v6122_v13 }
 0xa51   : > { %v6157_v63 = vpop.f32.mrb[192].mxu1 }
 0xa52   : > { %v6158_v15 = vpop.f32.mrb[193].mxu1 }
 0xa53   : > { %v6159_v45 = vadd.f32 %v6158_v15, %v6157_v63  ;;  %v6160_v14 = vpop.f32.mrb[194].mxu1 }
 0xa54   : > { %v6161_v18 = vpop.f32.mrb[195].mxu1 }
 0xa55   : > { %v5534_v58 = vadd.f32 %v6159_v45, %v5350_v40  ;;  %v6162_v49 = vadd.f32 %v6161_v18, %v6160_v14 }
 0xa57   : > { %v5537_v47 = vadd.f32 %v6162_v49, %v5355_v50  ;;  %v5595_v4 = vmax.f32 %v5534_v58, 0.0  ;;  %v5400_v58 = vpop.permute.xlu1 %5399 }
 0xa59   : > { %v5596_v12 = vmax.f32 %v5537_v47, 0.0  ;;  %v6163_v24 = vpop.f32.mrb[196].mxu1 }
 0xa5a   : > { %v6164_v41 = vpop.f32.mrb[197].mxu1 }
 0xa5b   : > { %v6165_v0 = vadd.f32 %v6164_v41, %v6163_v24  ;;  %v6166_v21 = vpop.f32.mrb[198].mxu1  ;;  %v5621_v3 = vpack.c.bf16 %v5596_v12, %v5595_v4  ;;  %v5405_v4 = vpop.permute.xlu0 %5404 }
 0xa5c   : > { %v6167_v35 = vpop.f32.mrb[199].mxu1 }
 0xa5d   : > { %v5542_v31 = vadd.f32 %v6165_v0, %v5360_v2  ;;  %v6168_v56 = vadd.f32 %v6167_v35, %v6166_v21  ;;  %6226 = vmatprep.subr.bf16.mxu0 %v5621_v3 }
 0xa5e   : > { %6227 = vmatpush3.bf16.msra.mxu0 %v5621_v3 }
 0xa5f   : > { %v5545_v39 = vadd.f32 %v6168_v56, %v5365_v28  ;;  %v5597_v23 = vmax.f32 %v5542_v31, 0.0  ;;  %v5410_v31 = vpop.permute.xlu1 %5409 }
 0xa61   : > { %v5598_v61 = vmax.f32 %v5545_v39, 0.0  ;;  %v6169_v19 = vpop.f32.mrb[200].mxu1 }
 0xa62   : > { %v6170_v8 = vpop.f32.mrb[201].mxu1 }
 0xa63   : > { %v6171_v32 = vadd.f32 %v6170_v8, %v6169_v19  ;;  %v6172_v9 = vpop.f32.mrb[202].mxu1  ;;  %v5622_v42 = vpack.c.bf16 %v5598_v61, %v5597_v23  ;;  %v5415_v23 = vpop.permute.xlu0 %5414 }
 0xa64   : > { %v6173_v30 = vpop.f32.mrb[203].mxu1 }
 0xa65   : > { %v5550_v59 = vadd.f32 %v6171_v32, %v5370_v57  ;;  %v6174_v29 = vadd.f32 %v6173_v30, %v6172_v9  ;;  %6228 = vmatprep.subr.bf16.mxu0 %v5622_v42 }
 0xa66   : > { %6229 = vmatpush3.bf16.msra.mxu0 %v5622_v42 }
 0xa67   : > { %v5553_v52 = vadd.f32 %v6174_v29, %v5375_v38  ;;  %v5599_v26 = vmax.f32 %v5550_v59, 0.0  ;;  %v5420_v59 = vpop.permute.xlu1 %5419 }
 0xa69   : > { %v5600_v34 = vmax.f32 %v5553_v52, 0.0  ;;  %v6175_v5 = vpop.f32.mrb[204].mxu1 }
 0xa6a   : > { %v6176_v1 = vpop.f32.mrb[205].mxu1 }
 0xa6b   : > { %v6177_v6 = vadd.f32 %v6176_v1, %v6175_v5  ;;  %v6178_v33 = vpop.f32.mrb[206].mxu1  ;;  %v5623_v16 = vpack.c.bf16 %v5600_v34, %v5599_v26  ;;  %v7788_v5 = vld [vmem:[%s12088_s11 + $0x8] sm:$0xff]   ;;  %v7789_v1 = vld [vmem:[%s12088_s11 + $0x10] sm:$0xff]  }
 0xa6c   : > { %v6179_v48 = vpop.f32.mrb[207].mxu1 }
 0xa6d   : > { %v5558_v17 = vadd.f32 %v6177_v6, %v5380_v46  ;;  %v6180_v25 = vadd.f32 %v6179_v48, %v6178_v33  ;;  %6230 = vmatprep.subr.bf16.mxu0 %v5623_v16  ;;  %v7790_v6 = vld [vmem:[%s12088_s11 + $0x18] sm:$0xff]   ;;  %v7791_v33 = vld [vmem:[%s12088_s11 + $0x20] sm:$0xff]   ;;  %v5643_v46 = vpop.permute.xlu0 %5642  ;;  %v5648_v48 = vpop.permute.xlu1 %5647 }
 0xa6e   : > { %6231 = vmatpush3.bf16.msra.mxu0 %v5623_v16  ;;  %v7792_v16 = vld [vmem:[%s12088_s11 + $0x28] ss:$0 sps:$4 sm:$0x33]  }
 0xa6f   : > { %v5561_v20 = vadd.f32 %v6180_v25, %v5385_v10  ;;  %v5601_v54 = vmax.f32 %v5558_v17, 0.0 }
 0xa71   : > { %v5602_v11 = vmax.f32 %v5561_v20, 0.0  ;;  %v6181_v27 = vpop.f32.mrb[208].mxu1  ;;  %v5653_v17 = vpop.permute.xlu0 %5652 }
 0xa72   : > { %v6182_v37 = vpop.f32.mrb[209].mxu1  ;;  %v5658_v25 = vpop.permute.xlu1 %5657 }
 0xa73   : > { %v6183_v60 = vadd.f32 %v6182_v37, %v6181_v27  ;;  %v6184_v44 = vpop.f32.mrb[210].mxu1  ;;  %v5624_v62 = vpack.c.bf16 %v5602_v11, %v5601_v54 }
 0xa74   : > { %v6185_v53 = vpop.f32.mrb[211].mxu1 }
 0xa75   : > { %v5566_v55 = vadd.f32 %v6183_v60, %v5390_v51  ;;  %v6186_v22 = vadd.f32 %v6185_v53, %v6184_v44  ;;  %6232 = vmatprep.subr.bf16.mxu0 %v5624_v62  ;;  %v5663_v10 = vpop.permute.xlu0 %5662 }
 0xa76   : > { %6233 = vmatpush3.bf16.msra.mxu0 %v5624_v62  ;;  %v5668_v60 = vpop.permute.xlu1 %5667 }
 0xa77   : > { %v5569_v13 = vadd.f32 %v6186_v22, %v5395_v36  ;;  %v5603_v7 = vmax.f32 %v5566_v55, 0.0 }
 0xa79   : > { %v5604_v63 = vmax.f32 %v5569_v13, 0.0  ;;  %v6187_v15 = vpop.f32.mrb[212].mxu1  ;;  %v5673_v51 = vpop.permute.xlu0 %5672 }
 0xa7a   : > { %v6188_v45 = vpop.f32.mrb[213].mxu1 }
 0xa7b   : > { %v6189_v14 = vadd.f32 %v6188_v45, %v6187_v15  ;;  %v6190_v40 = vpop.f32.mrb[214].mxu1  ;;  %v5625_v18 = vpack.c.bf16 %v5604_v63, %v5603_v7  ;;  %v5678_v45 = vpop.permute.xlu1 %5677 }
 0xa7c   : > { %v6191_v49 = vpop.f32.mrb[215].mxu1 }
 0xa7d   : > { %v5574_v50 = vadd.f32 %v6189_v14, %v5400_v58  ;;  %v6192_v47 = vadd.f32 %v6191_v49, %v6190_v40  ;;  %6234 = vmatprep.subr.bf16.mxu0 %v5625_v18 }
 0xa7e   : > { %6235 = vmatpush3.bf16.msra.mxu0 %v5625_v18  ;;  %v5683_v18 = vpop.permute.xlu0 %5682 }
 0xa7f   : > { %v5577_v12 = vadd.f32 %v6192_v47, %v5405_v4  ;;  %v5605_v24 = vmax.f32 %v5574_v50, 0.0 }
 0xa81   : > { %v5606_v41 = vmax.f32 %v5577_v12, 0.0  ;;  %v6193_v0 = vpop.f32.mrb[216].mxu1 }
 0xa82   : > { %v6194_v21 = vpop.f32.mrb[217].mxu1 }
 0xa83   : > { %v6195_v3 = vadd.f32 %v6194_v21, %v6193_v0  ;;  %v6196_v2 = vpop.f32.mrb[218].mxu1  ;;  %v5626_v35 = vpack.c.bf16 %v5606_v41, %v5605_v24 }
 0xa84   : > { %v6197_v56 = vpop.f32.mrb[219].mxu1 }
 0xa85   : > { %v5582_v28 = vadd.f32 %v6195_v3, %v5410_v31  ;;  %v6198_v39 = vadd.f32 %v6197_v56, %v6196_v2  ;;  %6236 = vmatprep.subr.bf16.mxu0 %v5626_v35  ;;  %v5693_v3 = vpop.permute.xlu0 %5692 }
 0xa86   : > { %6237 = vmatpush3.bf16.msra.mxu0 %v5626_v35 }
 0xa87   : > { %v5585_v61 = vadd.f32 %v6198_v39, %v5415_v23  ;;  %v5607_v19 = vmax.f32 %v5582_v28, 0.0  ;;  %v5688_v23 = vpop.permute.xlu1 %5687 }
 0xa89   : > { %v5608_v8 = vmax.f32 %v5585_v61, 0.0  ;;  %v6199_v32 = vpop.f32.mrb[220].mxu1 }
 0xa8a   : > { %v6200_v9 = vpop.f32.mrb[221].mxu1 }
 0xa8b   : > { %v6201_v42 = vadd.f32 %v6200_v9, %v6199_v32  ;;  %v5627_v57 = vpack.c.bf16 %v5608_v8, %v5607_v19  ;;  %v6202_v30 = vpop.f32.mrb[222].mxu1 }
 0xa8c   : > { %v6203_v29 = vpop.f32.mrb[223].mxu1 }
 0xa8d   : > { %v5590_v38 = vadd.f32 %v6201_v42, %v5420_v59  ;;  %6238 = vmatprep.subr.bf16.mxu0 %v5627_v57  ;;  %v7793_v59 = vld [vmem:[%s12090_s13] sm:$0x1f]   ;;  %v5849_v29 = vpop.permute.xlu1 %5848 }
 0xa8e   : > { %6239 = vmatpush3.bf16.msra.mxu0 %v5627_v57 }
 0xa8f   : > { %v5609_v52 = vmax.f32 %v5590_v38, 0.0 }
 0xa91   : > { %v5628_v26 = vpack.c.bf16 %v5609_v52, %v5609_v52 }
 0xa93   : > { %7222 = vmatprep.subr.msk.bf16.mxu0 %vm4578_vm4, %v5628_v26  ;;  %v5743_v34 = vsel %vm4578_vm4, %v5628_v26, 0 }
 0xa94   : > { %6241 = vmatpush3.bf16.msra.mxu0 %v5743_v34  ;;  %v5854_v34 = vpop.permute.xlu0 %5853 }
 0xa95   : > { %6254 = vmatprep.subr.bf16.mxu0 %v7807_v43 }
 0xa97   : > { %6243 = vmatmul.mubr.msk.bf16.vlgmr.msra.gmra.mrb[160].mxu0 %vm5723_vm6, %v7788_v5 }
 0xa98   : > { %6246 = vmatprep.mubr.msk.bf16.mxu0 %vm5723_vm6, %v7789_v1 }
 0xa9f   : > { %6247 = vmatmul.mubr.msk.bf16.gmra.mrb[164].mxu0 %vm5723_vm6, %v7790_v6 }
 0xaa0   : > { %6250 = vmatprep.mubr.msk.bf16.mxu0 %vm5723_vm6, %v7791_v33 }
 0xaa7   : > { %6251 = vmatmul.mubr.msk.bf16.gmra.mrb[168].mxu0 %vm5723_vm6, %v7792_v16 }
 0xaa8   : > { %6266 = vmatprep.mubr.msk.bf16.mxu0 %vm7808_vm7, %v7807_v43 }
 0xb6a   : > { %v6244_v20 = vpop.f32.mrb[160].mxu0 }
 0xb6b   : > { %v5788_v54 = vadd.f32 %v6244_v20, %v5653_v17  ;;  %v5779_v11 = vpop.f32.mrb[161].mxu0 }
 0xb6c   : > { %v5780_v27 = vadd.f32 %v5779_v11, %v5643_v46  ;;  %v6245_v37 = vpop.f32.mrb[162].mxu0 }
 0xb6d   : > { %v5791_v44 = vadd.f32 %v6245_v37, %v5658_v25  ;;  %v5782_v62 = vpop.f32.mrb[163].mxu0  ;;  %v5827_v55 = vmax.f32 %v5788_v54, 0.0 }
 0xb6e   : > { %v5783_v53 = vadd.f32 %v5782_v62, %v5648_v48  ;;  %v5825_v36 = vmax.f32 %v5780_v27, 0.0 }
 0xb6f   : > { %v5828_v22 = vmax.f32 %v5791_v44, 0.0 }
 0xb70   : > { %v5826_v13 = vmax.f32 %v5783_v53, 0.0 }
 0xb71   : > { %v5839_v7 = vpack.c.bf16 %v5828_v22, %v5827_v55 }
 0xb72   : > { %v5838_v63 = vpack.c.bf16 %v5826_v13, %v5825_v36  ;;  %v6248_v15 = vpop.f32.mrb[164].mxu0 }
 0xb73   : > { %v5804_v14 = vadd.f32 %v6248_v15, %v5673_v51  ;;  %v5795_v40 = vpop.f32.mrb[165].mxu0 }
 0xb74   : > { %v5796_v58 = vadd.f32 %v5795_v40, %v5663_v10  ;;  %v6249_v49 = vpop.f32.mrb[166].mxu0  ;;  %6255 = vmatpush3.bf16.msra.mxu0 %v5838_v63 }
 0xb75   : > { %v5807_v50 = vadd.f32 %v6249_v49, %v5678_v45  ;;  %v5798_v47 = vpop.f32.mrb[167].mxu0  ;;  %6256 = vmatprep.subr.bf16.mxu0 %v7807_v43  ;;  %v5831_v12 = vmax.f32 %v5804_v14, 0.0 }
 0xb76   : > { %v5799_v4 = vadd.f32 %v5798_v47, %v5668_v60  ;;  %v5829_v41 = vmax.f32 %v5796_v58, 0.0 }
 0xb77   : > { %v5832_v24 = vmax.f32 %v5807_v50, 0.0 }
 0xb78   : > { %v5830_v0 = vmax.f32 %v5799_v4, 0.0  ;;  %6257 = vmatpush3.bf16.msra.mxu0 %v5839_v7 }
 0xb79   : > { %v5841_v21 = vpack.c.bf16 %v5832_v24, %v5831_v12  ;;  %6258 = vmatprep.subr.bf16.mxu0 %v7807_v43 }
 0xb7a   : > { %v5840_v2 = vpack.c.bf16 %v5830_v0, %v5829_v41  ;;  %v6252_v35 = vpop.f32.mrb[168].mxu0 }
 0xb7b   : > { %v5820_v31 = vadd.f32 %v6252_v35, %v5693_v3  ;;  %v5811_v56 = vpop.f32.mrb[169].mxu0 }
 0xb7c   : > { %v5812_v28 = vadd.f32 %v5811_v56, %v5683_v18  ;;  %v6253_v39 = vpop.f32.mrb[170].mxu0  ;;  %6259 = vmatpush3.bf16.msra.mxu0 %v5840_v2 }
 0xb7d   : > { %v5814_v61 = vpop.f32.mrb[171].mxu0  ;;  %6260 = vmatprep.subr.bf16.mxu0 %v7807_v43  ;;  %v5835_v8 = vmax.f32 %v5820_v31, 0.0 }
 0xb7e   : > { %v5815_v19 = vadd.f32 %v5814_v61, %v5688_v23  ;;  %v5833_v32 = vmax.f32 %v5812_v28, 0.0 }
 0xb7f   : > { %v5843_v57 = vpack.c.bf16 %v5835_v8, %v5835_v8 }
 0xb80   : > { %v5834_v9 = vmax.f32 %v5815_v19, 0.0  ;;  %6261 = vmatpush3.bf16.msra.mxu0 %v5841_v21 }
 0xb81   : > { %6262 = vmatprep.subr.bf16.mxu0 %v7807_v43  ;;  %v5867_v30 = vsel %vm5865_vm8, %v5843_v57, 0 }
 0xb82   : > { %v5842_v42 = vpack.c.bf16 %v5834_v9, %v5833_v32 }
 0xb84   : > { %6263 = vmatpush3.bf16.msra.mxu0 %v5842_v42 }
 0xb85   : > { %6264 = vmatprep.subr.bf16.mxu0 %v7807_v43 }
 0xb88   : > { %6265 = vmatpush3.bf16.msra.mxu0 %v5867_v30 }
 0xb8b   : > { %6267 = vmatmul.mubr.msk.bf16.vlgmr.msra.gmra.mrb[172].mxu0 %vm5861_vm9, %v7793_v59 }
 0xc5e   : > { %v5903_v38 = vpop.f32.mrb[172].mxu0 }
 0xc5f   : > { %v5904_v52 = vadd.f32 %v5903_v38, %v5849_v29  ;;  %v6268_v26 = vpop.f32.mrb[173].mxu0 }
 0xc60   : > { %v5906_v5 = vpop.f32.mrb[174].mxu0 }
 0xc61   : > { %5910 = vst.msk [vmem:[%s494_s22] sm:$0xff] %vm818_vm0, %v5904_v52  ;;  %v5907_v43 = vadd.f32 %v5906_v5, %v5854_v34  ;;  %v6269_v1 = vpop.f32.mrb[175].mxu0 }
 0xc63   : > { %5912 = vst.msk [vmem:[%s494_s22 + $0x8] sm:$0x3] %vm5911_vm10, %v5907_v43 }
 0xc64 PF: > { %s25_s18 = sadd.s32 1, %s7801_s18  }
 0xc65   : > { %p22_p4 = scmp.ge.s32.totalorder %s25_s18, 4  }
 0xc67   :  { %24 = sbr.rel (!%p22_p4) target bundleno = 1 (0x1), region = 110 }

</bundles_post_ra>
